<compile_context>
chip_gen: v7x
topology: tpu7x:2x2x1
jax: 0.10.0
libtpu: 0.0.40
codegen_flags: <defaults>
</compile_context>

<pallas_src>
import jax
import jax.numpy as jnp
from jax import lax
from jax.experimental import pallas as pl
from jax.experimental.pallas import tpu as pltpu


# ----------------------------------------------------------------------------
# Fused per-image pipeline: conv1 -> pool -> conv2 -> pool -> conv3 -> pool
# ----------------------------------------------------------------------------
def _fused_conv_kernel(p1_ref, w1_ref, b1_ref, w2_ref, b2_ref, w3_ref, b3_ref,
                       feat_ref, xp2, xp3, rp1, rp2, rp3):
    f32 = jnp.float32
    bf16 = jnp.bfloat16

    # ---- Conv1: single im2col matmul (1024, 75) @ (75, 32), f32 accumulate ----
    y1 = jnp.dot(p1_ref[0], w1_ref[...], preferred_element_type=f32) + b1_ref[...]
    y1 = y1.reshape(32, 32, 32)                                   # (H, W, C)

    # ---- MaxPool 2x2: pool H via leading-dim reshape, pool W via strided loads ----
    rp1[...] = jnp.max(y1.reshape(16, 2, 32, 32), axis=1)         # (16, 32, 32)
    pool1 = jnp.maximum(rp1[:, pl.ds(0, 16, 2), :],
                        rp1[:, pl.ds(1, 16, 2), :])               # (16, 16, 32)

    # ---- Conv2 input with padding=2 halo built in VMEM ----
    xp2[...] = jnp.zeros_like(xp2)                                # (20, 20, 32)
    xp2[pl.ds(2, 16), pl.ds(2, 16), :] = pool1

    # ---- Conv2: 25 accumulated dots, M=256, K=32, bf16 -> f32 ----
    acc = jnp.zeros((256, 32), f32)
    for kh in range(5):
        for kw in range(5):
            patch = xp2[pl.ds(kh, 16), pl.ds(kw, 16), :].reshape(256, 32)
            acc = acc + jnp.dot(patch.astype(bf16), w2_ref[kh, kw],
                                preferred_element_type=f32)
    y2 = (acc + b2_ref[...]).reshape(16, 16, 32)

    rp2[...] = jnp.max(y2.reshape(8, 2, 16, 32), axis=1)          # (8, 16, 32)
    pool2 = jnp.maximum(rp2[:, pl.ds(0, 8, 2), :],
                        rp2[:, pl.ds(1, 8, 2), :])                # (8, 8, 32)

    # ---- Conv3 input with halo ----
    xp3[...] = jnp.zeros_like(xp3)                                # (12, 12, 32)
    xp3[pl.ds(2, 8), pl.ds(2, 8), :] = pool2

    # ---- Conv3: 25 accumulated dots, M=64, K=32, bf16 -> f32 ----
    acc = jnp.zeros((64, 64), f32)
    for kh in range(5):
        for kw in range(5):
            patch = xp3[pl.ds(kh, 8), pl.ds(kw, 8), :].reshape(64, 32)
            acc = acc + jnp.dot(patch.astype(bf16), w3_ref[kh, kw],
                                preferred_element_type=f32)
    y3 = (acc + b3_ref[...]).reshape(8, 8, 64)

    rp3[...] = jnp.max(y3.reshape(4, 2, 8, 64), axis=1)           # (4, 8, 64)
    feat_ref[0] = jnp.maximum(rp3[:, pl.ds(0, 4, 2), :],
                              rp3[:, pl.ds(1, 4, 2), :])          # (4, 4, 64)


def fused_convnet(patches, w1m, b1, w2, b2, w3, b3):
    n = patches.shape[0]
    f32 = jnp.float32
    return pl.pallas_call(
        _fused_conv_kernel,
        out_shape=jax.ShapeDtypeStruct((n, 4, 4, 64), f32),
        grid_spec=pltpu.PrefetchScalarGridSpec(
            num_scalar_prefetch=0,
            grid=(n,),
            in_specs=[
                pl.BlockSpec((1, 1024, 75), lambda i: (i, 0, 0)),   # im2col patches
                pl.BlockSpec((75, 32), lambda i: (0, 0)),           # conv1 weights
                pl.BlockSpec((1, 32), lambda i: (0, 0)),
                pl.BlockSpec((5, 5, 32, 32), lambda i: (0, 0, 0, 0)),
                pl.BlockSpec((1, 32), lambda i: (0, 0)),
                pl.BlockSpec((5, 5, 32, 64), lambda i: (0, 0, 0, 0)),
                pl.BlockSpec((1, 64), lambda i: (0, 0)),
            ],
            out_specs=pl.BlockSpec((1, 4, 4, 64), lambda i: (i, 0, 0, 0)),
            scratch_shapes=[
                pltpu.VMEM((20, 20, 32), f32),   # padded conv2 input
                pltpu.VMEM((12, 12, 32), f32),   # padded conv3 input
                pltpu.VMEM((16, 32, 32), f32),   # row-pooled conv1
                pltpu.VMEM((8, 16, 32), f32),    # row-pooled conv2
                pltpu.VMEM((4, 8, 64), f32),     # row-pooled conv3
            ],
        ),
        compiler_params=pltpu.CompilerParams(
            dimension_semantics=("parallel",)),
    )(patches, w1m, b1, w2, b2, w3, b3)


# ----------------------------------------------------------------------------
# Linear(1024, 64) -> Linear(64, 10) fused, whole batch in one invocation
# ----------------------------------------------------------------------------
def _mlp_kernel(x_ref, w1_ref, b1_ref, w2_ref, b2_ref, o_ref):
    h = jnp.dot(x_ref[...].astype(jnp.bfloat16), w1_ref[...],
                preferred_element_type=jnp.float32) + b1_ref[...]
    y = jnp.dot(h.astype(jnp.bfloat16), w2_ref[...],
                preferred_element_type=jnp.float32) + b2_ref[...]
    o_ref[...] = y.astype(o_ref.dtype)


def mlp(flat, w1, b1, w2, b2):
    n = flat.shape[0]
    vmem = pl.BlockSpec(memory_space=pltpu.MemorySpace.VMEM)
    return pl.pallas_call(
        _mlp_kernel,
        out_shape=jax.ShapeDtypeStruct((n, w2.shape[1]), jnp.float32),
        in_specs=[vmem, vmem, vmem, vmem, vmem],
        out_specs=vmem,
    )(flat, w1, b1, w2, b2)


# ----------------------------------------------------------------------------
# Full forward (PyTorch NCHW semantics)
# ----------------------------------------------------------------------------
def tudui_forward(x_nchw, p):
    n, _, h, w = x_nchw.shape                                     # (N, 3, 32, 32)
    x = jnp.transpose(x_nchw, (0, 2, 3, 1))                       # NCHW -> NHWC
    xp = jnp.pad(x, ((0, 0), (2, 2), (2, 2), (0, 0)))             # tiny, wrapper-side
    cols = [xp[:, kh:kh + h, kw:kw + w, :] for kh in range(5) for kw in range(5)]
    patches = jnp.concatenate(cols, axis=-1)                      # (N, 32, 32, 75)
    patches = patches.reshape(n, h * w, 75).astype(jnp.bfloat16)

    w1m = p["wc1"].reshape(5 * 5 * 3, 32).astype(jnp.bfloat16)    # im2col weights
    w2 = p["wc2"].astype(jnp.bfloat16)
    w3 = p["wc3"].astype(jnp.bfloat16)
    b1 = p["bc1"].reshape(1, -1)
    b2 = p["bc2"].reshape(1, -1)
    b3 = p["bc3"].reshape(1, -1)

    feats = fused_convnet(patches, w1m, b1, w2, b2, w3, b3)       # (N, 4, 4, 64)
    flat = feats.reshape(n, 4 * 4 * 64)                           # HWC order, metadata-only

    # Permute Linear1 weight rows so HWC flatten matches PyTorch's NCHW Flatten
    # (PyTorch index c*16 + h*4 + w  ->  our index h*256 + w*64 + c).
    wl1_hwc = (p["wl1"].T.reshape(64, 4, 4, 64)
               .transpose(1, 2, 0, 3).reshape(1024, 64)).astype(jnp.bfloat16)
    wl2_t = p["wl2"].T.astype(jnp.bfloat16)
    bl1 = p["bl1"].reshape(1, -1)
    bl2 = p["bl2"].reshape(1, -1)
    return mlp(flat, wl1_hwc, bl1, wl2_t, bl2)


# ----------------------------------------------------------------------------
# Deterministic synthetic parameters (shapes from the module's __init__)
# ----------------------------------------------------------------------------
def init_params(key):
    ks = jax.random.split(key, 10)
    s = 0.05
    f32 = jnp.float32
    return {
        "wc1": jax.random.normal(ks[0], (5, 5, 3, 32), f32) * s,    # HWIO
        "bc1": jax.random.normal(ks[1], (32,), f32) * s,
        "wc2": jax.random.normal(ks[2], (5, 5, 32, 32), f32) * s,
        "bc2": jax.random.normal(ks[3], (32,), f32) * s,
        "wc3": jax.random.normal(ks[4], (5, 5, 32, 64), f32) * s,
        "bc3": jax.random.normal(ks[5], (64,), f32) * s,
        "wl1": jax.random.normal(ks[6], (64, 1024), f32) * s,       # PyTorch (out, in)
        "bl1": jax.random.normal(ks[7], (64,), f32) * s,
        "wl2": jax.random.normal(ks[8], (10, 64), f32) * s,
        "bl2": jax.random.normal(ks[9], (10,), f32) * s,
    }


# Pure-JAX reference (same NCHW semantics as the PyTorch module) for checking.
def reference_forward(x_nchw, p):
    hp = lax.Precision.HIGHEST

    def conv(x, w, b):
        y = lax.conv_general_dilated(
            x, w, window_strides=(1, 1), padding=((2, 2), (2, 2)),
            dimension_numbers=("NCHW", "HWIO", "NCHW"), precision=hp)
        return y + b[None, :, None, None]

    def pool(x):
        return lax.reduce_window(x, -jnp.inf, lax.max,
                                 (1, 1, 2, 2), (1, 1, 2, 2), "VALID")

    y = pool(conv(x_nchw, p["wc1"], p["bc1"]))
    y = pool(conv(y, p["wc2"], p["bc2"]))
    y = pool(conv(y, p["wc3"], p["bc3"]))
    y = y.reshape(y.shape[0], -1)
    y = jnp.dot(y, p["wl1"].T, precision=hp) + p["bl1"]
    y = jnp.dot(y, p["wl2"].T, precision=hp) + p["bl2"]
    return y


if __name__ == "__main__":
    key = jax.random.PRNGKey(0)
    pkey, xkey = jax.random.split(key)
    params = init_params(pkey)
    # Input must be (N, 3, 32, 32) so Flatten yields 1024 features for Linear(1024, 64).
    x = jax.random.normal(xkey, (2, 3, 32, 32), jnp.float32)

    out = jax.jit(tudui_forward)(x, params)
    out = jax.block_until_ready(out)

    assert out.shape == (2, 10), out.shape
    ref = reference_forward(x, params)
    # bf16 MXU inputs with f32 accumulation vs. an f32-HIGHEST reference.
    assert jnp.allclose(out, ref, atol=3e-2, rtol=3e-2), \
        f"max abs diff {jnp.max(jnp.abs(out - ref))}"
    print("KERNEL_OK")
</pallas_src>

<mosaic_0001>
module attributes {stable_mosaic.version = 11 : i64} {
  func.func @_fused_conv_kernel(%arg0: i32, %arg1: memref<1x1024x75xbf16, #tpu.memory_space<vmem>>, %arg2: memref<75x32xbf16, #tpu.memory_space<vmem>>, %arg3: memref<1x32xf32, #tpu.memory_space<vmem>>, %arg4: memref<5x5x32x32xbf16, #tpu.memory_space<vmem>>, %arg5: memref<1x32xf32, #tpu.memory_space<vmem>>, %arg6: memref<5x5x32x64xbf16, #tpu.memory_space<vmem>>, %arg7: memref<1x64xf32, #tpu.memory_space<vmem>>, %arg8: memref<1x4x4x64xf32, #tpu.memory_space<vmem>>, %arg9: memref<20x20x32xf32, #tpu.memory_space<vmem>>, %arg10: memref<12x12x32xf32, #tpu.memory_space<vmem>>, %arg11: memref<16x32x32xf32, #tpu.memory_space<vmem>>, %arg12: memref<8x16x32xf32, #tpu.memory_space<vmem>>, %arg13: memref<4x8x64xf32, #tpu.memory_space<vmem>>) attributes {dimension_semantics = [#tpu.dimension_semantics<parallel>], iteration_bounds = array<i64: 2>, scalar_prefetch = 0 : i64, scratch_operands = 5 : i64, tpu.core_type = #tpu.core_type<tc>, window_params = [{transform_indices = @transform_0, window_bounds = array<i64: 1, 1024, 75>}, {pipeline_mode = #tpu.pipeline_mode<synchronous>, transform_indices = @transform_1, window_bounds = array<i64: 75, 32>}, {pipeline_mode = #tpu.pipeline_mode<synchronous>, transform_indices = @transform_2, window_bounds = array<i64: 1, 32>}, {pipeline_mode = #tpu.pipeline_mode<synchronous>, transform_indices = @transform_3, window_bounds = array<i64: 5, 5, 32, 32>}, {pipeline_mode = #tpu.pipeline_mode<synchronous>, transform_indices = @transform_4, window_bounds = array<i64: 1, 32>}, {pipeline_mode = #tpu.pipeline_mode<synchronous>, transform_indices = @transform_5, window_bounds = array<i64: 5, 5, 32, 64>}, {pipeline_mode = #tpu.pipeline_mode<synchronous>, transform_indices = @transform_6, window_bounds = array<i64: 1, 64>}, {transform_indices = @transform_7, window_bounds = array<i64: 1, 4, 4, 64>}]} {
    %c0 = arith.constant 0 : index
    %c0_0 = arith.constant 0 : index
    %c0_1 = arith.constant 0 : index
    %0 = vector.load %arg1[%c0, %c0_0, %c0_1] : memref<1x1024x75xbf16, #tpu.memory_space<vmem>>, vector<1x1024x75xbf16>
    %1 = vector.shape_cast %0 : vector<1x1024x75xbf16> to vector<1024x75xbf16>
    %c0_2 = arith.constant 0 : index
    %c0_3 = arith.constant 0 : index
    %2 = vector.load %arg2[%c0_2, %c0_3] : memref<75x32xbf16, #tpu.memory_space<vmem>>, vector<75x32xbf16>
    %cst = arith.constant dense<0.000000e+00> : vector<1024x32xf32>
    %3 = tpu.matmul %1, %2, %cst {dimension_numbers = #tpu.dot_dimension_numbers<[1], [0], [0], [1], [0, 0, 1, 1], [], []>} : vector<1024x75xbf16>, vector<75x32xbf16>, vector<1024x32xf32> -> vector<1024x32xf32>
    %c0_4 = arith.constant 0 : index
    %c0_5 = arith.constant 0 : index
    %4 = vector.load %arg3[%c0_4, %c0_5] : memref<1x32xf32, #tpu.memory_space<vmem>>, vector<1x32xf32>
    %5 = vector.broadcast %4 : vector<1x32xf32> to vector<1024x32xf32>
    %6 = arith.addf %3, %5 : vector<1024x32xf32>
    %7 = vector.shape_cast %6 : vector<1024x32xf32> to vector<32x32x32xf32>
    %8 = vector.shape_cast %7 : vector<32x32x32xf32> to vector<16x2x32x32xf32>
    %cst_6 = arith.constant dense<0xFF800000> : vector<16x32x32xf32>
    %9 = vector.multi_reduction <maximumf>, %8, %cst_6 [1] : vector<16x2x32x32xf32> to vector<16x32x32xf32>
    %c0_7 = arith.constant 0 : index
    %c0_8 = arith.constant 0 : index
    %c0_9 = arith.constant 0 : index
    %10 = vector.load %arg11[%c0_7, %c0_8, %c0_9] : memref<16x32x32xf32, #tpu.memory_space<vmem>>, vector<16x32x32xf32>
    tpu.vector_store %arg11[%c0_7, %c0_8, %c0_9], %9 {strides = array<i32>} : memref<16x32x32xf32, #tpu.memory_space<vmem>>, vector<16x32x32xf32>,
    %c0_10 = arith.constant 0 : index
    %c0_11 = arith.constant 0 : index
    %c0_12 = arith.constant 0 : index
    %11 = tpu.strided_load %arg11[%c0_10, %c0_11, %c0_12] {strides = array<i32: 1, 2, 1>} : memref<16x32x32xf32, #tpu.memory_space<vmem>>, vector<16x16x32xf32>
    %c0_13 = arith.constant 0 : index
    %c1 = arith.constant 1 : index
    %c0_14 = arith.constant 0 : index
    %12 = tpu.strided_load %arg11[%c0_13, %c1, %c0_14] {strides = array<i32: 1, 2, 1>} : memref<16x32x32xf32, #tpu.memory_space<vmem>>, vector<16x16x32xf32>
    %13 = arith.maximumf %11, %12 : vector<16x16x32xf32>
    %cst_15 = arith.constant 0.000000e+00 : f32
    %14 = vector.broadcast %cst_15 : f32 to vector<20x20x32xf32>
    %c0_16 = arith.constant 0 : index
    %c0_17 = arith.constant 0 : index
    %c0_18 = arith.constant 0 : index
    %15 = vector.load %arg9[%c0_16, %c0_17, %c0_18] : memref<20x20x32xf32, #tpu.memory_space<vmem>>, vector<20x20x32xf32>
    tpu.vector_store %arg9[%c0_16, %c0_17, %c0_18], %14 {strides = array<i32>} : memref<20x20x32xf32, #tpu.memory_space<vmem>>, vector<20x20x32xf32>,
    %c2 = arith.constant 2 : index
    %c2_19 = arith.constant 2 : index
    %c0_20 = arith.constant 0 : index
    %16 = vector.load %arg9[%c2, %c2_19, %c0_20] : memref<20x20x32xf32, #tpu.memory_space<vmem>>, vector<16x16x32xf32>
    tpu.vector_store %arg9[%c2, %c2_19, %c0_20], %13 {strides = array<i32>} : memref<20x20x32xf32, #tpu.memory_space<vmem>>, vector<16x16x32xf32>,
    %cst_21 = arith.constant 0.000000e+00 : f32
    %17 = vector.broadcast %cst_21 : f32 to vector<256x32xf32>
    %c0_22 = arith.constant 0 : index
    %c0_23 = arith.constant 0 : index
    %c0_24 = arith.constant 0 : index
    %18 = vector.load %arg9[%c0_22, %c0_23, %c0_24] : memref<20x20x32xf32, #tpu.memory_space<vmem>>, vector<16x16x32xf32>
    %19 = vector.shape_cast %18 : vector<16x16x32xf32> to vector<256x32xf32>
    %20 = arith.truncf %19 : vector<256x32xf32> to vector<256x32xbf16>
    %c0_25 = arith.constant 0 : index
    %c0_26 = arith.constant 0 : index
    %c0_27 = arith.constant 0 : index
    %c0_28 = arith.constant 0 : index
    %21 = vector.load %arg4[%c0_25, %c0_26, %c0_27, %c0_28] : memref<5x5x32x32xbf16, #tpu.memory_space<vmem>>, vector<1x1x32x32xbf16>
    %22 = vector.shape_cast %21 : vector<1x1x32x32xbf16> to vector<32x32xbf16>
    %cst_29 = arith.constant dense<0.000000e+00> : vector<256x32xf32>
    %23 = tpu.matmul %20, %22, %cst_29 {dimension_numbers = #tpu.dot_dimension_numbers<[1], [0], [0], [1], [0, 0, 1, 1], [], []>} : vector<256x32xbf16>, vector<32x32xbf16>, vector<256x32xf32> -> vector<256x32xf32>
    %24 = arith.addf %17, %23 : vector<256x32xf32>
    %c0_30 = arith.constant 0 : index
    %c1_31 = arith.constant 1 : index
    %c0_32 = arith.constant 0 : index
    %25 = vector.load %arg9[%c0_30, %c1_31, %c0_32] : memref<20x20x32xf32, #tpu.memory_space<vmem>>, vector<16x16x32xf32>
    %26 = vector.shape_cast %25 : vector<16x16x32xf32> to vector<256x32xf32>
    %27 = arith.truncf %26 : vector<256x32xf32> to vector<256x32xbf16>
    %c0_33 = arith.constant 0 : index
    %c1_34 = arith.constant 1 : index
    %c0_35 = arith.constant 0 : index
    %c0_36 = arith.constant 0 : index
    %28 = vector.load %arg4[%c0_33, %c1_34, %c0_35, %c0_36] : memref<5x5x32x32xbf16, #tpu.memory_space<vmem>>, vector<1x1x32x32xbf16>
    %29 = vector.shape_cast %28 : vector<1x1x32x32xbf16> to vector<32x32xbf16>
    %cst_37 = arith.constant dense<0.000000e+00> : vector<256x32xf32>
    %30 = tpu.matmul %27, %29, %cst_37 {dimension_numbers = #tpu.dot_dimension_numbers<[1], [0], [0], [1], [0, 0, 1, 1], [], []>} : vector<256x32xbf16>, vector<32x32xbf16>, vector<256x32xf32> -> vector<256x32xf32>
    %31 = arith.addf %24, %30 : vector<256x32xf32>
    %c0_38 = arith.constant 0 : index
    %c2_39 = arith.constant 2 : index
    %c0_40 = arith.constant 0 : index
    %32 = vector.load %arg9[%c0_38, %c2_39, %c0_40] : memref<20x20x32xf32, #tpu.memory_space<vmem>>, vector<16x16x32xf32>
    %33 = vector.shape_cast %32 : vector<16x16x32xf32> to vector<256x32xf32>
    %34 = arith.truncf %33 : vector<256x32xf32> to vector<256x32xbf16>
    %c0_41 = arith.constant 0 : index
    %c2_42 = arith.constant 2 : index
    %c0_43 = arith.constant 0 : index
    %c0_44 = arith.constant 0 : index
    %35 = vector.load %arg4[%c0_41, %c2_42, %c0_43, %c0_44] : memref<5x5x32x32xbf16, #tpu.memory_space<vmem>>, vector<1x1x32x32xbf16>
    %36 = vector.shape_cast %35 : vector<1x1x32x32xbf16> to vector<32x32xbf16>
    %cst_45 = arith.constant dense<0.000000e+00> : vector<256x32xf32>
    %37 = tpu.matmul %34, %36, %cst_45 {dimension_numbers = #tpu.dot_dimension_numbers<[1], [0], [0], [1], [0, 0, 1, 1], [], []>} : vector<256x32xbf16>, vector<32x32xbf16>, vector<256x32xf32> -> vector<256x32xf32>
    %38 = arith.addf %31, %37 : vector<256x32xf32>
    %c0_46 = arith.constant 0 : index
    %c3 = arith.constant 3 : index
    %c0_47 = arith.constant 0 : index
    %39 = vector.load %arg9[%c0_46, %c3, %c0_47] : memref<20x20x32xf32, #tpu.memory_space<vmem>>, vector<16x16x32xf32>
    %40 = vector.shape_cast %39 : vector<16x16x32xf32> to vector<256x32xf32>
    %41 = arith.truncf %40 : vector<256x32xf32> to vector<256x32xbf16>
    %c0_48 = arith.constant 0 : index
    %c3_49 = arith.constant 3 : index
    %c0_50 = arith.constant 0 : index
    %c0_51 = arith.constant 0 : index
    %42 = vector.load %arg4[%c0_48, %c3_49, %c0_50, %c0_51] : memref<5x5x32x32xbf16, #tpu.memory_space<vmem>>, vector<1x1x32x32xbf16>
    %43 = vector.shape_cast %42 : vector<1x1x32x32xbf16> to vector<32x32xbf16>
    %cst_52 = arith.constant dense<0.000000e+00> : vector<256x32xf32>
    %44 = tpu.matmul %41, %43, %cst_52 {dimension_numbers = #tpu.dot_dimension_numbers<[1], [0], [0], [1], [0, 0, 1, 1], [], []>} : vector<256x32xbf16>, vector<32x32xbf16>, vector<256x32xf32> -> vector<256x32xf32>
    %45 = arith.addf %38, %44 : vector<256x32xf32>
    %c0_53 = arith.constant 0 : index
    %c4 = arith.constant 4 : index
    %c0_54 = arith.constant 0 : index
    %46 = vector.load %arg9[%c0_53, %c4, %c0_54] : memref<20x20x32xf32, #tpu.memory_space<vmem>>, vector<16x16x32xf32>
    %47 = vector.shape_cast %46 : vector<16x16x32xf32> to vector<256x32xf32>
    %48 = arith.truncf %47 : vector<256x32xf32> to vector<256x32xbf16>
    %c0_55 = arith.constant 0 : index
    %c4_56 = arith.constant 4 : index
    %c0_57 = arith.constant 0 : index
    %c0_58 = arith.constant 0 : index
    %49 = vector.load %arg4[%c0_55, %c4_56, %c0_57, %c0_58] : memref<5x5x32x32xbf16, #tpu.memory_space<vmem>>, vector<1x1x32x32xbf16>
    %50 = vector.shape_cast %49 : vector<1x1x32x32xbf16> to vector<32x32xbf16>
    %cst_59 = arith.constant dense<0.000000e+00> : vector<256x32xf32>
    %51 = tpu.matmul %48, %50, %cst_59 {dimension_numbers = #tpu.dot_dimension_numbers<[1], [0], [0], [1], [0, 0, 1, 1], [], []>} : vector<256x32xbf16>, vector<32x32xbf16>, vector<256x32xf32> -> vector<256x32xf32>
    %52 = arith.addf %45, %51 : vector<256x32xf32>
    %c1_60 = arith.constant 1 : index
    %c0_61 = arith.constant 0 : index
    %c0_62 = arith.constant 0 : index
    %53 = vector.load %arg9[%c1_60, %c0_61, %c0_62] : memref<20x20x32xf32, #tpu.memory_space<vmem>>, vector<16x16x32xf32>
    %54 = vector.shape_cast %53 : vector<16x16x32xf32> to vector<256x32xf32>
    %55 = arith.truncf %54 : vector<256x32xf32> to vector<256x32xbf16>
    %c1_63 = arith.constant 1 : index
    %c0_64 = arith.constant 0 : index
    %c0_65 = arith.constant 0 : index
    %c0_66 = arith.constant 0 : index
    %56 = vector.load %arg4[%c1_63, %c0_64, %c0_65, %c0_66] : memref<5x5x32x32xbf16, #tpu.memory_space<vmem>>, vector<1x1x32x32xbf16>
    %57 = vector.shape_cast %56 : vector<1x1x32x32xbf16> to vector<32x32xbf16>
    %cst_67 = arith.constant dense<0.000000e+00> : vector<256x32xf32>
    %58 = tpu.matmul %55, %57, %cst_67 {dimension_numbers = #tpu.dot_dimension_numbers<[1], [0], [0], [1], [0, 0, 1, 1], [], []>} : vector<256x32xbf16>, vector<32x32xbf16>, vector<256x32xf32> -> vector<256x32xf32>
    %59 = arith.addf %52, %58 : vector<256x32xf32>
    %c1_68 = arith.constant 1 : index
    %c1_69 = arith.constant 1 : index
    %c0_70 = arith.constant 0 : index
    %60 = vector.load %arg9[%c1_68, %c1_69, %c0_70] : memref<20x20x32xf32, #tpu.memory_space<vmem>>, vector<16x16x32xf32>
    %61 = vector.shape_cast %60 : vector<16x16x32xf32> to vector<256x32xf32>
    %62 = arith.truncf %61 : vector<256x32xf32> to vector<256x32xbf16>
    %c1_71 = arith.constant 1 : index
    %c1_72 = arith.constant 1 : index
    %c0_73 = arith.constant 0 : index
    %c0_74 = arith.constant 0 : index
    %63 = vector.load %arg4[%c1_71, %c1_72, %c0_73, %c0_74] : memref<5x5x32x32xbf16, #tpu.memory_space<vmem>>, vector<1x1x32x32xbf16>
    %64 = vector.shape_cast %63 : vector<1x1x32x32xbf16> to vector<32x32xbf16>
    %cst_75 = arith.constant dense<0.000000e+00> : vector<256x32xf32>
    %65 = tpu.matmul %62, %64, %cst_75 {dimension_numbers = #tpu.dot_dimension_numbers<[1], [0], [0], [1], [0, 0, 1, 1], [], []>} : vector<256x32xbf16>, vector<32x32xbf16>, vector<256x32xf32> -> vector<256x32xf32>
    %66 = arith.addf %59, %65 : vector<256x32xf32>
    %c1_76 = arith.constant 1 : index
    %c2_77 = arith.constant 2 : index
    %c0_78 = arith.constant 0 : index
    %67 = vector.load %arg9[%c1_76, %c2_77, %c0_78] : memref<20x20x32xf32, #tpu.memory_space<vmem>>, vector<16x16x32xf32>
    %68 = vector.shape_cast %67 : vector<16x16x32xf32> to vector<256x32xf32>
    %69 = arith.truncf %68 : vector<256x32xf32> to vector<256x32xbf16>
    %c1_79 = arith.constant 1 : index
    %c2_80 = arith.constant 2 : index
    %c0_81 = arith.constant 0 : index
    %c0_82 = arith.constant 0 : index
    %70 = vector.load %arg4[%c1_79, %c2_80, %c0_81, %c0_82] : memref<5x5x32x32xbf16, #tpu.memory_space<vmem>>, vector<1x1x32x32xbf16>
    %71 = vector.shape_cast %70 : vector<1x1x32x32xbf16> to vector<32x32xbf16>
    %cst_83 = arith.constant dense<0.000000e+00> : vector<256x32xf32>
    %72 = tpu.matmul %69, %71, %cst_83 {dimension_numbers = #tpu.dot_dimension_numbers<[1], [0], [0], [1], [0, 0, 1, 1], [], []>} : vector<256x32xbf16>, vector<32x32xbf16>, vector<256x32xf32> -> vector<256x32xf32>
    %73 = arith.addf %66, %72 : vector<256x32xf32>
    %c1_84 = arith.constant 1 : index
    %c3_85 = arith.constant 3 : index
    %c0_86 = arith.constant 0 : index
    %74 = vector.load %arg9[%c1_84, %c3_85, %c0_86] : memref<20x20x32xf32, #tpu.memory_space<vmem>>, vector<16x16x32xf32>
    %75 = vector.shape_cast %74 : vector<16x16x32xf32> to vector<256x32xf32>
    %76 = arith.truncf %75 : vector<256x32xf32> to vector<256x32xbf16>
    %c1_87 = arith.constant 1 : index
    %c3_88 = arith.constant 3 : index
    %c0_89 = arith.constant 0 : index
    %c0_90 = arith.constant 0 : index
    %77 = vector.load %arg4[%c1_87, %c3_88, %c0_89, %c0_90] : memref<5x5x32x32xbf16, #tpu.memory_space<vmem>>, vector<1x1x32x32xbf16>
    %78 = vector.shape_cast %77 : vector<1x1x32x32xbf16> to vector<32x32xbf16>
    %cst_91 = arith.constant dense<0.000000e+00> : vector<256x32xf32>
    %79 = tpu.matmul %76, %78, %cst_91 {dimension_numbers = #tpu.dot_dimension_numbers<[1], [0], [0], [1], [0, 0, 1, 1], [], []>} : vector<256x32xbf16>, vector<32x32xbf16>, vector<256x32xf32> -> vector<256x32xf32>
    %80 = arith.addf %73, %79 : vector<256x32xf32>
    %c1_92 = arith.constant 1 : index
    %c4_93 = arith.constant 4 : index
    %c0_94 = arith.constant 0 : index
    %81 = vector.load %arg9[%c1_92, %c4_93, %c0_94] : memref<20x20x32xf32, #tpu.memory_space<vmem>>, vector<16x16x32xf32>
    %82 = vector.shape_cast %81 : vector<16x16x32xf32> to vector<256x32xf32>
    %83 = arith.truncf %82 : vector<256x32xf32> to vector<256x32xbf16>
    %c1_95 = arith.constant 1 : index
    %c4_96 = arith.constant 4 : index
    %c0_97 = arith.constant 0 : index
    %c0_98 = arith.constant 0 : index
    %84 = vector.load %arg4[%c1_95, %c4_96, %c0_97, %c0_98] : memref<5x5x32x32xbf16, #tpu.memory_space<vmem>>, vector<1x1x32x32xbf16>
    %85 = vector.shape_cast %84 : vector<1x1x32x32xbf16> to vector<32x32xbf16>
    %cst_99 = arith.constant dense<0.000000e+00> : vector<256x32xf32>
    %86 = tpu.matmul %83, %85, %cst_99 {dimension_numbers = #tpu.dot_dimension_numbers<[1], [0], [0], [1], [0, 0, 1, 1], [], []>} : vector<256x32xbf16>, vector<32x32xbf16>, vector<256x32xf32> -> vector<256x32xf32>
    %87 = arith.addf %80, %86 : vector<256x32xf32>
    %c2_100 = arith.constant 2 : index
    %c0_101 = arith.constant 0 : index
    %c0_102 = arith.constant 0 : index
    %88 = vector.load %arg9[%c2_100, %c0_101, %c0_102] : memref<20x20x32xf32, #tpu.memory_space<vmem>>, vector<16x16x32xf32>
    %89 = vector.shape_cast %88 : vector<16x16x32xf32> to vector<256x32xf32>
    %90 = arith.truncf %89 : vector<256x32xf32> to vector<256x32xbf16>
    %c2_103 = arith.constant 2 : index
    %c0_104 = arith.constant 0 : index
    %c0_105 = arith.constant 0 : index
    %c0_106 = arith.constant 0 : index
    %91 = vector.load %arg4[%c2_103, %c0_104, %c0_105, %c0_106] : memref<5x5x32x32xbf16, #tpu.memory_space<vmem>>, vector<1x1x32x32xbf16>
    %92 = vector.shape_cast %91 : vector<1x1x32x32xbf16> to vector<32x32xbf16>
    %cst_107 = arith.constant dense<0.000000e+00> : vector<256x32xf32>
    %93 = tpu.matmul %90, %92, %cst_107 {dimension_numbers = #tpu.dot_dimension_numbers<[1], [0], [0], [1], [0, 0, 1, 1], [], []>} : vector<256x32xbf16>, vector<32x32xbf16>, vector<256x32xf32> -> vector<256x32xf32>
    %94 = arith.addf %87, %93 : vector<256x32xf32>
    %c2_108 = arith.constant 2 : index
    %c1_109 = arith.constant 1 : index
    %c0_110 = arith.constant 0 : index
    %95 = vector.load %arg9[%c2_108, %c1_109, %c0_110] : memref<20x20x32xf32, #tpu.memory_space<vmem>>, vector<16x16x32xf32>
    %96 = vector.shape_cast %95 : vector<16x16x32xf32> to vector<256x32xf32>
    %97 = arith.truncf %96 : vector<256x32xf32> to vector<256x32xbf16>
    %c2_111 = arith.constant 2 : index
    %c1_112 = arith.constant 1 : index
    %c0_113 = arith.constant 0 : index
    %c0_114 = arith.constant 0 : index
    %98 = vector.load %arg4[%c2_111, %c1_112, %c0_113, %c0_114] : memref<5x5x32x32xbf16, #tpu.memory_space<vmem>>, vector<1x1x32x32xbf16>
    %99 = vector.shape_cast %98 : vector<1x1x32x32xbf16> to vector<32x32xbf16>
    %cst_115 = arith.constant dense<0.000000e+00> : vector<256x32xf32>
    %100 = tpu.matmul %97, %99, %cst_115 {dimension_numbers = #tpu.dot_dimension_numbers<[1], [0], [0], [1], [0, 0, 1, 1], [], []>} : vector<256x32xbf16>, vector<32x32xbf16>, vector<256x32xf32> -> vector<256x32xf32>
    %101 = arith.addf %94, %100 : vector<256x32xf32>
    %c2_116 = arith.constant 2 : index
    %c2_117 = arith.constant 2 : index
    %c0_118 = arith.constant 0 : index
    %102 = vector.load %arg9[%c2_116, %c2_117, %c0_118] : memref<20x20x32xf32, #tpu.memory_space<vmem>>, vector<16x16x32xf32>
    %103 = vector.shape_cast %102 : vector<16x16x32xf32> to vector<256x32xf32>
    %104 = arith.truncf %103 : vector<256x32xf32> to vector<256x32xbf16>
    %c2_119 = arith.constant 2 : index
    %c2_120 = arith.constant 2 : index
    %c0_121 = arith.constant 0 : index
    %c0_122 = arith.constant 0 : index
    %105 = vector.load %arg4[%c2_119, %c2_120, %c0_121, %c0_122] : memref<5x5x32x32xbf16, #tpu.memory_space<vmem>>, vector<1x1x32x32xbf16>
    %106 = vector.shape_cast %105 : vector<1x1x32x32xbf16> to vector<32x32xbf16>
    %cst_123 = arith.constant dense<0.000000e+00> : vector<256x32xf32>
    %107 = tpu.matmul %104, %106, %cst_123 {dimension_numbers = #tpu.dot_dimension_numbers<[1], [0], [0], [1], [0, 0, 1, 1], [], []>} : vector<256x32xbf16>, vector<32x32xbf16>, vector<256x32xf32> -> vector<256x32xf32>
    %108 = arith.addf %101, %107 : vector<256x32xf32>
    %c2_124 = arith.constant 2 : index
    %c3_125 = arith.constant 3 : index
    %c0_126 = arith.constant 0 : index
    %109 = vector.load %arg9[%c2_124, %c3_125, %c0_126] : memref<20x20x32xf32, #tpu.memory_space<vmem>>, vector<16x16x32xf32>
    %110 = vector.shape_cast %109 : vector<16x16x32xf32> to vector<256x32xf32>
    %111 = arith.truncf %110 : vector<256x32xf32> to vector<256x32xbf16>
    %c2_127 = arith.constant 2 : index
    %c3_128 = arith.constant 3 : index
    %c0_129 = arith.constant 0 : index
    %c0_130 = arith.constant 0 : index
    %112 = vector.load %arg4[%c2_127, %c3_128, %c0_129, %c0_130] : memref<5x5x32x32xbf16, #tpu.memory_space<vmem>>, vector<1x1x32x32xbf16>
    %113 = vector.shape_cast %112 : vector<1x1x32x32xbf16> to vector<32x32xbf16>
    %cst_131 = arith.constant dense<0.000000e+00> : vector<256x32xf32>
    %114 = tpu.matmul %111, %113, %cst_131 {dimension_numbers = #tpu.dot_dimension_numbers<[1], [0], [0], [1], [0, 0, 1, 1], [], []>} : vector<256x32xbf16>, vector<32x32xbf16>, vector<256x32xf32> -> vector<256x32xf32>
    %115 = arith.addf %108, %114 : vector<256x32xf32>
    %c2_132 = arith.constant 2 : index
    %c4_133 = arith.constant 4 : index
    %c0_134 = arith.constant 0 : index
    %116 = vector.load %arg9[%c2_132, %c4_133, %c0_134] : memref<20x20x32xf32, #tpu.memory_space<vmem>>, vector<16x16x32xf32>
    %117 = vector.shape_cast %116 : vector<16x16x32xf32> to vector<256x32xf32>
    %118 = arith.truncf %117 : vector<256x32xf32> to vector<256x32xbf16>
    %c2_135 = arith.constant 2 : index
    %c4_136 = arith.constant 4 : index
    %c0_137 = arith.constant 0 : index
    %c0_138 = arith.constant 0 : index
    %119 = vector.load %arg4[%c2_135, %c4_136, %c0_137, %c0_138] : memref<5x5x32x32xbf16, #tpu.memory_space<vmem>>, vector<1x1x32x32xbf16>
    %120 = vector.shape_cast %119 : vector<1x1x32x32xbf16> to vector<32x32xbf16>
    %cst_139 = arith.constant dense<0.000000e+00> : vector<256x32xf32>
    %121 = tpu.matmul %118, %120, %cst_139 {dimension_numbers = #tpu.dot_dimension_numbers<[1], [0], [0], [1], [0, 0, 1, 1], [], []>} : vector<256x32xbf16>, vector<32x32xbf16>, vector<256x32xf32> -> vector<256x32xf32>
    %122 = arith.addf %115, %121 : vector<256x32xf32>
    %c3_140 = arith.constant 3 : index
    %c0_141 = arith.constant 0 : index
    %c0_142 = arith.constant 0 : index
    %123 = vector.load %arg9[%c3_140, %c0_141, %c0_142] : memref<20x20x32xf32, #tpu.memory_space<vmem>>, vector<16x16x32xf32>
    %124 = vector.shape_cast %123 : vector<16x16x32xf32> to vector<256x32xf32>
    %125 = arith.truncf %124 : vector<256x32xf32> to vector<256x32xbf16>
    %c3_143 = arith.constant 3 : index
    %c0_144 = arith.constant 0 : index
    %c0_145 = arith.constant 0 : index
    %c0_146 = arith.constant 0 : index
    %126 = vector.load %arg4[%c3_143, %c0_144, %c0_145, %c0_146] : memref<5x5x32x32xbf16, #tpu.memory_space<vmem>>, vector<1x1x32x32xbf16>
    %127 = vector.shape_cast %126 : vector<1x1x32x32xbf16> to vector<32x32xbf16>
    %cst_147 = arith.constant dense<0.000000e+00> : vector<256x32xf32>
    %128 = tpu.matmul %125, %127, %cst_147 {dimension_numbers = #tpu.dot_dimension_numbers<[1], [0], [0], [1], [0, 0, 1, 1], [], []>} : vector<256x32xbf16>, vector<32x32xbf16>, vector<256x32xf32> -> vector<256x32xf32>
    %129 = arith.addf %122, %128 : vector<256x32xf32>
    %c3_148 = arith.constant 3 : index
    %c1_149 = arith.constant 1 : index
    %c0_150 = arith.constant 0 : index
    %130 = vector.load %arg9[%c3_148, %c1_149, %c0_150] : memref<20x20x32xf32, #tpu.memory_space<vmem>>, vector<16x16x32xf32>
    %131 = vector.shape_cast %130 : vector<16x16x32xf32> to vector<256x32xf32>
    %132 = arith.truncf %131 : vector<256x32xf32> to vector<256x32xbf16>
    %c3_151 = arith.constant 3 : index
    %c1_152 = arith.constant 1 : index
    %c0_153 = arith.constant 0 : index
    %c0_154 = arith.constant 0 : index
    %133 = vector.load %arg4[%c3_151, %c1_152, %c0_153, %c0_154] : memref<5x5x32x32xbf16, #tpu.memory_space<vmem>>, vector<1x1x32x32xbf16>
    %134 = vector.shape_cast %133 : vector<1x1x32x32xbf16> to vector<32x32xbf16>
    %cst_155 = arith.constant dense<0.000000e+00> : vector<256x32xf32>
    %135 = tpu.matmul %132, %134, %cst_155 {dimension_numbers = #tpu.dot_dimension_numbers<[1], [0], [0], [1], [0, 0, 1, 1], [], []>} : vector<256x32xbf16>, vector<32x32xbf16>, vector<256x32xf32> -> vector<256x32xf32>
    %136 = arith.addf %129, %135 : vector<256x32xf32>
    %c3_156 = arith.constant 3 : index
    %c2_157 = arith.constant 2 : index
    %c0_158 = arith.constant 0 : index
    %137 = vector.load %arg9[%c3_156, %c2_157, %c0_158] : memref<20x20x32xf32, #tpu.memory_space<vmem>>, vector<16x16x32xf32>
    %138 = vector.shape_cast %137 : vector<16x16x32xf32> to vector<256x32xf32>
    %139 = arith.truncf %138 : vector<256x32xf32> to vector<256x32xbf16>
    %c3_159 = arith.constant 3 : index
    %c2_160 = arith.constant 2 : index
    %c0_161 = arith.constant 0 : index
    %c0_162 = arith.constant 0 : index
    %140 = vector.load %arg4[%c3_159, %c2_160, %c0_161, %c0_162] : memref<5x5x32x32xbf16, #tpu.memory_space<vmem>>, vector<1x1x32x32xbf16>
    %141 = vector.shape_cast %140 : vector<1x1x32x32xbf16> to vector<32x32xbf16>
    %cst_163 = arith.constant dense<0.000000e+00> : vector<256x32xf32>
    %142 = tpu.matmul %139, %141, %cst_163 {dimension_numbers = #tpu.dot_dimension_numbers<[1], [0], [0], [1], [0, 0, 1, 1], [], []>} : vector<256x32xbf16>, vector<32x32xbf16>, vector<256x32xf32> -> vector<256x32xf32>
    %143 = arith.addf %136, %142 : vector<256x32xf32>
    %c3_164 = arith.constant 3 : index
    %c3_165 = arith.constant 3 : index
    %c0_166 = arith.constant 0 : index
    %144 = vector.load %arg9[%c3_164, %c3_165, %c0_166] : memref<20x20x32xf32, #tpu.memory_space<vmem>>, vector<16x16x32xf32>
    %145 = vector.shape_cast %144 : vector<16x16x32xf32> to vector<256x32xf32>
    %146 = arith.truncf %145 : vector<256x32xf32> to vector<256x32xbf16>
    %c3_167 = arith.constant 3 : index
    %c3_168 = arith.constant 3 : index
    %c0_169 = arith.constant 0 : index
    %c0_170 = arith.constant 0 : index
    %147 = vector.load %arg4[%c3_167, %c3_168, %c0_169, %c0_170] : memref<5x5x32x32xbf16, #tpu.memory_space<vmem>>, vector<1x1x32x32xbf16>
    %148 = vector.shape_cast %147 : vector<1x1x32x32xbf16> to vector<32x32xbf16>
    %cst_171 = arith.constant dense<0.000000e+00> : vector<256x32xf32>
    %149 = tpu.matmul %146, %148, %cst_171 {dimension_numbers = #tpu.dot_dimension_numbers<[1], [0], [0], [1], [0, 0, 1, 1], [], []>} : vector<256x32xbf16>, vector<32x32xbf16>, vector<256x32xf32> -> vector<256x32xf32>
    %150 = arith.addf %143, %149 : vector<256x32xf32>
    %c3_172 = arith.constant 3 : index
    %c4_173 = arith.constant 4 : index
    %c0_174 = arith.constant 0 : index
    %151 = vector.load %arg9[%c3_172, %c4_173, %c0_174] : memref<20x20x32xf32, #tpu.memory_space<vmem>>, vector<16x16x32xf32>
    %152 = vector.shape_cast %151 : vector<16x16x32xf32> to vector<256x32xf32>
    %153 = arith.truncf %152 : vector<256x32xf32> to vector<256x32xbf16>
    %c3_175 = arith.constant 3 : index
    %c4_176 = arith.constant 4 : index
    %c0_177 = arith.constant 0 : index
    %c0_178 = arith.constant 0 : index
    %154 = vector.load %arg4[%c3_175, %c4_176, %c0_177, %c0_178] : memref<5x5x32x32xbf16, #tpu.memory_space<vmem>>, vector<1x1x32x32xbf16>
    %155 = vector.shape_cast %154 : vector<1x1x32x32xbf16> to vector<32x32xbf16>
    %cst_179 = arith.constant dense<0.000000e+00> : vector<256x32xf32>
    %156 = tpu.matmul %153, %155, %cst_179 {dimension_numbers = #tpu.dot_dimension_numbers<[1], [0], [0], [1], [0, 0, 1, 1], [], []>} : vector<256x32xbf16>, vector<32x32xbf16>, vector<256x32xf32> -> vector<256x32xf32>
    %157 = arith.addf %150, %156 : vector<256x32xf32>
    %c4_180 = arith.constant 4 : index
    %c0_181 = arith.constant 0 : index
    %c0_182 = arith.constant 0 : index
    %158 = vector.load %arg9[%c4_180, %c0_181, %c0_182] : memref<20x20x32xf32, #tpu.memory_space<vmem>>, vector<16x16x32xf32>
    %159 = vector.shape_cast %158 : vector<16x16x32xf32> to vector<256x32xf32>
    %160 = arith.truncf %159 : vector<256x32xf32> to vector<256x32xbf16>
    %c4_183 = arith.constant 4 : index
    %c0_184 = arith.constant 0 : index
    %c0_185 = arith.constant 0 : index
    %c0_186 = arith.constant 0 : index
    %161 = vector.load %arg4[%c4_183, %c0_184, %c0_185, %c0_186] : memref<5x5x32x32xbf16, #tpu.memory_space<vmem>>, vector<1x1x32x32xbf16>
    %162 = vector.shape_cast %161 : vector<1x1x32x32xbf16> to vector<32x32xbf16>
    %cst_187 = arith.constant dense<0.000000e+00> : vector<256x32xf32>
    %163 = tpu.matmul %160, %162, %cst_187 {dimension_numbers = #tpu.dot_dimension_numbers<[1], [0], [0], [1], [0, 0, 1, 1], [], []>} : vector<256x32xbf16>, vector<32x32xbf16>, vector<256x32xf32> -> vector<256x32xf32>
    %164 = arith.addf %157, %163 : vector<256x32xf32>
    %c4_188 = arith.constant 4 : index
    %c1_189 = arith.constant 1 : index
    %c0_190 = arith.constant 0 : index
    %165 = vector.load %arg9[%c4_188, %c1_189, %c0_190] : memref<20x20x32xf32, #tpu.memory_space<vmem>>, vector<16x16x32xf32>
    %166 = vector.shape_cast %165 : vector<16x16x32xf32> to vector<256x32xf32>
    %167 = arith.truncf %166 : vector<256x32xf32> to vector<256x32xbf16>
    %c4_191 = arith.constant 4 : index
    %c1_192 = arith.constant 1 : index
    %c0_193 = arith.constant 0 : index
    %c0_194 = arith.constant 0 : index
    %168 = vector.load %arg4[%c4_191, %c1_192, %c0_193, %c0_194] : memref<5x5x32x32xbf16, #tpu.memory_space<vmem>>, vector<1x1x32x32xbf16>
    %169 = vector.shape_cast %168 : vector<1x1x32x32xbf16> to vector<32x32xbf16>
    %cst_195 = arith.constant dense<0.000000e+00> : vector<256x32xf32>
    %170 = tpu.matmul %167, %169, %cst_195 {dimension_numbers = #tpu.dot_dimension_numbers<[1], [0], [0], [1], [0, 0, 1, 1], [], []>} : vector<256x32xbf16>, vector<32x32xbf16>, vector<256x32xf32> -> vector<256x32xf32>
    %171 = arith.addf %164, %170 : vector<256x32xf32>
    %c4_196 = arith.constant 4 : index
    %c2_197 = arith.constant 2 : index
    %c0_198 = arith.constant 0 : index
    %172 = vector.load %arg9[%c4_196, %c2_197, %c0_198] : memref<20x20x32xf32, #tpu.memory_space<vmem>>, vector<16x16x32xf32>
    %173 = vector.shape_cast %172 : vector<16x16x32xf32> to vector<256x32xf32>
    %174 = arith.truncf %173 : vector<256x32xf32> to vector<256x32xbf16>
    %c4_199 = arith.constant 4 : index
    %c2_200 = arith.constant 2 : index
    %c0_201 = arith.constant 0 : index
    %c0_202 = arith.constant 0 : index
    %175 = vector.load %arg4[%c4_199, %c2_200, %c0_201, %c0_202] : memref<5x5x32x32xbf16, #tpu.memory_space<vmem>>, vector<1x1x32x32xbf16>
    %176 = vector.shape_cast %175 : vector<1x1x32x32xbf16> to vector<32x32xbf16>
    %cst_203 = arith.constant dense<0.000000e+00> : vector<256x32xf32>
    %177 = tpu.matmul %174, %176, %cst_203 {dimension_numbers = #tpu.dot_dimension_numbers<[1], [0], [0], [1], [0, 0, 1, 1], [], []>} : vector<256x32xbf16>, vector<32x32xbf16>, vector<256x32xf32> -> vector<256x32xf32>
    %178 = arith.addf %171, %177 : vector<256x32xf32>
    %c4_204 = arith.constant 4 : index
    %c3_205 = arith.constant 3 : index
    %c0_206 = arith.constant 0 : index
    %179 = vector.load %arg9[%c4_204, %c3_205, %c0_206] : memref<20x20x32xf32, #tpu.memory_space<vmem>>, vector<16x16x32xf32>
    %180 = vector.shape_cast %179 : vector<16x16x32xf32> to vector<256x32xf32>
    %181 = arith.truncf %180 : vector<256x32xf32> to vector<256x32xbf16>
    %c4_207 = arith.constant 4 : index
    %c3_208 = arith.constant 3 : index
    %c0_209 = arith.constant 0 : index
    %c0_210 = arith.constant 0 : index
    %182 = vector.load %arg4[%c4_207, %c3_208, %c0_209, %c0_210] : memref<5x5x32x32xbf16, #tpu.memory_space<vmem>>, vector<1x1x32x32xbf16>
    %183 = vector.shape_cast %182 : vector<1x1x32x32xbf16> to vector<32x32xbf16>
    %cst_211 = arith.constant dense<0.000000e+00> : vector<256x32xf32>
    %184 = tpu.matmul %181, %183, %cst_211 {dimension_numbers = #tpu.dot_dimension_numbers<[1], [0], [0], [1], [0, 0, 1, 1], [], []>} : vector<256x32xbf16>, vector<32x32xbf16>, vector<256x32xf32> -> vector<256x32xf32>
    %185 = arith.addf %178, %184 : vector<256x32xf32>
    %c4_212 = arith.constant 4 : index
    %c4_213 = arith.constant 4 : index
    %c0_214 = arith.constant 0 : index
    %186 = vector.load %arg9[%c4_212, %c4_213, %c0_214] : memref<20x20x32xf32, #tpu.memory_space<vmem>>, vector<16x16x32xf32>
    %187 = vector.shape_cast %186 : vector<16x16x32xf32> to vector<256x32xf32>
    %188 = arith.truncf %187 : vector<256x32xf32> to vector<256x32xbf16>
    %c4_215 = arith.constant 4 : index
    %c4_216 = arith.constant 4 : index
    %c0_217 = arith.constant 0 : index
    %c0_218 = arith.constant 0 : index
    %189 = vector.load %arg4[%c4_215, %c4_216, %c0_217, %c0_218] : memref<5x5x32x32xbf16, #tpu.memory_space<vmem>>, vector<1x1x32x32xbf16>
    %190 = vector.shape_cast %189 : vector<1x1x32x32xbf16> to vector<32x32xbf16>
    %cst_219 = arith.constant dense<0.000000e+00> : vector<256x32xf32>
    %191 = tpu.matmul %188, %190, %cst_219 {dimension_numbers = #tpu.dot_dimension_numbers<[1], [0], [0], [1], [0, 0, 1, 1], [], []>} : vector<256x32xbf16>, vector<32x32xbf16>, vector<256x32xf32> -> vector<256x32xf32>
    %192 = arith.addf %185, %191 : vector<256x32xf32>
    %c0_220 = arith.constant 0 : index
    %c0_221 = arith.constant 0 : index
    %193 = vector.load %arg5[%c0_220, %c0_221] : memref<1x32xf32, #tpu.memory_space<vmem>>, vector<1x32xf32>
    %194 = vector.broadcast %193 : vector<1x32xf32> to vector<256x32xf32>
    %195 = arith.addf %192, %194 : vector<256x32xf32>
    %196 = vector.shape_cast %195 : vector<256x32xf32> to vector<16x16x32xf32>
    %197 = vector.shape_cast %196 : vector<16x16x32xf32> to vector<8x2x16x32xf32>
    %cst_222 = arith.constant dense<0xFF800000> : vector<8x16x32xf32>
    %198 = vector.multi_reduction <maximumf>, %197, %cst_222 [1] : vector<8x2x16x32xf32> to vector<8x16x32xf32>
    %c0_223 = arith.constant 0 : index
    %c0_224 = arith.constant 0 : index
    %c0_225 = arith.constant 0 : index
    %199 = vector.load %arg12[%c0_223, %c0_224, %c0_225] : memref<8x16x32xf32, #tpu.memory_space<vmem>>, vector<8x16x32xf32>
    tpu.vector_store %arg12[%c0_223, %c0_224, %c0_225], %198 {strides = array<i32>} : memref<8x16x32xf32, #tpu.memory_space<vmem>>, vector<8x16x32xf32>,
    %c0_226 = arith.constant 0 : index
    %c0_227 = arith.constant 0 : index
    %c0_228 = arith.constant 0 : index
    %200 = tpu.strided_load %arg12[%c0_226, %c0_227, %c0_228] {strides = array<i32: 1, 2, 1>} : memref<8x16x32xf32, #tpu.memory_space<vmem>>, vector<8x8x32xf32>
    %c0_229 = arith.constant 0 : index
    %c1_230 = arith.constant 1 : index
    %c0_231 = arith.constant 0 : index
    %201 = tpu.strided_load %arg12[%c0_229, %c1_230, %c0_231] {strides = array<i32: 1, 2, 1>} : memref<8x16x32xf32, #tpu.memory_space<vmem>>, vector<8x8x32xf32>
    %202 = arith.maximumf %200, %201 : vector<8x8x32xf32>
    %cst_232 = arith.constant 0.000000e+00 : f32
    %203 = vector.broadcast %cst_232 : f32 to vector<12x12x32xf32>
    %c0_233 = arith.constant 0 : index
    %c0_234 = arith.constant 0 : index
    %c0_235 = arith.constant 0 : index
    %204 = vector.load %arg10[%c0_233, %c0_234, %c0_235] : memref<12x12x32xf32, #tpu.memory_space<vmem>>, vector<12x12x32xf32>
    tpu.vector_store %arg10[%c0_233, %c0_234, %c0_235], %203 {strides = array<i32>} : memref<12x12x32xf32, #tpu.memory_space<vmem>>, vector<12x12x32xf32>,
    %c2_236 = arith.constant 2 : index
    %c2_237 = arith.constant 2 : index
    %c0_238 = arith.constant 0 : index
    %205 = vector.load %arg10[%c2_236, %c2_237, %c0_238] : memref<12x12x32xf32, #tpu.memory_space<vmem>>, vector<8x8x32xf32>
    tpu.vector_store %arg10[%c2_236, %c2_237, %c0_238], %202 {strides = array<i32>} : memref<12x12x32xf32, #tpu.memory_space<vmem>>, vector<8x8x32xf32>,
    %cst_239 = arith.constant 0.000000e+00 : f32
    %206 = vector.broadcast %cst_239 : f32 to vector<64x64xf32>
    %c0_240 = arith.constant 0 : index
    %c0_241 = arith.constant 0 : index
    %c0_242 = arith.constant 0 : index
    %207 = vector.load %arg10[%c0_240, %c0_241, %c0_242] : memref<12x12x32xf32, #tpu.memory_space<vmem>>, vector<8x8x32xf32>
    %208 = vector.shape_cast %207 : vector<8x8x32xf32> to vector<64x32xf32>
    %209 = arith.truncf %208 : vector<64x32xf32> to vector<64x32xbf16>
    %c0_243 = arith.constant 0 : index
    %c0_244 = arith.constant 0 : index
    %c0_245 = arith.constant 0 : index
    %c0_246 = arith.constant 0 : index
    %210 = vector.load %arg6[%c0_243, %c0_244, %c0_245, %c0_246] : memref<5x5x32x64xbf16, #tpu.memory_space<vmem>>, vector<1x1x32x64xbf16>
    %211 = vector.shape_cast %210 : vector<1x1x32x64xbf16> to vector<32x64xbf16>
    %cst_247 = arith.constant dense<0.000000e+00> : vector<64x64xf32>
    %212 = tpu.matmul %209, %211, %cst_247 {dimension_numbers = #tpu.dot_dimension_numbers<[1], [0], [0], [1], [0, 0, 1, 1], [], []>} : vector<64x32xbf16>, vector<32x64xbf16>, vector<64x64xf32> -> vector<64x64xf32>
    %213 = arith.addf %206, %212 : vector<64x64xf32>
    %c0_248 = arith.constant 0 : index
    %c1_249 = arith.constant 1 : index
    %c0_250 = arith.constant 0 : index
    %214 = vector.load %arg10[%c0_248, %c1_249, %c0_250] : memref<12x12x32xf32, #tpu.memory_space<vmem>>, vector<8x8x32xf32>
    %215 = vector.shape_cast %214 : vector<8x8x32xf32> to vector<64x32xf32>
    %216 = arith.truncf %215 : vector<64x32xf32> to vector<64x32xbf16>
    %c0_251 = arith.constant 0 : index
    %c1_252 = arith.constant 1 : index
    %c0_253 = arith.constant 0 : index
    %c0_254 = arith.constant 0 : index
    %217 = vector.load %arg6[%c0_251, %c1_252, %c0_253, %c0_254] : memref<5x5x32x64xbf16, #tpu.memory_space<vmem>>, vector<1x1x32x64xbf16>
    %218 = vector.shape_cast %217 : vector<1x1x32x64xbf16> to vector<32x64xbf16>
    %cst_255 = arith.constant dense<0.000000e+00> : vector<64x64xf32>
    %219 = tpu.matmul %216, %218, %cst_255 {dimension_numbers = #tpu.dot_dimension_numbers<[1], [0], [0], [1], [0, 0, 1, 1], [], []>} : vector<64x32xbf16>, vector<32x64xbf16>, vector<64x64xf32> -> vector<64x64xf32>
    %220 = arith.addf %213, %219 : vector<64x64xf32>
    %c0_256 = arith.constant 0 : index
    %c2_257 = arith.constant 2 : index
    %c0_258 = arith.constant 0 : index
    %221 = vector.load %arg10[%c0_256, %c2_257, %c0_258] : memref<12x12x32xf32, #tpu.memory_space<vmem>>, vector<8x8x32xf32>
    %222 = vector.shape_cast %221 : vector<8x8x32xf32> to vector<64x32xf32>
    %223 = arith.truncf %222 : vector<64x32xf32> to vector<64x32xbf16>
    %c0_259 = arith.constant 0 : index
    %c2_260 = arith.constant 2 : index
    %c0_261 = arith.constant 0 : index
    %c0_262 = arith.constant 0 : index
    %224 = vector.load %arg6[%c0_259, %c2_260, %c0_261, %c0_262] : memref<5x5x32x64xbf16, #tpu.memory_space<vmem>>, vector<1x1x32x64xbf16>
    %225 = vector.shape_cast %224 : vector<1x1x32x64xbf16> to vector<32x64xbf16>
    %cst_263 = arith.constant dense<0.000000e+00> : vector<64x64xf32>
    %226 = tpu.matmul %223, %225, %cst_263 {dimension_numbers = #tpu.dot_dimension_numbers<[1], [0], [0], [1], [0, 0, 1, 1], [], []>} : vector<64x32xbf16>, vector<32x64xbf16>, vector<64x64xf32> -> vector<64x64xf32>
    %227 = arith.addf %220, %226 : vector<64x64xf32>
    %c0_264 = arith.constant 0 : index
    %c3_265 = arith.constant 3 : index
    %c0_266 = arith.constant 0 : index
    %228 = vector.load %arg10[%c0_264, %c3_265, %c0_266] : memref<12x12x32xf32, #tpu.memory_space<vmem>>, vector<8x8x32xf32>
    %229 = vector.shape_cast %228 : vector<8x8x32xf32> to vector<64x32xf32>
    %230 = arith.truncf %229 : vector<64x32xf32> to vector<64x32xbf16>
    %c0_267 = arith.constant 0 : index
    %c3_268 = arith.constant 3 : index
    %c0_269 = arith.constant 0 : index
    %c0_270 = arith.constant 0 : index
    %231 = vector.load %arg6[%c0_267, %c3_268, %c0_269, %c0_270] : memref<5x5x32x64xbf16, #tpu.memory_space<vmem>>, vector<1x1x32x64xbf16>
    %232 = vector.shape_cast %231 : vector<1x1x32x64xbf16> to vector<32x64xbf16>
    %cst_271 = arith.constant dense<0.000000e+00> : vector<64x64xf32>
    %233 = tpu.matmul %230, %232, %cst_271 {dimension_numbers = #tpu.dot_dimension_numbers<[1], [0], [0], [1], [0, 0, 1, 1], [], []>} : vector<64x32xbf16>, vector<32x64xbf16>, vector<64x64xf32> -> vector<64x64xf32>
    %234 = arith.addf %227, %233 : vector<64x64xf32>
    %c0_272 = arith.constant 0 : index
    %c4_273 = arith.constant 4 : index
    %c0_274 = arith.constant 0 : index
    %235 = vector.load %arg10[%c0_272, %c4_273, %c0_274] : memref<12x12x32xf32, #tpu.memory_space<vmem>>, vector<8x8x32xf32>
    %236 = vector.shape_cast %235 : vector<8x8x32xf32> to vector<64x32xf32>
    %237 = arith.truncf %236 : vector<64x32xf32> to vector<64x32xbf16>
    %c0_275 = arith.constant 0 : index
    %c4_276 = arith.constant 4 : index
    %c0_277 = arith.constant 0 : index
    %c0_278 = arith.constant 0 : index
    %238 = vector.load %arg6[%c0_275, %c4_276, %c0_277, %c0_278] : memref<5x5x32x64xbf16, #tpu.memory_space<vmem>>, vector<1x1x32x64xbf16>
    %239 = vector.shape_cast %238 : vector<1x1x32x64xbf16> to vector<32x64xbf16>
    %cst_279 = arith.constant dense<0.000000e+00> : vector<64x64xf32>
    %240 = tpu.matmul %237, %239, %cst_279 {dimension_numbers = #tpu.dot_dimension_numbers<[1], [0], [0], [1], [0, 0, 1, 1], [], []>} : vector<64x32xbf16>, vector<32x64xbf16>, vector<64x64xf32> -> vector<64x64xf32>
    %241 = arith.addf %234, %240 : vector<64x64xf32>
    %c1_280 = arith.constant 1 : index
    %c0_281 = arith.constant 0 : index
    %c0_282 = arith.constant 0 : index
    %242 = vector.load %arg10[%c1_280, %c0_281, %c0_282] : memref<12x12x32xf32, #tpu.memory_space<vmem>>, vector<8x8x32xf32>
    %243 = vector.shape_cast %242 : vector<8x8x32xf32> to vector<64x32xf32>
    %244 = arith.truncf %243 : vector<64x32xf32> to vector<64x32xbf16>
    %c1_283 = arith.constant 1 : index
    %c0_284 = arith.constant 0 : index
    %c0_285 = arith.constant 0 : index
    %c0_286 = arith.constant 0 : index
    %245 = vector.load %arg6[%c1_283, %c0_284, %c0_285, %c0_286] : memref<5x5x32x64xbf16, #tpu.memory_space<vmem>>, vector<1x1x32x64xbf16>
    %246 = vector.shape_cast %245 : vector<1x1x32x64xbf16> to vector<32x64xbf16>
    %cst_287 = arith.constant dense<0.000000e+00> : vector<64x64xf32>
    %247 = tpu.matmul %244, %246, %cst_287 {dimension_numbers = #tpu.dot_dimension_numbers<[1], [0], [0], [1], [0, 0, 1, 1], [], []>} : vector<64x32xbf16>, vector<32x64xbf16>, vector<64x64xf32> -> vector<64x64xf32>
    %248 = arith.addf %241, %247 : vector<64x64xf32>
    %c1_288 = arith.constant 1 : index
    %c1_289 = arith.constant 1 : index
    %c0_290 = arith.constant 0 : index
    %249 = vector.load %arg10[%c1_288, %c1_289, %c0_290] : memref<12x12x32xf32, #tpu.memory_space<vmem>>, vector<8x8x32xf32>
    %250 = vector.shape_cast %249 : vector<8x8x32xf32> to vector<64x32xf32>
    %251 = arith.truncf %250 : vector<64x32xf32> to vector<64x32xbf16>
    %c1_291 = arith.constant 1 : index
    %c1_292 = arith.constant 1 : index
    %c0_293 = arith.constant 0 : index
    %c0_294 = arith.constant 0 : index
    %252 = vector.load %arg6[%c1_291, %c1_292, %c0_293, %c0_294] : memref<5x5x32x64xbf16, #tpu.memory_space<vmem>>, vector<1x1x32x64xbf16>
    %253 = vector.shape_cast %252 : vector<1x1x32x64xbf16> to vector<32x64xbf16>
    %cst_295 = arith.constant dense<0.000000e+00> : vector<64x64xf32>
    %254 = tpu.matmul %251, %253, %cst_295 {dimension_numbers = #tpu.dot_dimension_numbers<[1], [0], [0], [1], [0, 0, 1, 1], [], []>} : vector<64x32xbf16>, vector<32x64xbf16>, vector<64x64xf32> -> vector<64x64xf32>
    %255 = arith.addf %248, %254 : vector<64x64xf32>
    %c1_296 = arith.constant 1 : index
    %c2_297 = arith.constant 2 : index
    %c0_298 = arith.constant 0 : index
    %256 = vector.load %arg10[%c1_296, %c2_297, %c0_298] : memref<12x12x32xf32, #tpu.memory_space<vmem>>, vector<8x8x32xf32>
    %257 = vector.shape_cast %256 : vector<8x8x32xf32> to vector<64x32xf32>
    %258 = arith.truncf %257 : vector<64x32xf32> to vector<64x32xbf16>
    %c1_299 = arith.constant 1 : index
    %c2_300 = arith.constant 2 : index
    %c0_301 = arith.constant 0 : index
    %c0_302 = arith.constant 0 : index
    %259 = vector.load %arg6[%c1_299, %c2_300, %c0_301, %c0_302] : memref<5x5x32x64xbf16, #tpu.memory_space<vmem>>, vector<1x1x32x64xbf16>
    %260 = vector.shape_cast %259 : vector<1x1x32x64xbf16> to vector<32x64xbf16>
    %cst_303 = arith.constant dense<0.000000e+00> : vector<64x64xf32>
    %261 = tpu.matmul %258, %260, %cst_303 {dimension_numbers = #tpu.dot_dimension_numbers<[1], [0], [0], [1], [0, 0, 1, 1], [], []>} : vector<64x32xbf16>, vector<32x64xbf16>, vector<64x64xf32> -> vector<64x64xf32>
    %262 = arith.addf %255, %261 : vector<64x64xf32>
    %c1_304 = arith.constant 1 : index
    %c3_305 = arith.constant 3 : index
    %c0_306 = arith.constant 0 : index
    %263 = vector.load %arg10[%c1_304, %c3_305, %c0_306] : memref<12x12x32xf32, #tpu.memory_space<vmem>>, vector<8x8x32xf32>
    %264 = vector.shape_cast %263 : vector<8x8x32xf32> to vector<64x32xf32>
    %265 = arith.truncf %264 : vector<64x32xf32> to vector<64x32xbf16>
    %c1_307 = arith.constant 1 : index
    %c3_308 = arith.constant 3 : index
    %c0_309 = arith.constant 0 : index
    %c0_310 = arith.constant 0 : index
    %266 = vector.load %arg6[%c1_307, %c3_308, %c0_309, %c0_310] : memref<5x5x32x64xbf16, #tpu.memory_space<vmem>>, vector<1x1x32x64xbf16>
    %267 = vector.shape_cast %266 : vector<1x1x32x64xbf16> to vector<32x64xbf16>
    %cst_311 = arith.constant dense<0.000000e+00> : vector<64x64xf32>
    %268 = tpu.matmul %265, %267, %cst_311 {dimension_numbers = #tpu.dot_dimension_numbers<[1], [0], [0], [1], [0, 0, 1, 1], [], []>} : vector<64x32xbf16>, vector<32x64xbf16>, vector<64x64xf32> -> vector<64x64xf32>
    %269 = arith.addf %262, %268 : vector<64x64xf32>
    %c1_312 = arith.constant 1 : index
    %c4_313 = arith.constant 4 : index
    %c0_314 = arith.constant 0 : index
    %270 = vector.load %arg10[%c1_312, %c4_313, %c0_314] : memref<12x12x32xf32, #tpu.memory_space<vmem>>, vector<8x8x32xf32>
    %271 = vector.shape_cast %270 : vector<8x8x32xf32> to vector<64x32xf32>
    %272 = arith.truncf %271 : vector<64x32xf32> to vector<64x32xbf16>
    %c1_315 = arith.constant 1 : index
    %c4_316 = arith.constant 4 : index
    %c0_317 = arith.constant 0 : index
    %c0_318 = arith.constant 0 : index
    %273 = vector.load %arg6[%c1_315, %c4_316, %c0_317, %c0_318] : memref<5x5x32x64xbf16, #tpu.memory_space<vmem>>, vector<1x1x32x64xbf16>
    %274 = vector.shape_cast %273 : vector<1x1x32x64xbf16> to vector<32x64xbf16>
    %cst_319 = arith.constant dense<0.000000e+00> : vector<64x64xf32>
    %275 = tpu.matmul %272, %274, %cst_319 {dimension_numbers = #tpu.dot_dimension_numbers<[1], [0], [0], [1], [0, 0, 1, 1], [], []>} : vector<64x32xbf16>, vector<32x64xbf16>, vector<64x64xf32> -> vector<64x64xf32>
    %276 = arith.addf %269, %275 : vector<64x64xf32>
    %c2_320 = arith.constant 2 : index
    %c0_321 = arith.constant 0 : index
    %c0_322 = arith.constant 0 : index
    %277 = vector.load %arg10[%c2_320, %c0_321, %c0_322] : memref<12x12x32xf32, #tpu.memory_space<vmem>>, vector<8x8x32xf32>
    %278 = vector.shape_cast %277 : vector<8x8x32xf32> to vector<64x32xf32>
    %279 = arith.truncf %278 : vector<64x32xf32> to vector<64x32xbf16>
    %c2_323 = arith.constant 2 : index
    %c0_324 = arith.constant 0 : index
    %c0_325 = arith.constant 0 : index
    %c0_326 = arith.constant 0 : index
    %280 = vector.load %arg6[%c2_323, %c0_324, %c0_325, %c0_326] : memref<5x5x32x64xbf16, #tpu.memory_space<vmem>>, vector<1x1x32x64xbf16>
    %281 = vector.shape_cast %280 : vector<1x1x32x64xbf16> to vector<32x64xbf16>
    %cst_327 = arith.constant dense<0.000000e+00> : vector<64x64xf32>
    %282 = tpu.matmul %279, %281, %cst_327 {dimension_numbers = #tpu.dot_dimension_numbers<[1], [0], [0], [1], [0, 0, 1, 1], [], []>} : vector<64x32xbf16>, vector<32x64xbf16>, vector<64x64xf32> -> vector<64x64xf32>
    %283 = arith.addf %276, %282 : vector<64x64xf32>
    %c2_328 = arith.constant 2 : index
    %c1_329 = arith.constant 1 : index
    %c0_330 = arith.constant 0 : index
    %284 = vector.load %arg10[%c2_328, %c1_329, %c0_330] : memref<12x12x32xf32, #tpu.memory_space<vmem>>, vector<8x8x32xf32>
    %285 = vector.shape_cast %284 : vector<8x8x32xf32> to vector<64x32xf32>
    %286 = arith.truncf %285 : vector<64x32xf32> to vector<64x32xbf16>
    %c2_331 = arith.constant 2 : index
    %c1_332 = arith.constant 1 : index
    %c0_333 = arith.constant 0 : index
    %c0_334 = arith.constant 0 : index
    %287 = vector.load %arg6[%c2_331, %c1_332, %c0_333, %c0_334] : memref<5x5x32x64xbf16, #tpu.memory_space<vmem>>, vector<1x1x32x64xbf16>
    %288 = vector.shape_cast %287 : vector<1x1x32x64xbf16> to vector<32x64xbf16>
    %cst_335 = arith.constant dense<0.000000e+00> : vector<64x64xf32>
    %289 = tpu.matmul %286, %288, %cst_335 {dimension_numbers = #tpu.dot_dimension_numbers<[1], [0], [0], [1], [0, 0, 1, 1], [], []>} : vector<64x32xbf16>, vector<32x64xbf16>, vector<64x64xf32> -> vector<64x64xf32>
    %290 = arith.addf %283, %289 : vector<64x64xf32>
    %c2_336 = arith.constant 2 : index
    %c2_337 = arith.constant 2 : index
    %c0_338 = arith.constant 0 : index
    %291 = vector.load %arg10[%c2_336, %c2_337, %c0_338] : memref<12x12x32xf32, #tpu.memory_space<vmem>>, vector<8x8x32xf32>
    %292 = vector.shape_cast %291 : vector<8x8x32xf32> to vector<64x32xf32>
    %293 = arith.truncf %292 : vector<64x32xf32> to vector<64x32xbf16>
    %c2_339 = arith.constant 2 : index
    %c2_340 = arith.constant 2 : index
    %c0_341 = arith.constant 0 : index
    %c0_342 = arith.constant 0 : index
    %294 = vector.load %arg6[%c2_339, %c2_340, %c0_341, %c0_342] : memref<5x5x32x64xbf16, #tpu.memory_space<vmem>>, vector<1x1x32x64xbf16>
    %295 = vector.shape_cast %294 : vector<1x1x32x64xbf16> to vector<32x64xbf16>
    %cst_343 = arith.constant dense<0.000000e+00> : vector<64x64xf32>
    %296 = tpu.matmul %293, %295, %cst_343 {dimension_numbers = #tpu.dot_dimension_numbers<[1], [0], [0], [1], [0, 0, 1, 1], [], []>} : vector<64x32xbf16>, vector<32x64xbf16>, vector<64x64xf32> -> vector<64x64xf32>
    %297 = arith.addf %290, %296 : vector<64x64xf32>
    %c2_344 = arith.constant 2 : index
    %c3_345 = arith.constant 3 : index
    %c0_346 = arith.constant 0 : index
    %298 = vector.load %arg10[%c2_344, %c3_345, %c0_346] : memref<12x12x32xf32, #tpu.memory_space<vmem>>, vector<8x8x32xf32>
    %299 = vector.shape_cast %298 : vector<8x8x32xf32> to vector<64x32xf32>
    %300 = arith.truncf %299 : vector<64x32xf32> to vector<64x32xbf16>
    %c2_347 = arith.constant 2 : index
    %c3_348 = arith.constant 3 : index
    %c0_349 = arith.constant 0 : index
    %c0_350 = arith.constant 0 : index
    %301 = vector.load %arg6[%c2_347, %c3_348, %c0_349, %c0_350] : memref<5x5x32x64xbf16, #tpu.memory_space<vmem>>, vector<1x1x32x64xbf16>
    %302 = vector.shape_cast %301 : vector<1x1x32x64xbf16> to vector<32x64xbf16>
    %cst_351 = arith.constant dense<0.000000e+00> : vector<64x64xf32>
    %303 = tpu.matmul %300, %302, %cst_351 {dimension_numbers = #tpu.dot_dimension_numbers<[1], [0], [0], [1], [0, 0, 1, 1], [], []>} : vector<64x32xbf16>, vector<32x64xbf16>, vector<64x64xf32> -> vector<64x64xf32>
    %304 = arith.addf %297, %303 : vector<64x64xf32>
    %c2_352 = arith.constant 2 : index
    %c4_353 = arith.constant 4 : index
    %c0_354 = arith.constant 0 : index
    %305 = vector.load %arg10[%c2_352, %c4_353, %c0_354] : memref<12x12x32xf32, #tpu.memory_space<vmem>>, vector<8x8x32xf32>
    %306 = vector.shape_cast %305 : vector<8x8x32xf32> to vector<64x32xf32>
    %307 = arith.truncf %306 : vector<64x32xf32> to vector<64x32xbf16>
    %c2_355 = arith.constant 2 : index
    %c4_356 = arith.constant 4 : index
    %c0_357 = arith.constant 0 : index
    %c0_358 = arith.constant 0 : index
    %308 = vector.load %arg6[%c2_355, %c4_356, %c0_357, %c0_358] : memref<5x5x32x64xbf16, #tpu.memory_space<vmem>>, vector<1x1x32x64xbf16>
    %309 = vector.shape_cast %308 : vector<1x1x32x64xbf16> to vector<32x64xbf16>
    %cst_359 = arith.constant dense<0.000000e+00> : vector<64x64xf32>
    %310 = tpu.matmul %307, %309, %cst_359 {dimension_numbers = #tpu.dot_dimension_numbers<[1], [0], [0], [1], [0, 0, 1, 1], [], []>} : vector<64x32xbf16>, vector<32x64xbf16>, vector<64x64xf32> -> vector<64x64xf32>
    %311 = arith.addf %304, %310 : vector<64x64xf32>
    %c3_360 = arith.constant 3 : index
    %c0_361 = arith.constant 0 : index
    %c0_362 = arith.constant 0 : index
    %312 = vector.load %arg10[%c3_360, %c0_361, %c0_362] : memref<12x12x32xf32, #tpu.memory_space<vmem>>, vector<8x8x32xf32>
    %313 = vector.shape_cast %312 : vector<8x8x32xf32> to vector<64x32xf32>
    %314 = arith.truncf %313 : vector<64x32xf32> to vector<64x32xbf16>
    %c3_363 = arith.constant 3 : index
    %c0_364 = arith.constant 0 : index
    %c0_365 = arith.constant 0 : index
    %c0_366 = arith.constant 0 : index
    %315 = vector.load %arg6[%c3_363, %c0_364, %c0_365, %c0_366] : memref<5x5x32x64xbf16, #tpu.memory_space<vmem>>, vector<1x1x32x64xbf16>
    %316 = vector.shape_cast %315 : vector<1x1x32x64xbf16> to vector<32x64xbf16>
    %cst_367 = arith.constant dense<0.000000e+00> : vector<64x64xf32>
    %317 = tpu.matmul %314, %316, %cst_367 {dimension_numbers = #tpu.dot_dimension_numbers<[1], [0], [0], [1], [0, 0, 1, 1], [], []>} : vector<64x32xbf16>, vector<32x64xbf16>, vector<64x64xf32> -> vector<64x64xf32>
    %318 = arith.addf %311, %317 : vector<64x64xf32>
    %c3_368 = arith.constant 3 : index
    %c1_369 = arith.constant 1 : index
    %c0_370 = arith.constant 0 : index
    %319 = vector.load %arg10[%c3_368, %c1_369, %c0_370] : memref<12x12x32xf32, #tpu.memory_space<vmem>>, vector<8x8x32xf32>
    %320 = vector.shape_cast %319 : vector<8x8x32xf32> to vector<64x32xf32>
    %321 = arith.truncf %320 : vector<64x32xf32> to vector<64x32xbf16>
    %c3_371 = arith.constant 3 : index
    %c1_372 = arith.constant 1 : index
    %c0_373 = arith.constant 0 : index
    %c0_374 = arith.constant 0 : index
    %322 = vector.load %arg6[%c3_371, %c1_372, %c0_373, %c0_374] : memref<5x5x32x64xbf16, #tpu.memory_space<vmem>>, vector<1x1x32x64xbf16>
    %323 = vector.shape_cast %322 : vector<1x1x32x64xbf16> to vector<32x64xbf16>
    %cst_375 = arith.constant dense<0.000000e+00> : vector<64x64xf32>
    %324 = tpu.matmul %321, %323, %cst_375 {dimension_numbers = #tpu.dot_dimension_numbers<[1], [0], [0], [1], [0, 0, 1, 1], [], []>} : vector<64x32xbf16>, vector<32x64xbf16>, vector<64x64xf32> -> vector<64x64xf32>
    %325 = arith.addf %318, %324 : vector<64x64xf32>
    %c3_376 = arith.constant 3 : index
    %c2_377 = arith.constant 2 : index
    %c0_378 = arith.constant 0 : index
    %326 = vector.load %arg10[%c3_376, %c2_377, %c0_378] : memref<12x12x32xf32, #tpu.memory_space<vmem>>, vector<8x8x32xf32>
    %327 = vector.shape_cast %326 : vector<8x8x32xf32> to vector<64x32xf32>
    %328 = arith.truncf %327 : vector<64x32xf32> to vector<64x32xbf16>
    %c3_379 = arith.constant 3 : index
    %c2_380 = arith.constant 2 : index
    %c0_381 = arith.constant 0 : index
    %c0_382 = arith.constant 0 : index
    %329 = vector.load %arg6[%c3_379, %c2_380, %c0_381, %c0_382] : memref<5x5x32x64xbf16, #tpu.memory_space<vmem>>, vector<1x1x32x64xbf16>
    %330 = vector.shape_cast %329 : vector<1x1x32x64xbf16> to vector<32x64xbf16>
    %cst_383 = arith.constant dense<0.000000e+00> : vector<64x64xf32>
    %331 = tpu.matmul %328, %330, %cst_383 {dimension_numbers = #tpu.dot_dimension_numbers<[1], [0], [0], [1], [0, 0, 1, 1], [], []>} : vector<64x32xbf16>, vector<32x64xbf16>, vector<64x64xf32> -> vector<64x64xf32>
    %332 = arith.addf %325, %331 : vector<64x64xf32>
    %c3_384 = arith.constant 3 : index
    %c3_385 = arith.constant 3 : index
    %c0_386 = arith.constant 0 : index
    %333 = vector.load %arg10[%c3_384, %c3_385, %c0_386] : memref<12x12x32xf32, #tpu.memory_space<vmem>>, vector<8x8x32xf32>
    %334 = vector.shape_cast %333 : vector<8x8x32xf32> to vector<64x32xf32>
    %335 = arith.truncf %334 : vector<64x32xf32> to vector<64x32xbf16>
    %c3_387 = arith.constant 3 : index
    %c3_388 = arith.constant 3 : index
    %c0_389 = arith.constant 0 : index
    %c0_390 = arith.constant 0 : index
    %336 = vector.load %arg6[%c3_387, %c3_388, %c0_389, %c0_390] : memref<5x5x32x64xbf16, #tpu.memory_space<vmem>>, vector<1x1x32x64xbf16>
    %337 = vector.shape_cast %336 : vector<1x1x32x64xbf16> to vector<32x64xbf16>
    %cst_391 = arith.constant dense<0.000000e+00> : vector<64x64xf32>
    %338 = tpu.matmul %335, %337, %cst_391 {dimension_numbers = #tpu.dot_dimension_numbers<[1], [0], [0], [1], [0, 0, 1, 1], [], []>} : vector<64x32xbf16>, vector<32x64xbf16>, vector<64x64xf32> -> vector<64x64xf32>
    %339 = arith.addf %332, %338 : vector<64x64xf32>
    %c3_392 = arith.constant 3 : index
    %c4_393 = arith.constant 4 : index
    %c0_394 = arith.constant 0 : index
    %340 = vector.load %arg10[%c3_392, %c4_393, %c0_394] : memref<12x12x32xf32, #tpu.memory_space<vmem>>, vector<8x8x32xf32>
    %341 = vector.shape_cast %340 : vector<8x8x32xf32> to vector<64x32xf32>
    %342 = arith.truncf %341 : vector<64x32xf32> to vector<64x32xbf16>
    %c3_395 = arith.constant 3 : index
    %c4_396 = arith.constant 4 : index
    %c0_397 = arith.constant 0 : index
    %c0_398 = arith.constant 0 : index
    %343 = vector.load %arg6[%c3_395, %c4_396, %c0_397, %c0_398] : memref<5x5x32x64xbf16, #tpu.memory_space<vmem>>, vector<1x1x32x64xbf16>
    %344 = vector.shape_cast %343 : vector<1x1x32x64xbf16> to vector<32x64xbf16>
    %cst_399 = arith.constant dense<0.000000e+00> : vector<64x64xf32>
    %345 = tpu.matmul %342, %344, %cst_399 {dimension_numbers = #tpu.dot_dimension_numbers<[1], [0], [0], [1], [0, 0, 1, 1], [], []>} : vector<64x32xbf16>, vector<32x64xbf16>, vector<64x64xf32> -> vector<64x64xf32>
    %346 = arith.addf %339, %345 : vector<64x64xf32>
    %c4_400 = arith.constant 4 : index
    %c0_401 = arith.constant 0 : index
    %c0_402 = arith.constant 0 : index
    %347 = vector.load %arg10[%c4_400, %c0_401, %c0_402] : memref<12x12x32xf32, #tpu.memory_space<vmem>>, vector<8x8x32xf32>
    %348 = vector.shape_cast %347 : vector<8x8x32xf32> to vector<64x32xf32>
    %349 = arith.truncf %348 : vector<64x32xf32> to vector<64x32xbf16>
    %c4_403 = arith.constant 4 : index
    %c0_404 = arith.constant 0 : index
    %c0_405 = arith.constant 0 : index
    %c0_406 = arith.constant 0 : index
    %350 = vector.load %arg6[%c4_403, %c0_404, %c0_405, %c0_406] : memref<5x5x32x64xbf16, #tpu.memory_space<vmem>>, vector<1x1x32x64xbf16>
    %351 = vector.shape_cast %350 : vector<1x1x32x64xbf16> to vector<32x64xbf16>
    %cst_407 = arith.constant dense<0.000000e+00> : vector<64x64xf32>
    %352 = tpu.matmul %349, %351, %cst_407 {dimension_numbers = #tpu.dot_dimension_numbers<[1], [0], [0], [1], [0, 0, 1, 1], [], []>} : vector<64x32xbf16>, vector<32x64xbf16>, vector<64x64xf32> -> vector<64x64xf32>
    %353 = arith.addf %346, %352 : vector<64x64xf32>
    %c4_408 = arith.constant 4 : index
    %c1_409 = arith.constant 1 : index
    %c0_410 = arith.constant 0 : index
    %354 = vector.load %arg10[%c4_408, %c1_409, %c0_410] : memref<12x12x32xf32, #tpu.memory_space<vmem>>, vector<8x8x32xf32>
    %355 = vector.shape_cast %354 : vector<8x8x32xf32> to vector<64x32xf32>
    %356 = arith.truncf %355 : vector<64x32xf32> to vector<64x32xbf16>
    %c4_411 = arith.constant 4 : index
    %c1_412 = arith.constant 1 : index
    %c0_413 = arith.constant 0 : index
    %c0_414 = arith.constant 0 : index
    %357 = vector.load %arg6[%c4_411, %c1_412, %c0_413, %c0_414] : memref<5x5x32x64xbf16, #tpu.memory_space<vmem>>, vector<1x1x32x64xbf16>
    %358 = vector.shape_cast %357 : vector<1x1x32x64xbf16> to vector<32x64xbf16>
    %cst_415 = arith.constant dense<0.000000e+00> : vector<64x64xf32>
    %359 = tpu.matmul %356, %358, %cst_415 {dimension_numbers = #tpu.dot_dimension_numbers<[1], [0], [0], [1], [0, 0, 1, 1], [], []>} : vector<64x32xbf16>, vector<32x64xbf16>, vector<64x64xf32> -> vector<64x64xf32>
    %360 = arith.addf %353, %359 : vector<64x64xf32>
    %c4_416 = arith.constant 4 : index
    %c2_417 = arith.constant 2 : index
    %c0_418 = arith.constant 0 : index
    %361 = vector.load %arg10[%c4_416, %c2_417, %c0_418] : memref<12x12x32xf32, #tpu.memory_space<vmem>>, vector<8x8x32xf32>
    %362 = vector.shape_cast %361 : vector<8x8x32xf32> to vector<64x32xf32>
    %363 = arith.truncf %362 : vector<64x32xf32> to vector<64x32xbf16>
    %c4_419 = arith.constant 4 : index
    %c2_420 = arith.constant 2 : index
    %c0_421 = arith.constant 0 : index
    %c0_422 = arith.constant 0 : index
    %364 = vector.load %arg6[%c4_419, %c2_420, %c0_421, %c0_422] : memref<5x5x32x64xbf16, #tpu.memory_space<vmem>>, vector<1x1x32x64xbf16>
    %365 = vector.shape_cast %364 : vector<1x1x32x64xbf16> to vector<32x64xbf16>
    %cst_423 = arith.constant dense<0.000000e+00> : vector<64x64xf32>
    %366 = tpu.matmul %363, %365, %cst_423 {dimension_numbers = #tpu.dot_dimension_numbers<[1], [0], [0], [1], [0, 0, 1, 1], [], []>} : vector<64x32xbf16>, vector<32x64xbf16>, vector<64x64xf32> -> vector<64x64xf32>
    %367 = arith.addf %360, %366 : vector<64x64xf32>
    %c4_424 = arith.constant 4 : index
    %c3_425 = arith.constant 3 : index
    %c0_426 = arith.constant 0 : index
    %368 = vector.load %arg10[%c4_424, %c3_425, %c0_426] : memref<12x12x32xf32, #tpu.memory_space<vmem>>, vector<8x8x32xf32>
    %369 = vector.shape_cast %368 : vector<8x8x32xf32> to vector<64x32xf32>
    %370 = arith.truncf %369 : vector<64x32xf32> to vector<64x32xbf16>
    %c4_427 = arith.constant 4 : index
    %c3_428 = arith.constant 3 : index
    %c0_429 = arith.constant 0 : index
    %c0_430 = arith.constant 0 : index
    %371 = vector.load %arg6[%c4_427, %c3_428, %c0_429, %c0_430] : memref<5x5x32x64xbf16, #tpu.memory_space<vmem>>, vector<1x1x32x64xbf16>
    %372 = vector.shape_cast %371 : vector<1x1x32x64xbf16> to vector<32x64xbf16>
    %cst_431 = arith.constant dense<0.000000e+00> : vector<64x64xf32>
    %373 = tpu.matmul %370, %372, %cst_431 {dimension_numbers = #tpu.dot_dimension_numbers<[1], [0], [0], [1], [0, 0, 1, 1], [], []>} : vector<64x32xbf16>, vector<32x64xbf16>, vector<64x64xf32> -> vector<64x64xf32>
    %374 = arith.addf %367, %373 : vector<64x64xf32>
    %c4_432 = arith.constant 4 : index
    %c4_433 = arith.constant 4 : index
    %c0_434 = arith.constant 0 : index
    %375 = vector.load %arg10[%c4_432, %c4_433, %c0_434] : memref<12x12x32xf32, #tpu.memory_space<vmem>>, vector<8x8x32xf32>
    %376 = vector.shape_cast %375 : vector<8x8x32xf32> to vector<64x32xf32>
    %377 = arith.truncf %376 : vector<64x32xf32> to vector<64x32xbf16>
    %c4_435 = arith.constant 4 : index
    %c4_436 = arith.constant 4 : index
    %c0_437 = arith.constant 0 : index
    %c0_438 = arith.constant 0 : index
    %378 = vector.load %arg6[%c4_435, %c4_436, %c0_437, %c0_438] : memref<5x5x32x64xbf16, #tpu.memory_space<vmem>>, vector<1x1x32x64xbf16>
    %379 = vector.shape_cast %378 : vector<1x1x32x64xbf16> to vector<32x64xbf16>
    %cst_439 = arith.constant dense<0.000000e+00> : vector<64x64xf32>
    %380 = tpu.matmul %377, %379, %cst_439 {dimension_numbers = #tpu.dot_dimension_numbers<[1], [0], [0], [1], [0, 0, 1, 1], [], []>} : vector<64x32xbf16>, vector<32x64xbf16>, vector<64x64xf32> -> vector<64x64xf32>
    %381 = arith.addf %374, %380 : vector<64x64xf32>
    %c0_440 = arith.constant 0 : index
    %c0_441 = arith.constant 0 : index
    %382 = vector.load %arg7[%c0_440, %c0_441] : memref<1x64xf32, #tpu.memory_space<vmem>>, vector<1x64xf32>
    %383 = vector.broadcast %382 : vector<1x64xf32> to vector<64x64xf32>
    %384 = arith.addf %381, %383 : vector<64x64xf32>
    %385 = vector.shape_cast %384 : vector<64x64xf32> to vector<8x8x64xf32>
    %386 = vector.shape_cast %385 : vector<8x8x64xf32> to vector<4x2x8x64xf32>
    %cst_442 = arith.constant dense<0xFF800000> : vector<4x8x64xf32>
    %387 = vector.multi_reduction <maximumf>, %386, %cst_442 [1] : vector<4x2x8x64xf32> to vector<4x8x64xf32>
    %c0_443 = arith.constant 0 : index
    %c0_444 = arith.constant 0 : index
    %c0_445 = arith.constant 0 : index
    %388 = vector.load %arg13[%c0_443, %c0_444, %c0_445] : memref<4x8x64xf32, #tpu.memory_space<vmem>>, vector<4x8x64xf32>
    tpu.vector_store %arg13[%c0_443, %c0_444, %c0_445], %387 {strides = array<i32>} : memref<4x8x64xf32, #tpu.memory_space<vmem>>, vector<4x8x64xf32>,
    %c0_446 = arith.constant 0 : index
    %c0_447 = arith.constant 0 : index
    %c0_448 = arith.constant 0 : index
    %389 = tpu.strided_load %arg13[%c0_446, %c0_447, %c0_448] {strides = array<i32: 1, 2, 1>} : memref<4x8x64xf32, #tpu.memory_space<vmem>>, vector<4x4x64xf32>
    %c0_449 = arith.constant 0 : index
    %c1_450 = arith.constant 1 : index
    %c0_451 = arith.constant 0 : index
    %390 = tpu.strided_load %arg13[%c0_449, %c1_450, %c0_451] {strides = array<i32: 1, 2, 1>} : memref<4x8x64xf32, #tpu.memory_space<vmem>>, vector<4x4x64xf32>
    %391 = arith.maximumf %389, %390 : vector<4x4x64xf32>
    %c0_452 = arith.constant 0 : index
    %c0_453 = arith.constant 0 : index
    %c0_454 = arith.constant 0 : index
    %c0_455 = arith.constant 0 : index
    %392 = vector.load %arg8[%c0_452, %c0_453, %c0_454, %c0_455] : memref<1x4x4x64xf32, #tpu.memory_space<vmem>>, vector<1x4x4x64xf32>
    %393 = vector.shape_cast %392 : vector<1x4x4x64xf32> to vector<4x4x64xf32>
    %394 = vector.shape_cast %391 : vector<4x4x64xf32> to vector<1x4x4x64xf32>
    tpu.vector_store %arg8[%c0_452, %c0_453, %c0_454, %c0_455], %394 {strides = array<i32>} : memref<1x4x4x64xf32, #tpu.memory_space<vmem>>, vector<1x4x4x64xf32>,
    return
  }
  func.func @transform_0(%arg0: i32) -> (i32, i32, i32) {
    %c0_i32 = arith.constant 0 : i32
    %c0_i32_0 = arith.constant 0 : i32
    %c0_i32_1 = arith.constant 0 : i32
    return %arg0, %c0_i32, %c0_i32_0 : i32, i32, i32
  }
  func.func @transform_1(%arg0: i32) -> (i32, i32) {
    %c0_i32 = arith.constant 0 : i32
    %c0_i32_0 = arith.constant 0 : i32
    %c0_i32_1 = arith.constant 0 : i32
    return %c0_i32, %c0_i32_0 : i32, i32
  }
  func.func @transform_2(%arg0: i32) -> (i32, i32) {
    %c0_i32 = arith.constant 0 : i32
    %c0_i32_0 = arith.constant 0 : i32
    %c0_i32_1 = arith.constant 0 : i32
    return %c0_i32, %c0_i32_0 : i32, i32
  }
  func.func @transform_3(%arg0: i32) -> (i32, i32, i32, i32) {
    %c0_i32 = arith.constant 0 : i32
    %c0_i32_0 = arith.constant 0 : i32
    %c0_i32_1 = arith.constant 0 : i32
    %c0_i32_2 = arith.constant 0 : i32
    %c0_i32_3 = arith.constant 0 : i32
    return %c0_i32, %c0_i32_0, %c0_i32_1, %c0_i32_2 : i32, i32, i32, i32
  }
  func.func @transform_4(%arg0: i32) -> (i32, i32) {
    %c0_i32 = arith.constant 0 : i32
    %c0_i32_0 = arith.constant 0 : i32
    %c0_i32_1 = arith.constant 0 : i32
    return %c0_i32, %c0_i32_0 : i32, i32
  }
  func.func @transform_5(%arg0: i32) -> (i32, i32, i32, i32) {
    %c0_i32 = arith.constant 0 : i32
    %c0_i32_0 = arith.constant 0 : i32
    %c0_i32_1 = arith.constant 0 : i32
    %c0_i32_2 = arith.constant 0 : i32
    %c0_i32_3 = arith.constant 0 : i32
    return %c0_i32, %c0_i32_0, %c0_i32_1, %c0_i32_2 : i32, i32, i32, i32
  }
  func.func @transform_6(%arg0: i32) -> (i32, i32) {
    %c0_i32 = arith.constant 0 : i32
    %c0_i32_0 = arith.constant 0 : i32
    %c0_i32_1 = arith.constant 0 : i32
    return %c0_i32, %c0_i32_0 : i32, i32
  }
  func.func @transform_7(%arg0: i32) -> (i32, i32, i32, i32) {
    %c0_i32 = arith.constant 0 : i32
    %c0_i32_0 = arith.constant 0 : i32
    %c0_i32_1 = arith.constant 0 : i32
    %c0_i32_2 = arith.constant 0 : i32
    return %arg0, %c0_i32, %c0_i32_0, %c0_i32_1 : i32, i32, i32, i32
  }
}

module attributes {stable_mosaic.version = 11 : i64} {
  func.func @_mlp_kernel(%arg0: memref<2x1024xf32, #tpu.memory_space<vmem>>, %arg1: memref<1024x64xbf16, #tpu.memory_space<vmem>>, %arg2: memref<1x64xf32, #tpu.memory_space<vmem>>, %arg3: memref<64x10xbf16, #tpu.memory_space<vmem>>, %arg4: memref<1x10xf32, #tpu.memory_space<vmem>>, %arg5: memref<2x10xf32, #tpu.memory_space<vmem>>) attributes {dimension_semantics = [], scalar_prefetch = 0 : i64, scratch_operands = 0 : i64, tpu.core_type = #tpu.core_type<tc>} {
    %c0 = arith.constant 0 : index
    %c0_0 = arith.constant 0 : index
    %0 = vector.load %arg0[%c0, %c0_0] : memref<2x1024xf32, #tpu.memory_space<vmem>>, vector<2x1024xf32>
    %1 = arith.truncf %0 : vector<2x1024xf32> to vector<2x1024xbf16>
    %c0_1 = arith.constant 0 : index
    %c0_2 = arith.constant 0 : index
    %2 = vector.load %arg1[%c0_1, %c0_2] : memref<1024x64xbf16, #tpu.memory_space<vmem>>, vector<1024x64xbf16>
    %cst = arith.constant dense<0.000000e+00> : vector<2x64xf32>
    %3 = tpu.matmul %1, %2, %cst {dimension_numbers = #tpu.dot_dimension_numbers<[1], [0], [0], [1], [0, 0, 1, 1], [], []>} : vector<2x1024xbf16>, vector<1024x64xbf16>, vector<2x64xf32> -> vector<2x64xf32>
    %c0_3 = arith.constant 0 : index
    %c0_4 = arith.constant 0 : index
    %4 = vector.load %arg2[%c0_3, %c0_4] : memref<1x64xf32, #tpu.memory_space<vmem>>, vector<1x64xf32>
    %5 = vector.broadcast %4 : vector<1x64xf32> to vector<2x64xf32>
    %6 = arith.addf %3, %5 : vector<2x64xf32>
    %7 = arith.truncf %6 : vector<2x64xf32> to vector<2x64xbf16>
    %c0_5 = arith.constant 0 : index
    %c0_6 = arith.constant 0 : index
    %8 = vector.load %arg3[%c0_5, %c0_6] : memref<64x10xbf16, #tpu.memory_space<vmem>>, vector<64x10xbf16>
    %cst_7 = arith.constant dense<0.000000e+00> : vector<2x10xf32>
    %9 = tpu.matmul %7, %8, %cst_7 {dimension_numbers = #tpu.dot_dimension_numbers<[1], [0], [0], [1], [0, 0, 1, 1], [], []>} : vector<2x64xbf16>, vector<64x10xbf16>, vector<2x10xf32> -> vector<2x10xf32>
    %c0_8 = arith.constant 0 : index
    %c0_9 = arith.constant 0 : index
    %10 = vector.load %arg4[%c0_8, %c0_9] : memref<1x10xf32, #tpu.memory_space<vmem>>, vector<1x10xf32>
    %11 = vector.broadcast %10 : vector<1x10xf32> to vector<2x10xf32>
    %12 = arith.addf %9, %11 : vector<2x10xf32>
    %c0_10 = arith.constant 0 : index
    %c0_11 = arith.constant 0 : index
    %13 = vector.load %arg5[%c0_10, %c0_11] : memref<2x10xf32, #tpu.memory_space<vmem>>, vector<2x10xf32>
    tpu.vector_store %arg5[%c0_10, %c0_11], %12 {strides = array<i32>} : memref<2x10xf32, #tpu.memory_space<vmem>>, vector<2x10xf32>,
    return
  }
}

</mosaic_0001>

<bundles_post_ra>
// kernel: tudui_forward.3
= control target key start
LH: loop header
LB: loop body
LE: loop exit
PB: predicated region body
PF: predicated region fallthrough
CT: control target
= control target key end

     0   :  { %v30_v28 = vlaneseq  ;;  %v1129_v36 = vmov 1983009808   ;;  %s1397_s0 = inlined_call_operand.vmem [shape: f32[2,1024], index: 0, kind: input, shape index: {}]   ;;  %s1398_s1 = inlined_call_operand.vmem [shape: bf16[1024,64], index: 1, kind: input, shape index: {}]   ;;  %s1399_s2 = inlined_call_operand.vmem [shape: f32[1,64], index: 2, kind: input, shape index: {}]   ;;  %s1400_s3 = inlined_call_operand.vmem [shape: bf16[64,10], index: 3, kind: input, shape index: {}]   ;;  %s1401_s4 = inlined_call_operand.vmem [shape: f32[1,10], index: 4, kind: input, shape index: {}]   ;;  %s1402_s5 = inlined_call_operand.hbm [shape: f32[2,10], index: 5, kind: output, shape index: {}]  }
   0x1   :  { %v1035_v0 = vld [vmem:[%s1398_s1 + $0x40] sm:$0xff]   ;;  %v1039_v4 = vld [vmem:[%s1398_s1 + $0x48] sm:$0xff]   ;;  %v1043_v8 = vld [vmem:[%s1398_s1 + $0x50] sm:$0xff]   ;;  %v28_v37 = vunpack.c.l.s4 %v1129_v36 }
   0x2   :  { %v1036_v1 = vld [vmem:[%s1398_s1 + $0xc0] sm:$0xff]   ;;  %926 = vmatprep.subr.bf16.mxu0 %v1035_v0  ;;  %v1040_v5 = vld [vmem:[%s1398_s1 + $0xc8] sm:$0xff]   ;;  %v1044_v9 = vld [vmem:[%s1398_s1 + $0xd0] sm:$0xff]   ;;  %v31_v33 = vshrl.u32 %v30_v28, 7 }
   0x3   :  { %v1037_v2 = vld [vmem:[%s1398_s1] sm:$0xff]   ;;  %948 = vmatprep.subr.bf16.mxu1 %v1036_v1  ;;  %v1041_v6 = vld [vmem:[%s1398_s1 + $0x8] sm:$0xff]   ;;  %v1045_v10 = vld [vmem:[%s1398_s1 + $0x10] sm:$0xff]   ;;  %v29_v39 = vunpack.c.0.s8 %v28_v37 }
   0x4   :  { %v1038_v3 = vld [vmem:[%s1398_s1 + $0x80] sm:$0xff]   ;;  %927 = vmatpush3.bf16.msra.mxu0 %v1037_v2  ;;  %v1042_v7 = vld [vmem:[%s1398_s1 + $0x88] sm:$0xff]   ;;  %v1046_v11 = vld [vmem:[%s1398_s1 + $0x90] sm:$0xff]  }
   0x5   :  { %949 = vmatpush3.bf16.msra.mxu1 %v1038_v3  ;;  %928 = vmatprep.subr.bf16.mxu0 %v1039_v4  ;;  %v1047_v12 = vld [vmem:[%s1398_s1 + $0x58] sm:$0xff]   ;;  %v1051_v16 = vld [vmem:[%s1398_s1 + $0x60] sm:$0xff]   ;;  %v1055_v20 = vld [vmem:[%s1398_s1 + $0x68] sm:$0xff]   ;;  %v1268_v41 = vsub.s32 %v29_v39, %v31_v33 }
   0x6   :  { %950 = vmatprep.subr.bf16.mxu1 %v1040_v5  ;;  %v1048_v13 = vld [vmem:[%s1398_s1 + $0xd8] sm:$0xff]   ;;  %v1052_v17 = vld [vmem:[%s1398_s1 + $0xe0] sm:$0xff]   ;;  %v1056_v21 = vld [vmem:[%s1398_s1 + $0xe8] sm:$0xff]  }
   0x7   :  { %v1049_v14 = vld [vmem:[%s1398_s1 + $0x18] sm:$0xff]   ;;  %v1053_v18 = vld [vmem:[%s1398_s1 + $0x20] sm:$0xff]   ;;  %v1057_v22 = vld [vmem:[%s1398_s1 + $0x28] sm:$0xff]  }
   0x8   :  { %929 = vmatpush3.bf16.msra.mxu0 %v1041_v6  ;;  %v1050_v15 = vld [vmem:[%s1398_s1 + $0x98] sm:$0xff]   ;;  %v1054_v19 = vld [vmem:[%s1398_s1 + $0xa0] sm:$0xff]   ;;  %v1058_v23 = vld [vmem:[%s1398_s1 + $0xa8] sm:$0xff]  }
   0x9   :  { %951 = vmatpush3.bf16.msra.mxu1 %v1042_v7  ;;  %930 = vmatprep.subr.bf16.mxu0 %v1043_v8  ;;  %v1059_v24 = vld [vmem:[%s1398_s1 + $0x70] sm:$0xff]   ;;  %v1063_v29 = vld [vmem:[%s1398_s1 + $0x78] sm:$0xff]   ;;  %v22_v34 = vld [vmem:[%s1397_s0] sm:$0xff] }
   0xa   :  { %952 = vmatprep.subr.bf16.mxu1 %v1044_v9  ;;  %v1060_v25 = vld [vmem:[%s1398_s1 + $0xf0] sm:$0xff]   ;;  %v1064_v30 = vld [vmem:[%s1398_s1 + $0xf8] sm:$0xff]   ;;  %v1068_v35 = vld [vmem:[%s1398_s1 + $0x140] sm:$0xff]   ;;  %v26_v40 = vcombine.high %v22_v34, %v22_v34  ;;  %v33_v42 = vrot.slane %v22_v34, %v1268_v41 }
   0xb   :  { %v1061_v26 = vld [vmem:[%s1398_s1 + $0x30] sm:$0xff]   ;;  %v1065_v31 = vld [vmem:[%s1398_s1 + $0x38] sm:$0xff]   ;;  %v1069_v38 = vld [vmem:[%s1398_s1 + $0x1c0] sm:$0xff]  }
   0xc   :  { %931 = vmatpush3.bf16.msra.mxu0 %v1045_v10  ;;  %v1062_v27 = vld [vmem:[%s1398_s1 + $0xb0] sm:$0xff]   ;;  %v1066_v32 = vld [vmem:[%s1398_s1 + $0xb8] sm:$0xff]   ;;  %v40_v43 = vrot.slane %v26_v40, %v1268_v41  ;;  %v41_v44 = vcombine.high %v33_v42, %v33_v42  ;;  %v1070_v46 = vld [vmem:[%s1398_s1 + $0x100] sm:$0xff]   ;;  %v68_v47 = vpack.c.bf16 %v33_v42, %v33_v42 }
   0xd   :  { %953 = vmatpush3.bf16.msra.mxu1 %v1046_v11  ;;  %932 = vmatprep.subr.bf16.mxu0 %v1047_v12  ;;  %v1071_v49 = vld [vmem:[%s1398_s1 + $0x180] sm:$0xff]   ;;  %v1072_v52 = vld [vmem:[%s1398_s1 + $0x148] sm:$0xff]   ;;  %v1076_v56 = vld [vmem:[%s1398_s1 + $0x150] sm:$0xff]  }
   0xe   :  { %954 = vmatprep.subr.bf16.mxu1 %v1048_v13  ;;  %v42_v45 = vcombine.high %v40_v43, %v40_v43  ;;  %v70_v48 = vpack.c.bf16 %v40_v43, %v40_v43  ;;  %v69_v50 = vpack.c.bf16 %v41_v44, %v41_v44  ;;  %v1073_v53 = vld [vmem:[%s1398_s1 + $0x1c8] sm:$0xff]   ;;  %v1077_v57 = vld [vmem:[%s1398_s1 + $0x1d0] sm:$0xff]   ;;  %v1080_v60 = vld [vmem:[%s1398_s1 + $0x158] sm:$0xff]  }
   0xf   :  { %v1074_v54 = vld [vmem:[%s1398_s1 + $0x108] sm:$0xff]   ;;  %v1078_v58 = vld [vmem:[%s1398_s1 + $0x110] sm:$0xff]   ;;  %v1081_v61 = vld [vmem:[%s1398_s1 + $0x1d8] sm:$0xff]  }
  0x10   :  { %933 = vmatpush3.bf16.msra.mxu0 %v1049_v14  ;;  %v71_v51 = vpack.c.bf16 %v42_v45, %v42_v45  ;;  %627 = vmatprep.mubr.bf16.mxu0 %v69_v50  ;;  %v1075_v55 = vld [vmem:[%s1398_s1 + $0x188] sm:$0xff]   ;;  %v1079_v59 = vld [vmem:[%s1398_s1 + $0x190] sm:$0xff]   ;;  %v1082_v62 = vld [vmem:[%s1398_s1 + $0x118] sm:$0xff]  }
  0x11   :  { %955 = vmatpush3.bf16.msra.mxu1 %v1050_v15  ;;  %934 = vmatprep.subr.bf16.mxu0 %v1051_v16  ;;  %v1083_v63 = vld [vmem:[%s1398_s1 + $0x198] sm:$0xff]   ;;  %v1084_v0 = vld [vmem:[%s1398_s1 + $0x160] sm:$0xff]   ;;  %v1088_v4 = vld [vmem:[%s1398_s1 + $0x168] sm:$0xff]  }
  0x12   :  { %956 = vmatprep.subr.bf16.mxu1 %v1052_v17  ;;  %667 = vmatprep.mubr.bf16.mxu1 %v71_v51  ;;  %v1085_v1 = vld [vmem:[%s1398_s1 + $0x1e0] sm:$0xff]   ;;  %v1089_v5 = vld [vmem:[%s1398_s1 + $0x1e8] sm:$0xff]   ;;  %v1092_v8 = vld [vmem:[%s1398_s1 + $0x170] sm:$0xff]  }
  0x13   :  { %v1086_v2 = vld [vmem:[%s1398_s1 + $0x120] sm:$0xff]   ;;  %v1090_v6 = vld [vmem:[%s1398_s1 + $0x128] sm:$0xff]   ;;  %v1093_v9 = vld [vmem:[%s1398_s1 + $0x1f0] sm:$0xff]  }
  0x14   :  { %935 = vmatpush3.bf16.msra.mxu0 %v1053_v18  ;;  %v1087_v3 = vld [vmem:[%s1398_s1 + $0x1a0] sm:$0xff]   ;;  %v1091_v7 = vld [vmem:[%s1398_s1 + $0x1a8] sm:$0xff]   ;;  %v1094_v11 = vld [vmem:[%s1398_s1 + $0x130] sm:$0xff]  }
  0x15   :  { %957 = vmatpush3.bf16.msra.mxu1 %v1054_v19  ;;  %936 = vmatprep.subr.bf16.mxu0 %v1055_v20  ;;  %v23_v10 = vld [vmem:[%s1397_s0 + $0x8] sm:$0xff]  ;;  %v1095_v14 = vld [vmem:[%s1398_s1 + $0x1b0] sm:$0xff]  }
  0x16   :  { %958 = vmatprep.subr.bf16.mxu1 %v1056_v21  ;;  %v50_v12 = vrot.slane %v23_v10, %v1268_v41  ;;  %v43_v13 = vcombine.high %v23_v10, %v23_v10 }
  0x18   :  { %937 = vmatpush3.bf16.msra.mxu0 %v1057_v22  ;;  %v58_v15 = vcombine.high %v50_v12, %v50_v12  ;;  %v57_v16 = vrot.slane %v43_v13, %v1268_v41 }
  0x19   :  { %959 = vmatpush3.bf16.msra.mxu1 %v1058_v23  ;;  %938 = vmatprep.subr.bf16.mxu0 %v1059_v24 }
  0x1a   :  { %960 = vmatprep.subr.bf16.mxu1 %v1060_v25 }
  0x1c   :  { %939 = vmatpush3.bf16.msra.mxu0 %v1061_v26 }
  0x1d   :  { %961 = vmatpush3.bf16.msra.mxu1 %v1062_v27  ;;  %940 = vmatprep.subr.bf16.mxu0 %v1063_v29 }
  0x1e   :  { %962 = vmatprep.subr.bf16.mxu1 %v1064_v30 }
  0x20   :  { %941 = vmatpush3.bf16.msra.mxu0 %v1065_v31 }
  0x21   :  { %963 = vmatpush3.bf16.msra.mxu1 %v1066_v32  ;;  %970 = vmatprep.subr.bf16.mxu0 %v1068_v35 }
  0x22   :  { %992 = vmatprep.subr.bf16.mxu1 %v1069_v38 }
  0x23   :  { %628 = vmatmul.mubr.bf16.vlgmr.msra.gmra.mrb[0].mxu0 %v68_v47 }
  0x24   :  { %668 = vmatmul.mubr.bf16.vlgmr.msra.gmra.mrb[0].mxu1 %v70_v48  ;;  %971 = vmatpush3.bf16.msra.mxu0 %v1070_v46 }
  0x25   :  { %993 = vmatpush3.bf16.msra.mxu1 %v1071_v49  ;;  %972 = vmatprep.subr.bf16.mxu0 %v1072_v52 }
  0x26   :  { %994 = vmatprep.subr.bf16.mxu1 %v1073_v53 }
  0x28   :  { %973 = vmatpush3.bf16.msra.mxu0 %v1074_v54 }
  0x29   :  { %995 = vmatpush3.bf16.msra.mxu1 %v1075_v55  ;;  %974 = vmatprep.subr.bf16.mxu0 %v1076_v56 }
  0x2a   :  { %996 = vmatprep.subr.bf16.mxu1 %v1077_v57 }
  0x2c   :  { %975 = vmatpush3.bf16.msra.mxu0 %v1078_v58 }
  0x2d   :  { %997 = vmatpush3.bf16.msra.mxu1 %v1079_v59  ;;  %976 = vmatprep.subr.bf16.mxu0 %v1080_v60 }
  0x2e   :  { %998 = vmatprep.subr.bf16.mxu1 %v1081_v61 }
  0x30   :  { %977 = vmatpush3.bf16.msra.mxu0 %v1082_v62 }
  0x31   :  { %999 = vmatpush3.bf16.msra.mxu1 %v1083_v63  ;;  %978 = vmatprep.subr.bf16.mxu0 %v1084_v0 }
  0x32   :  { %1000 = vmatprep.subr.bf16.mxu1 %v1085_v1 }
  0x34   :  { %979 = vmatpush3.bf16.msra.mxu0 %v1086_v2 }
  0x35   :  { %1001 = vmatpush3.bf16.msra.mxu1 %v1087_v3  ;;  %980 = vmatprep.subr.bf16.mxu0 %v1088_v4 }
  0x36   :  { %1002 = vmatprep.subr.bf16.mxu1 %v1089_v5 }
  0x38   :  { %981 = vmatpush3.bf16.msra.mxu0 %v1090_v6 }
  0x39   :  { %1003 = vmatpush3.bf16.msra.mxu1 %v1091_v7 }
  0x3a   :  { %10 = vsyncpa [#allocation3], 0  ;;  %982 = vmatprep.subr.bf16.mxu0 %v1092_v8  ;;  %1004 = vmatprep.subr.bf16.mxu1 %v1093_v9  ;;  %v1096_v17 = vld [vmem:[%s1398_s1 + $0x178] sm:$0xff]   ;;  %v73_v19 = vpack.c.bf16 %v58_v15, %v58_v15  ;;  %v59_v20 = vcombine.high %v57_v16, %v57_v16  ;;  %v72_v24 = vpack.c.bf16 %v50_v12, %v50_v12  ;;  %v1101_v26 = vld [vmem:[%s1400_s3] sm:$0xff]   ;;  %v1130_v27 = vmov 0.0   ;;  %s1132_s8 = smov [#allocation2]  }
  0x3b   :  { %v1097_v18 = vld [vmem:[%s1398_s1 + $0x1f8] sm:$0xff]   ;;  %v74_v25 = vpack.c.bf16 %v57_v16, %v57_v16  ;;  %v1102_v28 = vld [vmem:[%s1400_s3 + $0x8] sm:$0xff]   ;;  %v1103_v29 = vld [vmem:[%s1400_s3 + $0x10] sm:$0xff]   ;;  %vm1131_vm0 = vmmov 0   ;;  %vm795_vm1 = vcmask 523264   ;;  %s847_s9 = sshll.u32 %s1132_s8, 4  ;;  %s848_s9 = int_to_ptr.vmem [resolvable:$true] %s847_s9 }
  0x3c   :  { %983 = vmatpush3.bf16.msra.mxu0 %v1094_v11  ;;  %v1098_v21 = vld [vmem:[%s1398_s1 + $0x138] sm:$0xff]   ;;  %v75_v23 = vpack.c.bf16 %v59_v20, %v59_v20  ;;  %707 = vmatprep.mubr.bf16.mxu0 %v73_v19  ;;  %v855_v33 = vld [vmem:[%s1399_s2] ss:$0 sm:$0xff]  ;;  %vm839_vm2 = vcmask 74752   ;;  %s1105_s10 = scalar_lea.vmem %s848_s9, 32  ;;  %p1110_p1 = scmp.lt.s32.totalorder %s848_s9, %s848_s9 }
  0x3d   :  { %1005 = vmatpush3.bf16.msra.mxu1 %v1095_v14  ;;  %v1099_v22 = vld [vmem:[%s1398_s1 + $0x1b8] sm:$0xff]   ;;  %984 = vmatprep.subr.bf16.mxu0 %v1096_v17  ;;  %v920_v57 = vld [vmem:[%s1401_s4] ss:$0 sm:$0xff]  ;;  %p1106_p0 = scmp.ne.s32.totalorder %s848_s9, %s1105_s10  ;;  %p1111_p2 = scmp.lt.s32.totalorder %s1105_s10, %s1105_s10 }
  0x3e   :  { %1006 = vmatprep.subr.bf16.mxu1 %v1097_v18  ;;  %747 = vmatprep.mubr.bf16.mxu1 %v75_v23  ;;  %v1104_v30 = vld [vmem:[%s1400_s3 + $0x18] sm:$0xff]  }
  0x3f   :  { %p1112_p3 = por %p1111_p2, %p1110_p1 }
  0x40   :  { %985 = vmatpush3.bf16.msra.mxu0 %v1098_v21 }
  0x41   :  { %1007 = vmatpush3.bf16.msra.mxu1 %v1099_v22  ;;  %1019 = vmatprep.subr.bf16.mxu0 %v1130_v27  ;;  %p1113_p4 = pnand %p1112_p3, %p1106_p0 }
  0x43   :  { %708 = vmatmul.mubr.bf16.vlgmr.msra.gmra.mrb[4].mxu0 %v72_v24 }
  0x44   :  { %748 = vmatmul.mubr.bf16.vlgmr.msra.gmra.mrb[4].mxu1 %v74_v25  ;;  %1020 = vmatpush3.bf16.msra.mxu0 %v1101_v26 }
  0x45   :  { %1021 = vmatprep.subr.bf16.mxu0 %v1130_v27  ;;  %1027 = vmatprep.mubr.msk.bf16.mxu0 %vm1131_vm0, %v1130_v27 }
  0x48   :  { %1022 = vmatpush3.bf16.msra.mxu0 %v1102_v28 }
  0x49   :  { %1023 = vmatprep.subr.bf16.mxu0 %v1130_v27 }
  0x4c   :  { %1024 = vmatpush3.bf16.msra.mxu0 %v1103_v29 }
  0x4d   :  { %1025 = vmatprep.subr.bf16.mxu0 %v1130_v27 }
  0x50   :  { %1026 = vmatpush3.bf16.msra.mxu0 %v1104_v30 }
  0xf6   :  { %v942_v31 = vpop.f32.mrb[0].mxu0 }
  0xf7   :  { %v964_v32 = vpop.f32.mrb[0].mxu1  ;;  %v943_v34 = vpop.f32.mrb[1].mxu0 }
  0xf8   :  { %v965_v35 = vpop.f32.mrb[1].mxu1  ;;  %v944_v36 = vadd.f32 %v943_v34, %v942_v31  ;;  %v945_v38 = vpop.f32.mrb[2].mxu0 }
  0xf9   :  { %v966_v37 = vadd.f32 %v965_v35, %v964_v32  ;;  %v967_v39 = vpop.f32.mrb[2].mxu1  ;;  %v946_v40 = vpop.f32.mrb[3].mxu0 }
  0xfa   :  { %v968_v41 = vpop.f32.mrb[3].mxu1  ;;  %v630_v42 = vadd.f32 %v944_v36, %v855_v33 }
  0xfc   :  { %v670_v43 = vadd.f32 %v966_v37, %v630_v42 }
 0x116   :  { %v986_v44 = vpop.f32.mrb[4].mxu0 }
 0x117   :  { %v1008_v45 = vpop.f32.mrb[4].mxu1  ;;  %v987_v46 = vpop.f32.mrb[5].mxu0 }
 0x118   :  { %v1009_v47 = vpop.f32.mrb[5].mxu1  ;;  %v988_v48 = vadd.f32 %v987_v46, %v986_v44  ;;  %v989_v50 = vpop.f32.mrb[6].mxu0 }
 0x119   :  { %v1010_v49 = vadd.f32 %v1009_v47, %v1008_v45  ;;  %v1011_v51 = vpop.f32.mrb[6].mxu1  ;;  %v990_v52 = vpop.f32.mrb[7].mxu0 }
 0x11a   :  { %v1012_v53 = vpop.f32.mrb[7].mxu1  ;;  %v710_v54 = vadd.f32 %v988_v48, %v670_v43 }
 0x11c   :  { %v750_v55 = vadd.f32 %v1010_v49, %v710_v54 }
 0x11e   :  { %v755_v56 = vpack.c.bf16 %v750_v55, %v750_v55 }
 0x120   :  { %1028 = vmatmul.mubr.msk.bf16.vlgmr.msra.gmra.mrb[8].mxu0 %vm795_vm1, %v755_v56 }
 0x1f3   :  { %v833_v58 = vpop.f32.mrb[8].mxu0 }
 0x1f4   :  { %v834_v59 = vadd.f32 %v920_v57, %v833_v58  ;;  %v1029_v60 = vpop.f32.mrb[9].mxu0 }
 0x1f5   :  { %v836_v61 = vpop.f32.mrb[10].mxu0 }
 0x1f6   :  { %v1030_v62 = vpop.f32.mrb[11].mxu0  ;;  %840 = vst.msk [vmem:[#allocation2] sm:$0x3] %vm839_vm2, %v834_v59 }
 0x1f7   :  { %1116 = shalt.err (!%p1113_p4)
}
 0x1f8   :  { %s1117_s4 = scalar_lea.hbm %s1402_s5, 32 }
 0x1f9   :  { %p1118_p5 = scmp.ne.s32.totalorder %s1402_s5, %s1117_s4  ;;  %p1121_p6 = scmp.lt.u32.totalorder %s1117_s4, %s1402_s5 }
 0x1fb   :  { %p1123_p7 = pnand %p1121_p6, %p1118_p5 }
 0x1fd   :  { %1126 = shalt.err (!%p1123_p7)
}
 0x1fe   :  { %850 = dma.vmem_to_hbm [thread:$0]  %s848_s9, 32, %s1402_s5, [#allocation3]  }
 0x1ff   :  { %1127 = dma.done.wait [#allocation3], 32  }
 0x200   :  { %1128 = vsyncadd [#allocation3], 4294967264 }
 0x201   :  { %854 = vsyncpa [#allocation3], 1 }

// kernel: tudui_forward.2
= control target key start
LH: loop header
LB: loop body
LE: loop exit
PB: predicated region body
PF: predicated region fallthrough
CT: control target
= control target key end

     0   :  { %s16883_s24 = smov 0   ;;  %s19582_s0 = inlined_call_operand.vmem [shape: bf16[2,1024,75], index: 0, kind: input, shape index: {}]   ;;  %s19583_s1 = inlined_call_operand.vmem [shape: bf16[75,32], index: 1, kind: input, shape index: {}]   ;;  %s19584_s2 = inlined_call_operand.vmem [shape: f32[1,32], index: 2, kind: input, shape index: {}]   ;;  %s19585_s3 = inlined_call_operand.vmem [shape: bf16[5,5,32,32], index: 3, kind: input, shape index: {}]   ;;  %s19586_s4 = inlined_call_operand.vmem [shape: f32[1,32], index: 4, kind: input, shape index: {}]   ;;  %s19587_s5 = inlined_call_operand.vmem [shape: bf16[5,5,32,64], index: 5, kind: input, shape index: {}]   ;;  %s19588_s6 = inlined_call_operand.vmem [shape: f32[1,64], index: 6, kind: input, shape index: {}]   ;;  %s19589_s7 = inlined_call_operand.vmem [shape: f32[2,4,4,64], index: 7, kind: output, shape index: {}]  }
   0x1 LB: > { %s12739_s25 = sadd.s32 4294967295, %s16839_s24   ;;  %p12743_p0 = scmp.ge.s32.totalorder %s16839_s24, 1  ;;  %s16839_s24 = sphi %s16883_s24, %s17_s24  }
   0x2   : > { %p237_p1 = scmp.lt.s32.totalorder %s16839_s24, 3 }
   0x4   : > { %p238_p2 = pnand %p12743_p0, %p237_p1 }
   0x6   : > { %241 = sbr.rel (%p238_p2) target bundleno = 2436 (0x984), region = 48 }
   0xd   : > { %v16661_v0 = vld [vmem:[%s19583_s1] sm:$0xff]   ;;  %v16662_v1 = vld [vmem:[%s19583_s1 + $0x8] sm:$0xff]   ;;  %vm967_vm0 = vcmask 1044480   ;;  %vm968_vm1 = vcmask 1045504   ;;  %v16663_v2 = vld [vmem:[%s19583_s1 + $0x10] sm:$0xff]   ;;  %v16841_v3 = vmov 65535  }
   0xe   : > { %14349 = vmatprep.subr.bf16.mxu0 %v16661_v0  ;;  %v969_v4 = vsel %vm967_vm0, 4294967295, %v16841_v3  ;;  %p269_p3 = scmp.lt.s32.totalorder %s12739_s25, 1  ;;  %v16664_v5 = vld [vmem:[%s19583_s1 + $0x18] sm:$0xff]   ;;  %v16665_v6 = vld [vmem:[%s19583_s1 + $0x20] sm:$0x3f]   ;;  %vm774_vm2 = vcmask 613376  }
   0xf   : > { %14350 = vmatpush3.bf16.msra.mxu0 %v16661_v0  ;;  %v970_v7 = vsel %vm968_vm1, %v969_v4, 0  ;;  %vm1519_vm3 = vcmask 261120   ;;  %vm1937_vm4 = vcmask 257024   ;;  %v16842_v39 = vmov 0.0   ;;  %v16730_v43 = vld [vmem:[%s19585_s3 + $0x10] sm:$0xff]   ;;  %v16731_v44 = vld [vmem:[%s19585_s3 + $0x18] sm:$0xff]  }
  0x10   : > { %14351 = vmatprep.subr.bf16.mxu0 %v16662_v1  ;;  %s19668_s25 = smov (!%p269_p3, %s12739_s25), 1  ;;  %v972_v9 = vand.u32 %v16665_v6, %v970_v7  ;;  %1935 = vst.msk [vmem:[#allocation2] sm:$0xff] %vm1519_vm3, %v16842_v39  ;;  %1936 = vst.msk [vmem:[#allocation2 + $0x8] sm:$0xff] %vm1519_vm3, %v16842_v39  ;;  %v16732_v59 = vld [vmem:[%s19585_s3 + $0x70] sm:$0xff]   ;;  %v16733_v60 = vld [vmem:[%s19585_s3 + $0x78] sm:$0xff]   ;;  %vm12643_vm5 = vcmask 523264  }
  0x11   : > { %s13678_s13 = sshll.u32 %s19668_s25, 9  ;;  %1938 = vst.msk [vmem:[#allocation2 + $0x10] sm:$0xf] %vm1937_vm4, %v16842_v39  ;;  %1941 = vst.msk [vmem:[#allocation2 + $0x28] sm:$0xf] %vm1937_vm4, %v16842_v39  ;;  %15687 = vmatprep.subr.bf16.mxu1 %v16732_v59  ;;  %s13679_s19 = sshll.u32 %s19668_s25, 4 }
  0x12   : > { %s16912_s16 = scalar_lea.vmem %s19582_s0, %s13678_s13  ;;  %1939 = vst.msk [vmem:[#allocation2 + $0x18] sm:$0xff] %vm1519_vm3, %v16842_v39  ;;  %1940 = vst.msk [vmem:[#allocation2 + $0x20] sm:$0xff] %vm1519_vm3, %v16842_v39  ;;  %15689 = vmatpush3.bf16.msra.mxu1 %v16732_v59  ;;  %vm12679_vm6 = vcmask 519168   ;;  %s278_s22 = scalar_lea.vmem %s19589_s7, %s13679_s19 }
  0x13   : > { %14352 = vmatpush3.bf16.msra.mxu0 %v16662_v1  ;;  %v16666_v8 = vld [vmem:[%s16912_s16] sm:$0xff]   ;;  %v16667_v10 = vld [vmem:[%s16912_s16 + $0x8] sm:$0xff]   ;;  %v16668_v11 = vld [vmem:[%s16912_s16 + $0x10] sm:$0xff]   ;;  %1942 = vst.msk [vmem:[#allocation2 + $0x30] sm:$0xff] %vm1519_vm3, %v16842_v39  ;;  %15688 = vmatprep.subr.bf16.mxu1 %v16733_v60 }
  0x14   : > { %14353 = vmatprep.subr.bf16.mxu0 %v16663_v2  ;;  %14359 = vmatprep.mubr.msk.bf16.mxu0 %vm774_vm2, %v16666_v8  ;;  %v16669_v12 = vld [vmem:[%s16912_s16 + $0x18] sm:$0xff]   ;;  %v16670_v13 = vld [vmem:[%s16912_s16 + $0x20] sm:$0xff]   ;;  %v16671_v14 = vld [vmem:[%s16912_s16 + $0x28] sm:$0xff]   ;;  %1943 = vst.msk [vmem:[#allocation2 + $0x38] sm:$0xff] %vm1519_vm3, %v16842_v39 }
  0x15   : > { %v16672_v15 = vld [vmem:[%s16912_s16 + $0x30] sm:$0xff]   ;;  %v16673_v16 = vld [vmem:[%s16912_s16 + $0x38] sm:$0xff]   ;;  %v16674_v17 = vld [vmem:[%s16912_s16 + $0x40] sm:$0xff]   ;;  %1944 = vst.msk [vmem:[#allocation2 + $0x40] sm:$0xf] %vm1937_vm4, %v16842_v39 }
  0x16   : > { %v16675_v18 = vld [vmem:[%s16912_s16 + $0x48] sm:$0xff]   ;;  %v16676_v19 = vld [vmem:[%s16912_s16 + $0x50] sm:$0xff]   ;;  %v16677_v20 = vld [vmem:[%s16912_s16 + $0x58] sm:$0xff]   ;;  %1945 = vst.msk [vmem:[#allocation2 + $0x48] sm:$0xff] %vm1519_vm3, %v16842_v39  ;;  %15690 = vmatpush3.bf16.msra.mxu1 %v16733_v60 }
  0x17   : > { %14354 = vmatpush3.bf16.msra.mxu0 %v16663_v2  ;;  %v16678_v21 = vld [vmem:[%s16912_s16 + $0x60] sm:$0xff]   ;;  %v16679_v22 = vld [vmem:[%s16912_s16 + $0x68] sm:$0xff]   ;;  %v16680_v23 = vld [vmem:[%s16912_s16 + $0x70] sm:$0xff]   ;;  %1946 = vst.msk [vmem:[#allocation2 + $0x50] sm:$0xff] %vm1519_vm3, %v16842_v39 }
  0x18   : > { %14355 = vmatprep.subr.bf16.mxu0 %v16664_v5  ;;  %v16681_v24 = vld [vmem:[%s16912_s16 + $0x78] sm:$0xff]   ;;  %v16682_v25 = vld [vmem:[%s16912_s16 + $0x80] sm:$0xff]   ;;  %v16683_v26 = vld [vmem:[%s16912_s16 + $0x88] sm:$0xff]   ;;  %1947 = vst.msk [vmem:[#allocation2 + $0x58] sm:$0xf] %vm1937_vm4, %v16842_v39 }
  0x19   : > { %v16684_v27 = vld [vmem:[%s16912_s16 + $0x90] sm:$0xff]   ;;  %v16685_v28 = vld [vmem:[%s16912_s16 + $0x98] sm:$0xff]   ;;  %v16686_v29 = vld [vmem:[%s16912_s16 + $0xa0] sm:$0xff]   ;;  %1948 = vst.msk [vmem:[#allocation2 + $0x60] sm:$0xff] %vm1519_vm3, %v16842_v39 }
  0x1a   : > { %v16687_v30 = vld [vmem:[%s16912_s16 + $0xa8] sm:$0xff]   ;;  %v16688_v31 = vld [vmem:[%s16912_s16 + $0xb0] sm:$0xff]   ;;  %v16689_v32 = vld [vmem:[%s16912_s16 + $0xb8] sm:$0xff]   ;;  %1949 = vst.msk [vmem:[#allocation2 + $0x68] sm:$0xff] %vm1519_vm3, %v16842_v39 }
  0x1b   : > { %14356 = vmatpush3.bf16.msra.mxu0 %v16664_v5  ;;  %v16690_v33 = vld [vmem:[%s16912_s16 + $0xc0] sm:$0xff]   ;;  %v16691_v34 = vld [vmem:[%s16912_s16 + $0xc8] sm:$0xff]   ;;  %v16692_v35 = vld [vmem:[%s16912_s16 + $0xd0] sm:$0xff]   ;;  %1950 = vst.msk [vmem:[#allocation2 + $0x70] sm:$0xf] %vm1937_vm4, %v16842_v39 }
  0x1c   : > { %14357 = vmatprep.subr.bf16.mxu0 %v972_v9  ;;  %v16693_v36 = vld [vmem:[%s16912_s16 + $0xd8] sm:$0xff]   ;;  %v16694_v37 = vld [vmem:[%s16912_s16 + $0xe0] sm:$0xff]   ;;  %v16973_v38 = vld [vmem:[%s16912_s16 + $0xe8] sm:$0xff]   ;;  %1951 = vst.msk [vmem:[#allocation2 + $0x78] sm:$0xff] %vm1519_vm3, %v16842_v39 }
  0x1d   : > { %1952 = vst.msk [vmem:[#allocation2 + $0x80] sm:$0xff] %vm1519_vm3, %v16842_v39  ;;  %1954 = vst.msk [vmem:[#allocation2 + $0x90] sm:$0xff] %vm1519_vm3, %v16842_v39  ;;  %v16696_v40 = vld [vmem:[%s16912_s16 + $0xf0] sm:$0xff]   ;;  %v16697_v41 = vld [vmem:[%s16912_s16 + $0xf8] sm:$0xff]  }
  0x1e   : > { %1953 = vst.msk [vmem:[#allocation2 + $0x88] sm:$0xf] %vm1937_vm4, %v16842_v39  ;;  %1956 = vst.msk [vmem:[#allocation2 + $0xa0] sm:$0xf] %vm1937_vm4, %v16842_v39  ;;  %v16698_v42 = vld [vmem:[%s16912_s16 + $0x100] sm:$0xff]   ;;  %v16699_v45 = vld [vmem:[%s16912_s16 + $0x108] sm:$0xff]  }
  0x1f   : > { %14358 = vmatpush3.bf16.msra.mxu0 %v972_v9  ;;  %1955 = vst.msk [vmem:[#allocation2 + $0x98] sm:$0xff] %vm1519_vm3, %v16842_v39  ;;  %1957 = vst.msk [vmem:[#allocation2 + $0xa8] sm:$0xff] %vm1519_vm3, %v16842_v39  ;;  %v16700_v46 = vld [vmem:[%s16912_s16 + $0x110] sm:$0xff]   ;;  %v16701_v47 = vld [vmem:[%s16912_s16 + $0x118] sm:$0xff]  }
  0x20   : > { %1958 = vst.msk [vmem:[#allocation2 + $0xb0] sm:$0xff] %vm1519_vm3, %v16842_v39  ;;  %1960 = vst.msk [vmem:[#allocation2 + $0xc0] sm:$0xff] %vm1519_vm3, %v16842_v39  ;;  %14487 = vmatprep.subr.bf16.mxu0 %v16730_v43  ;;  %v16702_v48 = vld [vmem:[%s16912_s16 + $0x120] sm:$0xff]   ;;  %v16703_v49 = vld [vmem:[%s16912_s16 + $0x128] sm:$0xff]  }
  0x21   : > { %1959 = vst.msk [vmem:[#allocation2 + $0xb8] sm:$0xf] %vm1937_vm4, %v16842_v39  ;;  %1962 = vst.msk [vmem:[#allocation2 + $0xd0] sm:$0xf] %vm1937_vm4, %v16842_v39  ;;  %v16704_v50 = vld [vmem:[%s16912_s16 + $0x130] sm:$0xff]   ;;  %v16705_v51 = vld [vmem:[%s16912_s16 + $0x138] sm:$0xff]  }
  0x22   : > { %14360 = vmatmul.mubr.msk.bf16.vlgmr.msra.gmra.mrb[0].mxu0 %vm774_vm2, %v16667_v10  ;;  %1961 = vst.msk [vmem:[#allocation2 + $0xc8] sm:$0xff] %vm1519_vm3, %v16842_v39  ;;  %1963 = vst.msk [vmem:[#allocation2 + $0xd8] sm:$0xff] %vm1519_vm3, %v16842_v39  ;;  %v16706_v52 = vld [vmem:[%s16912_s16 + $0x140] sm:$0xff]   ;;  %v16707_v53 = vld [vmem:[%s16912_s16 + $0x148] sm:$0xff]  }
  0x23   : > { %14363 = vmatprep.mubr.msk.bf16.mxu0 %vm774_vm2, %v16668_v11  ;;  %1964 = vst.msk [vmem:[#allocation2 + $0xe0] sm:$0xff] %vm1519_vm3, %v16842_v39  ;;  %1966 = vst.msk [vmem:[#allocation2 + $0xf0] sm:$0xff] %vm1519_vm3, %v16842_v39  ;;  %14488 = vmatpush3.bf16.msra.mxu0 %v16730_v43  ;;  %v16708_v54 = vld [vmem:[%s16912_s16 + $0x150] sm:$0xff]   ;;  %v16709_v55 = vld [vmem:[%s16912_s16 + $0x158] sm:$0xff]  }
  0x24   : > { %1965 = vst.msk [vmem:[#allocation2 + $0xe8] sm:$0xf] %vm1937_vm4, %v16842_v39  ;;  %1968 = vst.msk [vmem:[#allocation2 + $0x100] sm:$0xf] %vm1937_vm4, %v16842_v39  ;;  %14489 = vmatprep.subr.bf16.mxu0 %v16731_v44  ;;  %v16710_v56 = vld [vmem:[%s16912_s16 + $0x160] sm:$0xff]   ;;  %v16711_v57 = vld [vmem:[%s16912_s16 + $0x168] sm:$0xff]  }
  0x25   : > { %1967 = vst.msk [vmem:[#allocation2 + $0xf8] sm:$0xff] %vm1519_vm3, %v16842_v39  ;;  %1969 = vst.msk [vmem:[#allocation2 + $0x108] sm:$0xff] %vm1519_vm3, %v16842_v39  ;;  %v16712_v58 = vld [vmem:[%s16912_s16 + $0x170] sm:$0xff]   ;;  %v16713_v61 = vld [vmem:[%s16912_s16 + $0x178] sm:$0xff]  }
  0x26   : > { %1970 = vst.msk [vmem:[#allocation2 + $0x110] sm:$0xff] %vm1519_vm3, %v16842_v39  ;;  %1972 = vst.msk [vmem:[#allocation2 + $0x120] sm:$0xff] %vm1519_vm3, %v16842_v39  ;;  %v16714_v62 = vld [vmem:[%s16912_s16 + $0x180] sm:$0xff]   ;;  %v16715_v63 = vld [vmem:[%s16912_s16 + $0x188] sm:$0xff]  }
  0x27   : > { %1971 = vst.msk [vmem:[#allocation2 + $0x118] sm:$0xf] %vm1937_vm4, %v16842_v39  ;;  %1974 = vst.msk [vmem:[#allocation2 + $0x130] sm:$0xf] %vm1937_vm4, %v16842_v39  ;;  %14490 = vmatpush3.bf16.msra.mxu0 %v16731_v44  ;;  %v16716_v0 = vld [vmem:[%s16912_s16 + $0x190] sm:$0xff]   ;;  %v16717_v1 = vld [vmem:[%s16912_s16 + $0x198] sm:$0xff]  }
  0x28   : > { %1973 = vst.msk [vmem:[#allocation2 + $0x128] sm:$0xff] %vm1519_vm3, %v16842_v39  ;;  %1975 = vst.msk [vmem:[#allocation2 + $0x138] sm:$0xff] %vm1519_vm3, %v16842_v39  ;;  %v16718_v2 = vld [vmem:[%s16912_s16 + $0x1a0] sm:$0xff]   ;;  %v16719_v3 = vld [vmem:[%s16912_s16 + $0x1a8] sm:$0xff]  }
  0x29   : > { %1976 = vst.msk [vmem:[#allocation2 + $0x140] sm:$0xff] %vm1519_vm3, %v16842_v39  ;;  %1978 = vst.msk [vmem:[#allocation2 + $0x150] sm:$0xff] %vm1519_vm3, %v16842_v39  ;;  %v16720_v4 = vld [vmem:[%s16912_s16 + $0x1b0] sm:$0xff]   ;;  %v16721_v7 = vld [vmem:[%s16912_s16 + $0x1b8] sm:$0xff]  }
  0x2a   : > { %14364 = vmatmul.mubr.msk.bf16.gmra.mrb[4].mxu0 %vm774_vm2, %v16669_v12  ;;  %1977 = vst.msk [vmem:[#allocation2 + $0x148] sm:$0xf] %vm1937_vm4, %v16842_v39  ;;  %1980 = vst.msk [vmem:[#allocation2 + $0x160] sm:$0xf] %vm1937_vm4, %v16842_v39  ;;  %v16722_v9 = vld [vmem:[%s16912_s16 + $0x1c0] sm:$0xff]   ;;  %v16728_v60 = vld [vmem:[%s16912_s16 + $0x1f0] sm:$0xff]  }
  0x2b   : > { %14367 = vmatprep.mubr.msk.bf16.mxu0 %vm774_vm2, %v16670_v13  ;;  %1979 = vst.msk [vmem:[#allocation2 + $0x158] sm:$0xff] %vm1519_vm3, %v16842_v39  ;;  %1981 = vst.msk [vmem:[#allocation2 + $0x168] sm:$0xff] %vm1519_vm3, %v16842_v39  ;;  %v17212_v11 = vld [vmem:[%s19584_s2] ss:$0 sm:$0xff] }
  0x2c   : > { %1982 = vst.msk [vmem:[#allocation2 + $0x170] sm:$0xff] %vm1519_vm3, %v16842_v39  ;;  %1984 = vst.msk [vmem:[#allocation2 + $0x180] sm:$0xff] %vm1519_vm3, %v16842_v39 }
  0x2d   : > { %1983 = vst.msk [vmem:[#allocation2 + $0x178] sm:$0xf] %vm1937_vm4, %v16842_v39  ;;  %1986 = vst.msk [vmem:[#allocation2 + $0x190] sm:$0xf] %vm1937_vm4, %v16842_v39 }
  0x2e   : > { %1985 = vst.msk [vmem:[#allocation2 + $0x188] sm:$0xff] %vm1519_vm3, %v16842_v39  ;;  %1987 = vst.msk [vmem:[#allocation2 + $0x198] sm:$0xff] %vm1519_vm3, %v16842_v39 }
  0x2f   : > { %1988 = vst.msk [vmem:[#allocation2 + $0x1a0] sm:$0xff] %vm1519_vm3, %v16842_v39  ;;  %1990 = vst.msk [vmem:[#allocation2 + $0x1b0] sm:$0xff] %vm1519_vm3, %v16842_v39 }
  0x30   : > { %1989 = vst.msk [vmem:[#allocation2 + $0x1a8] sm:$0xf] %vm1937_vm4, %v16842_v39  ;;  %1992 = vst.msk [vmem:[#allocation2 + $0x1c0] sm:$0xf] %vm1937_vm4, %v16842_v39 }
  0x31   : > { %1991 = vst.msk [vmem:[#allocation2 + $0x1b8] sm:$0xff] %vm1519_vm3, %v16842_v39  ;;  %1993 = vst.msk [vmem:[#allocation2 + $0x1c8] sm:$0xff] %vm1519_vm3, %v16842_v39 }
  0x32   : > { %14368 = vmatmul.mubr.msk.bf16.gmra.mrb[8].mxu0 %vm774_vm2, %v16671_v14  ;;  %1994 = vst.msk [vmem:[#allocation2 + $0x1d0] sm:$0xff] %vm1519_vm3, %v16842_v39  ;;  %9759 = vst.msk [vmem:[#allocation3] sm:$0xff] %vm1519_vm3, %v16842_v39 }
  0x33   : > { %14371 = vmatprep.mubr.msk.bf16.mxu0 %vm774_vm2, %v16672_v15  ;;  %1995 = vst.msk [vmem:[#allocation2 + $0x1d8] sm:$0xf] %vm1937_vm4, %v16842_v39  ;;  %9760 = vst.msk [vmem:[#allocation3 + $0x8] sm:$0xf] %vm1937_vm4, %v16842_v39 }
  0x34   : > { %9761 = vst.msk [vmem:[#allocation3 + $0x10] sm:$0xff] %vm1519_vm3, %v16842_v39  ;;  %9763 = vst.msk [vmem:[#allocation3 + $0x20] sm:$0xff] %vm1519_vm3, %v16842_v39 }
  0x35   : > { %9762 = vst.msk [vmem:[#allocation3 + $0x18] sm:$0xf] %vm1937_vm4, %v16842_v39  ;;  %9764 = vst.msk [vmem:[#allocation3 + $0x28] sm:$0xf] %vm1937_vm4, %v16842_v39 }
  0x36   : > { %9765 = vst.msk [vmem:[#allocation3 + $0x30] sm:$0xff] %vm1519_vm3, %v16842_v39  ;;  %9767 = vst.msk [vmem:[#allocation3 + $0x40] sm:$0xff] %vm1519_vm3, %v16842_v39 }
  0x37   : > { %9766 = vst.msk [vmem:[#allocation3 + $0x38] sm:$0xf] %vm1937_vm4, %v16842_v39  ;;  %9768 = vst.msk [vmem:[#allocation3 + $0x48] sm:$0xf] %vm1937_vm4, %v16842_v39 }
  0x38   : > { %9769 = vst.msk [vmem:[#allocation3 + $0x50] sm:$0xff] %vm1519_vm3, %v16842_v39  ;;  %9771 = vst.msk [vmem:[#allocation3 + $0x60] sm:$0xff] %vm1519_vm3, %v16842_v39 }
  0x39   : > { %9770 = vst.msk [vmem:[#allocation3 + $0x58] sm:$0xf] %vm1937_vm4, %v16842_v39  ;;  %9772 = vst.msk [vmem:[#allocation3 + $0x68] sm:$0xf] %vm1937_vm4, %v16842_v39 }
  0x3a   : > { %14372 = vmatmul.mubr.msk.bf16.gmra.mrb[12].mxu0 %vm774_vm2, %v16673_v16  ;;  %9773 = vst.msk [vmem:[#allocation3 + $0x70] sm:$0xff] %vm1519_vm3, %v16842_v39  ;;  %9775 = vst.msk [vmem:[#allocation3 + $0x80] sm:$0xff] %vm1519_vm3, %v16842_v39 }
  0x3b   : > { %14375 = vmatprep.mubr.msk.bf16.mxu0 %vm774_vm2, %v16674_v17  ;;  %9774 = vst.msk [vmem:[#allocation3 + $0x78] sm:$0xf] %vm1937_vm4, %v16842_v39  ;;  %9776 = vst.msk [vmem:[#allocation3 + $0x88] sm:$0xf] %vm1937_vm4, %v16842_v39 }
  0x3c   : > { %9777 = vst.msk [vmem:[#allocation3 + $0x90] sm:$0xff] %vm1519_vm3, %v16842_v39  ;;  %9779 = vst.msk [vmem:[#allocation3 + $0xa0] sm:$0xff] %vm1519_vm3, %v16842_v39 }
  0x3d   : > { %9778 = vst.msk [vmem:[#allocation3 + $0x98] sm:$0xf] %vm1937_vm4, %v16842_v39  ;;  %9780 = vst.msk [vmem:[#allocation3 + $0xa8] sm:$0xf] %vm1937_vm4, %v16842_v39 }
  0x3e   : > { %9781 = vst.msk [vmem:[#allocation3 + $0xb0] sm:$0xff] %vm1519_vm3, %v16842_v39 }
  0x3f   : > { %9782 = vst.msk [vmem:[#allocation3 + $0xb8] sm:$0xf] %vm1937_vm4, %v16842_v39 }
  0x42   : > { %14376 = vmatmul.mubr.msk.bf16.gmra.mrb[16].mxu0 %vm774_vm2, %v16675_v18  ;;  %v16723_v18 = vld [vmem:[%s16912_s16 + $0x1c8] sm:$0xff]  }
  0x43   : > { %14379 = vmatprep.mubr.msk.bf16.mxu0 %vm774_vm2, %v16676_v19 }
  0x4a   : > { %14380 = vmatmul.mubr.msk.bf16.gmra.mrb[20].mxu0 %vm774_vm2, %v16677_v20 }
  0x4b   : > { %14383 = vmatprep.mubr.msk.bf16.mxu0 %vm774_vm2, %v16678_v21 }
  0x52   : > { %14384 = vmatmul.mubr.msk.bf16.gmra.mrb[24].mxu0 %vm774_vm2, %v16679_v22  ;;  %v16724_v22 = vld [vmem:[%s16912_s16 + $0x1d0] sm:$0xff]  }
  0x53   : > { %14387 = vmatprep.mubr.msk.bf16.mxu0 %vm774_vm2, %v16680_v23 }
  0x5a   : > { %14388 = vmatmul.mubr.msk.bf16.gmra.mrb[28].mxu0 %vm774_vm2, %v16681_v24 }
  0x5b   : > { %14391 = vmatprep.mubr.msk.bf16.mxu0 %vm774_vm2, %v16682_v25 }
  0x62   : > { %14392 = vmatmul.mubr.msk.bf16.gmra.mrb[32].mxu0 %vm774_vm2, %v16683_v26 }
  0x63   : > { %14395 = vmatprep.mubr.msk.bf16.mxu0 %vm774_vm2, %v16684_v27 }
  0x6a   : > { %14396 = vmatmul.mubr.msk.bf16.gmra.mrb[36].mxu0 %vm774_vm2, %v16685_v28 }
  0x6b   : > { %14399 = vmatprep.mubr.msk.bf16.mxu0 %vm774_vm2, %v16686_v29 }
  0x72   : > { %14400 = vmatmul.mubr.msk.bf16.gmra.mrb[40].mxu0 %vm774_vm2, %v16687_v30 }
  0x73   : > { %14403 = vmatprep.mubr.msk.bf16.mxu0 %vm774_vm2, %v16688_v31 }
  0x7a   : > { %14404 = vmatmul.mubr.msk.bf16.gmra.mrb[44].mxu0 %vm774_vm2, %v16689_v32 }
  0x7b   : > { %14407 = vmatprep.mubr.msk.bf16.mxu0 %vm774_vm2, %v16690_v33 }
  0x82   : > { %14408 = vmatmul.mubr.msk.bf16.gmra.mrb[48].mxu0 %vm774_vm2, %v16691_v34 }
  0x83   : > { %14411 = vmatprep.mubr.msk.bf16.mxu0 %vm774_vm2, %v16692_v35 }
  0x8a   : > { %14412 = vmatmul.mubr.msk.bf16.gmra.mrb[52].mxu0 %vm774_vm2, %v16693_v36 }
  0x8b   : > { %14415 = vmatprep.mubr.msk.bf16.mxu0 %vm774_vm2, %v16694_v37 }
  0x92   : > { %14416 = vmatmul.mubr.msk.bf16.gmra.mrb[56].mxu0 %vm774_vm2, %v16973_v38 }
  0x93   : > { %14419 = vmatprep.mubr.msk.bf16.mxu0 %vm774_vm2, %v16696_v40  ;;  %v16725_v40 = vld [vmem:[%s16912_s16 + $0x1d8] sm:$0xff]  }
  0x9a   : > { %14420 = vmatmul.mubr.msk.bf16.gmra.mrb[60].mxu0 %vm774_vm2, %v16697_v41 }
  0x9b   : > { %14423 = vmatprep.mubr.msk.bf16.mxu0 %vm774_vm2, %v16698_v42  ;;  %v16726_v42 = vld [vmem:[%s16912_s16 + $0x1e0] sm:$0xff]  }
  0xa2   : > { %14424 = vmatmul.mubr.msk.bf16.gmra.mrb[64].mxu0 %vm774_vm2, %v16699_v45 }
  0xa3   : > { %14427 = vmatprep.mubr.msk.bf16.mxu0 %vm774_vm2, %v16700_v46 }
  0xaa   : > { %14428 = vmatmul.mubr.msk.bf16.gmra.mrb[68].mxu0 %vm774_vm2, %v16701_v47 }
  0xab   : > { %14431 = vmatprep.mubr.msk.bf16.mxu0 %vm774_vm2, %v16702_v48 }
  0xb2   : > { %14432 = vmatmul.mubr.msk.bf16.gmra.mrb[72].mxu0 %vm774_vm2, %v16703_v49 }
  0xb3   : > { %14435 = vmatprep.mubr.msk.bf16.mxu0 %vm774_vm2, %v16704_v50 }
  0xba   : > { %14436 = vmatmul.mubr.msk.bf16.gmra.mrb[76].mxu0 %vm774_vm2, %v16705_v51 }
  0xbb   : > { %14439 = vmatprep.mubr.msk.bf16.mxu0 %vm774_vm2, %v16706_v52 }
  0xc2   : > { %14440 = vmatmul.mubr.msk.bf16.gmra.mrb[80].mxu0 %vm774_vm2, %v16707_v53 }
  0xc3   : > { %14443 = vmatprep.mubr.msk.bf16.mxu0 %vm774_vm2, %v16708_v54 }
  0xca   : > { %14444 = vmatmul.mubr.msk.bf16.gmra.mrb[84].mxu0 %vm774_vm2, %v16709_v55 }
  0xcb   : > { %14447 = vmatprep.mubr.msk.bf16.mxu0 %vm774_vm2, %v16710_v56  ;;  %v16727_v56 = vld [vmem:[%s16912_s16 + $0x1e8] sm:$0xff]  }
  0xd2   : > { %14448 = vmatmul.mubr.msk.bf16.gmra.mrb[88].mxu0 %vm774_vm2, %v16711_v57 }
  0xd3   : > { %14451 = vmatprep.mubr.msk.bf16.mxu0 %vm774_vm2, %v16712_v58 }
  0xda   : > { %14452 = vmatmul.mubr.msk.bf16.gmra.mrb[92].mxu0 %vm774_vm2, %v16713_v61 }
  0xdb   : > { %14455 = vmatprep.mubr.msk.bf16.mxu0 %vm774_vm2, %v16714_v62 }
  0xe2   : > { %14456 = vmatmul.mubr.msk.bf16.gmra.mrb[96].mxu0 %vm774_vm2, %v16715_v63 }
  0xe3   : > { %14459 = vmatprep.mubr.msk.bf16.mxu0 %vm774_vm2, %v16716_v0 }
  0xea   : > { %14460 = vmatmul.mubr.msk.bf16.gmra.mrb[100].mxu0 %vm774_vm2, %v16717_v1 }
  0xeb   : > { %14463 = vmatprep.mubr.msk.bf16.mxu0 %vm774_vm2, %v16718_v2 }
  0xf2   : > { %14464 = vmatmul.mubr.msk.bf16.gmra.mrb[104].mxu0 %vm774_vm2, %v16719_v3 }
  0xf3   : > { %14467 = vmatprep.mubr.msk.bf16.mxu0 %vm774_vm2, %v16720_v4 }
  0xf5   : > { %v14361_v5 = vpop.f32.mrb[0].mxu0 }
  0xf6   : > { %v1008_v6 = vpop.f32.mrb[1].mxu0  ;;  %v1017_v12 = vadd.f32 %v14361_v5, %v17212_v11 }
  0xf7   : > { %v14362_v8 = vpop.f32.mrb[2].mxu0  ;;  %v1009_v13 = vadd.f32 %v17212_v11, %v1008_v6 }
  0xf8   : > { %v1011_v10 = vpop.f32.mrb[3].mxu0  ;;  %v1020_v15 = vadd.f32 %v14362_v8, %v17212_v11  ;;  %v1526_v23 = vsel %vm1519_vm3, %v1017_v12, -inf }
  0xf9   : > { %v1012_v19 = vadd.f32 %v17212_v11, %v1011_v10  ;;  %v1520_v27 = vsel %vm1519_vm3, %v1009_v13, -inf  ;;  %v2081_v13 = vld [vmem:[#allocation2 + $0x1] sm:$0xff] }
  0xfa   : > { %14468 = vmatmul.mubr.msk.bf16.gmra.mrb[108].mxu0 %vm774_vm2, %v16721_v7  ;;  %v1529_v31 = vsel %vm1519_vm3, %v1020_v15, -inf }
  0xfb   : > { %14471 = vmatprep.mubr.msk.bf16.mxu0 %vm774_vm2, %v16722_v9  ;;  %v1523_v34 = vsel %vm1519_vm3, %v1012_v19, -inf }
  0xfd   : > { %v14365_v14 = vpop.f32.mrb[4].mxu0 }
  0xfe   : > { %v1033_v16 = vadd.f32 %v14365_v14, %v17212_v11  ;;  %v1024_v17 = vpop.f32.mrb[5].mxu0  ;;  %v2082_v14 = vld [vmem:[#allocation2 + $0x9] sm:$0xff] }
  0xff   : > { %v1025_v20 = vadd.f32 %v17212_v11, %v1024_v17  ;;  %v14366_v21 = vpop.f32.mrb[6].mxu0  ;;  %v16729_v17 = vld [vmem:[%s16912_s16 + $0x1f8] sm:$0xff]   ;;  %v2113_v19 = vpack.c.bf16 %v2082_v14, %v2081_v13 }
 0x100   : > { %v1527_v24 = vsel %vm1519_vm3, %v1033_v16, -inf  ;;  %v1036_v25 = vadd.f32 %v14366_v21, %v17212_v11  ;;  %v1027_v26 = vpop.f32.mrb[7].mxu0  ;;  %v2083_v21 = vld [vmem:[#allocation2 + $0x19] sm:$0xff] }
 0x101   : > { %v1528_v28 = vmax.f32 %v1526_v23, %v1527_v24  ;;  %v1521_v29 = vsel %vm1519_vm3, %v1025_v20, -inf  ;;  %v1028_v30 = vadd.f32 %v17212_v11, %v1027_v26 }
 0x102   : > { %v1522_v32 = vmax.f32 %v1520_v27, %v1521_v29  ;;  %v1530_v33 = vsel %vm1519_vm3, %v1036_v25, -inf  ;;  %14472 = vmatmul.mubr.msk.bf16.gmra.mrb[112].mxu0 %vm774_vm2, %v16723_v18 }
 0x103   : > { %1714 = vst.msk [vmem:[#allocation4 + $0x10] sm:$0xff] %vm1519_vm3, %v1528_v28  ;;  %v1531_v35 = vmax.f32 %v1529_v31, %v1530_v33  ;;  %v1524_v36 = vsel %vm1519_vm3, %v1028_v30, -inf  ;;  %14475 = vmatprep.mubr.msk.bf16.mxu0 %vm774_vm2, %v16724_v22  ;;  %v2084_v22 = vld [vmem:[#allocation2 + $0x21] sm:$0xff] }
 0x104   : > { %1712 = vst.msk [vmem:[#allocation4] sm:$0xff] %vm1519_vm3, %v1522_v32  ;;  %v1525_v37 = vmax.f32 %v1523_v34, %v1524_v36 }
 0x105   : > { %1715 = vst.msk [vmem:[#allocation4 + $0x18] sm:$0xff] %vm1519_vm3, %v1531_v35  ;;  %v14369_v38 = vpop.f32.mrb[8].mxu0 }
 0x106   : > { %1713 = vst.msk [vmem:[#allocation4 + $0x8] sm:$0xff] %vm1519_vm3, %v1525_v37  ;;  %v1040_v39 = vpop.f32.mrb[9].mxu0  ;;  %v1049_v46 = vadd.f32 %v14369_v38, %v17212_v11  ;;  %v2114_v37 = vpack.c.bf16 %v2084_v22, %v2083_v21 }
 0x107   : > { %v14370_v41 = vpop.f32.mrb[10].mxu0  ;;  %v1041_v50 = vadd.f32 %v17212_v11, %v1040_v39 }
 0x108   : > { %v1043_v43 = vpop.f32.mrb[11].mxu0  ;;  %v1052_v53 = vadd.f32 %v14370_v41, %v17212_v11  ;;  %v1538_v61 = vsel %vm1519_vm3, %v1049_v46, -inf }
 0x109   : > { %v1044_v57 = vadd.f32 %v17212_v11, %v1043_v43  ;;  %v1532_v1 = vsel %vm1519_vm3, %v1041_v50, -inf }
 0x10a   : > { %14476 = vmatmul.mubr.msk.bf16.gmra.mrb[116].mxu0 %vm774_vm2, %v16725_v40  ;;  %v1541_v5 = vsel %vm1519_vm3, %v1052_v53, -inf }
 0x10b   : > { %14479 = vmatprep.mubr.msk.bf16.mxu0 %vm774_vm2, %v16726_v42  ;;  %v1535_v8 = vsel %vm1519_vm3, %v1044_v57, -inf }
 0x10c   : > { %v1778_v44 = vld [vmem:[#allocation4 + $0x10] ss:$2 sm:$0xff]  ;;  %v1842_v45 = vld [vmem:[#allocation4 + $0x11] ss:$2 sm:$0xff] }
 0x10d   : > { %v1904_v47 = vmax.f32 %v1778_v44, %v1842_v45  ;;  %v1776_v48 = vld [vmem:[#allocation4] ss:$2 sm:$0xff]  ;;  %v1840_v49 = vld [vmem:[#allocation4 + $0x1] ss:$2 sm:$0xff]  ;;  %v14373_v51 = vpop.f32.mrb[12].mxu0 }
 0x10e   : > { %v1903_v52 = vmax.f32 %v1776_v48, %v1840_v49  ;;  %v1065_v54 = vadd.f32 %v14373_v51, %v17212_v11  ;;  %v1056_v55 = vpop.f32.mrb[13].mxu0 }
 0x10f   : > { %v1057_v58 = vadd.f32 %v17212_v11, %v1056_v55  ;;  %v14374_v59 = vpop.f32.mrb[14].mxu0  ;;  %1998 = vst.msk [vmem:[#allocation2 + $0x3a] sm:$0xff] %vm1519_vm3, %v1904_v47 }
 0x110   : > { %v1539_v62 = vsel %vm1519_vm3, %v1065_v54, -inf  ;;  %v1068_v63 = vadd.f32 %v14374_v59, %v17212_v11  ;;  %v1059_v0 = vpop.f32.mrb[15].mxu0  ;;  %1997 = vst.msk [vmem:[#allocation2 + $0x32] sm:$0xff] %vm1519_vm3, %v1903_v52 }
 0x111   : > { %v1540_v2 = vmax.f32 %v1538_v61, %v1539_v62  ;;  %v1533_v3 = vsel %vm1519_vm3, %v1057_v58, -inf  ;;  %v1060_v4 = vadd.f32 %v17212_v11, %v1059_v0 }
 0x112   : > { %v1534_v6 = vmax.f32 %v1532_v1, %v1533_v3  ;;  %v1542_v7 = vsel %vm1519_vm3, %v1068_v63, -inf  ;;  %14480 = vmatmul.mubr.msk.bf16.gmra.mrb[120].mxu0 %vm774_vm2, %v16727_v56 }
 0x113   : > { %1718 = vst.msk [vmem:[#allocation4 + $0x30] sm:$0xff] %vm1519_vm3, %v1540_v2  ;;  %v1543_v9 = vmax.f32 %v1541_v5, %v1542_v7  ;;  %v1536_v10 = vsel %vm1519_vm3, %v1060_v4, -inf  ;;  %14483 = vmatprep.mubr.msk.bf16.mxu0 %vm774_vm2, %v16728_v60 }
 0x114   : > { %1716 = vst.msk [vmem:[#allocation4 + $0x20] sm:$0xff] %vm1519_vm3, %v1534_v6  ;;  %v1537_v12 = vmax.f32 %v1535_v8, %v1536_v10 }
 0x115   : > { %1719 = vst.msk [vmem:[#allocation4 + $0x38] sm:$0xff] %vm1519_vm3, %v1543_v9  ;;  %v14377_v15 = vpop.f32.mrb[16].mxu0 }
 0x116   : > { %1717 = vst.msk [vmem:[#allocation4 + $0x28] sm:$0xff] %vm1519_vm3, %v1537_v12  ;;  %v1072_v16 = vpop.f32.mrb[17].mxu0  ;;  %v1081_v25 = vadd.f32 %v14377_v15, %v17212_v11 }
 0x117   : > { %v14378_v18 = vpop.f32.mrb[18].mxu0  ;;  %v2085_v26 = vld [vmem:[#allocation2 + $0x31] sm:$0xff]  ;;  %v1073_v30 = vadd.f32 %v17212_v11, %v1072_v16  ;;  %v2086_v32 = vld [vmem:[#allocation2 + $0x39] sm:$0xff] }
 0x118   : > { %v1075_v20 = vpop.f32.mrb[19].mxu0  ;;  %v1084_v34 = vadd.f32 %v14378_v18, %v17212_v11  ;;  %v1550_v41 = vsel %vm1519_vm3, %v1081_v25, -inf  ;;  %v2115_v45 = vpack.c.bf16 %v2086_v32, %v2085_v26 }
 0x119   : > { %v1076_v38 = vadd.f32 %v17212_v11, %v1075_v20  ;;  %v1544_v46 = vsel %vm1519_vm3, %v1073_v30, -inf }
 0x11a   : > { %14484 = vmatmul.mubr.msk.bf16.gmra.mrb[124].mxu0 %vm774_vm2, %v16729_v17  ;;  %v1553_v50 = vsel %vm1519_vm3, %v1084_v34, -inf }
 0x11b   : > { %14491 = vmatprep.mubr.msk.bf16.mxu0 %vm1519_vm3, %v2113_v19  ;;  %v1547_v53 = vsel %vm1519_vm3, %v1076_v38, -inf }
 0x11c   : > { %v1782_v23 = vld [vmem:[#allocation4 + $0x30] ss:$2 sm:$0xff]  ;;  %v1846_v24 = vld [vmem:[#allocation4 + $0x31] ss:$2 sm:$0xff] }
 0x11d   : > { %v1906_v27 = vmax.f32 %v1782_v23, %v1846_v24  ;;  %v1780_v28 = vld [vmem:[#allocation4 + $0x20] ss:$2 sm:$0xff]  ;;  %v1844_v29 = vld [vmem:[#allocation4 + $0x21] ss:$2 sm:$0xff]  ;;  %v14381_v31 = vpop.f32.mrb[20].mxu0 }
 0x11e   : > { %v1905_v33 = vmax.f32 %v1780_v28, %v1844_v29  ;;  %v1097_v35 = vadd.f32 %v14381_v31, %v17212_v11  ;;  %v1088_v36 = vpop.f32.mrb[21].mxu0 }
 0x11f   : > { %v1089_v39 = vadd.f32 %v17212_v11, %v1088_v36  ;;  %v14382_v40 = vpop.f32.mrb[22].mxu0  ;;  %2000 = vst.msk [vmem:[#allocation2 + $0x52] sm:$0xff] %vm1519_vm3, %v1906_v27 }
 0x120   : > { %v1551_v42 = vsel %vm1519_vm3, %v1097_v35, -inf  ;;  %v1100_v43 = vadd.f32 %v14382_v40, %v17212_v11  ;;  %v1091_v44 = vpop.f32.mrb[23].mxu0  ;;  %1999 = vst.msk [vmem:[#allocation2 + $0x4a] sm:$0xff] %vm1519_vm3, %v1905_v33 }
 0x121   : > { %v1552_v47 = vmax.f32 %v1550_v41, %v1551_v42  ;;  %v1545_v48 = vsel %vm1519_vm3, %v1089_v39, -inf  ;;  %v1092_v49 = vadd.f32 %v17212_v11, %v1091_v44 }
 0x122   : > { %v1546_v51 = vmax.f32 %v1544_v46, %v1545_v48  ;;  %v1554_v52 = vsel %vm1519_vm3, %v1100_v43, -inf  ;;  %14492 = vmatmul.mubr.msk.bf16.vlgmr.msra.gmra.mrb[128].mxu0 %vm1519_vm3, %v2114_v37 }
 0x123   : > { %1722 = vst.msk [vmem:[#allocation4 + $0x50] sm:$0xff] %vm1519_vm3, %v1552_v47  ;;  %v1555_v54 = vmax.f32 %v1553_v50, %v1554_v52  ;;  %v1548_v55 = vsel %vm1519_vm3, %v1092_v49, -inf  ;;  %14495 = vmatprep.mubr.msk.bf16.mxu0 %vm1519_vm3, %v2115_v45 }
 0x124   : > { %1720 = vst.msk [vmem:[#allocation4 + $0x40] sm:$0xff] %vm1519_vm3, %v1546_v51  ;;  %v1549_v56 = vmax.f32 %v1547_v53, %v1548_v55 }
 0x125   : > { %1723 = vst.msk [vmem:[#allocation4 + $0x58] sm:$0xff] %vm1519_vm3, %v1555_v54  ;;  %v14385_v57 = vpop.f32.mrb[24].mxu0 }
 0x126   : > { %1721 = vst.msk [vmem:[#allocation4 + $0x48] sm:$0xff] %vm1519_vm3, %v1549_v56  ;;  %v1104_v58 = vpop.f32.mrb[25].mxu0  ;;  %v1113_v2 = vadd.f32 %v14385_v57, %v17212_v11 }
 0x127   : > { %v14386_v59 = vpop.f32.mrb[26].mxu0  ;;  %v2087_v60 = vld [vmem:[#allocation2 + $0x49] sm:$0xff]  ;;  %v2088_v61 = vld [vmem:[#allocation2 + $0x51] sm:$0xff]  ;;  %v1105_v6 = vadd.f32 %v17212_v11, %v1104_v58 }
 0x128   : > { %v1107_v62 = vpop.f32.mrb[27].mxu0  ;;  %v2116_v63 = vpack.c.bf16 %v2088_v61, %v2087_v60  ;;  %v1116_v9 = vadd.f32 %v14386_v59, %v17212_v11  ;;  %v1562_v16 = vsel %vm1519_vm3, %v1113_v2, -inf }
 0x129   : > { %v1108_v13 = vadd.f32 %v17212_v11, %v1107_v62  ;;  %v1556_v20 = vsel %vm1519_vm3, %v1105_v6, -inf }
 0x12a   : > { %14496 = vmatmul.mubr.msk.bf16.gmra.mrb[132].mxu0 %vm1519_vm3, %v2116_v63  ;;  %v1565_v24 = vsel %vm1519_vm3, %v1116_v9, -inf }
 0x12b   : > { %v1559_v27 = vsel %vm1519_vm3, %v1108_v13, -inf }
 0x12c   : > { %v1786_v0 = vld [vmem:[#allocation4 + $0x50] ss:$2 sm:$0xff]  ;;  %v1850_v1 = vld [vmem:[#allocation4 + $0x51] ss:$2 sm:$0xff] }
 0x12d   : > { %v1908_v3 = vmax.f32 %v1786_v0, %v1850_v1  ;;  %v1784_v4 = vld [vmem:[#allocation4 + $0x40] ss:$2 sm:$0xff]  ;;  %v1848_v5 = vld [vmem:[#allocation4 + $0x41] ss:$2 sm:$0xff]  ;;  %v14389_v7 = vpop.f32.mrb[28].mxu0 }
 0x12e   : > { %v1907_v8 = vmax.f32 %v1784_v4, %v1848_v5  ;;  %v1129_v10 = vadd.f32 %v14389_v7, %v17212_v11  ;;  %v1120_v12 = vpop.f32.mrb[29].mxu0 }
 0x12f   : > { %2002 = vst.msk [vmem:[#allocation2 + $0x6a] sm:$0xff] %vm1519_vm3, %v1908_v3  ;;  %v1121_v14 = vadd.f32 %v17212_v11, %v1120_v12  ;;  %v14390_v15 = vpop.f32.mrb[30].mxu0 }
 0x130   : > { %2001 = vst.msk [vmem:[#allocation2 + $0x62] sm:$0xff] %vm1519_vm3, %v1907_v8  ;;  %v1563_v17 = vsel %vm1519_vm3, %v1129_v10, -inf  ;;  %v1132_v18 = vadd.f32 %v14390_v15, %v17212_v11  ;;  %v1123_v19 = vpop.f32.mrb[31].mxu0 }
 0x131   : > { %v1564_v21 = vmax.f32 %v1562_v16, %v1563_v17  ;;  %v1557_v22 = vsel %vm1519_vm3, %v1121_v14, -inf  ;;  %v1124_v23 = vadd.f32 %v17212_v11, %v1123_v19 }
 0x132   : > { %v1558_v25 = vmax.f32 %v1556_v20, %v1557_v22  ;;  %v1566_v26 = vsel %vm1519_vm3, %v1132_v18, -inf }
 0x133   : > { %1726 = vst.msk [vmem:[#allocation4 + $0x70] sm:$0xff] %vm1519_vm3, %v1564_v21  ;;  %v1567_v28 = vmax.f32 %v1565_v24, %v1566_v26  ;;  %v1560_v29 = vsel %vm1519_vm3, %v1124_v23, -inf }
 0x134   : > { %1724 = vst.msk [vmem:[#allocation4 + $0x60] sm:$0xff] %vm1519_vm3, %v1558_v25  ;;  %v1561_v30 = vmax.f32 %v1559_v27, %v1560_v29 }
 0x135   : > { %1727 = vst.msk [vmem:[#allocation4 + $0x78] sm:$0xff] %vm1519_vm3, %v1567_v28  ;;  %v14393_v31 = vpop.f32.mrb[32].mxu0 }
 0x136   : > { %1725 = vst.msk [vmem:[#allocation4 + $0x68] sm:$0xff] %vm1519_vm3, %v1561_v30  ;;  %v1136_v32 = vpop.f32.mrb[33].mxu0  ;;  %v1145_v40 = vadd.f32 %v14393_v31, %v17212_v11 }
 0x137   : > { %v14394_v33 = vpop.f32.mrb[34].mxu0  ;;  %v2089_v34 = vld [vmem:[#allocation2 + $0x61] sm:$0xff]  ;;  %v2090_v35 = vld [vmem:[#allocation2 + $0x69] sm:$0xff]  ;;  %v1137_v44 = vadd.f32 %v17212_v11, %v1136_v32 }
 0x138   : > { %v1139_v36 = vpop.f32.mrb[35].mxu0  ;;  %v2117_v37 = vpack.c.bf16 %v2090_v35, %v2089_v34  ;;  %v1148_v47 = vadd.f32 %v14394_v33, %v17212_v11  ;;  %v1574_v53 = vsel %vm1519_vm3, %v1145_v40, -inf }
 0x139   : > { %v1140_v50 = vadd.f32 %v17212_v11, %v1139_v36  ;;  %v1568_v57 = vsel %vm1519_vm3, %v1137_v44, -inf }
 0x13a   : > { %14499 = vmatprep.mubr.msk.bf16.mxu0 %vm1519_vm3, %v2117_v37  ;;  %v1577_v61 = vsel %vm1519_vm3, %v1148_v47, -inf }
 0x13b   : > { %v1571_v0 = vsel %vm1519_vm3, %v1140_v50, -inf }
 0x13c   : > { %v1790_v38 = vld [vmem:[#allocation4 + $0x70] ss:$2 sm:$0xff]  ;;  %v1854_v39 = vld [vmem:[#allocation4 + $0x71] ss:$2 sm:$0xff] }
 0x13d   : > { %v1910_v41 = vmax.f32 %v1790_v38, %v1854_v39  ;;  %v1788_v42 = vld [vmem:[#allocation4 + $0x60] ss:$2 sm:$0xff]  ;;  %v1852_v43 = vld [vmem:[#allocation4 + $0x61] ss:$2 sm:$0xff]  ;;  %v14397_v45 = vpop.f32.mrb[36].mxu0 }
 0x13e   : > { %v1909_v46 = vmax.f32 %v1788_v42, %v1852_v43  ;;  %v1161_v48 = vadd.f32 %v14397_v45, %v17212_v11  ;;  %v1152_v49 = vpop.f32.mrb[37].mxu0 }
 0x13f   : > { %2004 = vst.msk [vmem:[#allocation2 + $0x82] sm:$0xff] %vm1519_vm3, %v1910_v41  ;;  %v1153_v51 = vadd.f32 %v17212_v11, %v1152_v49  ;;  %v14398_v52 = vpop.f32.mrb[38].mxu0 }
 0x140   : > { %2003 = vst.msk [vmem:[#allocation2 + $0x7a] sm:$0xff] %vm1519_vm3, %v1909_v46  ;;  %v1575_v54 = vsel %vm1519_vm3, %v1161_v48, -inf  ;;  %v1164_v55 = vadd.f32 %v14398_v52, %v17212_v11  ;;  %v1155_v56 = vpop.f32.mrb[39].mxu0 }
 0x141   : > { %v1576_v58 = vmax.f32 %v1574_v53, %v1575_v54  ;;  %v1569_v59 = vsel %vm1519_vm3, %v1153_v51, -inf  ;;  %v1156_v60 = vadd.f32 %v17212_v11, %v1155_v56 }
 0x142   : > { %v1570_v62 = vmax.f32 %v1568_v57, %v1569_v59  ;;  %v1578_v63 = vsel %vm1519_vm3, %v1164_v55, -inf }
 0x143   : > { %1730 = vst.msk [vmem:[#allocation4 + $0x90] sm:$0xff] %vm1519_vm3, %v1576_v58  ;;  %v1579_v1 = vmax.f32 %v1577_v61, %v1578_v63  ;;  %v1572_v2 = vsel %vm1519_vm3, %v1156_v60, -inf }
 0x144   : > { %1728 = vst.msk [vmem:[#allocation4 + $0x80] sm:$0xff] %vm1519_vm3, %v1570_v62  ;;  %v1573_v3 = vmax.f32 %v1571_v0, %v1572_v2 }
 0x145   : > { %1731 = vst.msk [vmem:[#allocation4 + $0x98] sm:$0xff] %vm1519_vm3, %v1579_v1  ;;  %v14401_v4 = vpop.f32.mrb[40].mxu0 }
 0x146   : > { %1729 = vst.msk [vmem:[#allocation4 + $0x88] sm:$0xff] %vm1519_vm3, %v1573_v3  ;;  %v1168_v5 = vpop.f32.mrb[41].mxu0  ;;  %v4116_v6 = vld [vmem:[#allocation2 + $0x82] sm:$0xff]  ;;  %v1177_v17 = vadd.f32 %v14401_v4, %v17212_v11 }
 0x147   : > { %v14402_v7 = vpop.f32.mrb[42].mxu0  ;;  %v2091_v8 = vld [vmem:[#allocation2 + $0x79] sm:$0xff]  ;;  %v2092_v9 = vld [vmem:[#allocation2 + $0x81] sm:$0xff]  ;;  %v1169_v21 = vadd.f32 %v17212_v11, %v1168_v5 }
 0x148   : > { %v4115_v10 = vld [vmem:[#allocation2 + $0x7a] sm:$0xff]  ;;  %v1171_v12 = vpop.f32.mrb[43].mxu0  ;;  %v2118_v13 = vpack.c.bf16 %v2092_v9, %v2091_v8  ;;  %v1180_v24 = vadd.f32 %v14402_v7, %v17212_v11  ;;  %v1586_v30 = vsel %vm1519_vm3, %v1177_v17, -inf }
 0x149   : > { %v4143_v14 = vpack.c.bf16 %v4116_v6, %v4115_v10  ;;  %v1172_v27 = vadd.f32 %v17212_v11, %v1171_v12  ;;  %v1580_v34 = vsel %vm1519_vm3, %v1169_v21, -inf  ;;  %v16734_v10 = vld [vmem:[%s19585_s3 + $0x80] sm:$0xff]  }
 0x14a   : > { %14500 = vmatmul.mubr.msk.bf16.gmra.mrb[136].mxu0 %vm1519_vm3, %v2118_v13  ;;  %v1589_v38 = vsel %vm1519_vm3, %v1180_v24, -inf  ;;  %14775 = vmatprep.subr.bf16.mxu1 %v16734_v10 }
 0x14b   : > { %14751 = vmatprep.mubr.msk.bf16.mxu1 %vm1519_vm3, %v4143_v14  ;;  %v1583_v41 = vsel %vm1519_vm3, %v1172_v27, -inf }
 0x14c   : > { %v1794_v15 = vld [vmem:[#allocation4 + $0x90] ss:$2 sm:$0xff]  ;;  %v1858_v16 = vld [vmem:[#allocation4 + $0x91] ss:$2 sm:$0xff] }
 0x14d   : > { %v1912_v18 = vmax.f32 %v1794_v15, %v1858_v16  ;;  %v1792_v19 = vld [vmem:[#allocation4 + $0x80] ss:$2 sm:$0xff]  ;;  %v1856_v20 = vld [vmem:[#allocation4 + $0x81] ss:$2 sm:$0xff]  ;;  %v14405_v22 = vpop.f32.mrb[44].mxu0 }
 0x14e   : > { %v1911_v23 = vmax.f32 %v1792_v19, %v1856_v20  ;;  %v1193_v25 = vadd.f32 %v14405_v22, %v17212_v11  ;;  %v1184_v26 = vpop.f32.mrb[45].mxu0 }
 0x14f   : > { %2006 = vst.msk [vmem:[#allocation2 + $0x9a] sm:$0xff] %vm1519_vm3, %v1912_v18  ;;  %v1185_v28 = vadd.f32 %v17212_v11, %v1184_v26  ;;  %v14406_v29 = vpop.f32.mrb[46].mxu0 }
 0x150   : > { %2005 = vst.msk [vmem:[#allocation2 + $0x92] sm:$0xff] %vm1519_vm3, %v1911_v23  ;;  %v1587_v31 = vsel %vm1519_vm3, %v1193_v25, -inf  ;;  %v1196_v32 = vadd.f32 %v14406_v29, %v17212_v11  ;;  %v1187_v33 = vpop.f32.mrb[47].mxu0 }
 0x151   : > { %v1588_v35 = vmax.f32 %v1586_v30, %v1587_v31  ;;  %v1581_v36 = vsel %vm1519_vm3, %v1185_v28, -inf  ;;  %v1188_v37 = vadd.f32 %v17212_v11, %v1187_v33  ;;  %v16736_v33 = vld [vmem:[%s19585_s3] sm:$0xff]  }
 0x152   : > { %v1582_v39 = vmax.f32 %v1580_v34, %v1581_v36  ;;  %v1590_v40 = vsel %vm1519_vm3, %v1196_v32, -inf  ;;  %14523 = vmatprep.subr.bf16.mxu0 %v16736_v33 }
 0x153   : > { %1734 = vst.msk [vmem:[#allocation4 + $0xb0] sm:$0xff] %vm1519_vm3, %v1588_v35  ;;  %v1591_v42 = vmax.f32 %v1589_v38, %v1590_v40  ;;  %v1584_v43 = vsel %vm1519_vm3, %v1188_v37, -inf  ;;  %14524 = vmatpush3.bf16.msra.mxu0 %v16736_v33  ;;  %v16737_v37 = vld [vmem:[%s19585_s3 + $0x8] sm:$0xff]  }
 0x154   : > { %1732 = vst.msk [vmem:[#allocation4 + $0xa0] sm:$0xff] %vm1519_vm3, %v1582_v39  ;;  %v1585_v44 = vmax.f32 %v1583_v41, %v1584_v43  ;;  %14525 = vmatprep.subr.bf16.mxu0 %v16737_v37 }
 0x155   : > { %1735 = vst.msk [vmem:[#allocation4 + $0xb8] sm:$0xff] %vm1519_vm3, %v1591_v42  ;;  %v14409_v45 = vpop.f32.mrb[48].mxu0 }
 0x156   : > { %1733 = vst.msk [vmem:[#allocation4 + $0xa8] sm:$0xff] %vm1519_vm3, %v1585_v44  ;;  %v1200_v46 = vpop.f32.mrb[49].mxu0  ;;  %v4118_v47 = vld [vmem:[#allocation2 + $0x9a] sm:$0xff]  ;;  %v1209_v57 = vadd.f32 %v14409_v45, %v17212_v11 }
 0x157   : > { %v14410_v48 = vpop.f32.mrb[50].mxu0  ;;  %v2093_v49 = vld [vmem:[#allocation2 + $0x91] sm:$0xff]  ;;  %v2094_v50 = vld [vmem:[#allocation2 + $0x99] sm:$0xff]  ;;  %v1201_v61 = vadd.f32 %v17212_v11, %v1200_v46  ;;  %14526 = vmatpush3.bf16.msra.mxu0 %v16737_v37 }
 0x158   : > { %v4117_v51 = vld [vmem:[#allocation2 + $0x92] sm:$0xff]  ;;  %v1203_v52 = vpop.f32.mrb[51].mxu0  ;;  %v2119_v53 = vpack.c.bf16 %v2094_v50, %v2093_v49  ;;  %v1212_v0 = vadd.f32 %v14410_v48, %v17212_v11  ;;  %v1598_v6 = vsel %vm1519_vm3, %v1209_v57, -inf }
 0x159   : > { %v4144_v54 = vpack.c.bf16 %v4118_v47, %v4117_v51  ;;  %v1204_v3 = vadd.f32 %v17212_v11, %v1203_v52  ;;  %v1592_v12 = vsel %vm1519_vm3, %v1201_v61, -inf }
 0x15a   : > { %14503 = vmatprep.mubr.msk.bf16.mxu0 %vm1519_vm3, %v2119_v53  ;;  %v1601_v16 = vsel %vm1519_vm3, %v1212_v0, -inf }
 0x15b   : > { %14752 = vmatmul.mubr.msk.bf16.vlgmr.msra.gmra.mrb[0].mxu1 %vm1519_vm3, %v4144_v54  ;;  %v1595_v19 = vsel %vm1519_vm3, %v1204_v3, -inf  ;;  %v16735_v54 = vld [vmem:[%s19585_s3 + $0x88] sm:$0xff]  }
 0x15c   : > { %v1798_v55 = vld [vmem:[#allocation4 + $0xb0] ss:$2 sm:$0xff]  ;;  %v1862_v56 = vld [vmem:[#allocation4 + $0xb1] ss:$2 sm:$0xff]  ;;  %14776 = vmatpush3.bf16.msra.mxu1 %v16734_v10 }
 0x15d   : > { %v1914_v58 = vmax.f32 %v1798_v55, %v1862_v56  ;;  %v1796_v59 = vld [vmem:[#allocation4 + $0xa0] ss:$2 sm:$0xff]  ;;  %v1860_v60 = vld [vmem:[#allocation4 + $0xa1] ss:$2 sm:$0xff]  ;;  %v14413_v62 = vpop.f32.mrb[52].mxu0  ;;  %14777 = vmatprep.subr.bf16.mxu1 %v16735_v54 }
 0x15e   : > { %v1913_v63 = vmax.f32 %v1796_v59, %v1860_v60  ;;  %v1225_v1 = vadd.f32 %v14413_v62, %v17212_v11  ;;  %v1216_v2 = vpop.f32.mrb[53].mxu0 }
 0x15f   : > { %2008 = vst.msk [vmem:[#allocation2 + $0xb2] sm:$0xff] %vm1519_vm3, %v1914_v58  ;;  %v1217_v4 = vadd.f32 %v17212_v11, %v1216_v2  ;;  %v14414_v5 = vpop.f32.mrb[54].mxu0 }
 0x160   : > { %2007 = vst.msk [vmem:[#allocation2 + $0xaa] sm:$0xff] %vm1519_vm3, %v1913_v63  ;;  %v1599_v7 = vsel %vm1519_vm3, %v1225_v1, -inf  ;;  %v1228_v8 = vadd.f32 %v14414_v5, %v17212_v11  ;;  %v1219_v9 = vpop.f32.mrb[55].mxu0  ;;  %14778 = vmatpush3.bf16.msra.mxu1 %v16735_v54 }
 0x161   : > { %v1600_v13 = vmax.f32 %v1598_v6, %v1599_v7  ;;  %v1593_v14 = vsel %vm1519_vm3, %v1217_v4, -inf  ;;  %v1220_v15 = vadd.f32 %v17212_v11, %v1219_v9 }
 0x162   : > { %v1594_v17 = vmax.f32 %v1592_v12, %v1593_v14  ;;  %v1602_v18 = vsel %vm1519_vm3, %v1228_v8, -inf }
 0x163   : > { %1738 = vst.msk [vmem:[#allocation4 + $0xd0] sm:$0xff] %vm1519_vm3, %v1600_v13  ;;  %v1603_v20 = vmax.f32 %v1601_v16, %v1602_v18  ;;  %v1596_v21 = vsel %vm1519_vm3, %v1220_v15, -inf  ;;  %v17432_v13 = vld [vmem:[%s19585_s3 + $0x90] sm:$0xff]  }
 0x164   : > { %1736 = vst.msk [vmem:[#allocation4 + $0xc0] sm:$0xff] %vm1519_vm3, %v1594_v17  ;;  %v1597_v22 = vmax.f32 %v1595_v19, %v1596_v21  ;;  %14811 = vmatprep.subr.bf16.mxu1 %v17432_v13 }
 0x165   : > { %1739 = vst.msk [vmem:[#allocation4 + $0xd8] sm:$0xff] %vm1519_vm3, %v1603_v20  ;;  %v14417_v23 = vpop.f32.mrb[56].mxu0 }
 0x166   : > { %1737 = vst.msk [vmem:[#allocation4 + $0xc8] sm:$0xff] %vm1519_vm3, %v1597_v22  ;;  %v1232_v24 = vpop.f32.mrb[57].mxu0  ;;  %v4120_v25 = vld [vmem:[#allocation2 + $0xb2] sm:$0xff]  ;;  %v1241_v36 = vadd.f32 %v14417_v23, %v17212_v11 }
 0x167   : > { %v14418_v26 = vpop.f32.mrb[58].mxu0  ;;  %v2095_v27 = vld [vmem:[#allocation2 + $0xa9] sm:$0xff]  ;;  %v2096_v28 = vld [vmem:[#allocation2 + $0xb1] sm:$0xff]  ;;  %v1233_v41 = vadd.f32 %v17212_v11, %v1232_v24 }
 0x168   : > { %v4119_v29 = vld [vmem:[#allocation2 + $0xaa] sm:$0xff]  ;;  %v1235_v30 = vpop.f32.mrb[59].mxu0  ;;  %v2120_v31 = vpack.c.bf16 %v2096_v28, %v2095_v27  ;;  %v1244_v44 = vadd.f32 %v14418_v26, %v17212_v11  ;;  %v1610_v50 = vsel %vm1519_vm3, %v1241_v36, -inf }
 0x169   : > { %v4145_v32 = vpack.c.bf16 %v4120_v25, %v4119_v29  ;;  %v1236_v47 = vadd.f32 %v17212_v11, %v1235_v30  ;;  %v1604_v55 = vsel %vm1519_vm3, %v1233_v41, -inf }
 0x16a   : > { %14504 = vmatmul.mubr.msk.bf16.gmra.mrb[140].mxu0 %vm1519_vm3, %v2120_v31  ;;  %v1613_v59 = vsel %vm1519_vm3, %v1244_v44, -inf }
 0x16b   : > { %14755 = vmatprep.mubr.msk.bf16.mxu1 %vm1519_vm3, %v4145_v32  ;;  %v1607_v62 = vsel %vm1519_vm3, %v1236_v47, -inf }
 0x16c   : > { %v1802_v34 = vld [vmem:[#allocation4 + $0xd0] ss:$2 sm:$0xff]  ;;  %v1866_v35 = vld [vmem:[#allocation4 + $0xd1] ss:$2 sm:$0xff] }
 0x16d   : > { %v1916_v38 = vmax.f32 %v1802_v34, %v1866_v35  ;;  %v1800_v39 = vld [vmem:[#allocation4 + $0xc0] ss:$2 sm:$0xff]  ;;  %v1864_v40 = vld [vmem:[#allocation4 + $0xc1] ss:$2 sm:$0xff]  ;;  %v14421_v42 = vpop.f32.mrb[60].mxu0 }
 0x16e   : > { %v1915_v43 = vmax.f32 %v1800_v39, %v1864_v40  ;;  %v1257_v45 = vadd.f32 %v14421_v42, %v17212_v11  ;;  %v1248_v46 = vpop.f32.mrb[61].mxu0 }
 0x16f   : > { %2010 = vst.msk [vmem:[#allocation2 + $0xca] sm:$0xff] %vm1519_vm3, %v1916_v38  ;;  %v1249_v48 = vadd.f32 %v17212_v11, %v1248_v46  ;;  %v14422_v49 = vpop.f32.mrb[62].mxu0 }
 0x170   : > { %2009 = vst.msk [vmem:[#allocation2 + $0xc2] sm:$0xff] %vm1519_vm3, %v1915_v43  ;;  %v1611_v51 = vsel %vm1519_vm3, %v1257_v45, -inf  ;;  %v1260_v52 = vadd.f32 %v14422_v49, %v17212_v11  ;;  %v1251_v53 = vpop.f32.mrb[63].mxu0 }
 0x171   : > { %v1612_v56 = vmax.f32 %v1610_v50, %v1611_v51  ;;  %v1605_v57 = vsel %vm1519_vm3, %v1249_v48, -inf  ;;  %v1252_v58 = vadd.f32 %v17212_v11, %v1251_v53 }
 0x172   : > { %v1606_v60 = vmax.f32 %v1604_v55, %v1605_v57  ;;  %v1614_v61 = vsel %vm1519_vm3, %v1260_v52, -inf }
 0x173   : > { %1742 = vst.msk [vmem:[#allocation4 + $0xf0] sm:$0xff] %vm1519_vm3, %v1612_v56  ;;  %v1615_v63 = vmax.f32 %v1613_v59, %v1614_v61  ;;  %v1608_v0 = vsel %vm1519_vm3, %v1252_v58, -inf }
 0x174   : > { %1740 = vst.msk [vmem:[#allocation4 + $0xe0] sm:$0xff] %vm1519_vm3, %v1606_v60  ;;  %v1609_v1 = vmax.f32 %v1607_v62, %v1608_v0 }
 0x175   : > { %1743 = vst.msk [vmem:[#allocation4 + $0xf8] sm:$0xff] %vm1519_vm3, %v1615_v63  ;;  %v14425_v2 = vpop.f32.mrb[64].mxu0 }
 0x176   : > { %1741 = vst.msk [vmem:[#allocation4 + $0xe8] sm:$0xff] %vm1519_vm3, %v1609_v1  ;;  %v1264_v3 = vpop.f32.mrb[65].mxu0  ;;  %v4122_v4 = vld [vmem:[#allocation2 + $0xca] sm:$0xff]  ;;  %v1273_v16 = vadd.f32 %v14425_v2, %v17212_v11 }
 0x177   : > { %v14426_v5 = vpop.f32.mrb[66].mxu0  ;;  %v2097_v6 = vld [vmem:[#allocation2 + $0xc1] sm:$0xff]  ;;  %v2098_v7 = vld [vmem:[#allocation2 + $0xc9] sm:$0xff]  ;;  %v1265_v20 = vadd.f32 %v17212_v11, %v1264_v3 }
 0x178   : > { %v4121_v8 = vld [vmem:[#allocation2 + $0xc2] sm:$0xff]  ;;  %v1267_v9 = vpop.f32.mrb[67].mxu0  ;;  %v2121_v10 = vpack.c.bf16 %v2098_v7, %v2097_v6  ;;  %v1276_v23 = vadd.f32 %v14426_v5, %v17212_v11  ;;  %v1622_v29 = vsel %vm1519_vm3, %v1273_v16, -inf }
 0x179   : > { %v4146_v12 = vpack.c.bf16 %v4122_v4, %v4121_v8  ;;  %v1268_v26 = vadd.f32 %v17212_v11, %v1267_v9  ;;  %v1616_v33 = vsel %vm1519_vm3, %v1265_v20, -inf }
 0x17a   : > { %14507 = vmatprep.mubr.msk.bf16.mxu0 %vm1519_vm3, %v2121_v10  ;;  %v1625_v37 = vsel %vm1519_vm3, %v1276_v23, -inf }
 0x17b   : > { %14756 = vmatmul.mubr.msk.bf16.gmra.mrb[4].mxu1 %vm1519_vm3, %v4146_v12  ;;  %v1619_v40 = vsel %vm1519_vm3, %v1268_v26, -inf }
 0x17c   : > { %v1806_v14 = vld [vmem:[#allocation4 + $0xf0] ss:$2 sm:$0xff]  ;;  %v1870_v15 = vld [vmem:[#allocation4 + $0xf1] ss:$2 sm:$0xff] }
 0x17d   : > { %v1918_v17 = vmax.f32 %v1806_v14, %v1870_v15  ;;  %v1804_v18 = vld [vmem:[#allocation4 + $0xe0] ss:$2 sm:$0xff]  ;;  %v1868_v19 = vld [vmem:[#allocation4 + $0xe1] ss:$2 sm:$0xff]  ;;  %v14429_v21 = vpop.f32.mrb[68].mxu0 }
 0x17e   : > { %v1917_v22 = vmax.f32 %v1804_v18, %v1868_v19  ;;  %v1289_v24 = vadd.f32 %v14429_v21, %v17212_v11  ;;  %v1280_v25 = vpop.f32.mrb[69].mxu0 }
 0x17f   : > { %2012 = vst.msk [vmem:[#allocation2 + $0xe2] sm:$0xff] %vm1519_vm3, %v1918_v17  ;;  %v1281_v27 = vadd.f32 %v17212_v11, %v1280_v25  ;;  %v14430_v28 = vpop.f32.mrb[70].mxu0 }
 0x180   : > { %2011 = vst.msk [vmem:[#allocation2 + $0xda] sm:$0xff] %vm1519_vm3, %v1917_v22  ;;  %v1623_v30 = vsel %vm1519_vm3, %v1289_v24, -inf  ;;  %v1292_v31 = vadd.f32 %v14430_v28, %v17212_v11  ;;  %v1283_v32 = vpop.f32.mrb[71].mxu0 }
 0x181   : > { %v1624_v34 = vmax.f32 %v1622_v29, %v1623_v30  ;;  %v1617_v35 = vsel %vm1519_vm3, %v1281_v27, -inf  ;;  %v1284_v36 = vadd.f32 %v17212_v11, %v1283_v32 }
 0x182   : > { %v1618_v38 = vmax.f32 %v1616_v33, %v1617_v35  ;;  %v1626_v39 = vsel %vm1519_vm3, %v1292_v31, -inf }
 0x183   : > { %1746 = vst.msk [vmem:[#allocation4 + $0x110] sm:$0xff] %vm1519_vm3, %v1624_v34  ;;  %v1627_v41 = vmax.f32 %v1625_v37, %v1626_v39  ;;  %v1620_v42 = vsel %vm1519_vm3, %v1284_v36, -inf }
 0x184   : > { %1744 = vst.msk [vmem:[#allocation4 + $0x100] sm:$0xff] %vm1519_vm3, %v1618_v38  ;;  %v1621_v43 = vmax.f32 %v1619_v40, %v1620_v42 }
 0x185   : > { %1747 = vst.msk [vmem:[#allocation4 + $0x118] sm:$0xff] %vm1519_vm3, %v1627_v41  ;;  %v14433_v44 = vpop.f32.mrb[72].mxu0 }
 0x186   : > { %1745 = vst.msk [vmem:[#allocation4 + $0x108] sm:$0xff] %vm1519_vm3, %v1621_v43  ;;  %v1296_v45 = vpop.f32.mrb[73].mxu0  ;;  %v4124_v46 = vld [vmem:[#allocation2 + $0xe2] sm:$0xff]  ;;  %v1305_v56 = vadd.f32 %v14433_v44, %v17212_v11 }
 0x187   : > { %v14434_v47 = vpop.f32.mrb[74].mxu0  ;;  %v2099_v48 = vld [vmem:[#allocation2 + $0xd9] sm:$0xff]  ;;  %v2100_v49 = vld [vmem:[#allocation2 + $0xe1] sm:$0xff]  ;;  %v1297_v60 = vadd.f32 %v17212_v11, %v1296_v45 }
 0x188   : > { %v4123_v50 = vld [vmem:[#allocation2 + $0xda] sm:$0xff]  ;;  %v1299_v51 = vpop.f32.mrb[75].mxu0  ;;  %v2122_v52 = vpack.c.bf16 %v2100_v49, %v2099_v48  ;;  %v1308_v63 = vadd.f32 %v14434_v47, %v17212_v11  ;;  %v1634_v5 = vsel %vm1519_vm3, %v1305_v56, -inf }
 0x189   : > { %v4147_v53 = vpack.c.bf16 %v4124_v46, %v4123_v50  ;;  %v1300_v2 = vadd.f32 %v17212_v11, %v1299_v51  ;;  %v1628_v9 = vsel %vm1519_vm3, %v1297_v60, -inf }
 0x18a   : > { %14508 = vmatmul.mubr.msk.bf16.gmra.mrb[144].mxu0 %vm1519_vm3, %v2122_v52  ;;  %v1637_v15 = vsel %vm1519_vm3, %v1308_v63, -inf }
 0x18b   : > { %14759 = vmatprep.mubr.msk.bf16.mxu1 %vm1519_vm3, %v4147_v53  ;;  %v1631_v18 = vsel %vm1519_vm3, %v1300_v2, -inf }
 0x18c   : > { %v1810_v54 = vld [vmem:[#allocation4 + $0x110] ss:$2 sm:$0xff]  ;;  %v1874_v55 = vld [vmem:[#allocation4 + $0x111] ss:$2 sm:$0xff] }
 0x18d   : > { %v1920_v57 = vmax.f32 %v1810_v54, %v1874_v55  ;;  %v1808_v58 = vld [vmem:[#allocation4 + $0x100] ss:$2 sm:$0xff]  ;;  %v1872_v59 = vld [vmem:[#allocation4 + $0x101] ss:$2 sm:$0xff]  ;;  %v14437_v61 = vpop.f32.mrb[76].mxu0 }
 0x18e   : > { %v1919_v62 = vmax.f32 %v1808_v58, %v1872_v59  ;;  %v1321_v0 = vadd.f32 %v14437_v61, %v17212_v11  ;;  %v1312_v1 = vpop.f32.mrb[77].mxu0  ;;  %v17502_v54 = vld [vmem:[%s19584_s2] ss:$0 sm:$0xff] }
 0x18f   : > { %2014 = vst.msk [vmem:[#allocation2 + $0xfa] sm:$0xff] %vm1519_vm3, %v1920_v57  ;;  %v1313_v3 = vadd.f32 %v17212_v11, %v1312_v1  ;;  %v14438_v4 = vpop.f32.mrb[78].mxu0 }
 0x190   : > { %2013 = vst.msk [vmem:[#allocation2 + $0xf2] sm:$0xff] %vm1519_vm3, %v1919_v62  ;;  %v1635_v6 = vsel %vm1519_vm3, %v1321_v0, -inf  ;;  %v1324_v7 = vadd.f32 %v14438_v4, %v17212_v11  ;;  %v1315_v8 = vpop.f32.mrb[79].mxu0 }
 0x191   : > { %v1636_v10 = vmax.f32 %v1634_v5, %v1635_v6  ;;  %v1629_v12 = vsel %vm1519_vm3, %v1313_v3, -inf  ;;  %v1316_v14 = vadd.f32 %v17212_v11, %v1315_v8  ;;  %v17521_v8 = vld [vmem:[%s19585_s3 + $0x20] sm:$0xff]  }
 0x192   : > { %v1630_v16 = vmax.f32 %v1628_v9, %v1629_v12  ;;  %v1638_v17 = vsel %vm1519_vm3, %v1324_v7, -inf  ;;  %14559 = vmatprep.subr.bf16.mxu0 %v17521_v8 }
 0x193   : > { %1750 = vst.msk [vmem:[#allocation4 + $0x130] sm:$0xff] %vm1519_vm3, %v1636_v10  ;;  %v1639_v19 = vmax.f32 %v1637_v15, %v1638_v17  ;;  %v1632_v20 = vsel %vm1519_vm3, %v1316_v14, -inf }
 0x194   : > { %1748 = vst.msk [vmem:[#allocation4 + $0x120] sm:$0xff] %vm1519_vm3, %v1630_v16  ;;  %v1633_v21 = vmax.f32 %v1631_v18, %v1632_v20 }
 0x195   : > { %1751 = vst.msk [vmem:[#allocation4 + $0x138] sm:$0xff] %vm1519_vm3, %v1639_v19  ;;  %v14441_v22 = vpop.f32.mrb[80].mxu0 }
 0x196   : > { %1749 = vst.msk [vmem:[#allocation4 + $0x128] sm:$0xff] %vm1519_vm3, %v1633_v21  ;;  %v1328_v23 = vpop.f32.mrb[81].mxu0  ;;  %v4126_v24 = vld [vmem:[#allocation2 + $0xfa] sm:$0xff]  ;;  %v1337_v34 = vadd.f32 %v14441_v22, %v17212_v11 }
 0x197   : > { %v14442_v25 = vpop.f32.mrb[82].mxu0  ;;  %v2101_v26 = vld [vmem:[#allocation2 + $0xf1] sm:$0xff]  ;;  %v2102_v27 = vld [vmem:[#allocation2 + $0xf9] sm:$0xff]  ;;  %v1329_v38 = vadd.f32 %v17212_v11, %v1328_v23 }
 0x198   : > { %v4125_v28 = vld [vmem:[#allocation2 + $0xf2] sm:$0xff]  ;;  %v1331_v29 = vpop.f32.mrb[83].mxu0  ;;  %v2123_v30 = vpack.c.bf16 %v2102_v27, %v2101_v26  ;;  %v1340_v41 = vadd.f32 %v14442_v25, %v17212_v11  ;;  %v1646_v47 = vsel %vm1519_vm3, %v1337_v34, -inf }
 0x199   : > { %v17481_v31 = vpack.c.bf16 %v4126_v24, %v4125_v28  ;;  %v1332_v44 = vadd.f32 %v17212_v11, %v1331_v29  ;;  %v1640_v51 = vsel %vm1519_vm3, %v1329_v38, -inf }
 0x19a   : > { %14511 = vmatprep.mubr.msk.bf16.mxu0 %vm1519_vm3, %v2123_v30  ;;  %v1649_v56 = vsel %vm1519_vm3, %v1340_v41, -inf }
 0x19b   : > { %14760 = vmatmul.mubr.msk.bf16.gmra.mrb[8].mxu1 %vm1519_vm3, %v17481_v31 }
 0x19c   : > { %v1814_v32 = vld [vmem:[#allocation4 + $0x130] ss:$2 sm:$0xff]  ;;  %v1878_v33 = vld [vmem:[#allocation4 + $0x131] ss:$2 sm:$0xff] }
 0x19d   : > { %v1922_v35 = vmax.f32 %v1814_v32, %v1878_v33  ;;  %v1812_v36 = vld [vmem:[#allocation4 + $0x120] ss:$2 sm:$0xff]  ;;  %v1876_v37 = vld [vmem:[#allocation4 + $0x121] ss:$2 sm:$0xff]  ;;  %v14445_v39 = vpop.f32.mrb[84].mxu0 }
 0x19e   : > { %v1921_v40 = vmax.f32 %v1812_v36, %v1876_v37  ;;  %v1353_v42 = vadd.f32 %v14445_v39, %v17212_v11  ;;  %v1344_v43 = vpop.f32.mrb[85].mxu0 }
 0x19f   : > { %2016 = vst.msk [vmem:[#allocation2 + $0x112] sm:$0xff] %vm1519_vm3, %v1922_v35  ;;  %v1345_v45 = vadd.f32 %v17212_v11, %v1344_v43  ;;  %v14446_v46 = vpop.f32.mrb[86].mxu0 }
 0x1a0   : > { %2015 = vst.msk [vmem:[#allocation2 + $0x10a] sm:$0xff] %vm1519_vm3, %v1921_v40  ;;  %v1647_v48 = vsel %vm1519_vm3, %v1353_v42, -inf  ;;  %v1356_v49 = vadd.f32 %v14446_v46, %v17212_v11  ;;  %v1347_v50 = vpop.f32.mrb[87].mxu0  ;;  %v1643_v11 = vsel %vm1519_vm3, %v1332_v44, -inf }
 0x1a1   : > { %v1648_v52 = vmax.f32 %v1646_v47, %v1647_v48  ;;  %v1641_v53 = vsel %vm1519_vm3, %v1345_v45, -inf  ;;  %v1348_v55 = vadd.f32 %v17502_v54, %v1347_v50 }
 0x1a2   : > { %v1642_v57 = vmax.f32 %v1640_v51, %v1641_v53  ;;  %v1650_v58 = vsel %vm1519_vm3, %v1356_v49, -inf }
 0x1a3   : > { %1754 = vst.msk [vmem:[#allocation4 + $0x150] sm:$0xff] %vm1519_vm3, %v1648_v52  ;;  %v1651_v59 = vmax.f32 %v1649_v56, %v1650_v58  ;;  %v1644_v60 = vsel %vm1519_vm3, %v1348_v55, -inf }
 0x1a4   : > { %1752 = vst.msk [vmem:[#allocation4 + $0x140] sm:$0xff] %vm1519_vm3, %v1642_v57  ;;  %v1645_v61 = vmax.f32 %v1643_v11, %v1644_v60 }
 0x1a5   : > { %1755 = vst.msk [vmem:[#allocation4 + $0x158] sm:$0xff] %vm1519_vm3, %v1651_v59  ;;  %v14449_v62 = vpop.f32.mrb[88].mxu0 }
 0x1a6   : > { %1753 = vst.msk [vmem:[#allocation4 + $0x148] sm:$0xff] %vm1519_vm3, %v1645_v61  ;;  %v1360_v63 = vpop.f32.mrb[89].mxu0  ;;  %v4128_v0 = vld [vmem:[#allocation2 + $0x112] sm:$0xff]  ;;  %v1369_v12 = vadd.f32 %v17502_v54, %v14449_v62 }
 0x1a7   : > { %v14450_v1 = vpop.f32.mrb[90].mxu0  ;;  %v2103_v2 = vld [vmem:[#allocation2 + $0x109] sm:$0xff]  ;;  %v2104_v3 = vld [vmem:[#allocation2 + $0x111] sm:$0xff]  ;;  %v1361_v17 = vadd.f32 %v17502_v54, %v1360_v63 }
 0x1a8   : > { %v4127_v4 = vld [vmem:[#allocation2 + $0x10a] sm:$0xff]  ;;  %v1363_v5 = vpop.f32.mrb[91].mxu0  ;;  %v2124_v6 = vpack.c.bf16 %v2104_v3, %v2103_v2  ;;  %v1372_v20 = vadd.f32 %v17502_v54, %v14450_v1  ;;  %v1658_v26 = vsel %vm1519_vm3, %v1369_v12, -inf }
 0x1a9   : > { %v17513_v7 = vpack.c.bf16 %v4128_v0, %v4127_v4  ;;  %v1364_v23 = vadd.f32 %v17502_v54, %v1363_v5  ;;  %v1652_v30 = vsel %vm1519_vm3, %v1361_v17, -inf }
 0x1aa   : > { %14512 = vmatmul.mubr.msk.bf16.gmra.mrb[148].mxu0 %vm1519_vm3, %v2124_v6  ;;  %v1661_v35 = vsel %vm1519_vm3, %v1372_v20, -inf }
 0x1ab   : > { %14763 = vmatprep.mubr.msk.bf16.mxu1 %vm1519_vm3, %v17513_v7  ;;  %v1655_v38 = vsel %vm1519_vm3, %v1364_v23, -inf }
 0x1ac   : > { %v1818_v9 = vld [vmem:[#allocation4 + $0x150] ss:$2 sm:$0xff]  ;;  %v1882_v10 = vld [vmem:[#allocation4 + $0x151] ss:$2 sm:$0xff] }
 0x1ad   : > { %v1924_v14 = vmax.f32 %v1818_v9, %v1882_v10  ;;  %v1816_v15 = vld [vmem:[#allocation4 + $0x140] ss:$2 sm:$0xff]  ;;  %v1880_v16 = vld [vmem:[#allocation4 + $0x141] ss:$2 sm:$0xff]  ;;  %v14453_v18 = vpop.f32.mrb[92].mxu0 }
 0x1ae   : > { %v1923_v19 = vmax.f32 %v1816_v15, %v1880_v16  ;;  %v1385_v21 = vadd.f32 %v17502_v54, %v14453_v18  ;;  %v1376_v22 = vpop.f32.mrb[93].mxu0 }
 0x1af   : > { %2018 = vst.msk [vmem:[#allocation2 + $0x12a] sm:$0xff] %vm1519_vm3, %v1924_v14  ;;  %v1377_v24 = vadd.f32 %v17502_v54, %v1376_v22  ;;  %v14454_v25 = vpop.f32.mrb[94].mxu0 }
 0x1b0   : > { %2017 = vst.msk [vmem:[#allocation2 + $0x122] sm:$0xff] %vm1519_vm3, %v1923_v19  ;;  %v1659_v27 = vsel %vm1519_vm3, %v1385_v21, -inf  ;;  %v1388_v28 = vadd.f32 %v17502_v54, %v14454_v25  ;;  %v1379_v29 = vpop.f32.mrb[95].mxu0 }
 0x1b1   : > { %v1660_v32 = vmax.f32 %v1658_v26, %v1659_v27  ;;  %v1653_v33 = vsel %vm1519_vm3, %v1377_v24, -inf  ;;  %v1380_v34 = vadd.f32 %v17502_v54, %v1379_v29 }
 0x1b2   : > { %v1654_v36 = vmax.f32 %v1652_v30, %v1653_v33  ;;  %v1662_v37 = vsel %vm1519_vm3, %v1388_v28, -inf }
 0x1b3   : > { %1758 = vst.msk [vmem:[#allocation4 + $0x170] sm:$0xff] %vm1519_vm3, %v1660_v32  ;;  %v1663_v39 = vmax.f32 %v1661_v35, %v1662_v37  ;;  %v1656_v40 = vsel %vm1519_vm3, %v1380_v34, -inf }
 0x1b4   : > { %1756 = vst.msk [vmem:[#allocation4 + $0x160] sm:$0xff] %vm1519_vm3, %v1654_v36  ;;  %v1657_v41 = vmax.f32 %v1655_v38, %v1656_v40 }
 0x1b5   : > { %1759 = vst.msk [vmem:[#allocation4 + $0x178] sm:$0xff] %vm1519_vm3, %v1663_v39  ;;  %v14457_v42 = vpop.f32.mrb[96].mxu0 }
 0x1b6   : > { %1757 = vst.msk [vmem:[#allocation4 + $0x168] sm:$0xff] %vm1519_vm3, %v1657_v41  ;;  %v1392_v43 = vpop.f32.mrb[97].mxu0  ;;  %v4130_v44 = vld [vmem:[#allocation2 + $0x12a] sm:$0xff]  ;;  %v1401_v55 = vadd.f32 %v17502_v54, %v14457_v42 }
 0x1b7   : > { %v14458_v45 = vpop.f32.mrb[98].mxu0  ;;  %v2105_v46 = vld [vmem:[#allocation2 + $0x121] sm:$0xff]  ;;  %v2106_v47 = vld [vmem:[#allocation2 + $0x129] sm:$0xff]  ;;  %v1393_v11 = vadd.f32 %v17502_v54, %v1392_v43 }
 0x1b8   : > { %v4129_v48 = vld [vmem:[#allocation2 + $0x122] sm:$0xff]  ;;  %v1395_v49 = vpop.f32.mrb[99].mxu0  ;;  %v2125_v50 = vpack.c.bf16 %v2106_v47, %v2105_v46  ;;  %v1404_v61 = vadd.f32 %v17502_v54, %v14458_v45  ;;  %v1670_v3 = vsel %vm1519_vm3, %v1401_v55, -inf }
 0x1b9   : > { %v17546_v51 = vpack.c.bf16 %v4130_v44, %v4129_v48  ;;  %v1396_v0 = vadd.f32 %v17502_v54, %v1395_v49  ;;  %v1664_v9 = vsel %vm1519_vm3, %v1393_v11, -inf }
 0x1ba   : > { %14515 = vmatprep.mubr.msk.bf16.mxu0 %vm1519_vm3, %v2125_v50  ;;  %v1673_v15 = vsel %vm1519_vm3, %v1404_v61, -inf }
 0x1bb   : > { %14764 = vmatmul.mubr.msk.bf16.gmra.mrb[12].mxu1 %vm1519_vm3, %v17546_v51  ;;  %v1667_v18 = vsel %vm1519_vm3, %v1396_v0, -inf }
 0x1bc   : > { %v1822_v52 = vld [vmem:[#allocation4 + $0x170] ss:$2 sm:$0xff]  ;;  %v1886_v53 = vld [vmem:[#allocation4 + $0x171] ss:$2 sm:$0xff] }
 0x1bd   : > { %v1926_v56 = vmax.f32 %v1822_v52, %v1886_v53  ;;  %v1820_v57 = vld [vmem:[#allocation4 + $0x160] ss:$2 sm:$0xff]  ;;  %v1884_v58 = vld [vmem:[#allocation4 + $0x161] ss:$2 sm:$0xff]  ;;  %v14461_v59 = vpop.f32.mrb[100].mxu0 }
 0x1be   : > { %v1925_v60 = vmax.f32 %v1820_v57, %v1884_v58  ;;  %v1417_v62 = vadd.f32 %v17502_v54, %v14461_v59  ;;  %v1408_v63 = vpop.f32.mrb[101].mxu0 }
 0x1bf   : > { %2020 = vst.msk [vmem:[#allocation2 + $0x142] sm:$0xff] %vm1519_vm3, %v1926_v56  ;;  %v1409_v1 = vadd.f32 %v17502_v54, %v1408_v63  ;;  %v14462_v2 = vpop.f32.mrb[102].mxu0 }
 0x1c0   : > { %2019 = vst.msk [vmem:[#allocation2 + $0x13a] sm:$0xff] %vm1519_vm3, %v1925_v60  ;;  %v1671_v4 = vsel %vm1519_vm3, %v1417_v62, -inf  ;;  %v1420_v5 = vadd.f32 %v17502_v54, %v14462_v2  ;;  %v1411_v6 = vpop.f32.mrb[103].mxu0 }
 0x1c1   : > { %v1672_v10 = vmax.f32 %v1670_v3, %v1671_v4  ;;  %v1665_v12 = vsel %vm1519_vm3, %v1409_v1, -inf  ;;  %v1412_v14 = vadd.f32 %v17502_v54, %v1411_v6 }
 0x1c2   : > { %v1666_v16 = vmax.f32 %v1664_v9, %v1665_v12  ;;  %v1674_v17 = vsel %vm1519_vm3, %v1420_v5, -inf }
 0x1c3   : > { %1762 = vst.msk [vmem:[#allocation4 + $0x190] sm:$0xff] %vm1519_vm3, %v1672_v10  ;;  %v1675_v19 = vmax.f32 %v1673_v15, %v1674_v17  ;;  %v1668_v20 = vsel %vm1519_vm3, %v1412_v14, -inf }
 0x1c4   : > { %1760 = vst.msk [vmem:[#allocation4 + $0x180] sm:$0xff] %vm1519_vm3, %v1666_v16  ;;  %v1669_v21 = vmax.f32 %v1667_v18, %v1668_v20 }
 0x1c5   : > { %1763 = vst.msk [vmem:[#allocation4 + $0x198] sm:$0xff] %vm1519_vm3, %v1675_v19  ;;  %v14465_v22 = vpop.f32.mrb[104].mxu0 }
 0x1c6   : > { %1761 = vst.msk [vmem:[#allocation4 + $0x188] sm:$0xff] %vm1519_vm3, %v1669_v21  ;;  %v1424_v23 = vpop.f32.mrb[105].mxu0  ;;  %v4132_v24 = vld [vmem:[#allocation2 + $0x142] sm:$0xff]  ;;  %v1433_v35 = vadd.f32 %v17502_v54, %v14465_v22 }
 0x1c7   : > { %v14466_v25 = vpop.f32.mrb[106].mxu0  ;;  %v2107_v26 = vld [vmem:[#allocation2 + $0x139] sm:$0xff]  ;;  %v2108_v27 = vld [vmem:[#allocation2 + $0x141] sm:$0xff]  ;;  %v1425_v39 = vadd.f32 %v17502_v54, %v1424_v23 }
 0x1c8   : > { %v4131_v28 = vld [vmem:[#allocation2 + $0x13a] sm:$0xff]  ;;  %v1427_v29 = vpop.f32.mrb[107].mxu0  ;;  %v2126_v30 = vpack.c.bf16 %v2108_v27, %v2107_v26  ;;  %v1436_v42 = vadd.f32 %v17502_v54, %v14466_v25  ;;  %v1682_v48 = vsel %vm1519_vm3, %v1433_v35, -inf }
 0x1c9   : > { %v17573_v32 = vpack.c.bf16 %v4132_v24, %v4131_v28  ;;  %v1428_v45 = vadd.f32 %v17502_v54, %v1427_v29  ;;  %v1676_v53 = vsel %vm1519_vm3, %v1425_v39, -inf }
 0x1ca   : > { %14516 = vmatmul.mubr.msk.bf16.gmra.mrb[152].mxu0 %vm1519_vm3, %v2126_v30  ;;  %v1685_v58 = vsel %vm1519_vm3, %v1436_v42, -inf }
 0x1cb   : > { %14767 = vmatprep.mubr.msk.bf16.mxu1 %vm1519_vm3, %v17573_v32  ;;  %v1679_v60 = vsel %vm1519_vm3, %v1428_v45, -inf }
 0x1cc   : > { %v1826_v33 = vld [vmem:[#allocation4 + $0x190] ss:$2 sm:$0xff]  ;;  %v1890_v34 = vld [vmem:[#allocation4 + $0x191] ss:$2 sm:$0xff] }
 0x1cd   : > { %v1928_v36 = vmax.f32 %v1826_v33, %v1890_v34  ;;  %v1824_v37 = vld [vmem:[#allocation4 + $0x180] ss:$2 sm:$0xff]  ;;  %v1888_v38 = vld [vmem:[#allocation4 + $0x181] ss:$2 sm:$0xff]  ;;  %v14469_v40 = vpop.f32.mrb[108].mxu0 }
 0x1ce   : > { %v1927_v41 = vmax.f32 %v1824_v37, %v1888_v38  ;;  %v1449_v43 = vadd.f32 %v17502_v54, %v14469_v40  ;;  %v1440_v44 = vpop.f32.mrb[109].mxu0 }
 0x1cf   : > { %2022 = vst.msk [vmem:[#allocation2 + $0x15a] sm:$0xff] %vm1519_vm3, %v1928_v36  ;;  %v1441_v46 = vadd.f32 %v17502_v54, %v1440_v44  ;;  %v14470_v47 = vpop.f32.mrb[110].mxu0 }
 0x1d0   : > { %2021 = vst.msk [vmem:[#allocation2 + $0x152] sm:$0xff] %vm1519_vm3, %v1927_v41  ;;  %v1683_v49 = vsel %vm1519_vm3, %v1449_v43, -inf  ;;  %v1452_v50 = vadd.f32 %v17502_v54, %v14470_v47  ;;  %v1443_v52 = vpop.f32.mrb[111].mxu0  ;;  %v2030_v47 = vld [vmem:[#allocation2 + $0x8] sm:$0xff] }
 0x1d1   : > { %v1684_v55 = vmax.f32 %v1682_v48, %v1683_v49  ;;  %v1677_v56 = vsel %vm1519_vm3, %v1441_v46, -inf  ;;  %v1444_v57 = vadd.f32 %v17502_v54, %v1443_v52  ;;  %v2029_v46 = vld [vmem:[#allocation2] sm:$0xff] }
 0x1d2   : > { %v1678_v11 = vmax.f32 %v1676_v53, %v1677_v56  ;;  %v1686_v59 = vsel %vm1519_vm3, %v1452_v50, -inf  ;;  %v2061_v53 = vpack.c.bf16 %v2030_v47, %v2029_v46 }
 0x1d3   : > { %1766 = vst.msk [vmem:[#allocation4 + $0x1b0] sm:$0xff] %vm1519_vm3, %v1684_v55  ;;  %v1687_v61 = vmax.f32 %v1685_v58, %v1686_v59  ;;  %v1680_v62 = vsel %vm1519_vm3, %v1444_v57, -inf  ;;  %v2031_v57 = vld [vmem:[#allocation2 + $0x18] sm:$0xff]  ;;  %v2032_v58 = vld [vmem:[#allocation2 + $0x20] sm:$0xff] }
 0x1d4   : > { %1764 = vst.msk [vmem:[#allocation4 + $0x1a0] sm:$0xff] %vm1519_vm3, %v1678_v11  ;;  %v1681_v63 = vmax.f32 %v1679_v60, %v1680_v62 }
 0x1d5   : > { %1767 = vst.msk [vmem:[#allocation4 + $0x1b8] sm:$0xff] %vm1519_vm3, %v1687_v61  ;;  %v14473_v0 = vpop.f32.mrb[112].mxu0 }
 0x1d6   : > { %1765 = vst.msk [vmem:[#allocation4 + $0x1a8] sm:$0xff] %vm1519_vm3, %v1681_v63  ;;  %v1456_v1 = vpop.f32.mrb[113].mxu0  ;;  %v4134_v2 = vld [vmem:[#allocation2 + $0x15a] sm:$0xff]  ;;  %v1465_v16 = vadd.f32 %v17502_v54, %v14473_v0  ;;  %v2062_v0 = vpack.c.bf16 %v2032_v58, %v2031_v57 }
 0x1d7   : > { %v14474_v3 = vpop.f32.mrb[114].mxu0  ;;  %v2109_v4 = vld [vmem:[#allocation2 + $0x151] sm:$0xff]  ;;  %v2110_v5 = vld [vmem:[#allocation2 + $0x159] sm:$0xff]  ;;  %v1457_v20 = vadd.f32 %v17502_v54, %v1456_v1 }
 0x1d8   : > { %v4133_v6 = vld [vmem:[#allocation2 + $0x152] sm:$0xff]  ;;  %v1459_v9 = vpop.f32.mrb[115].mxu0  ;;  %v2127_v10 = vpack.c.bf16 %v2110_v5, %v2109_v4  ;;  %v1468_v23 = vadd.f32 %v17502_v54, %v14474_v3  ;;  %v1694_v29 = vsel %vm1519_vm3, %v1465_v16, -inf  ;;  %v16741_v3 = vld [vmem:[%s19585_s3 + $0x28] sm:$0xff]   ;;  %v4413_v5 = vld [vmem:[#allocation2 + $0x1b] sm:$0xff] }
 0x1d9   : > { %v17600_v12 = vpack.c.bf16 %v4134_v2, %v4133_v6  ;;  %v1460_v26 = vadd.f32 %v17502_v54, %v1459_v9  ;;  %v1688_v35 = vsel %vm1519_vm3, %v1457_v20, -inf  ;;  %v2033_v1 = vld [vmem:[#allocation2 + $0x30] sm:$0xff]  ;;  %v2034_v2 = vld [vmem:[#allocation2 + $0x38] sm:$0xff]  ;;  %v4414_v6 = vld [vmem:[#allocation2 + $0x23] sm:$0xff] }
 0x1da   : > { %14519 = vmatprep.mubr.msk.bf16.mxu0 %vm1519_vm3, %v2127_v10  ;;  %v1697_v39 = vsel %vm1519_vm3, %v1468_v23, -inf  ;;  %v17638_v4 = vpack.c.bf16 %v2034_v2, %v2033_v1  ;;  %v17647_v9 = vld [vmem:[%s19585_s3 + $0x30] sm:$0xff]   ;;  %v2035_v10 = vld [vmem:[#allocation2 + $0x48] sm:$0xff]  ;;  %v2037_v16 = vld [vmem:[#allocation2 + $0x60] sm:$0xff] }
 0x1db   : > { %14768 = vmatmul.mubr.msk.bf16.gmra.mrb[16].mxu1 %vm1519_vm3, %v17600_v12  ;;  %v1691_v42 = vsel %vm1519_vm3, %v1460_v26, -inf  ;;  %v2039_v23 = vld [vmem:[#allocation2 + $0x78] sm:$0xff]  ;;  %v2041_v26 = vld [vmem:[#allocation2 + $0x90] sm:$0xff]  ;;  %v2048_v58 = vld [vmem:[#allocation2 + $0xe0] sm:$0xff] }
 0x1dc   : > { %v1830_v14 = vld [vmem:[#allocation4 + $0x1b0] ss:$2 sm:$0xff]  ;;  %v1894_v15 = vld [vmem:[#allocation4 + $0x1b1] ss:$2 sm:$0xff] }
 0x1dd   : > { %v1930_v17 = vmax.f32 %v1830_v14, %v1894_v15  ;;  %v1828_v18 = vld [vmem:[#allocation4 + $0x1a0] ss:$2 sm:$0xff]  ;;  %v1892_v19 = vld [vmem:[#allocation4 + $0x1a1] ss:$2 sm:$0xff]  ;;  %v14477_v21 = vpop.f32.mrb[116].mxu0  ;;  %v2036_v14 = vld [vmem:[#allocation2 + $0x50] sm:$0xff] }
 0x1de   : > { %v1929_v22 = vmax.f32 %v1828_v18, %v1892_v19  ;;  %v1481_v24 = vadd.f32 %v17502_v54, %v14477_v21  ;;  %v1472_v25 = vpop.f32.mrb[117].mxu0  ;;  %v17649_v19 = vpack.c.bf16 %v4414_v6, %v4413_v5  ;;  %v17651_v20 = vpack.c.bf16 %v2036_v14, %v2035_v10  ;;  %v2047_v57 = vld [vmem:[#allocation2 + $0xd8] sm:$0xff] }
 0x1df   : > { %2024 = vst.msk [vmem:[#allocation2 + $0x172] sm:$0xff] %vm1519_vm3, %v1930_v17  ;;  %v1473_v27 = vadd.f32 %v17502_v54, %v1472_v25  ;;  %v14478_v28 = vpop.f32.mrb[118].mxu0  ;;  %v2038_v17 = vld [vmem:[#allocation2 + $0x68] sm:$0xff]  ;;  %v4415_v25 = vld [vmem:[#allocation2 + $0x33] sm:$0xff] }
 0x1e0   : > { %2023 = vst.msk [vmem:[#allocation2 + $0x16a] sm:$0xff] %vm1519_vm3, %v1929_v22  ;;  %v1695_v30 = vsel %vm1519_vm3, %v1481_v24, -inf  ;;  %v1484_v33 = vadd.f32 %v17502_v54, %v14478_v28  ;;  %v1475_v34 = vpop.f32.mrb[119].mxu0  ;;  %v17654_v21 = vpack.c.bf16 %v2038_v17, %v2037_v16  ;;  %v4416_v22 = vld [vmem:[#allocation2 + $0x3b] sm:$0xff]  ;;  %v4417_v28 = vld [vmem:[#allocation2 + $0x4b] sm:$0xff] }
 0x1e1   : > { %v1696_v36 = vmax.f32 %v1694_v29, %v1695_v30  ;;  %v1689_v37 = vsel %vm1519_vm3, %v1473_v27, -inf  ;;  %v1476_v38 = vadd.f32 %v17502_v54, %v1475_v34  ;;  %v2040_v24 = vld [vmem:[#allocation2 + $0x80] sm:$0xff]  ;;  %v2042_v27 = vld [vmem:[#allocation2 + $0x98] sm:$0xff] }
 0x1e2   : > { %v1690_v40 = vmax.f32 %v1688_v35, %v1689_v37  ;;  %v1698_v41 = vsel %vm1519_vm3, %v1484_v33, -inf  ;;  %v4418_v29 = vld [vmem:[#allocation2 + $0x53] sm:$0xff]  ;;  %v17663_v30 = vpack.c.bf16 %v2040_v24, %v2039_v23  ;;  %v17665_v33 = vpack.c.bf16 %v4416_v22, %v4415_v25  ;;  %v4419_v37 = vld [vmem:[#allocation2 + $0x63] sm:$0xff] }
 0x1e3   : > { %1770 = vst.msk [vmem:[#allocation4 + $0x1d0] sm:$0xff] %vm1519_vm3, %v1696_v36  ;;  %v1699_v43 = vmax.f32 %v1697_v39, %v1698_v41  ;;  %v1692_v44 = vsel %vm1519_vm3, %v1476_v38, -inf  ;;  %v16739_v34 = vld [vmem:[%s19585_s3 + $0x98] sm:$0xff]   ;;  %v17670_v35 = vpack.c.bf16 %v2042_v27, %v2041_v26  ;;  %v17676_v36 = vpack.c.bf16 %v4418_v29, %v4417_v28  ;;  %v4420_v38 = vld [vmem:[#allocation2 + $0x6b] sm:$0xff]  ;;  %v17686_v39 = vld [vmem:[%s19585_s3 + $0xa0] sm:$0xff]  }
 0x1e4   : > { %1768 = vst.msk [vmem:[#allocation4 + $0x1c0] sm:$0xff] %vm1519_vm3, %v1690_v40  ;;  %v1693_v45 = vmax.f32 %v1691_v42, %v1692_v44  ;;  %v2043_v40 = vld [vmem:[#allocation2 + $0xa8] sm:$0xff]  ;;  %v2044_v41 = vld [vmem:[#allocation2 + $0xb0] sm:$0xff]  ;;  %v17690_v46 = vpack.c.bf16 %v4420_v38, %v4419_v37 }
 0x1e5   : > { %1771 = vst.msk [vmem:[#allocation4 + $0x1d8] sm:$0xff] %vm1519_vm3, %v1699_v43  ;;  %v4422_v42 = vld [vmem:[#allocation2 + $0x83] sm:$0xff]  ;;  %v4428_v26 = vld [vmem:[#allocation2 + $0xcb] sm:$0xff] }
 0x1e6   : > { %1769 = vst.msk [vmem:[#allocation4 + $0x1c8] sm:$0xff] %vm1519_vm3, %v1693_v45  ;;  %v4136_v48 = vld [vmem:[#allocation2 + $0x172] sm:$0xff]  ;;  %v2045_v43 = vld [vmem:[#allocation2 + $0xc0] sm:$0xff]  ;;  %v2046_v44 = vld [vmem:[#allocation2 + $0xc8] sm:$0xff]  ;;  %v17688_v45 = vpack.c.bf16 %v2044_v41, %v2043_v40 }
 0x1e7   : > { %v2111_v49 = vld [vmem:[#allocation2 + $0x169] sm:$0xff]  ;;  %v2112_v50 = vld [vmem:[#allocation2 + $0x171] sm:$0xff]  ;;  %v17693_v47 = vpack.c.bf16 %v2046_v44, %v2045_v43  ;;  %v2053_v43 = vld [vmem:[#allocation2 + $0x120] sm:$0xff] }
 0x1e8   : > { %v4135_v52 = vld [vmem:[#allocation2 + $0x16a] sm:$0xff]  ;;  %v2128_v55 = vpack.c.bf16 %v2112_v50, %v2111_v49  ;;  %v14481_v49 = vpop.f32.mrb[120].mxu0  ;;  %v4423_v50 = vld [vmem:[#allocation2 + $0x93] sm:$0xff] }
 0x1e9   : > { %v17627_v56 = vpack.c.bf16 %v4136_v48, %v4135_v52  ;;  %v4424_v52 = vld [vmem:[#allocation2 + $0x9b] sm:$0xff]  ;;  %v4427_v25 = vld [vmem:[#allocation2 + $0xc3] sm:$0xff]  ;;  %v2052_v37 = vld [vmem:[#allocation2 + $0x110] sm:$0xff] }
 0x1ea   : > { %14520 = vmatmul.mubr.msk.bf16.gmra.mrb[156].mxu0 %vm1519_vm3, %v2128_v55  ;;  %v1488_v55 = vpop.f32.mrb[121].mxu0  ;;  %v4430_v38 = vld [vmem:[#allocation2 + $0xe3] sm:$0xff] }
 0x1eb   : > { %14771 = vmatprep.mubr.msk.bf16.mxu1 %vm1519_vm3, %v17627_v56  ;;  %14527 = vmatprep.mubr.msk.bf16.mxu0 %vm1519_vm3, %v2061_v53  ;;  %v1497_v53 = vadd.f32 %v17502_v54, %v14481_v49  ;;  %v1489_v1 = vadd.f32 %v17502_v54, %v1488_v55  ;;  %v2054_v44 = vld [vmem:[#allocation2 + $0x128] sm:$0xff] }
 0x1ec   : > { %v1834_v11 = vld [vmem:[#allocation4 + $0x1d0] ss:$2 sm:$0xff]  ;;  %v1898_v59 = vld [vmem:[#allocation4 + $0x1d1] ss:$2 sm:$0xff] }
 0x1ed   : > { %v1932_v60 = vmax.f32 %v1834_v11, %v1898_v59  ;;  %v1832_v61 = vld [vmem:[#allocation4 + $0x1c0] ss:$2 sm:$0xff]  ;;  %v1896_v62 = vld [vmem:[#allocation4 + $0x1c1] ss:$2 sm:$0xff]  ;;  %v4426_v11 = vld [vmem:[#allocation2 + $0xb3] sm:$0xff]  ;;  %v14482_v59 = vpop.f32.mrb[122].mxu0 }
 0x1ee   : > { %v1931_v63 = vmax.f32 %v1832_v61, %v1896_v62  ;;  %v2050_v61 = vld [vmem:[#allocation2 + $0xf8] sm:$0xff]  ;;  %v4425_v62 = vld [vmem:[#allocation2 + $0xab] sm:$0xff]  ;;  %v1706_v5 = vsel %vm1519_vm3, %v1497_v53, -inf  ;;  %v1500_v6 = vadd.f32 %v17502_v54, %v14482_v59 }
 0x1ef   : > { %2026 = vst.msk [vmem:[#allocation2 + $0x18a] sm:$0xff] %vm1519_vm3, %v1932_v60  ;;  %v2049_v60 = vld [vmem:[#allocation2 + $0xf0] sm:$0xff] }
 0x1f0   : > { %2025 = vst.msk [vmem:[#allocation2 + $0x182] sm:$0xff] %vm1519_vm3, %v1931_v63  ;;  %v1491_v63 = vpop.f32.mrb[123].mxu0  ;;  %v17714_v14 = vpack.c.bf16 %v2050_v61, %v2049_v60  ;;  %v1709_v27 = vsel %vm1519_vm3, %v1500_v6, -inf  ;;  %v4432_v60 = vld [vmem:[#allocation2 + $0xfb] sm:$0xff] }
 0x1f1   : > { %v14485_v2 = vpop.f32.mrb[124].mxu0  ;;  %v1492_v16 = vadd.f32 %v17502_v54, %v1491_v63  ;;  %v2055_v61 = vld [vmem:[#allocation2 + $0x138] sm:$0xff] }
 0x1f2   : > { %14528 = vmatmul.mubr.msk.bf16.vlgmr.msra.gmra.mrb[128].mxu0 %vm1519_vm3, %v2062_v0  ;;  %v17706_v0 = vpack.c.bf16 %v4424_v52, %v4423_v50  ;;  %v1513_v10 = vadd.f32 %v17502_v54, %v14485_v2  ;;  %v4434_v63 = vld [vmem:[#allocation2 + $0x113] sm:$0xff] }
 0x1f3   : > { %14531 = vmatprep.mubr.msk.bf16.mxu0 %vm1519_vm3, %v17638_v4  ;;  %14560 = vmatpush3.bf16.msra.mxu0 %v17521_v8  ;;  %v1703_v40 = vsel %vm1519_vm3, %v1492_v16, -inf  ;;  %v2058_v2 = vld [vmem:[#allocation2 + $0x158] sm:$0xff] }
 0x1f4   : > { %14561 = vmatprep.subr.bf16.mxu0 %v16741_v3  ;;  %v1707_v17 = vsel %vm1519_vm3, %v1513_v10, -inf }
 0x1f5   : > { %v1708_v22 = vmax.f32 %v1706_v5, %v1707_v17  ;;  %v4433_v5 = vld [vmem:[#allocation2 + $0x10b] sm:$0xff] }
 0x1f6   : > { %v4138_v15 = vld [vmem:[#allocation2 + $0x18a] sm:$0xff] }
 0x1f7   : > { %v4137_v18 = vld [vmem:[#allocation2 + $0x182] sm:$0xff]  ;;  %14562 = vmatpush3.bf16.msra.mxu0 %v16741_v3  ;;  %v17709_v3 = vpack.c.bf16 %v2048_v58, %v2047_v57  ;;  %1774 = vst.msk [vmem:[#allocation4 + $0x1f0] sm:$0xff] %vm1519_vm3, %v1708_v22  ;;  %v17740_v57 = vpack.c.bf16 %v4428_v26, %v4427_v25  ;;  %v4436_v26 = vld [vmem:[#allocation2 + $0x12b] sm:$0xff] }
 0x1f8   : > { %v4154_v8 = vpack.c.bf16 %v4138_v15, %v4137_v18  ;;  %14595 = vmatprep.subr.bf16.mxu0 %v17647_v9  ;;  %v17716_v15 = vpack.c.bf16 %v4426_v11, %v4425_v62  ;;  %v1504_v18 = vpop.f32.mrb[125].mxu0  ;;  %v17743_v11 = vpack.c.bf16 %v2054_v44, %v2053_v43  ;;  %v2056_v62 = vld [vmem:[#allocation2 + $0x140] sm:$0xff] }
 0x1f9   : > { %v1505_v23 = vadd.f32 %v17502_v54, %v1504_v18  ;;  %v14486_v24 = vpop.f32.mrb[126].mxu0  ;;  %v17757_v6 = vpack.c.bf16 %v2056_v62, %v2055_v61  ;;  %v4442_v61 = vld [vmem:[#allocation2 + $0x173] sm:$0xff] }
 0x1fa   : > { %14532 = vmatmul.mubr.msk.bf16.gmra.mrb[132].mxu0 %vm1519_vm3, %v17651_v20  ;;  %14772 = vmatmul.mubr.msk.bf16.gmra.mrb[20].mxu1 %vm1519_vm3, %v4154_v8  ;;  %v1700_v8 = vsel %vm1519_vm3, %v1489_v1, -inf  ;;  %v1516_v28 = vadd.f32 %v17502_v54, %v14486_v24  ;;  %v1507_v29 = vpop.f32.mrb[127].mxu0  ;;  %v2057_v1 = vld [vmem:[#allocation2 + $0x150] sm:$0xff] }
 0x1fb   : > { %14535 = vmatprep.mubr.msk.bf16.mxu0 %vm1519_vm3, %v17654_v21  ;;  %14779 = vmatprep.mubr.msk.bf16.mxu1 %vm1519_vm3, %v17649_v19  ;;  %v1701_v41 = vsel %vm1519_vm3, %v1505_v23, -inf  ;;  %v17761_v18 = vpack.c.bf16 %v2058_v2, %v2057_v1  ;;  %v16745_v2 = vld [vmem:[%s19585_s3 + $0x38] sm:$0xff]  }
 0x1fc   : > { %v1702_v49 = vmax.f32 %v1700_v8, %v1701_v41  ;;  %v1710_v50 = vsel %vm1519_vm3, %v1516_v28, -inf  ;;  %v17763_v8 = vpack.c.bf16 %v4434_v63, %v4433_v5  ;;  %v2577_v28 = vld [vmem:[#allocation2 + $0xa] sm:$0xff]  ;;  %v2583_v5 = vld [vmem:[#allocation2 + $0x52] sm:$0xff] }
 0x1fd   : > { %v1711_v52 = vmax.f32 %v1709_v27, %v1710_v50  ;;  %v2576_v27 = vld [vmem:[#allocation2 + $0x2] sm:$0xff]  ;;  %v4439_v50 = vld [vmem:[#allocation2 + $0x153] sm:$0xff] }
 0x1fe   : > { %1772 = vst.msk [vmem:[#allocation4 + $0x1e0] sm:$0xff] %vm1519_vm3, %v1702_v49  ;;  %v2608_v41 = vpack.c.bf16 %v2577_v28, %v2576_v27  ;;  %v2579_v49 = vld [vmem:[#allocation2 + $0x22] sm:$0xff]  ;;  %v2585_v27 = vld [vmem:[#allocation2 + $0x6a] sm:$0xff] }
 0x1ff   : > { %1775 = vst.msk [vmem:[#allocation4 + $0x1f8] sm:$0xff] %vm1519_vm3, %v1711_v52  ;;  %v4440_v52 = vld [vmem:[#allocation2 + $0x15b] sm:$0xff] }
 0x200   : > { %v17788_v62 = vpack.c.bf16 %v4440_v52, %v4439_v50  ;;  %v4723_v50 = vld [vmem:[#allocation2 + $0x4c] sm:$0xff]  ;;  %v4724_v52 = vld [vmem:[#allocation2 + $0x54] sm:$0xff] }
 0x202   : > { %14536 = vmatmul.mubr.msk.bf16.gmra.mrb[136].mxu0 %vm1519_vm3, %v17663_v30  ;;  %14780 = vmatmul.mubr.msk.bf16.vlgmr.msra.gmra.mrb[24].mxu1 %vm1519_vm3, %v17665_v33 }
 0x203   : > { %14812 = vmatpush3.bf16.msra.mxu1 %v17432_v13  ;;  %14539 = vmatprep.mubr.msk.bf16.mxu0 %vm1519_vm3, %v17670_v35  ;;  %v4421_v13 = vld [vmem:[#allocation2 + $0x7b] sm:$0xff] }
 0x204   : > { %14783 = vmatprep.mubr.msk.bf16.mxu1 %vm1519_vm3, %v17676_v36  ;;  %14813 = vmatprep.subr.bf16.mxu1 %v16739_v34  ;;  %v17695_v48 = vpack.c.bf16 %v4422_v42, %v4421_v13  ;;  %v1508_v42 = vadd.f32 %v17502_v54, %v1507_v29  ;;  %v4429_v13 = vld [vmem:[#allocation2 + $0xdb] sm:$0xff]  ;;  %v4431_v54 = vld [vmem:[#allocation2 + $0xf3] sm:$0xff]  ;;  %v2059_v29 = vld [vmem:[#allocation2 + $0x168] sm:$0xff] }
 0x205   : > { %v17745_v59 = vpack.c.bf16 %v4430_v38, %v4429_v13  ;;  %v17759_v10 = vpack.c.bf16 %v4432_v60, %v4431_v54  ;;  %v4437_v38 = vld [vmem:[#allocation2 + $0x13b] sm:$0xff]  ;;  %v2580_v54 = vld [vmem:[#allocation2 + $0x32] sm:$0xff] }
 0x206   : > { %v1704_v53 = vsel %vm1519_vm3, %v1508_v42, -inf  ;;  %v1838_v16 = vld [vmem:[#allocation4 + $0x1f0] ss:$2 sm:$0xff]  ;;  %v1902_v17 = vld [vmem:[#allocation4 + $0x1f1] ss:$2 sm:$0xff] }
 0x207   : > { %14814 = vmatpush3.bf16.msra.mxu1 %v16739_v34  ;;  %v2051_v34 = vld [vmem:[#allocation2 + $0x108] sm:$0xff]  ;;  %v1705_v58 = vmax.f32 %v1703_v40, %v1704_v53  ;;  %v1934_v22 = vmax.f32 %v1838_v16, %v1902_v17  ;;  %v2578_v13 = vld [vmem:[#allocation2 + $0x1a] sm:$0xff] }
 0x208   : > { %14847 = vmatprep.subr.bf16.mxu1 %v17686_v39  ;;  %v17738_v55 = vpack.c.bf16 %v2052_v37, %v2051_v34  ;;  %v2060_v34 = vld [vmem:[#allocation2 + $0x170] sm:$0xff]  ;;  %v4435_v37 = vld [vmem:[#allocation2 + $0x123] sm:$0xff]  ;;  %v2581_v53 = vld [vmem:[#allocation2 + $0x3a] sm:$0xff] }
 0x209   : > { %1773 = vst.msk [vmem:[#allocation4 + $0x1e8] sm:$0xff] %vm1519_vm3, %v1705_v58  ;;  %2028 = vst.msk [vmem:[#allocation2 + $0x1a2] sm:$0xff] %vm1519_vm3, %v1934_v22  ;;  %v4438_v40 = vld [vmem:[#allocation2 + $0x143] sm:$0xff]  ;;  %v17775_v42 = vpack.c.bf16 %v2060_v34, %v2059_v29  ;;  %v17777_v43 = vpack.c.bf16 %v4436_v26, %v4435_v37  ;;  %v2609_v58 = vpack.c.bf16 %v2579_v49, %v2578_v13  ;;  %v4441_v60 = vld [vmem:[#allocation2 + $0x16b] sm:$0xff] }
 0x20a   : > { %14540 = vmatmul.mubr.msk.bf16.gmra.mrb[140].mxu0 %vm1519_vm3, %v17688_v45  ;;  %14784 = vmatmul.mubr.msk.bf16.gmra.mrb[28].mxu1 %vm1519_vm3, %v17690_v46  ;;  %v17779_v44 = vpack.c.bf16 %v4438_v40, %v4437_v38  ;;  %v17790_v63 = vpack.c.bf16 %v2581_v53, %v2580_v54  ;;  %v17792_v1 = vpack.c.bf16 %v4442_v61, %v4441_v60  ;;  %v2582_v16 = vld [vmem:[#allocation2 + $0x4a] sm:$0xff]  ;;  %v4719_v17 = vld [vmem:[#allocation2 + $0x1c] sm:$0xff]  ;;  %v2588_v13 = vld [vmem:[#allocation2 + $0x92] sm:$0xff] }
 0x20b   : > { %14543 = vmatprep.mubr.msk.bf16.mxu0 %vm1519_vm3, %v17693_v47  ;;  %14787 = vmatprep.mubr.msk.bf16.mxu1 %vm1519_vm3, %v17695_v48  ;;  %v4720_v22 = vld [vmem:[#allocation2 + $0x24] sm:$0xff]  ;;  %v17812_v29 = vpack.c.bf16 %v2583_v5, %v2582_v16  ;;  %v2586_v38 = vld [vmem:[#allocation2 + $0x7a] sm:$0xff]  ;;  %v17837_v61 = vpack.c.bf16 %v4724_v52, %v4723_v50  ;;  %v4726_v5 = vld [vmem:[#allocation2 + $0x6c] sm:$0xff] }
 0x20c   : > { %v2584_v26 = vld [vmem:[#allocation2 + $0x62] sm:$0xff]  ;;  %v17810_v28 = vpack.c.bf16 %v4720_v22, %v4719_v17  ;;  %v2589_v49 = vld [vmem:[#allocation2 + $0x9a] sm:$0xff]  ;;  %v17847_v16 = vld [vmem:[%s19585_s3 + $0xb0] sm:$0xff]  }
 0x20d   : > { %v17814_v37 = vpack.c.bf16 %v2585_v27, %v2584_v26  ;;  %v2587_v40 = vld [vmem:[#allocation2 + $0x82] sm:$0xff]  ;;  %v17831_v60 = vpack.c.bf16 %v2589_v49, %v2588_v13  ;;  %v2590_v17 = vld [vmem:[#allocation2 + $0xaa] sm:$0xff]  ;;  %v2591_v22 = vld [vmem:[#allocation2 + $0xb2] sm:$0xff] }
 0x20e   : > { %v17824_v53 = vpack.c.bf16 %v2587_v40, %v2586_v38  ;;  %v16743_v54 = vld [vmem:[%s19585_s3 + $0xa8] sm:$0xff]   ;;  %v17849_v27 = vpack.c.bf16 %v2591_v22, %v2590_v17  ;;  %v4729_v40 = vld [vmem:[#allocation2 + $0x94] sm:$0xff]  ;;  %v4730_v49 = vld [vmem:[#allocation2 + $0x9c] sm:$0xff] }
 0x20f   : > { %v2593_v26 = vld [vmem:[#allocation2 + $0xca] sm:$0xff]  ;;  %v2595_v13 = vld [vmem:[#allocation2 + $0xe2] sm:$0xff]  ;;  %v4732_v52 = vld [vmem:[#allocation2 + $0xb4] sm:$0xff] }
 0x210   : > { %v1836_v23 = vld [vmem:[#allocation4 + $0x1e0] ss:$2 sm:$0xff]  ;;  %v1900_v24 = vld [vmem:[#allocation4 + $0x1e1] ss:$2 sm:$0xff] }
 0x211   : > { %v1933_v25 = vmax.f32 %v1836_v23, %v1900_v24  ;;  %v4443_v23 = vld [vmem:[#allocation2 + $0x183] sm:$0xff]  ;;  %v4444_v24 = vld [vmem:[#allocation2 + $0x18b] sm:$0xff] }
 0x212   : > { %14544 = vmatmul.mubr.msk.bf16.gmra.mrb[144].mxu0 %vm1519_vm3, %v17709_v3  ;;  %14788 = vmatmul.mubr.msk.bf16.gmra.mrb[0].mxu1 %vm1519_vm3, %v17706_v0  ;;  %v4460_v34 = vpack.c.bf16 %v4444_v24, %v4443_v23  ;;  %v4727_v23 = vld [vmem:[#allocation2 + $0x7c] sm:$0xff]  ;;  %v4731_v50 = vld [vmem:[#allocation2 + $0xac] sm:$0xff]  ;;  %v4733_v17 = vld [vmem:[#allocation2 + $0xc4] sm:$0xff] }
 0x213   : > { %14547 = vmatprep.mubr.msk.bf16.mxu0 %vm1519_vm3, %v17714_v14  ;;  %14791 = vmatprep.mubr.msk.bf16.mxu1 %vm1519_vm3, %v17716_v15  ;;  %2027 = vst.msk [vmem:[#allocation2 + $0x19a] sm:$0xff] %vm1519_vm3, %v1933_v25  ;;  %v17808_v25 = vld [vmem:[%s19585_s3 + $0x40] sm:$0xff]   ;;  %v4734_v22 = vld [vmem:[#allocation2 + $0xcc] sm:$0xff] }
 0x214   : > { %v2592_v24 = vld [vmem:[#allocation2 + $0xc2] sm:$0xff] }
 0x21a   : > { %14548 = vmatmul.mubr.msk.bf16.gmra.mrb[148].mxu0 %vm1519_vm3, %v17738_v55  ;;  %14792 = vmatmul.mubr.msk.bf16.gmra.mrb[4].mxu1 %vm1519_vm3, %v17740_v57 }
 0x21b   : > { %14551 = vmatprep.mubr.msk.bf16.mxu0 %vm1519_vm3, %v17743_v11  ;;  %14795 = vmatprep.mubr.msk.bf16.mxu1 %vm1519_vm3, %v17745_v59 }
 0x222   : > { %14552 = vmatmul.mubr.msk.bf16.gmra.mrb[152].mxu0 %vm1519_vm3, %v17757_v6  ;;  %14796 = vmatmul.mubr.msk.bf16.gmra.mrb[8].mxu1 %vm1519_vm3, %v17759_v10 }
 0x223   : > { %14555 = vmatprep.mubr.msk.bf16.mxu0 %vm1519_vm3, %v17761_v18  ;;  %14799 = vmatprep.mubr.msk.bf16.mxu1 %vm1519_vm3, %v17763_v8 }
 0x22a   : > { %14556 = vmatmul.mubr.msk.bf16.gmra.mrb[156].mxu0 %vm1519_vm3, %v17775_v42  ;;  %14800 = vmatmul.mubr.msk.bf16.gmra.mrb[12].mxu1 %vm1519_vm3, %v17777_v43 }
 0x22b   : > { %14803 = vmatprep.mubr.msk.bf16.mxu1 %vm1519_vm3, %v17779_v44  ;;  %14563 = vmatprep.mubr.msk.bf16.mxu0 %vm1519_vm3, %v2608_v41  ;;  %v4721_v41 = vld [vmem:[#allocation2 + $0x34] sm:$0xff] }
 0x232   : > { %14564 = vmatmul.mubr.msk.bf16.vlgmr.msra.gmra.mrb[128].mxu0 %vm1519_vm3, %v2609_v58  ;;  %14804 = vmatmul.mubr.msk.bf16.gmra.mrb[16].mxu1 %vm1519_vm3, %v17788_v62 }
 0x233   : > { %14567 = vmatprep.mubr.msk.bf16.mxu0 %vm1519_vm3, %v17790_v63  ;;  %14807 = vmatprep.mubr.msk.bf16.mxu1 %vm1519_vm3, %v17792_v1 }
 0x234   : > { %14596 = vmatpush3.bf16.msra.mxu0 %v17647_v9  ;;  %v4722_v9 = vld [vmem:[#allocation2 + $0x3c] sm:$0xff] }
 0x235   : > { %14597 = vmatprep.subr.bf16.mxu0 %v16745_v2  ;;  %v17826_v58 = vpack.c.bf16 %v4722_v9, %v4721_v41  ;;  %v17854_v9 = vpack.c.bf16 %v2593_v26, %v2592_v24  ;;  %v2594_v41 = vld [vmem:[#allocation2 + $0xda] sm:$0xff]  ;;  %v4736_v24 = vld [vmem:[#allocation2 + $0xe4] sm:$0xff]  ;;  %v17880_v26 = vpack.c.bf16 %v4734_v22, %v4733_v17  ;;  %v4742_v17 = vld [vmem:[#allocation2 + $0x12c] sm:$0xff] }
 0x236   : > { %v4743_v22 = vld [vmem:[#allocation2 + $0x13c] sm:$0xff] }
 0x238   : > { %14598 = vmatpush3.bf16.msra.mxu0 %v16745_v2  ;;  %v4725_v2 = vld [vmem:[#allocation2 + $0x64] sm:$0xff] }
 0x239   : > { %14631 = vmatprep.subr.bf16.mxu0 %v17808_v25 }
 0x23a   : > { %14568 = vmatmul.mubr.msk.bf16.gmra.mrb[132].mxu0 %vm1519_vm3, %v17812_v29  ;;  %14808 = vmatmul.mubr.msk.bf16.gmra.mrb[20].mxu1 %vm1519_vm3, %v4460_v34  ;;  %v17851_v34 = vpack.c.bf16 %v4726_v5, %v4725_v2  ;;  %v17868_v2 = vpack.c.bf16 %v4730_v49, %v4729_v40  ;;  %v17870_v5 = vpack.c.bf16 %v4732_v52, %v4731_v50  ;;  %v4738_v40 = vld [vmem:[#allocation2 + $0xfc] sm:$0xff]  ;;  %v4741_v52 = vld [vmem:[#allocation2 + $0x124] sm:$0xff] }
 0x23b   : > { %14571 = vmatprep.mubr.msk.bf16.mxu0 %vm1519_vm3, %v17814_v37  ;;  %14815 = vmatprep.mubr.msk.bf16.mxu1 %vm1519_vm3, %v17810_v28 }
 0x242   : > { %14572 = vmatmul.mubr.msk.bf16.gmra.mrb[136].mxu0 %vm1519_vm3, %v17824_v53  ;;  %14816 = vmatmul.mubr.msk.bf16.vlgmr.msra.gmra.mrb[24].mxu1 %vm1519_vm3, %v17826_v58 }
 0x243   : > { %14848 = vmatpush3.bf16.msra.mxu1 %v17686_v39  ;;  %14575 = vmatprep.mubr.msk.bf16.mxu0 %vm1519_vm3, %v17831_v60  ;;  %v4728_v39 = vld [vmem:[#allocation2 + $0x84] sm:$0xff] }
 0x244   : > { %14819 = vmatprep.mubr.msk.bf16.mxu1 %vm1519_vm3, %v17837_v61  ;;  %14849 = vmatprep.subr.bf16.mxu1 %v16743_v54  ;;  %v17856_v38 = vpack.c.bf16 %v4728_v39, %v4727_v23  ;;  %v4735_v23 = vld [vmem:[#allocation2 + $0xdc] sm:$0xff] }
 0x245   : > { %v17882_v39 = vpack.c.bf16 %v4736_v24, %v4735_v23  ;;  %v4744_v23 = vld [vmem:[#allocation2 + $0x144] sm:$0xff] }
 0x247   : > { %14850 = vmatpush3.bf16.msra.mxu1 %v16743_v54  ;;  %v17866_v54 = vpack.c.bf16 %v2595_v13, %v2594_v41  ;;  %v4739_v41 = vld [vmem:[#allocation2 + $0x10c] sm:$0xff]  ;;  %v4740_v13 = vld [vmem:[#allocation2 + $0x114] sm:$0xff] }
 0x248   : > { %14883 = vmatprep.subr.bf16.mxu1 %v17847_v16  ;;  %v17894_v50 = vpack.c.bf16 %v4740_v13, %v4739_v41  ;;  %v4747_v41 = vld [vmem:[#allocation2 + $0x16c] sm:$0xff]  ;;  %v4748_v13 = vld [vmem:[#allocation2 + $0x174] sm:$0xff] }
 0x24a   : > { %14576 = vmatmul.mubr.msk.bf16.gmra.mrb[140].mxu0 %vm1519_vm3, %v17849_v27  ;;  %14820 = vmatmul.mubr.msk.bf16.gmra.mrb[28].mxu1 %vm1519_vm3, %v17851_v34 }
 0x24b   : > { %14579 = vmatprep.mubr.msk.bf16.mxu0 %vm1519_vm3, %v17854_v9  ;;  %14823 = vmatprep.mubr.msk.bf16.mxu1 %vm1519_vm3, %v17856_v38 }
 0x252   : > { %14580 = vmatmul.mubr.msk.bf16.gmra.mrb[144].mxu0 %vm1519_vm3, %v17866_v54  ;;  %14824 = vmatmul.mubr.msk.bf16.gmra.mrb[0].mxu1 %vm1519_vm3, %v17868_v2 }
 0x253   : > { %14583 = vmatprep.mubr.msk.bf16.mxu0 %vm1519_vm3, %v17481_v31  ;;  %14827 = vmatprep.mubr.msk.bf16.mxu1 %vm1519_vm3, %v17870_v5  ;;  %v4737_v31 = vld [vmem:[#allocation2 + $0xf4] sm:$0xff] }
 0x254   : > { %v17892_v49 = vpack.c.bf16 %v4738_v40, %v4737_v31  ;;  %v17904_v31 = vpack.c.bf16 %v4742_v17, %v4741_v52  ;;  %v17906_v40 = vpack.c.bf16 %v4744_v23, %v4743_v22  ;;  %v4749_v52 = vld [vmem:[#allocation2 + $0x184] sm:$0xff]  ;;  %v4750_v17 = vld [vmem:[#allocation2 + $0x18c] sm:$0xff] }
 0x255   : > { %v16752_v22 = vld [vmem:[%s19585_s3 + $0x50] sm:$0xff]   ;;  %v4766_v23 = vpack.c.bf16 %v4750_v17, %v4749_v52  ;;  %v5353_v17 = vld [vmem:[#allocation2 + $0x139] sm:$0xff] }
 0x25a   : > { %14584 = vmatmul.mubr.msk.bf16.gmra.mrb[148].mxu0 %vm1519_vm3, %v17513_v7  ;;  %14828 = vmatmul.mubr.msk.bf16.gmra.mrb[4].mxu1 %vm1519_vm3, %v17880_v26  ;;  %v2882_v7 = vld [vmem:[#allocation2 + $0x3] sm:$0xff] }
 0x25b   : > { %14587 = vmatprep.mubr.msk.bf16.mxu0 %vm1519_vm3, %v17546_v51  ;;  %14831 = vmatprep.mubr.msk.bf16.mxu1 %vm1519_vm3, %v17882_v39  ;;  %v2883_v51 = vld [vmem:[#allocation2 + $0xb] sm:$0xff] }
 0x25c   : > { %v2914_v24 = vpack.c.bf16 %v2883_v51, %v2882_v7  ;;  %v17917_v51 = vpack.c.bf16 %v4748_v13, %v4747_v41  ;;  %v5351_v41 = vld [vmem:[#allocation2 + $0x121] sm:$0xff]  ;;  %v5352_v13 = vld [vmem:[#allocation2 + $0x129] sm:$0xff] }
 0x25d   : > { %v18082_v52 = vpack.c.bf16 %v5352_v13, %v5351_v41  ;;  %v3511_v41 = vld [vmem:[#allocation2 + $0xd8] sm:$0xff]  ;;  %v3512_v13 = vld [vmem:[#allocation2 + $0xe0] sm:$0xff] }
 0x262   : > { %14588 = vmatmul.mubr.msk.bf16.gmra.mrb[152].mxu0 %vm1519_vm3, %v17573_v32  ;;  %14832 = vmatmul.mubr.msk.bf16.gmra.mrb[8].mxu1 %vm1519_vm3, %v17892_v49  ;;  %v4745_v32 = vld [vmem:[#allocation2 + $0x154] sm:$0xff] }
 0x263   : > { %14591 = vmatprep.mubr.msk.bf16.mxu0 %vm1519_vm3, %v17600_v12  ;;  %14835 = vmatprep.mubr.msk.bf16.mxu1 %vm1519_vm3, %v17894_v50  ;;  %v4746_v12 = vld [vmem:[#allocation2 + $0x15c] sm:$0xff] }
 0x264   : > { %v17915_v7 = vpack.c.bf16 %v4746_v12, %v4745_v32 }
 0x26a   : > { %14592 = vmatmul.mubr.msk.bf16.gmra.mrb[156].mxu0 %vm1519_vm3, %v17627_v56  ;;  %14836 = vmatmul.mubr.msk.bf16.gmra.mrb[12].mxu1 %vm1519_vm3, %v17904_v31  ;;  %v16749_v56 = vld [vmem:[%s19585_s3 + $0x48] sm:$0xff]  }
 0x26b   : > { %14839 = vmatprep.mubr.msk.bf16.mxu1 %vm1519_vm3, %v17906_v40  ;;  %14599 = vmatprep.mubr.msk.bf16.mxu0 %vm1519_vm3, %v2914_v24  ;;  %v5348_v24 = vld [vmem:[#allocation2 + $0xf9] sm:$0xff] }
 0x272   : > { %14600 = vmatmul.mubr.msk.bf16.vlgmr.msra.gmra.mrb[128].mxu0 %vm1519_vm3, %v17649_v19  ;;  %14840 = vmatmul.mubr.msk.bf16.gmra.mrb[16].mxu1 %vm1519_vm3, %v17915_v7  ;;  %v16747_v19 = vld [vmem:[%s19585_s3 + $0xb8] sm:$0xff]  }
 0x273   : > { %14603 = vmatprep.mubr.msk.bf16.mxu0 %vm1519_vm3, %v17665_v33  ;;  %14843 = vmatprep.mubr.msk.bf16.mxu1 %vm1519_vm3, %v17917_v51  ;;  %v5053_v33 = vld [vmem:[#allocation2 + $0x180] sm:$0xff] }
 0x274   : > { %14632 = vmatpush3.bf16.msra.mxu0 %v17808_v25 }
 0x275   : > { %14633 = vmatprep.subr.bf16.mxu0 %v16749_v56 }
 0x278   : > { %14634 = vmatpush3.bf16.msra.mxu0 %v16749_v56 }
 0x279   : > { %14667 = vmatprep.subr.bf16.mxu0 %v16752_v22 }
 0x27a   : > { %14604 = vmatmul.mubr.msk.bf16.gmra.mrb[132].mxu0 %vm1519_vm3, %v17676_v36  ;;  %14844 = vmatmul.mubr.msk.bf16.gmra.mrb[20].mxu1 %vm1519_vm3, %v4766_v23  ;;  %v5355_v23 = vld [vmem:[#allocation2 + $0x151] sm:$0xff] }
 0x27b   : > { %14607 = vmatprep.mubr.msk.bf16.mxu0 %vm1519_vm3, %v17690_v46  ;;  %14851 = vmatprep.mubr.msk.bf16.mxu1 %vm1519_vm3, %v17638_v4  ;;  %v16750_v4 = vld [vmem:[%s19585_s3 + $0xc0] sm:$0xff]   ;;  %v5055_v46 = vld [vmem:[#allocation2 + $0x198] sm:$0xff] }
 0x282   : > { %14608 = vmatmul.mubr.msk.bf16.gmra.mrb[136].mxu0 %vm1519_vm3, %v17695_v48  ;;  %14852 = vmatmul.mubr.msk.bf16.vlgmr.msra.gmra.mrb[24].mxu1 %vm1519_vm3, %v17651_v20  ;;  %v3188_v20 = vld [vmem:[#allocation2 + $0x4] sm:$0xff] }
 0x283   : > { %14884 = vmatpush3.bf16.msra.mxu1 %v17847_v16  ;;  %14611 = vmatprep.mubr.msk.bf16.mxu0 %vm1519_vm3, %v17706_v0  ;;  %v18011_v48 = vld [vmem:[%s19585_s3 + $0x60] sm:$0xff]   ;;  %v5331_v0 = vld [vmem:[#allocation2 + $0x31] sm:$0xff]  ;;  %v5344_v16 = vld [vmem:[#allocation2 + $0xc9] sm:$0xff] }
 0x284   : > { %14855 = vmatprep.mubr.msk.bf16.mxu1 %vm1519_vm3, %v17654_v21  ;;  %14885 = vmatprep.subr.bf16.mxu1 %v16747_v19  ;;  %v3189_v21 = vld [vmem:[#allocation2 + $0xc] sm:$0xff] }
 0x287   : > { %14886 = vmatpush3.bf16.msra.mxu1 %v16747_v19  ;;  %v5356_v19 = vld [vmem:[#allocation2 + $0x159] sm:$0xff] }
 0x288   : > { %14919 = vmatprep.subr.bf16.mxu1 %v16750_v4 }
 0x28a   : > { %14612 = vmatmul.mubr.msk.bf16.gmra.mrb[140].mxu0 %vm1519_vm3, %v17716_v15  ;;  %14856 = vmatmul.mubr.msk.bf16.gmra.mrb[28].mxu1 %vm1519_vm3, %v17663_v30  ;;  %v3220_v30 = vpack.c.bf16 %v3189_v21, %v3188_v20  ;;  %v18094_v21 = vpack.c.bf16 %v5356_v19, %v5355_v23  ;;  %v5653_v19 = vld [vmem:[#allocation2 + $0xf2] sm:$0xff] }
 0x28b   : > { %14615 = vmatprep.mubr.msk.bf16.mxu0 %vm1519_vm3, %v17740_v57  ;;  %14859 = vmatprep.mubr.msk.bf16.mxu1 %vm1519_vm3, %v17670_v35  ;;  %v5054_v35 = vld [vmem:[#allocation2 + $0x188] sm:$0xff]  ;;  %v5334_v57 = vld [vmem:[#allocation2 + $0x51] sm:$0xff] }
 0x28c   : > { %v17995_v36 = vpack.c.bf16 %v5054_v35, %v5053_v33  ;;  %v5358_v33 = vld [vmem:[#allocation2 + $0x171] sm:$0xff]  ;;  %v3499_v35 = vld [vmem:[#allocation2 + $0x48] sm:$0xff] }
 0x292   : > { %14616 = vmatmul.mubr.msk.bf16.gmra.mrb[144].mxu0 %vm1519_vm3, %v17745_v59  ;;  %14860 = vmatmul.mubr.msk.bf16.gmra.mrb[0].mxu1 %vm1519_vm3, %v17688_v45  ;;  %v16753_v45 = vld [vmem:[%s19585_s3 + $0x58] sm:$0xff]   ;;  %v5336_v59 = vld [vmem:[#allocation2 + $0x69] sm:$0xff] }
 0x293   : > { %14619 = vmatprep.mubr.msk.bf16.mxu0 %vm1519_vm3, %v17759_v10  ;;  %14863 = vmatprep.mubr.msk.bf16.mxu1 %vm1519_vm3, %v17693_v47  ;;  %v5056_v47 = vld [vmem:[#allocation2 + $0x1a0] sm:$0xff]  ;;  %v16751_v10 = vld [vmem:[%s19585_s3 + $0xc8] sm:$0xff]  }
 0x29a   : > { %14620 = vmatmul.mubr.msk.bf16.gmra.mrb[148].mxu0 %vm1519_vm3, %v17763_v8  ;;  %14864 = vmatmul.mubr.msk.bf16.gmra.mrb[4].mxu1 %vm1519_vm3, %v17709_v3  ;;  %v5332_v3 = vld [vmem:[#allocation2 + $0x39] sm:$0xff]  ;;  %v18041_v8 = vld [vmem:[%s19585_s3 + $0xd0] sm:$0xff]  }
 0x29b   : > { %14623 = vmatprep.mubr.msk.bf16.mxu0 %vm1519_vm3, %v17777_v43  ;;  %14867 = vmatprep.mubr.msk.bf16.mxu1 %vm1519_vm3, %v17714_v14  ;;  %v5072_v14 = vpack.c.bf16 %v5056_v47, %v5055_v46  ;;  %v18013_v15 = vpack.c.bf16 %v5332_v3, %v5331_v0  ;;  %v5338_v43 = vld [vmem:[#allocation2 + $0x81] sm:$0xff]  ;;  %v5360_v47 = vld [vmem:[#allocation2 + $0x189] sm:$0xff] }
 0x29c   : > { %v5359_v46 = vld [vmem:[#allocation2 + $0x181] sm:$0xff] }
 0x2a2   : > { %14624 = vmatmul.mubr.msk.bf16.gmra.mrb[152].mxu0 %vm1519_vm3, %v17779_v44  ;;  %14868 = vmatmul.mubr.msk.bf16.gmra.mrb[8].mxu1 %vm1519_vm3, %v17738_v55  ;;  %v5333_v55 = vld [vmem:[#allocation2 + $0x49] sm:$0xff]  ;;  %v5339_v44 = vld [vmem:[#allocation2 + $0x91] sm:$0xff] }
 0x2a3   : > { %14627 = vmatprep.mubr.msk.bf16.mxu0 %vm1519_vm3, %v17788_v62  ;;  %14871 = vmatprep.mubr.msk.bf16.mxu1 %vm1519_vm3, %v17743_v11  ;;  %v5335_v11 = vld [vmem:[#allocation2 + $0x61] sm:$0xff]  ;;  %v5340_v62 = vld [vmem:[#allocation2 + $0x99] sm:$0xff] }
 0x2a4   : > { %v18046_v25 = vpack.c.bf16 %v5340_v62, %v5339_v44 }
 0x2aa   : > { %14628 = vmatmul.mubr.msk.bf16.gmra.mrb[156].mxu0 %vm1519_vm3, %v17792_v1  ;;  %14872 = vmatmul.mubr.msk.bf16.gmra.mrb[12].mxu1 %vm1519_vm3, %v17757_v6  ;;  %v18023_v6 = vpack.c.bf16 %v5334_v57, %v5333_v55  ;;  %v16757_v55 = vld [vmem:[%s19585_s3 + $0x68] sm:$0xff]   ;;  %v3501_v57 = vld [vmem:[#allocation2 + $0x60] sm:$0xff] }
 0x2ab   : > { %14875 = vmatprep.mubr.msk.bf16.mxu1 %vm1519_vm3, %v17761_v18  ;;  %14635 = vmatprep.mubr.msk.bf16.mxu0 %vm1519_vm3, %v3220_v30  ;;  %v18032_v18 = vpack.c.bf16 %v5336_v59, %v5335_v11  ;;  %v5357_v30 = vld [vmem:[#allocation2 + $0x169] sm:$0xff]  ;;  %v5361_v59 = vld [vmem:[#allocation2 + $0x199] sm:$0xff] }
 0x2ac   : > { %v18103_v3 = vpack.c.bf16 %v5358_v33, %v5357_v30  ;;  %v3502_v11 = vld [vmem:[#allocation2 + $0x68] sm:$0xff] }
 0x2ad   : > { %v18120_v44 = vpack.c.bf16 %v3502_v11, %v3501_v57  ;;  %v5658_v57 = vld [vmem:[#allocation2 + $0x12a] sm:$0xff] }
 0x2b2   : > { %14636 = vmatmul.mubr.msk.bf16.vlgmr.msra.gmra.mrb[128].mxu0 %vm1519_vm3, %v17810_v28  ;;  %14876 = vmatmul.mubr.msk.bf16.gmra.mrb[16].mxu1 %vm1519_vm3, %v17775_v42  ;;  %v5337_v42 = vld [vmem:[#allocation2 + $0x79] sm:$0xff]  ;;  %v5341_v28 = vld [vmem:[#allocation2 + $0xa9] sm:$0xff] }
 0x2b3   : > { %14639 = vmatprep.mubr.msk.bf16.mxu0 %vm1519_vm3, %v17826_v58  ;;  %14879 = vmatprep.mubr.msk.bf16.mxu1 %vm1519_vm3, %v17995_v36  ;;  %v18043_v1 = vpack.c.bf16 %v5338_v43, %v5337_v42  ;;  %v5342_v58 = vld [vmem:[#allocation2 + $0xb1] sm:$0xff]  ;;  %v3504_v43 = vld [vmem:[#allocation2 + $0x80] sm:$0xff] }
 0x2b4   : > { %14668 = vmatpush3.bf16.msra.mxu0 %v16752_v22  ;;  %v5354_v22 = vld [vmem:[#allocation2 + $0x141] sm:$0xff]  ;;  %v3503_v42 = vld [vmem:[#allocation2 + $0x78] sm:$0xff] }
 0x2b5   : > { %14669 = vmatprep.subr.bf16.mxu0 %v16753_v45  ;;  %v18092_v20 = vpack.c.bf16 %v5354_v22, %v5353_v17  ;;  %v3516_v17 = vld [vmem:[#allocation2 + $0x110] sm:$0xff] }
 0x2b8   : > { %14670 = vmatpush3.bf16.msra.mxu0 %v16753_v45  ;;  %v3500_v45 = vld [vmem:[#allocation2 + $0x50] sm:$0xff] }
 0x2b9   : > { %14703 = vmatprep.subr.bf16.mxu0 %v18011_v48 }
 0x2ba   : > { %14640 = vmatmul.mubr.msk.bf16.gmra.mrb[132].mxu0 %vm1519_vm3, %v17837_v61  ;;  %14880 = vmatmul.mubr.msk.bf16.gmra.mrb[20].mxu1 %vm1519_vm3, %v5072_v14  ;;  %v5343_v61 = vld [vmem:[#allocation2 + $0xc1] sm:$0xff]  ;;  %v18107_v14 = vpack.c.bf16 %v5360_v47, %v5359_v46  ;;  %v3522_v46 = vld [vmem:[#allocation2 + $0x158] sm:$0xff] }
 0x2bb   : > { %14643 = vmatprep.mubr.msk.bf16.mxu0 %vm1519_vm3, %v17851_v34  ;;  %14887 = vmatprep.mubr.msk.bf16.mxu1 %vm1519_vm3, %v18013_v15  ;;  %v18056_v34 = vpack.c.bf16 %v5342_v58, %v5341_v28  ;;  %v18122_v28 = vpack.c.bf16 %v3504_v43, %v3503_v42  ;;  %v18127_v58 = vld [vmem:[%s19585_s3 + $0x70] sm:$0xff]   ;;  %v5657_v47 = vld [vmem:[#allocation2 + $0x122] sm:$0xff]  ;;  %v3801_v42 = vld [vmem:[#allocation2 + $0x19] sm:$0xff] }
 0x2bc   : > { %v3802_v43 = vld [vmem:[#allocation2 + $0x21] sm:$0xff] }
 0x2c2   : > { %14644 = vmatmul.mubr.msk.bf16.gmra.mrb[136].mxu0 %vm1519_vm3, %v17856_v38  ;;  %14888 = vmatmul.mubr.msk.bf16.vlgmr.msra.gmra.mrb[24].mxu1 %vm1519_vm3, %v18023_v6  ;;  %v18058_v38 = vpack.c.bf16 %v5344_v16, %v5343_v61  ;;  %v3506_v61 = vld [vmem:[#allocation2 + $0x98] sm:$0xff]  ;;  %v3507_v16 = vld [vmem:[#allocation2 + $0xa8] sm:$0xff] }
 0x2c3   : > { %14920 = vmatpush3.bf16.msra.mxu1 %v16750_v4  ;;  %14647 = vmatprep.mubr.msk.bf16.mxu0 %vm1519_vm3, %v17868_v2  ;;  %v5345_v2 = vld [vmem:[#allocation2 + $0xd9] sm:$0xff] }
 0x2c4   : > { %14891 = vmatprep.mubr.msk.bf16.mxu1 %vm1519_vm3, %v18032_v18  ;;  %14921 = vmatprep.subr.bf16.mxu1 %v16751_v10 }
 0x2c7   : > { %14922 = vmatpush3.bf16.msra.mxu1 %v16751_v10  ;;  %v5362_v10 = vld [vmem:[#allocation2 + $0x1a1] sm:$0xff] }
 0x2c8   : > { %14955 = vmatprep.subr.bf16.mxu1 %v18041_v8  ;;  %v5378_v62 = vpack.c.bf16 %v5362_v10, %v5361_v59 }
 0x2ca   : > { %14648 = vmatmul.mubr.msk.bf16.gmra.mrb[140].mxu0 %vm1519_vm3, %v17870_v5  ;;  %14892 = vmatmul.mubr.msk.bf16.gmra.mrb[28].mxu1 %vm1519_vm3, %v18043_v1  ;;  %v5346_v5 = vld [vmem:[#allocation2 + $0xe1] sm:$0xff] }
 0x2cb   : > { %14651 = vmatprep.mubr.msk.bf16.mxu0 %vm1519_vm3, %v17880_v26  ;;  %14895 = vmatprep.mubr.msk.bf16.mxu1 %vm1519_vm3, %v18046_v25  ;;  %v5347_v26 = vld [vmem:[#allocation2 + $0xf1] sm:$0xff]  ;;  %v18068_v32 = vpack.c.bf16 %v5346_v5, %v5345_v2 }
 0x2cc   : > { %v18070_v12 = vpack.c.bf16 %v5348_v24, %v5347_v26  ;;  %v3508_v2 = vld [vmem:[#allocation2 + $0xb0] sm:$0xff]  ;;  %v16755_v26 = vld [vmem:[%s19585_s3 + $0xd8] sm:$0xff]  }
 0x2cd   : > { %v18142_v24 = vpack.c.bf16 %v3508_v2, %v3507_v16  ;;  %v5662_v16 = vld [vmem:[#allocation2 + $0x15a] sm:$0xff]  ;;  %v3833_v2 = vpack.c.bf16 %v3802_v43, %v3801_v42  ;;  %v5956_v42 = vld [vmem:[#allocation2 + $0xcb] sm:$0xff] }
 0x2d2   : > { %14652 = vmatmul.mubr.msk.bf16.gmra.mrb[144].mxu0 %vm1519_vm3, %v17882_v39  ;;  %14896 = vmatmul.mubr.msk.bf16.gmra.mrb[0].mxu1 %vm1519_vm3, %v18056_v34  ;;  %v5349_v39 = vld [vmem:[#allocation2 + $0x109] sm:$0xff] }
 0x2d3   : > { %14655 = vmatprep.mubr.msk.bf16.mxu0 %vm1519_vm3, %v17892_v49  ;;  %14899 = vmatprep.mubr.msk.bf16.mxu1 %vm1519_vm3, %v18058_v38  ;;  %v5350_v49 = vld [vmem:[#allocation2 + $0x111] sm:$0xff] }
 0x2d4   : > { %v18080_v56 = vpack.c.bf16 %v5350_v49, %v5349_v39  ;;  %v3509_v39 = vld [vmem:[#allocation2 + $0xc0] sm:$0xff]  ;;  %v3510_v49 = vld [vmem:[#allocation2 + $0xc8] sm:$0xff] }
 0x2da   : > { %14656 = vmatmul.mubr.msk.bf16.gmra.mrb[148].mxu0 %vm1519_vm3, %v17894_v50  ;;  %14900 = vmatmul.mubr.msk.bf16.gmra.mrb[4].mxu1 %vm1519_vm3, %v18068_v32  ;;  %v3495_v50 = vld [vmem:[#allocation2 + $0x18] sm:$0xff] }
 0x2db   : > { %14659 = vmatprep.mubr.msk.bf16.mxu0 %vm1519_vm3, %v17904_v31  ;;  %14903 = vmatprep.mubr.msk.bf16.mxu1 %vm1519_vm3, %v18070_v12  ;;  %v3496_v31 = vld [vmem:[#allocation2 + $0x20] sm:$0xff] }
 0x2dc   : > { %v3527_v4 = vpack.c.bf16 %v3496_v31, %v3495_v50  ;;  %v3514_v50 = vld [vmem:[#allocation2 + $0xf8] sm:$0xff]  ;;  %v3515_v31 = vld [vmem:[#allocation2 + $0x108] sm:$0xff] }
 0x2dd   : > { %v18173_v23 = vpack.c.bf16 %v3516_v17, %v3515_v31  ;;  %v5668_v17 = vld [vmem:[#allocation2 + $0x1a2] sm:$0xff] }
 0x2e2   : > { %14660 = vmatmul.mubr.msk.bf16.gmra.mrb[152].mxu0 %vm1519_vm3, %v17906_v40  ;;  %14904 = vmatmul.mubr.msk.bf16.gmra.mrb[8].mxu1 %vm1519_vm3, %v18080_v56  ;;  %v3497_v40 = vld [vmem:[#allocation2 + $0x30] sm:$0xff] }
 0x2e3   : > { %14663 = vmatprep.mubr.msk.bf16.mxu0 %vm1519_vm3, %v17915_v7  ;;  %14907 = vmatprep.mubr.msk.bf16.mxu1 %vm1519_vm3, %v18082_v52  ;;  %v3498_v7 = vld [vmem:[#allocation2 + $0x38] sm:$0xff] }
 0x2e4   : > { %v3528_v0 = vpack.c.bf16 %v3498_v7, %v3497_v40  ;;  %v3520_v40 = vld [vmem:[#allocation2 + $0x140] sm:$0xff] }
 0x2e5   : > { %v5654_v7 = vld [vmem:[#allocation2 + $0xfa] sm:$0xff] }
 0x2ea   : > { %14664 = vmatmul.mubr.msk.bf16.gmra.mrb[156].mxu0 %vm1519_vm3, %v17917_v51  ;;  %14908 = vmatmul.mubr.msk.bf16.gmra.mrb[12].mxu1 %vm1519_vm3, %v18092_v20  ;;  %v18105_v51 = vpack.c.bf16 %v3500_v45, %v3499_v35  ;;  %v18187_v35 = vpack.c.bf16 %v5654_v7, %v5653_v19  ;;  %v3521_v45 = vld [vmem:[#allocation2 + $0x150] sm:$0xff] }
 0x2eb   : > { %14911 = vmatprep.mubr.msk.bf16.mxu1 %vm1519_vm3, %v18094_v21  ;;  %14671 = vmatprep.mubr.msk.bf16.mxu0 %vm1519_vm3, %v3527_v4  ;;  %v3519_v4 = vld [vmem:[#allocation2 + $0x138] sm:$0xff]  ;;  %v18197_v11 = vpack.c.bf16 %v3522_v46, %v3521_v45  ;;  %v5948_v7 = vld [vmem:[#allocation2 + $0x6b] sm:$0xff]  ;;  %v5950_v45 = vld [vmem:[#allocation2 + $0x83] sm:$0xff] }
 0x2ec   : > { %v18185_v33 = vpack.c.bf16 %v3520_v40, %v3519_v4  ;;  %v5947_v40 = vld [vmem:[#allocation2 + $0x63] sm:$0xff]  ;;  %v5951_v46 = vld [vmem:[#allocation2 + $0x93] sm:$0xff] }
 0x2f2   : > { %14672 = vmatmul.mubr.msk.bf16.vlgmr.msra.gmra.mrb[128].mxu0 %vm1519_vm3, %v3528_v0  ;;  %14912 = vmatmul.mubr.msk.bf16.gmra.mrb[16].mxu1 %vm1519_vm3, %v18103_v3  ;;  %v3523_v0 = vld [vmem:[#allocation2 + $0x168] sm:$0xff] }
 0x2f3   : > { %14675 = vmatprep.mubr.msk.bf16.mxu0 %vm1519_vm3, %v18105_v51  ;;  %14915 = vmatprep.mubr.msk.bf16.mxu1 %vm1519_vm3, %v18107_v14 }
 0x2f4   : > { %14704 = vmatpush3.bf16.msra.mxu0 %v18011_v48  ;;  %v3505_v48 = vld [vmem:[#allocation2 + $0x90] sm:$0xff] }
 0x2f5   : > { %14705 = vmatprep.subr.bf16.mxu0 %v16757_v55  ;;  %v18137_v5 = vpack.c.bf16 %v3506_v61, %v3505_v48  ;;  %v5660_v48 = vld [vmem:[#allocation2 + $0x142] sm:$0xff]  ;;  %v5661_v61 = vld [vmem:[#allocation2 + $0x152] sm:$0xff] }
 0x2f8   : > { %14706 = vmatpush3.bf16.msra.mxu0 %v16757_v55  ;;  %v3524_v55 = vld [vmem:[#allocation2 + $0x170] sm:$0xff] }
 0x2f9   : > { %14739 = vmatprep.subr.bf16.mxu0 %v18127_v58  ;;  %v18201_v10 = vpack.c.bf16 %v3524_v55, %v3523_v0  ;;  %v5954_v55 = vld [vmem:[#allocation2 + $0xb3] sm:$0xff] }
 0x2fa   : > { %14676 = vmatmul.mubr.msk.bf16.gmra.mrb[132].mxu0 %vm1519_vm3, %v18120_v44  ;;  %14916 = vmatmul.mubr.msk.bf16.gmra.mrb[20].mxu1 %vm1519_vm3, %v5378_v62  ;;  %v5659_v62 = vld [vmem:[#allocation2 + $0x13a] sm:$0xff] }
 0x2fb   : > { %14679 = vmatprep.mubr.msk.bf16.mxu0 %vm1519_vm3, %v18122_v28  ;;  %14923 = vmatprep.mubr.msk.bf16.mxu1 %vm1519_vm3, %v17790_v63  ;;  %v18156_v63 = vld [vmem:[%s19585_s3 + $0xe0] sm:$0xff]  }
 0x302   : > { %14680 = vmatmul.mubr.msk.bf16.gmra.mrb[136].mxu0 %vm1519_vm3, %v18137_v5  ;;  %14924 = vmatmul.mubr.msk.bf16.vlgmr.msra.gmra.mrb[24].mxu1 %vm1519_vm3, %v17812_v29  ;;  %v18158_v29 = vpack.c.bf16 %v3510_v49, %v3509_v39  ;;  %v18215_v39 = vpack.c.bf16 %v5662_v16, %v5661_v61  ;;  %v5663_v49 = vld [vmem:[#allocation2 + $0x16a] sm:$0xff]  ;;  %v5960_v61 = vld [vmem:[#allocation2 + $0xfb] sm:$0xff] }
 0x303   : > { %14956 = vmatpush3.bf16.msra.mxu1 %v18041_v8  ;;  %14683 = vmatprep.mubr.msk.bf16.mxu0 %vm1519_vm3, %v18142_v24  ;;  %v18161_v8 = vpack.c.bf16 %v3512_v13, %v3511_v41  ;;  %v5664_v41 = vld [vmem:[#allocation2 + $0x172] sm:$0xff]  ;;  %v5665_v13 = vld [vmem:[#allocation2 + $0x182] sm:$0xff] }
 0x304   : > { %14927 = vmatprep.mubr.msk.bf16.mxu1 %vm1519_vm3, %v17814_v37  ;;  %14957 = vmatprep.subr.bf16.mxu1 %v16755_v26  ;;  %v3513_v37 = vld [vmem:[#allocation2 + $0xf0] sm:$0xff] }
 0x305   : > { %v18171_v22 = vpack.c.bf16 %v3514_v50, %v3513_v37  ;;  %v5666_v37 = vld [vmem:[#allocation2 + $0x18a] sm:$0xff]  ;;  %v18224_v50 = vpack.c.bf16 %v5664_v41, %v5663_v49 }
 0x306   : > { %v18226_v31 = vpack.c.bf16 %v5666_v37, %v5665_v13  ;;  %v5963_v49 = vld [vmem:[#allocation2 + $0x123] sm:$0xff]  ;;  %v5964_v41 = vld [vmem:[#allocation2 + $0x12b] sm:$0xff] }
 0x307   : > { %14958 = vmatpush3.bf16.msra.mxu1 %v16755_v26  ;;  %v18213_v26 = vpack.c.bf16 %v5660_v48, %v5659_v62  ;;  %v5959_v48 = vld [vmem:[#allocation2 + $0xf3] sm:$0xff]  ;;  %v18309_v37 = vpack.c.bf16 %v5964_v41, %v5963_v49 }
 0x308   : > { %14991 = vmatprep.subr.bf16.mxu1 %v18156_v63  ;;  %v6251_v49 = vld [vmem:[#allocation2 + $0x4c] sm:$0xff]  ;;  %v6252_v41 = vld [vmem:[#allocation2 + $0x54] sm:$0xff] }
 0x30a   : > { %14684 = vmatmul.mubr.msk.bf16.gmra.mrb[140].mxu0 %vm1519_vm3, %v18158_v29  ;;  %14928 = vmatmul.mubr.msk.bf16.gmra.mrb[28].mxu1 %vm1519_vm3, %v17824_v53  ;;  %v3517_v53 = vld [vmem:[#allocation2 + $0x120] sm:$0xff] }
 0x30b   : > { %14687 = vmatprep.mubr.msk.bf16.mxu0 %vm1519_vm3, %v18161_v8  ;;  %14931 = vmatprep.mubr.msk.bf16.mxu1 %vm1519_vm3, %v17831_v60  ;;  %v3518_v60 = vld [vmem:[#allocation2 + $0x128] sm:$0xff] }
 0x30c   : > { %v18183_v30 = vpack.c.bf16 %v3518_v60, %v3517_v53  ;;  %v16832_v53 = vld [vmem:[%s19585_s3 + $0x78] sm:$0xff]  }
 0x30d   : > { %v5943_v60 = vld [vmem:[#allocation2 + $0x33] sm:$0xff] }
 0x312   : > { %14688 = vmatmul.mubr.msk.bf16.gmra.mrb[144].mxu0 %vm1519_vm3, %v18171_v22  ;;  %14932 = vmatmul.mubr.msk.bf16.gmra.mrb[0].mxu1 %vm1519_vm3, %v17849_v27  ;;  %v5655_v27 = vld [vmem:[#allocation2 + $0x10a] sm:$0xff] }
 0x313   : > { %14691 = vmatprep.mubr.msk.bf16.mxu0 %vm1519_vm3, %v18173_v23  ;;  %14935 = vmatprep.mubr.msk.bf16.mxu1 %vm1519_vm3, %v17854_v9  ;;  %v5656_v9 = vld [vmem:[#allocation2 + $0x112] sm:$0xff] }
 0x314   : > { %v18199_v59 = vpack.c.bf16 %v5656_v9, %v5655_v27  ;;  %v16759_v9 = vld [vmem:[%s19585_s3 + $0xe8] sm:$0xff]  }
 0x31a   : > { %14692 = vmatmul.mubr.msk.bf16.gmra.mrb[148].mxu0 %vm1519_vm3, %v18183_v30  ;;  %14936 = vmatmul.mubr.msk.bf16.gmra.mrb[4].mxu1 %vm1519_vm3, %v17866_v54  ;;  %v18203_v54 = vpack.c.bf16 %v5658_v57, %v5657_v47  ;;  %v5952_v47 = vld [vmem:[#allocation2 + $0x9b] sm:$0xff]  ;;  %v5955_v57 = vld [vmem:[#allocation2 + $0xc3] sm:$0xff] }
 0x31b   : > { %14695 = vmatprep.mubr.msk.bf16.mxu0 %vm1519_vm3, %v18185_v33  ;;  %14939 = vmatprep.mubr.msk.bf16.mxu1 %vm1519_vm3, %v18187_v35  ;;  %v18285_v62 = vpack.c.bf16 %v5956_v42, %v5955_v57  ;;  %v4114_v57 = vld [vmem:[#allocation2 + $0x6a] sm:$0xff]  ;;  %v5973_v42 = vld [vmem:[#allocation2 + $0x19b] sm:$0xff] }
 0x322   : > { %14696 = vmatmul.mubr.msk.bf16.gmra.mrb[152].mxu0 %vm1519_vm3, %v18197_v11  ;;  %14940 = vmatmul.mubr.msk.bf16.gmra.mrb[8].mxu1 %vm1519_vm3, %v18199_v59 }
 0x323   : > { %14699 = vmatprep.mubr.msk.bf16.mxu0 %vm1519_vm3, %v18201_v10  ;;  %14943 = vmatprep.mubr.msk.bf16.mxu1 %vm1519_vm3, %v18203_v54 }
 0x32a   : > { %14700 = vmatmul.mubr.msk.bf16.gmra.mrb[156].mxu0 %vm1519_vm3, %v17995_v36  ;;  %14944 = vmatmul.mubr.msk.bf16.gmra.mrb[12].mxu1 %vm1519_vm3, %v18213_v26  ;;  %v5667_v36 = vld [vmem:[#allocation2 + $0x19a] sm:$0xff] }
 0x32b   : > { %14947 = vmatprep.mubr.msk.bf16.mxu1 %vm1519_vm3, %v18215_v39  ;;  %14707 = vmatprep.mubr.msk.bf16.mxu0 %vm1519_vm3, %v3833_v2  ;;  %v18240_v19 = vpack.c.bf16 %v5668_v17, %v5667_v36  ;;  %v18297_v2 = vpack.c.bf16 %v5960_v61, %v5959_v48  ;;  %v5965_v36 = vld [vmem:[#allocation2 + $0x13b] sm:$0xff]  ;;  %v5966_v17 = vld [vmem:[#allocation2 + $0x143] sm:$0xff] }
 0x32c   : > { %v6250_v48 = vld [vmem:[#allocation2 + $0x3c] sm:$0xff] }
 0x332   : > { %14708 = vmatmul.mubr.msk.bf16.vlgmr.msra.gmra.mrb[128].mxu0 %vm1519_vm3, %v18013_v15  ;;  %14948 = vmatmul.mubr.msk.bf16.gmra.mrb[16].mxu1 %vm1519_vm3, %v18224_v50  ;;  %v5944_v15 = vld [vmem:[#allocation2 + $0x3b] sm:$0xff] }
 0x333   : > { %14711 = vmatprep.mubr.msk.bf16.mxu0 %vm1519_vm3, %v18023_v6  ;;  %14951 = vmatprep.mubr.msk.bf16.mxu1 %vm1519_vm3, %v18226_v31  ;;  %v5975_v4 = vpack.c.bf16 %v5944_v15, %v5943_v60  ;;  %v5945_v6 = vld [vmem:[#allocation2 + $0x4b] sm:$0xff]  ;;  %v5968_v60 = vld [vmem:[#allocation2 + $0x15b] sm:$0xff] }
 0x334   : > { %14740 = vmatpush3.bf16.msra.mxu0 %v18127_v58  ;;  %v5946_v58 = vld [vmem:[#allocation2 + $0x53] sm:$0xff] }
 0x335   : > { %14741 = vmatprep.subr.bf16.mxu0 %v16832_v53  ;;  %v18249_v27 = vpack.c.bf16 %v5946_v58, %v5945_v6  ;;  %v5969_v58 = vld [vmem:[#allocation2 + $0x16b] sm:$0xff] }
 0x338   : > { %14742 = vmatpush3.bf16.msra.mxu0 %v16832_v53  ;;  %v5967_v53 = vld [vmem:[#allocation2 + $0x153] sm:$0xff] }
 0x339   : > { %v18321_v6 = vpack.c.bf16 %v5968_v60, %v5967_v53  ;;  %v16762_v60 = vld [vmem:[%s19585_s3 + $0x100] sm:$0xff]  }
 0x33a   : > { %14712 = vmatmul.mubr.msk.bf16.gmra.mrb[132].mxu0 %vm1519_vm3, %v18032_v18  ;;  %14952 = vmatmul.mubr.msk.bf16.gmra.mrb[20].mxu1 %vm1519_vm3, %v18240_v19  ;;  %v18258_v18 = vpack.c.bf16 %v5948_v7, %v5947_v40  ;;  %v5970_v40 = vld [vmem:[#allocation2 + $0x173] sm:$0xff]  ;;  %v4111_v7 = vld [vmem:[#allocation2 + $0x4a] sm:$0xff] }
 0x33b   : > { %14715 = vmatprep.mubr.msk.bf16.mxu0 %vm1519_vm3, %v18043_v1  ;;  %14959 = vmatprep.mubr.msk.bf16.mxu1 %vm1519_vm3, %v5975_v4  ;;  %v18268_v1 = vld [vmem:[%s19585_s3 + $0xf0] sm:$0xff]   ;;  %v18319_v4 = vpack.c.bf16 %v5966_v17, %v5965_v36  ;;  %v18352_v36 = vpack.c.bf16 %v6252_v41, %v6251_v49  ;;  %v16761_v17 = vld [vmem:[%s19585_s3 + $0xf8] sm:$0xff]  }
 0x33c   : > { %v6267_v49 = vld [vmem:[#allocation2 + $0x10c] sm:$0xff]  ;;  %v6268_v41 = vld [vmem:[#allocation2 + $0x114] sm:$0xff] }
 0x342   : > { %14716 = vmatmul.mubr.msk.bf16.gmra.mrb[136].mxu0 %vm1519_vm3, %v18046_v25  ;;  %14960 = vmatmul.mubr.msk.bf16.vlgmr.msra.gmra.mrb[24].mxu1 %vm1519_vm3, %v18249_v27  ;;  %v5949_v25 = vld [vmem:[#allocation2 + $0x7b] sm:$0xff] }
 0x343   : > { %14992 = vmatpush3.bf16.msra.mxu1 %v18156_v63  ;;  %14719 = vmatprep.mubr.msk.bf16.mxu0 %vm1519_vm3, %v18056_v34  ;;  %v18270_v0 = vpack.c.bf16 %v5950_v45, %v5949_v25  ;;  %v18273_v63 = vpack.c.bf16 %v5952_v47, %v5951_v46  ;;  %v5953_v34 = vld [vmem:[#allocation2 + $0xab] sm:$0xff]  ;;  %v5971_v25 = vld [vmem:[#allocation2 + $0x183] sm:$0xff]  ;;  %v18330_v47 = vpack.c.bf16 %v5970_v40, %v5969_v58 }
 0x344   : > { %14963 = vmatprep.mubr.msk.bf16.mxu1 %vm1519_vm3, %v18258_v18  ;;  %14993 = vmatprep.subr.bf16.mxu1 %v16759_v9  ;;  %v18283_v43 = vpack.c.bf16 %v5954_v55, %v5953_v34  ;;  %v5972_v45 = vld [vmem:[#allocation2 + $0x18b] sm:$0xff]  ;;  %v4113_v55 = vld [vmem:[#allocation2 + $0x62] sm:$0xff] }
 0x345   : > { %v18334_v34 = vpack.c.bf16 %v5972_v45, %v5971_v25  ;;  %v18343_v61 = vpack.c.bf16 %v4114_v57, %v4113_v55  ;;  %v6258_v58 = vld [vmem:[#allocation2 + $0x9c] sm:$0xff]  ;;  %v6261_v25 = vld [vmem:[#allocation2 + $0xc4] sm:$0xff]  ;;  %v6262_v45 = vld [vmem:[#allocation2 + $0xcc] sm:$0xff] }
 0x346   : > { %v18377_v55 = vpack.c.bf16 %v6262_v45, %v6261_v25  ;;  %v6263_v57 = vld [vmem:[#allocation2 + $0xdc] sm:$0xff]  ;;  %v6275_v45 = vld [vmem:[#allocation2 + $0x16c] sm:$0xff] }
 0x347   : > { %14994 = vmatpush3.bf16.msra.mxu1 %v16759_v9  ;;  %v4112_v9 = vld [vmem:[#allocation2 + $0x52] sm:$0xff] }
 0x348   : > { %15027 = vmatprep.subr.bf16.mxu1 %v18268_v1 }
 0x34a   : > { %14720 = vmatmul.mubr.msk.bf16.gmra.mrb[140].mxu0 %vm1519_vm3, %v18058_v38  ;;  %14964 = vmatmul.mubr.msk.bf16.gmra.mrb[28].mxu1 %vm1519_vm3, %v18270_v0  ;;  %v5957_v38 = vld [vmem:[#allocation2 + $0xdb] sm:$0xff] }
 0x34b   : > { %14723 = vmatprep.mubr.msk.bf16.mxu0 %vm1519_vm3, %v18068_v32  ;;  %14967 = vmatprep.mubr.msk.bf16.mxu1 %vm1519_vm3, %v18273_v63  ;;  %v5958_v32 = vld [vmem:[#allocation2 + $0xe3] sm:$0xff] }
 0x34c   : > { %v18295_v16 = vpack.c.bf16 %v5958_v32, %v5957_v38  ;;  %v5974_v38 = vld [vmem:[#allocation2 + $0x1a3] sm:$0xff]  ;;  %v6249_v32 = vld [vmem:[#allocation2 + $0x34] sm:$0xff] }
 0x352   : > { %14724 = vmatmul.mubr.msk.bf16.gmra.mrb[144].mxu0 %vm1519_vm3, %v18070_v12  ;;  %14968 = vmatmul.mubr.msk.bf16.gmra.mrb[0].mxu1 %vm1519_vm3, %v18283_v43  ;;  %v5961_v12 = vld [vmem:[#allocation2 + $0x10b] sm:$0xff] }
 0x353   : > { %14727 = vmatprep.mubr.msk.bf16.mxu0 %vm1519_vm3, %v18080_v56  ;;  %14971 = vmatprep.mubr.msk.bf16.mxu1 %vm1519_vm3, %v18285_v62  ;;  %v5962_v56 = vld [vmem:[#allocation2 + $0x113] sm:$0xff] }
 0x354   : > { %v18307_v13 = vpack.c.bf16 %v5962_v56, %v5961_v12  ;;  %v18345_v12 = vpack.c.bf16 %v5974_v38, %v5973_v42  ;;  %v6281_v56 = vpack.c.bf16 %v6250_v48, %v6249_v32  ;;  %v6264_v42 = vld [vmem:[#allocation2 + $0xe4] sm:$0xff]  ;;  %v6265_v38 = vld [vmem:[#allocation2 + $0xf4] sm:$0xff]  ;;  %v6266_v32 = vld [vmem:[#allocation2 + $0xfc] sm:$0xff] }
 0x355   : > { %v18383_v48 = vpack.c.bf16 %v6264_v42, %v6263_v57  ;;  %v6276_v57 = vld [vmem:[#allocation2 + $0x174] sm:$0xff]  ;;  %v6277_v42 = vld [vmem:[#allocation2 + $0x184] sm:$0xff] }
 0x35a   : > { %14728 = vmatmul.mubr.msk.bf16.gmra.mrb[148].mxu0 %vm1519_vm3, %v18082_v52  ;;  %14972 = vmatmul.mubr.msk.bf16.gmra.mrb[4].mxu1 %vm1519_vm3, %v18295_v16  ;;  %v4107_v52 = vld [vmem:[#allocation2 + $0x1a] sm:$0xff] }
 0x35b   : > { %14731 = vmatprep.mubr.msk.bf16.mxu0 %vm1519_vm3, %v18092_v20  ;;  %14975 = vmatprep.mubr.msk.bf16.mxu1 %vm1519_vm3, %v18297_v2  ;;  %v4108_v20 = vld [vmem:[#allocation2 + $0x22] sm:$0xff] }
 0x35c   : > { %v4139_v15 = vpack.c.bf16 %v4108_v20, %v4107_v52  ;;  %v6253_v52 = vld [vmem:[#allocation2 + $0x64] sm:$0xff]  ;;  %v6254_v20 = vld [vmem:[#allocation2 + $0x6c] sm:$0xff] }
 0x35d   : > { %v18357_v53 = vpack.c.bf16 %v6254_v20, %v6253_v52  ;;  %v6269_v52 = vld [vmem:[#allocation2 + $0x124] sm:$0xff]  ;;  %v6270_v20 = vld [vmem:[#allocation2 + $0x12c] sm:$0xff] }
 0x362   : > { %14732 = vmatmul.mubr.msk.bf16.gmra.mrb[152].mxu0 %vm1519_vm3, %v18094_v21  ;;  %14976 = vmatmul.mubr.msk.bf16.gmra.mrb[8].mxu1 %vm1519_vm3, %v18307_v13  ;;  %v4109_v21 = vld [vmem:[#allocation2 + $0x32] sm:$0xff] }
 0x363   : > { %14735 = vmatprep.mubr.msk.bf16.mxu0 %vm1519_vm3, %v18103_v3  ;;  %14979 = vmatprep.mubr.msk.bf16.mxu1 %vm1519_vm3, %v18309_v37  ;;  %v4110_v3 = vld [vmem:[#allocation2 + $0x3a] sm:$0xff] }
 0x364   : > { %v4140_v46 = vpack.c.bf16 %v4110_v3, %v4109_v21  ;;  %v6256_v21 = vld [vmem:[#allocation2 + $0x84] sm:$0xff]  ;;  %v6257_v3 = vld [vmem:[#allocation2 + $0x94] sm:$0xff] }
 0x36a   : > { %14736 = vmatmul.mubr.msk.bf16.gmra.mrb[156].mxu0 %vm1519_vm3, %v18107_v14  ;;  %14980 = vmatmul.mubr.msk.bf16.gmra.mrb[12].mxu1 %vm1519_vm3, %v18319_v4  ;;  %v18332_v14 = vpack.c.bf16 %v4112_v9, %v4111_v7  ;;  %v18369_v7 = vpack.c.bf16 %v6258_v58, %v6257_v3  ;;  %v6260_v9 = vld [vmem:[#allocation2 + $0xb4] sm:$0xff]  ;;  %v6272_v3 = vld [vmem:[#allocation2 + $0x144] sm:$0xff] }
 0x36b   : > { %14983 = vmatprep.mubr.msk.bf16.mxu1 %vm1519_vm3, %v18321_v6  ;;  %14743 = vmatprep.mubr.msk.bf16.mxu0 %vm1519_vm3, %v4139_v15  ;;  %v6255_v15 = vld [vmem:[#allocation2 + $0x7c] sm:$0xff]  ;;  %v6273_v58 = vld [vmem:[#allocation2 + $0x154] sm:$0xff] }
 0x36c   : > { %v18367_v40 = vpack.c.bf16 %v6256_v21, %v6255_v15  ;;  %v18393_v15 = vpack.c.bf16 %v6270_v20, %v6269_v52  ;;  %v6271_v21 = vld [vmem:[#allocation2 + $0x13c] sm:$0xff]  ;;  %v6280_v52 = vld [vmem:[#allocation2 + $0x1a4] sm:$0xff] }
 0x372   : > { %14744 = vmatmul.mubr.msk.bf16.vlgmr.msra.gmra.mrb[128].mxu0 %vm1519_vm3, %v4140_v46  ;;  %14984 = vmatmul.mubr.msk.bf16.gmra.mrb[16].mxu1 %vm1519_vm3, %v18330_v47 }
 0x373   : > { %14747 = vmatprep.mubr.msk.bf16.mxu0 %vm1519_vm3, %v18332_v14  ;;  %14987 = vmatprep.mubr.msk.bf16.mxu1 %vm1519_vm3, %v18334_v34 }
 0x37a   : > { %14748 = vmatmul.mubr.msk.bf16.gmra.mrb[132].mxu0 %vm1519_vm3, %v18343_v61  ;;  %14988 = vmatmul.mubr.msk.bf16.gmra.mrb[20].mxu1 %vm1519_vm3, %v18345_v12 }
 0x37b   : > { %14995 = vmatprep.mubr.msk.bf16.mxu1 %vm1519_vm3, %v6281_v56  ;;  %v18385_v56 = vpack.c.bf16 %v6266_v32, %v6265_v38  ;;  %v6278_v38 = vld [vmem:[#allocation2 + $0x18c] sm:$0xff]  ;;  %v18407_v32 = vpack.c.bf16 %v6276_v57, %v6275_v45  ;;  %v16765_v57 = vld [vmem:[%s19585_s3 + $0x118] sm:$0xff]  }
 0x382   : > { %14996 = vmatmul.mubr.msk.bf16.vlgmr.msra.gmra.mrb[24].mxu1 %vm1519_vm3, %v18352_v36 }
 0x383   : > { %15028 = vmatpush3.bf16.msra.mxu1 %v18268_v1  ;;  %14999 = vmatprep.mubr.msk.bf16.mxu1 %vm1519_vm3, %v18357_v53  ;;  %v6259_v1 = vld [vmem:[#allocation2 + $0xac] sm:$0xff] }
 0x384   : > { %15029 = vmatprep.subr.bf16.mxu1 %v16761_v17  ;;  %v18375_v46 = vpack.c.bf16 %v6260_v9, %v6259_v1  ;;  %v6274_v1 = vld [vmem:[#allocation2 + $0x15c] sm:$0xff]  ;;  %v18399_v9 = vpack.c.bf16 %v6272_v3, %v6271_v21  ;;  %v16763_v21 = vld [vmem:[%s19585_s3 + $0x108] sm:$0xff]   ;;  %v16764_v3 = vld [vmem:[%s19585_s3 + $0x110] sm:$0xff]  }
 0x385   : > { %v18401_v25 = vpack.c.bf16 %v6274_v1, %v6273_v58  ;;  %v6866_v58 = vld [vmem:[#allocation2 + $0x79] sm:$0xff]  ;;  %v6867_v1 = vld [vmem:[#allocation2 + $0x81] sm:$0xff] }
 0x387   : > { %15030 = vmatpush3.bf16.msra.mxu1 %v16761_v17  ;;  %v18391_v17 = vpack.c.bf16 %v6268_v41, %v6267_v49  ;;  %v18409_v49 = vpack.c.bf16 %v6278_v38, %v6277_v42  ;;  %v6279_v41 = vld [vmem:[#allocation2 + $0x19c] sm:$0xff]  ;;  %v18469_v42 = vpack.c.bf16 %v6867_v1, %v6866_v58  ;;  %v6878_v1 = vld [vmem:[#allocation2 + $0x109] sm:$0xff] }
 0x388   : > { %15063 = vmatprep.subr.bf16.mxu1 %v16762_v60  ;;  %v18415_v20 = vpack.c.bf16 %v6280_v52, %v6279_v41  ;;  %v18478_v38 = vld [vmem:[%s19585_s3 + $0x120] sm:$0xff]   ;;  %v6868_v41 = vld [vmem:[#allocation2 + $0x91] sm:$0xff] }
 0x389   : > { %v6869_v52 = vld [vmem:[#allocation2 + $0x99] sm:$0xff] }
 0x38a   : > { %15000 = vmatmul.mubr.msk.bf16.gmra.mrb[28].mxu1 %vm1519_vm3, %v18367_v40 }
 0x38b   : > { %15003 = vmatprep.mubr.msk.bf16.mxu1 %vm1519_vm3, %v18369_v7 }
 0x392   : > { %15004 = vmatmul.mubr.msk.bf16.gmra.mrb[0].mxu1 %vm1519_vm3, %v18375_v46 }
 0x393   : > { %15007 = vmatprep.mubr.msk.bf16.mxu1 %vm1519_vm3, %v18377_v55 }
 0x39a   : > { %15008 = vmatmul.mubr.msk.bf16.gmra.mrb[4].mxu1 %vm1519_vm3, %v18383_v48 }
 0x39b   : > { %15011 = vmatprep.mubr.msk.bf16.mxu1 %vm1519_vm3, %v18385_v56 }
 0x3a2   : > { %15012 = vmatmul.mubr.msk.bf16.gmra.mrb[8].mxu1 %vm1519_vm3, %v18391_v17 }
 0x3a3   : > { %15015 = vmatprep.mubr.msk.bf16.mxu1 %vm1519_vm3, %v18393_v15 }
 0x3aa   : > { %15016 = vmatmul.mubr.msk.bf16.gmra.mrb[12].mxu1 %vm1519_vm3, %v18399_v9 }
 0x3ab   : > { %15019 = vmatprep.mubr.msk.bf16.mxu1 %vm1519_vm3, %v18401_v25 }
 0x3b2   : > { %15020 = vmatmul.mubr.msk.bf16.gmra.mrb[16].mxu1 %vm1519_vm3, %v18407_v32 }
 0x3b3   : > { %15023 = vmatprep.mubr.msk.bf16.mxu1 %vm1519_vm3, %v18409_v49 }
 0x3ba   : > { %15024 = vmatmul.mubr.msk.bf16.gmra.mrb[20].mxu1 %vm1519_vm3, %v18415_v20 }
 0x3bb   : > { %15031 = vmatprep.mubr.msk.bf16.mxu1 %vm1519_vm3, %v18105_v51  ;;  %v6582_v51 = vld [vmem:[#allocation2 + $0x180] sm:$0xff] }
 0x3c2   : > { %15032 = vmatmul.mubr.msk.bf16.vlgmr.msra.gmra.mrb[24].mxu1 %vm1519_vm3, %v18120_v44  ;;  %v6583_v44 = vld [vmem:[#allocation2 + $0x188] sm:$0xff] }
 0x3c3   : > { %15064 = vmatpush3.bf16.msra.mxu1 %v16762_v60  ;;  %15035 = vmatprep.mubr.msk.bf16.mxu1 %vm1519_vm3, %v18122_v28  ;;  %v6584_v28 = vld [vmem:[#allocation2 + $0x198] sm:$0xff]  ;;  %v6865_v60 = vld [vmem:[#allocation2 + $0x69] sm:$0xff] }
 0x3c4   : > { %15065 = vmatprep.subr.bf16.mxu1 %v16763_v21 }
 0x3c7   : > { %15066 = vmatpush3.bf16.msra.mxu1 %v16763_v21  ;;  %v6870_v21 = vld [vmem:[#allocation2 + $0xa9] sm:$0xff] }
 0x3c8   : > { %15099 = vmatprep.subr.bf16.mxu1 %v16764_v3 }
 0x3ca   : > { %15036 = vmatmul.mubr.msk.bf16.gmra.mrb[28].mxu1 %vm1519_vm3, %v18137_v5  ;;  %v6585_v5 = vld [vmem:[#allocation2 + $0x1a0] sm:$0xff] }
 0x3cb   : > { %15039 = vmatprep.mubr.msk.bf16.mxu1 %vm1519_vm3, %v18142_v24  ;;  %v18451_v24 = vpack.c.bf16 %v6583_v44, %v6582_v51  ;;  %v6871_v51 = vld [vmem:[#allocation2 + $0xb1] sm:$0xff]  ;;  %v18480_v44 = vpack.c.bf16 %v6869_v52, %v6868_v41 }
 0x3d2   : > { %15040 = vmatmul.mubr.msk.bf16.gmra.mrb[0].mxu1 %vm1519_vm3, %v18158_v29  ;;  %v18453_v29 = vpack.c.bf16 %v6585_v5, %v6584_v28  ;;  %v18483_v28 = vpack.c.bf16 %v6871_v51, %v6870_v21  ;;  %v6873_v5 = vld [vmem:[#allocation2 + $0xc9] sm:$0xff] }
 0x3d3   : > { %15043 = vmatprep.mubr.msk.bf16.mxu1 %vm1519_vm3, %v18161_v8  ;;  %v6586_v8 = vld [vmem:[#allocation2 + $0x1b0] sm:$0xff] }
 0x3da   : > { %15044 = vmatmul.mubr.msk.bf16.gmra.mrb[4].mxu1 %vm1519_vm3, %v18171_v22  ;;  %v6587_v22 = vld [vmem:[#allocation2 + $0x1b8] sm:$0xff] }
 0x3db   : > { %15047 = vmatprep.mubr.msk.bf16.mxu1 %vm1519_vm3, %v18173_v23  ;;  %v18459_v23 = vpack.c.bf16 %v6587_v22, %v6586_v8  ;;  %v6874_v8 = vld [vmem:[#allocation2 + $0xd9] sm:$0xff]  ;;  %v6875_v22 = vld [vmem:[#allocation2 + $0xe1] sm:$0xff] }
 0x3e2   : > { %15048 = vmatmul.mubr.msk.bf16.gmra.mrb[8].mxu1 %vm1519_vm3, %v18183_v30  ;;  %v6862_v30 = vld [vmem:[#allocation2 + $0x49] sm:$0xff] }
 0x3e3   : > { %15051 = vmatprep.mubr.msk.bf16.mxu1 %vm1519_vm3, %v18185_v33  ;;  %v6863_v33 = vld [vmem:[#allocation2 + $0x51] sm:$0xff] }
 0x3ea   : > { %15052 = vmatmul.mubr.msk.bf16.gmra.mrb[12].mxu1 %vm1519_vm3, %v18197_v11  ;;  %v6894_v11 = vpack.c.bf16 %v6863_v33, %v6862_v30  ;;  %v18491_v33 = vpack.c.bf16 %v6875_v22, %v6874_v8  ;;  %v6881_v8 = vld [vmem:[#allocation2 + $0x129] sm:$0xff] }
 0x3eb   : > { %15055 = vmatprep.mubr.msk.bf16.mxu1 %vm1519_vm3, %v18201_v10  ;;  %v6864_v10 = vld [vmem:[#allocation2 + $0x61] sm:$0xff] }
 0x3ec   : > { %v18464_v45 = vpack.c.bf16 %v6865_v60, %v6864_v10  ;;  %v6876_v10 = vld [vmem:[#allocation2 + $0xf1] sm:$0xff]  ;;  %v6877_v60 = vld [vmem:[#allocation2 + $0xf9] sm:$0xff] }
 0x3ed   : > { %v18505_v21 = vpack.c.bf16 %v6877_v60, %v6876_v10 }
 0x3ef   : > { %19601 = vst [vmem:[#allocation11_spill] sm:$0xff] %v18505_v21 }
 0x3f2   : > { %15056 = vmatmul.mubr.msk.bf16.gmra.mrb[16].mxu1 %vm1519_vm3, %v18451_v24 }
 0x3f3   : > { %15059 = vmatprep.mubr.msk.bf16.mxu1 %vm1519_vm3, %v18453_v29 }
 0x3fa   : > { %15060 = vmatmul.mubr.msk.bf16.gmra.mrb[20].mxu1 %vm1519_vm3, %v18459_v23 }
 0x3fb   : > { %15067 = vmatprep.mubr.msk.bf16.mxu1 %vm1519_vm3, %v6894_v11 }
 0x402   : > { %15068 = vmatmul.mubr.msk.bf16.vlgmr.msra.gmra.mrb[24].mxu1 %vm1519_vm3, %v18464_v45 }
 0x403   : > { %15100 = vmatpush3.bf16.msra.mxu1 %v16764_v3  ;;  %15071 = vmatprep.mubr.msk.bf16.mxu1 %vm1519_vm3, %v18469_v42  ;;  %v6872_v3 = vld [vmem:[#allocation2 + $0xc1] sm:$0xff] }
 0x404   : > { %15101 = vmatprep.subr.bf16.mxu1 %v16765_v57  ;;  %v18489_v30 = vpack.c.bf16 %v6873_v5, %v6872_v3  ;;  %v6880_v5 = vld [vmem:[#allocation2 + $0x121] sm:$0xff] }
 0x405   : > { %v18521_v60 = vpack.c.bf16 %v6881_v8, %v6880_v5 }
 0x407   : > { %15102 = vmatpush3.bf16.msra.mxu1 %v16765_v57  ;;  %v6879_v57 = vld [vmem:[#allocation2 + $0x111] sm:$0xff]  ;;  %19607 = vst [vmem:[#allocation17_spill] sm:$0xff] %v18521_v60 }
 0x408   : > { %15135 = vmatprep.subr.bf16.mxu1 %v18478_v38  ;;  %v18507_v51 = vpack.c.bf16 %v6879_v57, %v6878_v1 }
 0x40a   : > { %15072 = vmatmul.mubr.msk.bf16.gmra.mrb[28].mxu1 %vm1519_vm3, %v18480_v44  ;;  %19602 = vst [vmem:[#allocation12_spill] sm:$0xff] %v18507_v51 }
 0x40b   : > { %15075 = vmatprep.mubr.msk.bf16.mxu1 %vm1519_vm3, %v18483_v28 }
 0x412   : > { %15076 = vmatmul.mubr.msk.bf16.gmra.mrb[0].mxu1 %vm1519_vm3, %v18489_v30 }
 0x413   : > { %15079 = vmatprep.mubr.msk.bf16.mxu1 %vm1519_vm3, %v18491_v33 }
 0x415   : > { %v18497_v11 = vpop.f32.mrb[136].mxu0 }
 0x416   : > { %19597 = vst [vmem:[#allocation7_spill] sm:$0xff] %v18497_v11  ;;  %v18499_v58 = vpop.f32.mrb[137].mxu0 }
 0x417   : > { %19598 = vst [vmem:[#allocation8_spill] sm:$0xff] %v18499_v58  ;;  %v18501_v41 = vpop.f32.mrb[138].mxu0  ;;  %v6882_v58 = vld [vmem:[#allocation2 + $0x139] sm:$0xff] }
 0x418   : > { %19599 = vst [vmem:[#allocation9_spill] sm:$0xff] %v18501_v41  ;;  %v18503_v52 = vpop.f32.mrb[139].mxu0  ;;  %v6883_v41 = vld [vmem:[#allocation2 + $0x141] sm:$0xff] }
 0x419   : > { %19600 = vst [vmem:[#allocation10_spill] sm:$0xff] %v18503_v52  ;;  %v18523_v1 = vpack.c.bf16 %v6883_v41, %v6882_v58 }
 0x41a   : > { %15080 = vmatmul.mubr.msk.bf16.gmra.mrb[4].mxu1 %vm1519_vm3, %v18505_v21 }
 0x41b   : > { %15083 = vmatprep.mubr.msk.bf16.mxu1 %vm1519_vm3, %v18507_v51  ;;  %19608 = vst [vmem:[#allocation18_spill] sm:$0xff] %v18523_v1  ;;  %v6886_v51 = vld [vmem:[#allocation2 + $0x169] sm:$0xff] }
 0x41d   : > { %v18513_v3 = vpop.f32.mrb[140].mxu0 }
 0x41e   : > { %19603 = vst [vmem:[#allocation13_spill] sm:$0xff] %v18513_v3  ;;  %v18515_v22 = vpop.f32.mrb[141].mxu0  ;;  %v6884_v3 = vld [vmem:[#allocation2 + $0x151] sm:$0xff] }
 0x41f   : > { %19604 = vst [vmem:[#allocation14_spill] sm:$0xff] %v18515_v22  ;;  %v18517_v11 = vpop.f32.mrb[142].mxu0  ;;  %v6885_v22 = vld [vmem:[#allocation2 + $0x159] sm:$0xff] }
 0x420   : > { %19605 = vst [vmem:[#allocation15_spill] sm:$0xff] %v18517_v11  ;;  %v18519_v10 = vpop.f32.mrb[143].mxu0  ;;  %v6887_v11 = vld [vmem:[#allocation2 + $0x171] sm:$0xff]  ;;  %v18537_v58 = vpack.c.bf16 %v6885_v22, %v6884_v3 }
 0x421   : > { %19606 = vst [vmem:[#allocation16_spill] sm:$0xff] %v18519_v10  ;;  %v18539_v41 = vpack.c.bf16 %v6887_v11, %v6886_v51  ;;  %v6892_v22 = vld [vmem:[#allocation2 + $0x1b1] sm:$0xff] }
 0x422   : > { %15084 = vmatmul.mubr.msk.bf16.gmra.mrb[8].mxu1 %vm1519_vm3, %v18521_v60 }
 0x423   : > { %15087 = vmatprep.mubr.msk.bf16.mxu1 %vm1519_vm3, %v18523_v1  ;;  %19613 = vst [vmem:[#allocation23_spill] sm:$0xff] %v18539_v41  ;;  %v6890_v1 = vld [vmem:[#allocation2 + $0x199] sm:$0xff] }
 0x425   : > { %v18529_v57 = vpop.f32.mrb[144].mxu0 }
 0x426   : > { %19609 = vst [vmem:[#allocation19_spill] sm:$0xff] %v18529_v57  ;;  %v18531_v52 = vpop.f32.mrb[145].mxu0  ;;  %v6888_v57 = vld [vmem:[#allocation2 + $0x181] sm:$0xff] }
 0x427   : > { %19610 = vst [vmem:[#allocation20_spill] sm:$0xff] %v18531_v52  ;;  %v18533_v21 = vpop.f32.mrb[146].mxu0  ;;  %v6889_v52 = vld [vmem:[#allocation2 + $0x189] sm:$0xff] }
 0x428   : > { %19611 = vst [vmem:[#allocation21_spill] sm:$0xff] %v18533_v21  ;;  %v18535_v5 = vpop.f32.mrb[147].mxu0  ;;  %v6891_v21 = vld [vmem:[#allocation2 + $0x1a1] sm:$0xff]  ;;  %v18553_v11 = vpack.c.bf16 %v6889_v52, %v6888_v57 }
 0x429   : > { %19612 = vst [vmem:[#allocation22_spill] sm:$0xff] %v18535_v5  ;;  %v18555_v51 = vpack.c.bf16 %v6891_v21, %v6890_v1  ;;  %v7172_v57 = vld [vmem:[#allocation2 + $0x7a] sm:$0xff] }
 0x42a   : > { %15088 = vmatmul.mubr.msk.bf16.gmra.mrb[12].mxu1 %vm1519_vm3, %v18537_v58 }
 0x42b   : > { %15091 = vmatprep.mubr.msk.bf16.mxu1 %vm1519_vm3, %v18539_v41 }
 0x42d   : > { %v18545_v8 = vpop.f32.mrb[148].mxu0 }
 0x42e   : > { %19614 = vst [vmem:[#allocation24_spill] sm:$0xff] %v18545_v8  ;;  %v18547_v10 = vpop.f32.mrb[149].mxu0  ;;  %v6893_v8 = vld [vmem:[#allocation2 + $0x1b9] sm:$0xff] }
 0x42f   : > { %19615 = vst [vmem:[#allocation25_spill] sm:$0xff] %v18547_v10  ;;  %v18549_v60 = vpop.f32.mrb[150].mxu0  ;;  %v18565_v41 = vpack.c.bf16 %v6893_v8, %v6892_v22  ;;  %v16767_v22 = vld [vmem:[%s19585_s3 + $0x128] sm:$0xff]  }
 0x430   : > { %19616 = vst [vmem:[#allocation26_spill] sm:$0xff] %v18549_v60  ;;  %v18551_v3 = vpop.f32.mrb[151].mxu0 }
 0x431   : > { %19617 = vst [vmem:[#allocation27_spill] sm:$0xff] %v18551_v3  ;;  %19620 = vst [vmem:[#allocation30_spill] sm:$0xff] %v18565_v41 }
 0x432   : > { %15092 = vmatmul.mubr.msk.bf16.gmra.mrb[16].mxu1 %vm1519_vm3, %v18553_v11 }
 0x433   : > { %15095 = vmatprep.mubr.msk.bf16.mxu1 %vm1519_vm3, %v18555_v51 }
 0x435   : > { %v18561_v5 = vpop.f32.mrb[152].mxu0 }
 0x436   : > { %19618 = vst [vmem:[#allocation28_spill] sm:$0xff] %v18561_v5  ;;  %v18563_v10 = vpop.f32.mrb[153].mxu0  ;;  %v7173_v5 = vld [vmem:[#allocation2 + $0x82] sm:$0xff] }
 0x437   : > { %19619 = vst [vmem:[#allocation29_spill] sm:$0xff] %v18563_v10  ;;  %v18567_v60 = vpop.f32.mrb[154].mxu0 }
 0x438   : > { %19621 = vst [vmem:[#allocation31_spill] sm:$0xff] %v18567_v60  ;;  %v18569_v52 = vpop.f32.mrb[155].mxu0 }
 0x439   : > { %19622 = vst [vmem:[#allocation32_spill] sm:$0xff] %v18569_v52  ;;  %v18586_v52 = vpack.c.bf16 %v7173_v5, %v7172_v57  ;;  %v7176_v5 = vld [vmem:[#allocation2 + $0xaa] sm:$0xff]  ;;  %v7177_v57 = vld [vmem:[#allocation2 + $0xb2] sm:$0xff] }
 0x43a   : > { %15096 = vmatmul.mubr.msk.bf16.gmra.mrb[20].mxu1 %vm1519_vm3, %v18565_v41  ;;  %v18606_v10 = vpack.c.bf16 %v7177_v57, %v7176_v5  ;;  %v8105_v57 = vld [vmem:[#allocation2 + $0x138] sm:$0xff] }
 0x43b   : > { %15103 = vmatprep.mubr.msk.bf16.mxu1 %vm1519_vm3, %v18332_v14  ;;  %19627 = vst [vmem:[#allocation37_spill] sm:$0xff] %v18586_v52  ;;  %v16768_v14 = vld [vmem:[%s19585_s3 + $0x130] sm:$0xff]  }
 0x43d   : > { %v18575_v21 = vpop.f32.mrb[156].mxu0 }
 0x43e   : > { %19623 = vst [vmem:[#allocation33_spill] sm:$0xff] %v18575_v21  ;;  %v18577_v1 = vpop.f32.mrb[157].mxu0 }
 0x43f   : > { %19624 = vst [vmem:[#allocation34_spill] sm:$0xff] %v18577_v1  ;;  %v18579_v3 = vpop.f32.mrb[158].mxu0  ;;  %v7175_v1 = vld [vmem:[#allocation2 + $0x9a] sm:$0xff] }
 0x440   : > { %19625 = vst [vmem:[#allocation35_spill] sm:$0xff] %v18579_v3  ;;  %v18581_v8 = vpop.f32.mrb[159].mxu0  ;;  %v7174_v3 = vld [vmem:[#allocation2 + $0x92] sm:$0xff] }
 0x441   : > { %19626 = vst [vmem:[#allocation36_spill] sm:$0xff] %v18581_v8 }
 0x442   : > { %15104 = vmatmul.mubr.msk.bf16.vlgmr.msra.gmra.mrb[24].mxu1 %vm1519_vm3, %v18343_v61 }
 0x443   : > { %15136 = vmatpush3.bf16.msra.mxu1 %v18478_v38  ;;  %15107 = vmatprep.mubr.msk.bf16.mxu1 %vm1519_vm3, %v18586_v52  ;;  %v18604_v38 = vpack.c.bf16 %v7175_v1, %v7174_v3  ;;  %v7179_v52 = vld [vmem:[#allocation2 + $0xca] sm:$0xff] }
 0x444   : > { %15137 = vmatprep.subr.bf16.mxu1 %v16767_v22 }
 0x445   : > { %v18596_v8 = vpop.f32.mrb[128].mxu0 }
 0x446   : > { %19628 = vst [vmem:[#allocation38_spill] sm:$0xff] %v18596_v8  ;;  %v18598_v21 = vpop.f32.mrb[129].mxu0 }
 0x447   : > { %19629 = vst [vmem:[#allocation39_spill] sm:$0xff] %v18598_v21  ;;  %v18600_v60 = vpop.f32.mrb[130].mxu0  ;;  %15138 = vmatpush3.bf16.msra.mxu1 %v16767_v22  ;;  %v7178_v21 = vld [vmem:[#allocation2 + $0xc2] sm:$0xff]  ;;  %v7180_v22 = vld [vmem:[#allocation2 + $0xda] sm:$0xff] }
 0x448   : > { %19630 = vst [vmem:[#allocation40_spill] sm:$0xff] %v18600_v60  ;;  %v18602_v61 = vpop.f32.mrb[131].mxu0  ;;  %15171 = vmatprep.subr.bf16.mxu1 %v16768_v14  ;;  %v7181_v60 = vld [vmem:[#allocation2 + $0xe2] sm:$0xff]  ;;  %v18620_v1 = vpack.c.bf16 %v7179_v52, %v7178_v21 }
 0x449   : > { %19631 = vst [vmem:[#allocation41_spill] sm:$0xff] %v18602_v61  ;;  %v18622_v5 = vpack.c.bf16 %v7181_v60, %v7180_v22  ;;  %v8104_v52 = vld [vmem:[#allocation2 + $0x128] sm:$0xff]  ;;  %v8106_v22 = vld [vmem:[#allocation2 + $0x140] sm:$0xff] }
 0x44a   : > { %15108 = vmatmul.mubr.msk.bf16.gmra.mrb[28].mxu1 %vm1519_vm3, %v18604_v38 }
 0x44b   : > { %15111 = vmatprep.mubr.msk.bf16.mxu1 %vm1519_vm3, %v18606_v10 }
 0x44d   : > { %v18612_v8 = vpop.f32.mrb[132].mxu0 }
 0x44e   : > { %v18614_v41 = vpop.f32.mrb[133].mxu0 }
 0x44f   : > { %v18616_v61 = vpop.f32.mrb[134].mxu0 }
 0x450   : > { %v18618_v3 = vpop.f32.mrb[135].mxu0 }
 0x452   : > { %15112 = vmatmul.mubr.msk.bf16.gmra.mrb[0].mxu1 %vm1519_vm3, %v18620_v1 }
 0x453   : > { %15115 = vmatprep.mubr.msk.bf16.mxu1 %vm1519_vm3, %v18622_v5 }
 0x45a   : > { %15116 = vmatmul.mubr.msk.bf16.gmra.mrb[4].mxu1 %vm1519_vm3, %v18187_v35  ;;  %v7198_v35 = vld [vmem:[#allocation2 + $0x1b2] sm:$0xff] }
 0x45b   : > { %15119 = vmatprep.mubr.msk.bf16.mxu1 %vm1519_vm3, %v18199_v59  ;;  %v7199_v59 = vld [vmem:[#allocation2 + $0x1ba] sm:$0xff] }
 0x45c   : > { %v18644_v60 = vpack.c.bf16 %v7199_v59, %v7198_v35  ;;  %v8107_v35 = vld [vmem:[#allocation2 + $0x150] sm:$0xff]  ;;  %v8108_v59 = vld [vmem:[#allocation2 + $0x158] sm:$0xff] }
 0x462   : > { %15120 = vmatmul.mubr.msk.bf16.gmra.mrb[8].mxu1 %vm1519_vm3, %v18203_v54  ;;  %v16769_v54 = vld [vmem:[%s19585_s3 + $0x138] sm:$0xff]  }
 0x463   : > { %15123 = vmatprep.mubr.msk.bf16.mxu1 %vm1519_vm3, %v18213_v26  ;;  %v16770_v26 = vld [vmem:[%s19585_s3 + $0x140] sm:$0xff]  }
 0x46a   : > { %15124 = vmatmul.mubr.msk.bf16.gmra.mrb[12].mxu1 %vm1519_vm3, %v18215_v39  ;;  %v7504_v39 = vld [vmem:[#allocation2 + $0x1b3] sm:$0xff] }
 0x46b   : > { %15127 = vmatprep.mubr.msk.bf16.mxu1 %vm1519_vm3, %v18224_v50  ;;  %v7505_v50 = vld [vmem:[#allocation2 + $0x1bb] sm:$0xff] }
 0x472   : > { %15128 = vmatmul.mubr.msk.bf16.gmra.mrb[16].mxu1 %vm1519_vm3, %v18226_v31  ;;  %v18684_v31 = vpack.c.bf16 %v7505_v50, %v7504_v39  ;;  %v8109_v39 = vld [vmem:[#allocation2 + $0x168] sm:$0xff]  ;;  %v8110_v50 = vld [vmem:[#allocation2 + $0x170] sm:$0xff] }
 0x473   : > { %15131 = vmatprep.mubr.msk.bf16.mxu1 %vm1519_vm3, %v18240_v19  ;;  %v16771_v19 = vld [vmem:[%s19585_s3 + $0x148] sm:$0xff]  }
 0x47a   : > { %15132 = vmatmul.mubr.msk.bf16.gmra.mrb[20].mxu1 %vm1519_vm3, %v18644_v60 }
 0x47b   : > { %15139 = vmatprep.mubr.msk.bf16.mxu1 %vm1519_vm3, %v18249_v27  ;;  %v16772_v27 = vld [vmem:[%s19585_s3 + $0x150] sm:$0xff]  }
 0x482   : > { %15140 = vmatmul.mubr.msk.bf16.vlgmr.msra.gmra.mrb[24].mxu1 %vm1519_vm3, %v18258_v18  ;;  %v7810_v18 = vld [vmem:[#allocation2 + $0x1b4] sm:$0xff] }
 0x483   : > { %15172 = vmatpush3.bf16.msra.mxu1 %v16768_v14  ;;  %15143 = vmatprep.mubr.msk.bf16.mxu1 %vm1519_vm3, %v18270_v0  ;;  %v7811_v0 = vld [vmem:[#allocation2 + $0x1bc] sm:$0xff] }
 0x484   : > { %15173 = vmatprep.subr.bf16.mxu1 %v16769_v54 }
 0x487   : > { %15174 = vmatpush3.bf16.msra.mxu1 %v16769_v54  ;;  %v8128_v54 = vpack.c.bf16 %v8106_v22, %v8105_v57  ;;  %v9006_v57 = vld [vmem:[#allocation2 + $0x6b] sm:$0xff] }
 0x488   : > { %15207 = vmatprep.subr.bf16.mxu1 %v16770_v26 }
 0x48a   : > { %15144 = vmatmul.mubr.msk.bf16.gmra.mrb[28].mxu1 %vm1519_vm3, %v18273_v63  ;;  %v18724_v63 = vpack.c.bf16 %v7811_v0, %v7810_v18  ;;  %v8118_v18 = vld [vmem:[#allocation2 + $0x1d0] sm:$0xff] }
 0x48b   : > { %15147 = vmatprep.mubr.msk.bf16.mxu1 %vm1519_vm3, %v18283_v43  ;;  %v8087_v43 = vld [vmem:[#allocation2 + $0x60] sm:$0xff] }
 0x492   : > { %15148 = vmatmul.mubr.msk.bf16.gmra.mrb[0].mxu1 %vm1519_vm3, %v18285_v62  ;;  %v8088_v62 = vld [vmem:[#allocation2 + $0x68] sm:$0xff] }
 0x493   : > { %15151 = vmatprep.mubr.msk.bf16.mxu1 %vm1519_vm3, %v18295_v16  ;;  %v8119_v16 = vpack.c.bf16 %v8088_v62, %v8087_v43  ;;  %v16775_v43 = vld [vmem:[%s19585_s3 + $0x168] sm:$0xff]  }
 0x49a   : > { %15152 = vmatmul.mubr.msk.bf16.gmra.mrb[4].mxu1 %vm1519_vm3, %v18297_v2  ;;  %v8089_v2 = vld [vmem:[#allocation2 + $0x78] sm:$0xff] }
 0x49b   : > { %15155 = vmatprep.mubr.msk.bf16.mxu1 %vm1519_vm3, %v18307_v13  ;;  %v8090_v13 = vld [vmem:[#allocation2 + $0x80] sm:$0xff] }
 0x4a2   : > { %15156 = vmatmul.mubr.msk.bf16.gmra.mrb[8].mxu1 %vm1519_vm3, %v18309_v37  ;;  %v8091_v37 = vld [vmem:[#allocation2 + $0x90] sm:$0xff] }
 0x4a3   : > { %15159 = vmatprep.mubr.msk.bf16.mxu1 %vm1519_vm3, %v18319_v4  ;;  %v8092_v4 = vld [vmem:[#allocation2 + $0x98] sm:$0xff] }
 0x4aa   : > { %15160 = vmatmul.mubr.msk.bf16.gmra.mrb[12].mxu1 %vm1519_vm3, %v18321_v6  ;;  %v8120_v6 = vpack.c.bf16 %v8090_v13, %v8089_v2  ;;  %v8700_v2 = vld [vmem:[#allocation2 + $0x6a] sm:$0xff] }
 0x4ab   : > { %15163 = vmatprep.mubr.msk.bf16.mxu1 %vm1519_vm3, %v18330_v47  ;;  %v16773_v47 = vld [vmem:[%s19585_s3 + $0x158] sm:$0xff]  }
 0x4b2   : > { %15164 = vmatmul.mubr.msk.bf16.gmra.mrb[16].mxu1 %vm1519_vm3, %v18334_v34  ;;  %v8121_v34 = vpack.c.bf16 %v8092_v4, %v8091_v37  ;;  %v8711_v37 = vld [vmem:[#allocation2 + $0xf2] sm:$0xff]  ;;  %v8712_v4 = vld [vmem:[#allocation2 + $0xfa] sm:$0xff] }
 0x4b3   : > { %15167 = vmatprep.mubr.msk.bf16.mxu1 %vm1519_vm3, %v18345_v12  ;;  %v16774_v12 = vld [vmem:[%s19585_s3 + $0x160] sm:$0xff]  }
 0x4ba   : > { %15168 = vmatmul.mubr.msk.bf16.gmra.mrb[20].mxu1 %vm1519_vm3, %v18684_v31 }
 0x4bb   : > { %15175 = vmatprep.mubr.msk.bf16.mxu1 %vm1519_vm3, %v18352_v36  ;;  %v8093_v36 = vld [vmem:[#allocation2 + $0xa8] sm:$0xff] }
 0x4c2   : > { %15176 = vmatmul.mubr.msk.bf16.vlgmr.msra.gmra.mrb[24].mxu1 %vm1519_vm3, %v18357_v53  ;;  %v8094_v53 = vld [vmem:[#allocation2 + $0xb0] sm:$0xff] }
 0x4c3   : > { %15208 = vmatpush3.bf16.msra.mxu1 %v16770_v26  ;;  %15179 = vmatprep.mubr.msk.bf16.mxu1 %vm1519_vm3, %v18367_v40  ;;  %v8095_v40 = vld [vmem:[#allocation2 + $0xc0] sm:$0xff]  ;;  %v8129_v26 = vpack.c.bf16 %v8108_v59, %v8107_v35 }
 0x4c4   : > { %15209 = vmatprep.subr.bf16.mxu1 %v16771_v19  ;;  %v9007_v35 = vld [vmem:[#allocation2 + $0x7b] sm:$0xff]  ;;  %v9008_v59 = vld [vmem:[#allocation2 + $0x83] sm:$0xff] }
 0x4c7   : > { %15210 = vmatpush3.bf16.msra.mxu1 %v16771_v19  ;;  %v8130_v19 = vpack.c.bf16 %v8110_v50, %v8109_v39  ;;  %v9038_v39 = vpack.c.bf16 %v9008_v59, %v9007_v35  ;;  %v16779_v50 = vld [vmem:[%s19585_s3 + $0x188] sm:$0xff]   ;;  %v9323_v59 = vld [vmem:[#allocation2 + $0xf4] sm:$0xff] }
 0x4c8   : > { %15243 = vmatprep.subr.bf16.mxu1 %v16772_v27  ;;  %v9322_v35 = vld [vmem:[#allocation2 + $0xe4] sm:$0xff] }
 0x4ca   : > { %15180 = vmatmul.mubr.msk.bf16.gmra.mrb[28].mxu1 %vm1519_vm3, %v18369_v7  ;;  %v8096_v7 = vld [vmem:[#allocation2 + $0xc8] sm:$0xff] }
 0x4cb   : > { %15183 = vmatprep.mubr.msk.bf16.mxu1 %vm1519_vm3, %v18375_v46  ;;  %v8122_v46 = vpack.c.bf16 %v8094_v53, %v8093_v36 }
 0x4d2   : > { %15184 = vmatmul.mubr.msk.bf16.gmra.mrb[0].mxu1 %vm1519_vm3, %v18377_v55  ;;  %v8123_v55 = vpack.c.bf16 %v8096_v7, %v8095_v40  ;;  %v8719_v40 = vld [vmem:[#allocation2 + $0x152] sm:$0xff]  ;;  %v8720_v7 = vld [vmem:[#allocation2 + $0x15a] sm:$0xff] }
 0x4d3   : > { %15187 = vmatprep.mubr.msk.bf16.mxu1 %vm1519_vm3, %v18383_v48  ;;  %v8097_v48 = vld [vmem:[#allocation2 + $0xd8] sm:$0xff] }
 0x4da   : > { %15188 = vmatmul.mubr.msk.bf16.gmra.mrb[4].mxu1 %vm1519_vm3, %v18385_v56  ;;  %v8098_v56 = vld [vmem:[#allocation2 + $0xe0] sm:$0xff] }
 0x4db   : > { %15191 = vmatprep.mubr.msk.bf16.mxu1 %vm1519_vm3, %v18391_v17  ;;  %v8099_v17 = vld [vmem:[#allocation2 + $0xf0] sm:$0xff] }
 0x4e2   : > { %15192 = vmatmul.mubr.msk.bf16.gmra.mrb[8].mxu1 %vm1519_vm3, %v18393_v15  ;;  %v8100_v15 = vld [vmem:[#allocation2 + $0xf8] sm:$0xff] }
 0x4e3   : > { %15195 = vmatprep.mubr.msk.bf16.mxu1 %vm1519_vm3, %v18399_v9  ;;  %v8124_v9 = vpack.c.bf16 %v8098_v56, %v8097_v48  ;;  %v8722_v48 = vld [vmem:[#allocation2 + $0x172] sm:$0xff]  ;;  %v8723_v56 = vld [vmem:[#allocation2 + $0x182] sm:$0xff] }
 0x4ea   : > { %15196 = vmatmul.mubr.msk.bf16.gmra.mrb[12].mxu1 %vm1519_vm3, %v18401_v25  ;;  %v8125_v25 = vpack.c.bf16 %v8100_v15, %v8099_v17  ;;  %v8724_v17 = vld [vmem:[#allocation2 + $0x18a] sm:$0xff] }
 0x4eb   : > { %15199 = vmatprep.mubr.msk.bf16.mxu1 %vm1519_vm3, %v18407_v32  ;;  %v8101_v32 = vld [vmem:[#allocation2 + $0x108] sm:$0xff] }
 0x4f2   : > { %15200 = vmatmul.mubr.msk.bf16.gmra.mrb[16].mxu1 %vm1519_vm3, %v18409_v49  ;;  %v8102_v49 = vld [vmem:[#allocation2 + $0x110] sm:$0xff] }
 0x4f3   : > { %15203 = vmatprep.mubr.msk.bf16.mxu1 %vm1519_vm3, %v18415_v20  ;;  %v8103_v20 = vld [vmem:[#allocation2 + $0x120] sm:$0xff]  ;;  %v8126_v21 = vpack.c.bf16 %v8102_v49, %v8101_v32 }
 0x4f4   : > { %v8127_v14 = vpack.c.bf16 %v8104_v52, %v8103_v20  ;;  %v8726_v32 = vld [vmem:[#allocation2 + $0x1a2] sm:$0xff]  ;;  %v8729_v20 = vld [vmem:[#allocation2 + $0x1ca] sm:$0xff]  ;;  %v8730_v52 = vld [vmem:[#allocation2 + $0x1d2] sm:$0xff] }
 0x4fa   : > { %15204 = vmatmul.mubr.msk.bf16.gmra.mrb[20].mxu1 %vm1519_vm3, %v18724_v63 }
 0x4fb   : > { %15211 = vmatprep.mubr.msk.bf16.mxu1 %vm1519_vm3, %v8119_v16  ;;  %v8699_v16 = vld [vmem:[#allocation2 + $0x62] sm:$0xff] }
 0x4fc   : > { %v8731_v13 = vpack.c.bf16 %v8700_v2, %v8699_v16  ;;  %v9022_v16 = vld [vmem:[#allocation2 + $0x12b] sm:$0xff] }
 0x502   : > { %15212 = vmatmul.mubr.msk.bf16.vlgmr.msra.gmra.mrb[24].mxu1 %vm1519_vm3, %v8120_v6  ;;  %v8737_v6 = vpack.c.bf16 %v8712_v4, %v8711_v37  ;;  %v9026_v37 = vld [vmem:[#allocation2 + $0x15b] sm:$0xff] }
 0x503   : > { %15244 = vmatpush3.bf16.msra.mxu1 %v16772_v27  ;;  %15215 = vmatprep.mubr.msk.bf16.mxu1 %vm1519_vm3, %v8121_v34  ;;  %v8117_v27 = vld [vmem:[#allocation2 + $0x1c8] sm:$0xff] }
 0x504   : > { %15245 = vmatprep.subr.bf16.mxu1 %v16773_v47  ;;  %v8134_v0 = vpack.c.bf16 %v8118_v18, %v8117_v27  ;;  %v8715_v34 = vld [vmem:[#allocation2 + $0x122] sm:$0xff]  ;;  %v9012_v27 = vld [vmem:[#allocation2 + $0xb3] sm:$0xff] }
 0x505   : > { %v9013_v18 = vld [vmem:[#allocation2 + $0xc3] sm:$0xff] }
 0x507   : > { %15246 = vmatpush3.bf16.msra.mxu1 %v16773_v47  ;;  %v8714_v47 = vld [vmem:[#allocation2 + $0x112] sm:$0xff] }
 0x508   : > { %15279 = vmatprep.subr.bf16.mxu1 %v16774_v12 }
 0x50a   : > { %15216 = vmatmul.mubr.msk.bf16.gmra.mrb[28].mxu1 %vm1519_vm3, %v8122_v46 }
 0x50b   : > { %15219 = vmatprep.mubr.msk.bf16.mxu1 %vm1519_vm3, %v8123_v55  ;;  %v8741_v55 = vpack.c.bf16 %v8720_v7, %v8719_v40  ;;  %v9035_v7 = vld [vmem:[#allocation2 + $0x1cb] sm:$0xff] }
 0x512   : > { %15220 = vmatmul.mubr.msk.bf16.gmra.mrb[0].mxu1 %vm1519_vm3, %v8124_v9  ;;  %v8743_v9 = vpack.c.bf16 %v8724_v17, %v8723_v56  ;;  %v9313_v17 = vld [vmem:[#allocation2 + $0x7c] sm:$0xff] }
 0x513   : > { %15223 = vmatprep.mubr.msk.bf16.mxu1 %vm1519_vm3, %v8125_v25  ;;  %v8725_v25 = vld [vmem:[#allocation2 + $0x19a] sm:$0xff] }
 0x514   : > { %v8744_v49 = vpack.c.bf16 %v8726_v32, %v8725_v25  ;;  %v9316_v25 = vld [vmem:[#allocation2 + $0x9c] sm:$0xff] }
 0x51a   : > { %15224 = vmatmul.mubr.msk.bf16.gmra.mrb[4].mxu1 %vm1519_vm3, %v8126_v21  ;;  %v8746_v21 = vpack.c.bf16 %v8730_v52, %v8729_v20  ;;  %v9318_v20 = vld [vmem:[#allocation2 + $0xb4] sm:$0xff]  ;;  %v9319_v52 = vld [vmem:[#allocation2 + $0xc4] sm:$0xff] }
 0x51b   : > { %15227 = vmatprep.mubr.msk.bf16.mxu1 %vm1519_vm3, %v8127_v14  ;;  %v9005_v14 = vld [vmem:[#allocation2 + $0x63] sm:$0xff] }
 0x51c   : > { %v9037_v22 = vpack.c.bf16 %v9006_v57, %v9005_v14 }
 0x522   : > { %15228 = vmatmul.mubr.msk.bf16.gmra.mrb[8].mxu1 %vm1519_vm3, %v8128_v54  ;;  %v9009_v54 = vld [vmem:[#allocation2 + $0x93] sm:$0xff] }
 0x523   : > { %15231 = vmatprep.mubr.msk.bf16.mxu1 %vm1519_vm3, %v8129_v26  ;;  %v9010_v26 = vld [vmem:[#allocation2 + $0x9b] sm:$0xff] }
 0x52a   : > { %15232 = vmatmul.mubr.msk.bf16.gmra.mrb[12].mxu1 %vm1519_vm3, %v8130_v19  ;;  %v9011_v19 = vld [vmem:[#allocation2 + $0xab] sm:$0xff] }
 0x52b   : > { %15235 = vmatprep.mubr.msk.bf16.mxu1 %vm1519_vm3, %v18451_v24  ;;  %v16776_v24 = vld [vmem:[%s19585_s3 + $0x170] sm:$0xff]  }
 0x532   : > { %15236 = vmatmul.mubr.msk.bf16.gmra.mrb[16].mxu1 %vm1519_vm3, %v18453_v29  ;;  %v19632_v29 = vld [vmem:[#allocation11_spill] sm:$0xff] }
 0x533   : > { %15239 = vmatprep.mubr.msk.bf16.mxu1 %vm1519_vm3, %v18459_v23  ;;  %v19633_v23 = vld [vmem:[#allocation12_spill] sm:$0xff] }
 0x53a   : > { %15240 = vmatmul.mubr.msk.bf16.gmra.mrb[20].mxu1 %vm1519_vm3, %v8134_v0  ;;  %v9014_v0 = vld [vmem:[#allocation2 + $0xcb] sm:$0xff] }
 0x53b   : > { %15247 = vmatprep.mubr.msk.bf16.mxu1 %vm1519_vm3, %v18464_v45  ;;  %v19634_v45 = vld [vmem:[#allocation17_spill] sm:$0xff] }
 0x542   : > { %15248 = vmatmul.mubr.msk.bf16.vlgmr.msra.gmra.mrb[24].mxu1 %vm1519_vm3, %v18469_v42  ;;  %v19635_v42 = vld [vmem:[#allocation18_spill] sm:$0xff] }
 0x543   : > { %15280 = vmatpush3.bf16.msra.mxu1 %v16774_v12  ;;  %15251 = vmatprep.mubr.msk.bf16.mxu1 %vm1519_vm3, %v18480_v44  ;;  %v19636_v44 = vld [vmem:[#allocation23_spill] sm:$0xff]  ;;  %v8716_v12 = vld [vmem:[#allocation2 + $0x12a] sm:$0xff] }
 0x544   : > { %15281 = vmatprep.subr.bf16.mxu1 %v16775_v43  ;;  %v8739_v53 = vpack.c.bf16 %v8716_v12, %v8715_v34  ;;  %v9029_v34 = vld [vmem:[#allocation2 + $0x183] sm:$0xff]  ;;  %v9030_v12 = vld [vmem:[#allocation2 + $0x18b] sm:$0xff] }
 0x547   : > { %15282 = vmatpush3.bf16.msra.mxu1 %v16775_v43  ;;  %v9040_v43 = vpack.c.bf16 %v9012_v27, %v9011_v19  ;;  %v9327_v19 = vld [vmem:[#allocation2 + $0x124] sm:$0xff]  ;;  %v9328_v27 = vld [vmem:[#allocation2 + $0x12c] sm:$0xff] }
 0x548   : > { %15315 = vmatprep.subr.bf16.mxu1 %v16776_v24 }
 0x54a   : > { %15252 = vmatmul.mubr.msk.bf16.gmra.mrb[28].mxu1 %vm1519_vm3, %v18483_v28  ;;  %v19637_v28 = vld [vmem:[#allocation30_spill] sm:$0xff] }
 0x54b   : > { %15255 = vmatprep.mubr.msk.bf16.mxu1 %vm1519_vm3, %v18489_v30  ;;  %v8423_v30 = vld [vmem:[#allocation2 + $0x1c9] sm:$0xff] }
 0x552   : > { %15256 = vmatmul.mubr.msk.bf16.gmra.mrb[0].mxu1 %vm1519_vm3, %v18491_v33  ;;  %v8424_v33 = vld [vmem:[#allocation2 + $0x1d1] sm:$0xff] }
 0x553   : > { %15259 = vmatprep.mubr.msk.bf16.mxu1 %vm1519_vm3, %v19632_v29  ;;  %v8440_v62 = vpack.c.bf16 %v8424_v33, %v8423_v30  ;;  %v9015_v29 = vld [vmem:[#allocation2 + $0xdb] sm:$0xff]  ;;  %v9019_v30 = vld [vmem:[#allocation2 + $0x10b] sm:$0xff]  ;;  %v9020_v33 = vld [vmem:[#allocation2 + $0x113] sm:$0xff] }
 0x554   : > { %v9044_v2 = vpack.c.bf16 %v9020_v33, %v9019_v30  ;;  %v9335_v30 = vld [vmem:[#allocation2 + $0x184] sm:$0xff]  ;;  %v9336_v33 = vld [vmem:[#allocation2 + $0x18c] sm:$0xff] }
 0x55a   : > { %15260 = vmatmul.mubr.msk.bf16.gmra.mrb[4].mxu1 %vm1519_vm3, %v19633_v23  ;;  %v9016_v23 = vld [vmem:[#allocation2 + $0xe3] sm:$0xff] }
 0x55b   : > { %15263 = vmatprep.mubr.msk.bf16.mxu1 %vm1519_vm3, %v19634_v45  ;;  %v9017_v45 = vld [vmem:[#allocation2 + $0xf3] sm:$0xff] }
 0x562   : > { %15264 = vmatmul.mubr.msk.bf16.gmra.mrb[8].mxu1 %vm1519_vm3, %v19635_v42  ;;  %v9018_v42 = vld [vmem:[#allocation2 + $0xfb] sm:$0xff] }
 0x563   : > { %15267 = vmatprep.mubr.msk.bf16.mxu1 %vm1519_vm3, %v18537_v58  ;;  %v16777_v58 = vld [vmem:[%s19585_s3 + $0x178] sm:$0xff]  }
 0x56a   : > { %15268 = vmatmul.mubr.msk.bf16.gmra.mrb[12].mxu1 %vm1519_vm3, %v19636_v44  ;;  %v9042_v44 = vpack.c.bf16 %v9016_v23, %v9015_v29  ;;  %v9331_v29 = vld [vmem:[#allocation2 + $0x154] sm:$0xff]  ;;  %v9332_v23 = vld [vmem:[#allocation2 + $0x15c] sm:$0xff] }
 0x56b   : > { %15271 = vmatprep.mubr.msk.bf16.mxu1 %vm1519_vm3, %v18553_v11  ;;  %v19638_v11 = vld [vmem:[#allocation37_spill] sm:$0xff] }
 0x572   : > { %15272 = vmatmul.mubr.msk.bf16.gmra.mrb[16].mxu1 %vm1519_vm3, %v18555_v51  ;;  %v16778_v51 = vld [vmem:[%s19585_s3 + $0x180] sm:$0xff]  }
 0x573   : > { %15275 = vmatprep.mubr.msk.bf16.mxu1 %vm1519_vm3, %v19637_v28  ;;  %v9043_v28 = vpack.c.bf16 %v9018_v42, %v9017_v45  ;;  %v9353_v42 = vpack.c.bf16 %v9332_v23, %v9331_v29  ;;  %v19643_v23 = vld [vmem:[#allocation7_spill] sm:$0xff] }
 0x57a   : > { %15276 = vmatmul.mubr.msk.bf16.gmra.mrb[20].mxu1 %vm1519_vm3, %v8440_v62  ;;  %v9021_v62 = vld [vmem:[#allocation2 + $0x123] sm:$0xff] }
 0x57b   : > { %15283 = vmatprep.mubr.msk.bf16.mxu1 %vm1519_vm3, %v8731_v13  ;;  %v9045_v13 = vpack.c.bf16 %v9022_v16, %v9021_v62  ;;  %v9355_v16 = vpack.c.bf16 %v9336_v33, %v9335_v30 }
 0x582   : > { %15284 = vmatmul.mubr.msk.bf16.vlgmr.msra.gmra.mrb[24].mxu1 %vm1519_vm3, %v19638_v11  ;;  %v9024_v11 = vld [vmem:[#allocation2 + $0x143] sm:$0xff] }
 0x583   : > { %15316 = vmatpush3.bf16.msra.mxu1 %v16776_v24  ;;  %15287 = vmatprep.mubr.msk.bf16.mxu1 %vm1519_vm3, %v18604_v38  ;;  %v8713_v38 = vld [vmem:[#allocation2 + $0x10a] sm:$0xff]  ;;  %v9041_v24 = vpack.c.bf16 %v9014_v0, %v9013_v18  ;;  %v9351_v0 = vpack.c.bf16 %v9328_v27, %v9327_v19 }
 0x584   : > { %15317 = vmatprep.subr.bf16.mxu1 %v16777_v58  ;;  %v8738_v36 = vpack.c.bf16 %v8714_v47, %v8713_v38  ;;  %v9027_v38 = vld [vmem:[#allocation2 + $0x16b] sm:$0xff]  ;;  %v9028_v47 = vld [vmem:[#allocation2 + $0x173] sm:$0xff] }
 0x587   : > { %15318 = vmatpush3.bf16.msra.mxu1 %v16777_v58  ;;  %v9023_v58 = vld [vmem:[#allocation2 + $0x13b] sm:$0xff] }
 0x588   : > { %15351 = vmatprep.subr.bf16.mxu1 %v16778_v51  ;;  %v9046_v4 = vpack.c.bf16 %v9024_v11, %v9023_v58  ;;  %v9341_v11 = vld [vmem:[#allocation2 + $0x1cc] sm:$0xff] }
 0x58a   : > { %15288 = vmatmul.mubr.msk.bf16.gmra.mrb[28].mxu1 %vm1519_vm3, %v18606_v10  ;;  %v8717_v10 = vld [vmem:[#allocation2 + $0x13a] sm:$0xff] }
 0x58b   : > { %15291 = vmatprep.mubr.msk.bf16.mxu1 %vm1519_vm3, %v18620_v1  ;;  %v8718_v1 = vld [vmem:[#allocation2 + $0x142] sm:$0xff] }
 0x58c   : > { %v8740_v46 = vpack.c.bf16 %v8718_v1, %v8717_v10  ;;  %v9031_v10 = vld [vmem:[#allocation2 + $0x19b] sm:$0xff]  ;;  %v9032_v1 = vld [vmem:[#allocation2 + $0x1a3] sm:$0xff] }
 0x58d   : > { %v9050_v40 = vpack.c.bf16 %v9032_v1, %v9031_v10 }
 0x592   : > { %15292 = vmatmul.mubr.msk.bf16.gmra.mrb[0].mxu1 %vm1519_vm3, %v18622_v5  ;;  %v8721_v5 = vld [vmem:[#allocation2 + $0x16a] sm:$0xff] }
 0x593   : > { %15295 = vmatprep.mubr.msk.bf16.mxu1 %vm1519_vm3, %v8737_v6  ;;  %v8742_v15 = vpack.c.bf16 %v8722_v48, %v8721_v5  ;;  %v9311_v5 = vld [vmem:[#allocation2 + $0x64] sm:$0xff]  ;;  %v9312_v48 = vld [vmem:[#allocation2 + $0x6c] sm:$0xff] }
 0x594   : > { %v9343_v56 = vpack.c.bf16 %v9312_v48, %v9311_v5  ;;  %v19641_v5 = vld [vmem:[#allocation40_spill] sm:$0xff] }
 0x59a   : > { %15296 = vmatmul.mubr.msk.bf16.gmra.mrb[4].mxu1 %vm1519_vm3, %v8738_v36  ;;  %v9048_v36 = vpack.c.bf16 %v9028_v47, %v9027_v38  ;;  %v9808_v38 = vld [vmem:[#allocation3 + $0x1] sm:$0xff]  ;;  %v18861_v47 = vld [vmem:[#allocation3 + $0x11] sm:$0xff] }
 0x59b   : > { %15299 = vmatprep.mubr.msk.bf16.mxu1 %vm1519_vm3, %v8739_v53  ;;  %v9049_v53 = vpack.c.bf16 %v9030_v12, %v9029_v34  ;;  %v18868_v34 = vld [vmem:[%s19587_s5] sm:$0xff]  }
 0x5a2   : > { %15300 = vmatmul.mubr.msk.bf16.gmra.mrb[8].mxu1 %vm1519_vm3, %v8740_v46  ;;  %v9036_v46 = vld [vmem:[#allocation2 + $0x1d3] sm:$0xff] }
 0x5a3   : > { %15303 = vmatprep.mubr.msk.bf16.mxu1 %vm1519_vm3, %v8741_v55  ;;  %v9052_v55 = vpack.c.bf16 %v9036_v46, %v9035_v7 }
 0x5aa   : > { %15304 = vmatmul.mubr.msk.bf16.gmra.mrb[12].mxu1 %vm1519_vm3, %v8742_v15  ;;  %v9314_v15 = vld [vmem:[#allocation2 + $0x84] sm:$0xff] }
 0x5ab   : > { %15307 = vmatprep.mubr.msk.bf16.mxu1 %vm1519_vm3, %v8743_v9  ;;  %v9315_v9 = vld [vmem:[#allocation2 + $0x94] sm:$0xff]  ;;  %v9344_v32 = vpack.c.bf16 %v9314_v15, %v9313_v17 }
 0x5ac   : > { %v19642_v15 = vld [vmem:[#allocation41_spill] sm:$0xff] }
 0x5b2   : > { %15308 = vmatmul.mubr.msk.bf16.gmra.mrb[16].mxu1 %vm1519_vm3, %v8744_v49  ;;  %v9345_v49 = vpack.c.bf16 %v9316_v25, %v9315_v9 }
 0x5b3   : > { %15311 = vmatprep.mubr.msk.bf16.mxu1 %vm1519_vm3, %v18644_v60  ;;  %v9039_v60 = vpack.c.bf16 %v9010_v26, %v9009_v54  ;;  %v9324_v54 = vld [vmem:[#allocation2 + $0xfc] sm:$0xff] }
 0x5ba   : > { %15312 = vmatmul.mubr.msk.bf16.gmra.mrb[20].mxu1 %vm1519_vm3, %v8746_v21  ;;  %v9320_v21 = vld [vmem:[#allocation2 + $0xcc] sm:$0xff] }
 0x5bb   : > { %15319 = vmatprep.mubr.msk.bf16.mxu1 %vm1519_vm3, %v9037_v22  ;;  %v9347_v57 = vpack.c.bf16 %v9320_v21, %v9319_v52  ;;  %v9321_v22 = vld [vmem:[#allocation2 + $0xdc] sm:$0xff] }
 0x5bc   : > { %v9348_v26 = vpack.c.bf16 %v9322_v35, %v9321_v22 }
 0x5c2   : > { %15320 = vmatmul.mubr.msk.bf16.vlgmr.msra.gmra.mrb[24].mxu1 %vm1519_vm3, %v9038_v39  ;;  %v9349_v39 = vpack.c.bf16 %v9324_v54, %v9323_v59 }
 0x5c3   : > { %15352 = vmatpush3.bf16.msra.mxu1 %v16778_v51  ;;  %15323 = vmatprep.mubr.msk.bf16.mxu1 %vm1519_vm3, %v9039_v60  ;;  %v9025_v51 = vld [vmem:[#allocation2 + $0x153] sm:$0xff] }
 0x5c4   : > { %15353 = vmatprep.subr.bf16.mxu1 %v16779_v50  ;;  %v9047_v6 = vpack.c.bf16 %v9026_v37, %v9025_v51  ;;  %v9326_v60 = vld [vmem:[#allocation2 + $0x114] sm:$0xff] }
 0x5c5   : > { %v9342_v51 = vld [vmem:[#allocation2 + $0x1d4] sm:$0xff] }
 0x5c6   : > { %v9358_v37 = vpack.c.bf16 %v9342_v51, %v9341_v11  ;;  %v19646_v51 = vld [vmem:[#allocation10_spill] sm:$0xff] }
 0x5c7   : > { %15354 = vmatpush3.bf16.msra.mxu1 %v16779_v50  ;;  %v9325_v50 = vld [vmem:[#allocation2 + $0x10c] sm:$0xff] }
 0x5c8   : > { %v9350_v18 = vpack.c.bf16 %v9326_v60, %v9325_v50 }
 0x5ca   : > { %15324 = vmatmul.mubr.msk.bf16.gmra.mrb[28].mxu1 %vm1519_vm3, %v9040_v43  ;;  %v9329_v43 = vld [vmem:[#allocation2 + $0x13c] sm:$0xff] }
 0x5cb   : > { %15327 = vmatprep.mubr.msk.bf16.mxu1 %vm1519_vm3, %v9041_v24  ;;  %v9330_v24 = vld [vmem:[#allocation2 + $0x144] sm:$0xff] }
 0x5cc   : > { %v9352_v45 = vpack.c.bf16 %v9330_v24, %v9329_v43 }
 0x5d2   : > { %15328 = vmatmul.mubr.msk.bf16.gmra.mrb[0].mxu1 %vm1519_vm3, %v9042_v44  ;;  %v9333_v44 = vld [vmem:[#allocation2 + $0x16c] sm:$0xff] }
 0x5d3   : > { %15331 = vmatprep.mubr.msk.bf16.mxu1 %vm1519_vm3, %v9043_v28  ;;  %v9334_v28 = vld [vmem:[#allocation2 + $0x174] sm:$0xff] }
 0x5d4   : > { %v9354_v62 = vpack.c.bf16 %v9334_v28, %v9333_v44  ;;  %v19644_v28 = vld [vmem:[#allocation8_spill] sm:$0xff] }
 0x5da   : > { %15332 = vmatmul.mubr.msk.bf16.gmra.mrb[4].mxu1 %vm1519_vm3, %v9044_v2  ;;  %v9337_v2 = vld [vmem:[#allocation2 + $0x19c] sm:$0xff] }
 0x5db   : > { %15335 = vmatprep.mubr.msk.bf16.mxu1 %vm1519_vm3, %v9045_v13  ;;  %v9338_v13 = vld [vmem:[#allocation2 + $0x1a4] sm:$0xff] }
 0x5dc   : > { %v9356_v58 = vpack.c.bf16 %v9338_v13, %v9337_v2  ;;  %v19645_v2 = vld [vmem:[#allocation9_spill] sm:$0xff] }
 0x5e2   : > { %15336 = vmatmul.mubr.msk.bf16.gmra.mrb[8].mxu1 %vm1519_vm3, %v9046_v4  ;;  %v16780_v4 = vld [vmem:[%s19587_s5 + $0x10] sm:$0xff]  }
 0x5e3   : > { %15339 = vmatprep.mubr.msk.bf16.mxu1 %vm1519_vm3, %v9047_v6  ;;  %15387 = vmatprep.subr.bf16.mxu0 %v16780_v4  ;;  %v16781_v6 = vld [vmem:[%s19587_s5 + $0x18] sm:$0xff]  }
 0x5e4   : > { %15388 = vmatpush3.bf16.msra.mxu0 %v16780_v4 }
 0x5e5   : > { %15389 = vmatprep.subr.bf16.mxu0 %v16781_v6 }
 0x5e8   : > { %15390 = vmatpush3.bf16.msra.mxu0 %v16781_v6 }
 0x5e9   : > { %15399 = vmatprep.subr.bf16.mxu0 %v18868_v34 }
 0x5ea   : > { %15340 = vmatmul.mubr.msk.bf16.gmra.mrb[12].mxu1 %vm1519_vm3, %v9048_v36  ;;  %v18874_v36 = vld [vmem:[%s19586_s4] ss:$0 sm:$0xff] }
 0x5eb   : > { %15343 = vmatprep.mubr.msk.bf16.mxu1 %vm1519_vm3, %v9049_v53  ;;  %v19639_v53 = vld [vmem:[#allocation38_spill] sm:$0xff] }
 0x5f2   : > { %15344 = vmatmul.mubr.msk.bf16.gmra.mrb[16].mxu1 %vm1519_vm3, %v9050_v40  ;;  %v19640_v40 = vld [vmem:[#allocation39_spill] sm:$0xff] }
 0x5f3   : > { %15347 = vmatprep.mubr.msk.bf16.mxu1 %vm1519_vm3, %v18684_v31  ;;  %v9317_v31 = vld [vmem:[#allocation2 + $0xac] sm:$0xff] }
 0x5f4   : > { %v9346_v14 = vpack.c.bf16 %v9318_v20, %v9317_v31 }
 0x5fa   : > { %15348 = vmatmul.mubr.msk.bf16.gmra.mrb[20].mxu1 %vm1519_vm3, %v9052_v55 }
 0x5fb   : > { %15355 = vmatprep.mubr.msk.bf16.mxu1 %vm1519_vm3, %v9343_v56 }
 0x602   : > { %15356 = vmatmul.mubr.msk.bf16.vlgmr.msra.gmra.mrb[24].mxu1 %vm1519_vm3, %v9344_v32 }
 0x603   : > { %15359 = vmatprep.mubr.msk.bf16.mxu1 %vm1519_vm3, %v9345_v49 }
 0x60a   : > { %15360 = vmatmul.mubr.msk.bf16.gmra.mrb[28].mxu1 %vm1519_vm3, %v9346_v14 }
 0x60b   : > { %15363 = vmatprep.mubr.msk.bf16.mxu1 %vm1519_vm3, %v9347_v57 }
 0x612   : > { %15364 = vmatmul.mubr.msk.bf16.gmra.mrb[0].mxu1 %vm1519_vm3, %v9348_v26 }
 0x613   : > { %15367 = vmatprep.mubr.msk.bf16.mxu1 %vm1519_vm3, %v9349_v39 }
 0x61a   : > { %15368 = vmatmul.mubr.msk.bf16.gmra.mrb[4].mxu1 %vm1519_vm3, %v9350_v18 }
 0x61b   : > { %15371 = vmatprep.mubr.msk.bf16.mxu1 %vm1519_vm3, %v9351_v0 }
 0x622   : > { %15372 = vmatmul.mubr.msk.bf16.gmra.mrb[8].mxu1 %vm1519_vm3, %v9352_v45 }
 0x623   : > { %15375 = vmatprep.mubr.msk.bf16.mxu1 %vm1519_vm3, %v9353_v42 }
 0x62a   : > { %15376 = vmatmul.mubr.msk.bf16.gmra.mrb[12].mxu1 %vm1519_vm3, %v9354_v62 }
 0x62b   : > { %15379 = vmatprep.mubr.msk.bf16.mxu1 %vm1519_vm3, %v9355_v16 }
 0x632   : > { %15380 = vmatmul.mubr.msk.bf16.gmra.mrb[16].mxu1 %vm1519_vm3, %v9356_v58 }
 0x633   : > { %15383 = vmatprep.mubr.msk.bf16.mxu1 %vm1519_vm3, %v18724_v63  ;;  %v9816_v63 = vpack.c.bf16 %v18861_v47, %v9808_v38 }
 0x635   : > { %15391 = vmatprep.mubr.msk.bf16.mxu0 %vm1519_vm3, %v9816_v63 }
 0x63a   : > { %15384 = vmatmul.mubr.msk.bf16.gmra.mrb[20].mxu1 %vm1519_vm3, %v9358_v37 }
 0x6d5   : > { %v15357_v12 = vpop.f32.mrb[24].mxu1 }
 0x6d6   : > { %v15691_v10 = vadd.f32 %v15357_v12, %v19639_v53  ;;  %v9458_v1 = vpop.f32.mrb[25].mxu1 }
 0x6d7   : > { %v15692_v7 = vadd.f32 %v9458_v1, %v19640_v40  ;;  %v15358_v46 = vpop.f32.mrb[26].mxu1 }
 0x6d8   : > { %v9626_v55 = vadd.f32 %v15691_v10, %v18874_v36  ;;  %v15693_v48 = vadd.f32 %v15358_v46, %v19641_v5  ;;  %v9461_v56 = vpop.f32.mrb[27].mxu1 }
 0x6d9   : > { %v9624_v17 = vadd.f32 %v15692_v7, %v18874_v36  ;;  %v15694_v9 = vadd.f32 %v9461_v56, %v19642_v15  ;;  %v19647_v7 = vld [vmem:[#allocation13_spill] sm:$0xff]  ;;  %v19648_v56 = vld [vmem:[#allocation14_spill] sm:$0xff] }
 0x6da   : > { %v9657_v25 = vsel %vm1519_vm3, %v9626_v55, -inf  ;;  %v9627_v32 = vadd.f32 %v15693_v48, %v18874_v36 }
 0x6db   : > { %v9656_v49 = vsel %vm1519_vm3, %v9624_v17, -inf  ;;  %v9625_v31 = vadd.f32 %v15694_v9, %v18874_v36 }
 0x6dc   : > { %v9658_v20 = vmax.f32 %v9656_v49, %v9657_v25  ;;  %v9660_v52 = vsel %vm1519_vm3, %v9627_v32, -inf  ;;  %v19649_v32 = vld [vmem:[#allocation15_spill] sm:$0xff] }
 0x6dd   : > { %v9659_v21 = vsel %vm1519_vm3, %v9625_v31, -inf  ;;  %v15361_v14 = vpop.f32.mrb[28].mxu1 }
 0x6de   : > { %9704 = vst.msk [vmem:[#allocation5] sm:$0xff] %vm1519_vm3, %v9658_v20  ;;  %v9661_v57 = vmax.f32 %v9659_v21, %v9660_v52  ;;  %v15695_v22 = vadd.f32 %v15361_v14, %v18612_v8  ;;  %v9474_v35 = vpop.f32.mrb[29].mxu1  ;;  %v18923_v20 = vld [vmem:[#allocation3 + $0x13] sm:$0xff]  ;;  %v19650_v21 = vld [vmem:[#allocation16_spill] sm:$0xff] }
 0x6df   : > { %v15696_v59 = vadd.f32 %v9474_v35, %v18614_v41  ;;  %v15362_v54 = vpop.f32.mrb[30].mxu1 }
 0x6e0   : > { %9705 = vst.msk [vmem:[#allocation5 + $0x8] sm:$0xff] %vm1519_vm3, %v9661_v57  ;;  %v9630_v26 = vadd.f32 %v15695_v22, %v18874_v36  ;;  %v15697_v39 = vadd.f32 %v15362_v54, %v18616_v61  ;;  %v9477_v50 = vpop.f32.mrb[31].mxu1  ;;  %v18927_v57 = vld [vmem:[#allocation3 + $0x14] sm:$0xff] }
 0x6e1   : > { %v9628_v60 = vadd.f32 %v15696_v59, %v18874_v36  ;;  %v15698_v19 = vadd.f32 %v9477_v50, %v18618_v3 }
 0x6e2   : > { %v9663_v27 = vsel %vm1519_vm3, %v9630_v26, -inf  ;;  %v9631_v18 = vadd.f32 %v15697_v39, %v18874_v36 }
 0x6e3   : > { %v9662_v8 = vsel %vm1519_vm3, %v9628_v60, -inf  ;;  %v9629_v41 = vadd.f32 %v15698_v19, %v18874_v36 }
 0x6e4   : > { %v9664_v0 = vmax.f32 %v9662_v8, %v9663_v27  ;;  %v9666_v43 = vsel %vm1519_vm3, %v9631_v18, -inf }
 0x6e5   : > { %v9665_v24 = vsel %vm1519_vm3, %v9629_v41, -inf  ;;  %v15365_v29 = vpop.f32.mrb[0].mxu1 }
 0x6e6   : > { %9706 = vst.msk [vmem:[#allocation5 + $0x10] sm:$0xff] %vm1519_vm3, %v9664_v0  ;;  %v9667_v61 = vmax.f32 %v9665_v24, %v9666_v43  ;;  %v15699_v45 = vadd.f32 %v15365_v29, %v19643_v23  ;;  %v9490_v3 = vpop.f32.mrb[1].mxu1  ;;  %v19651_v0 = vld [vmem:[#allocation19_spill] sm:$0xff]  ;;  %v19652_v23 = vld [vmem:[#allocation20_spill] sm:$0xff] }
 0x6e7   : > { %v9720_v42 = vld [vmem:[#allocation5] ss:$2 sm:$0xff]  ;;  %v9736_v44 = vld [vmem:[#allocation5 + $0x1] ss:$2 sm:$0xff]  ;;  %v15700_v30 = vadd.f32 %v9490_v3, %v19644_v28  ;;  %v15366_v33 = vpop.f32.mrb[2].mxu1  ;;  %v19653_v28 = vld [vmem:[#allocation21_spill] sm:$0xff] }
 0x6e8   : > { %v9751_v62 = vmax.f32 %v9720_v42, %v9736_v44  ;;  %9707 = vst.msk [vmem:[#allocation5 + $0x18] sm:$0xff] %vm1519_vm3, %v9667_v61  ;;  %v9634_v16 = vadd.f32 %v15699_v45, %v18874_v36  ;;  %v15701_v13 = vadd.f32 %v15366_v33, %v19645_v2  ;;  %v9493_v58 = vpop.f32.mrb[3].mxu1 }
 0x6e9   : > { %v9632_v11 = vadd.f32 %v15700_v30, %v18874_v36  ;;  %v15702_v37 = vadd.f32 %v9493_v58, %v19646_v51 }
 0x6ea   : > { %9784 = vst.msk [vmem:[#allocation3 + $0x22] sm:$0xff] %vm1519_vm3, %v9751_v62  ;;  %v9669_v4 = vsel %vm1519_vm3, %v9634_v16, -inf  ;;  %v9635_v6 = vadd.f32 %v15701_v13, %v18874_v36  ;;  %v19654_v16 = vld [vmem:[#allocation22_spill] sm:$0xff] }
 0x6eb   : > { %v9668_v38 = vsel %vm1519_vm3, %v9632_v11, -inf  ;;  %v9633_v63 = vadd.f32 %v15702_v37, %v18874_v36 }
 0x6ec   : > { %v9670_v12 = vmax.f32 %v9668_v38, %v9669_v4  ;;  %v9672_v53 = vsel %vm1519_vm3, %v9635_v6, -inf  ;;  %v16783_v4 = vld [vmem:[%s19587_s5 + $0x8] sm:$0xff]  }
 0x6ed   : > { %v9671_v10 = vsel %vm1519_vm3, %v9633_v63, -inf  ;;  %v15369_v1 = vpop.f32.mrb[4].mxu1 }
 0x6ee   : > { %9708 = vst.msk [vmem:[#allocation5 + $0x20] sm:$0xff] %vm1519_vm3, %v9670_v12  ;;  %v9673_v40 = vmax.f32 %v9671_v10, %v9672_v53  ;;  %v15703_v46 = vadd.f32 %v15369_v1, %v19647_v7  ;;  %v9506_v55 = vpop.f32.mrb[5].mxu1 }
 0x6ef   : > { %v9722_v5 = vld [vmem:[#allocation5 + $0x10] ss:$2 sm:$0xff]  ;;  %v9738_v48 = vld [vmem:[#allocation5 + $0x11] ss:$2 sm:$0xff]  ;;  %v15704_v17 = vadd.f32 %v9506_v55, %v19648_v56  ;;  %v15370_v15 = vpop.f32.mrb[6].mxu1  ;;  %v18975_v55 = vld [vmem:[%s19587_s5 + $0x20] sm:$0xff]  }
 0x6f0   : > { %v9752_v9 = vmax.f32 %v9722_v5, %v9738_v48  ;;  %9709 = vst.msk [vmem:[#allocation5 + $0x28] sm:$0xff] %vm1519_vm3, %v9673_v40  ;;  %v9638_v25 = vadd.f32 %v15703_v46, %v18874_v36  ;;  %v15705_v49 = vadd.f32 %v15370_v15, %v19649_v32  ;;  %v9509_v31 = vpop.f32.mrb[7].mxu1  ;;  %v19655_v40 = vld [vmem:[#allocation24_spill] sm:$0xff]  ;;  %v19656_v56 = vld [vmem:[#allocation25_spill] sm:$0xff] }
 0x6f1   : > { %v9636_v52 = vadd.f32 %v15704_v17, %v18874_v36  ;;  %v15706_v14 = vadd.f32 %v9509_v31, %v19650_v21  ;;  %v18932_v59 = vld [vmem:[#allocation3 + $0x23] sm:$0xff] }
 0x6f2   : > { %9785 = vst.msk [vmem:[#allocation3 + $0x32] sm:$0xff] %vm1519_vm3, %v9752_v9  ;;  %v9675_v22 = vsel %vm1519_vm3, %v9638_v25, -inf  ;;  %v9639_v35 = vadd.f32 %v15705_v49, %v18874_v36  ;;  %v18934_v54 = vld [vmem:[#allocation3 + $0x24] sm:$0xff]  ;;  %v10696_v50 = vpack.c.bf16 %v18932_v59, %v18923_v20  ;;  %v19657_v25 = vld [vmem:[#allocation26_spill] sm:$0xff] }
 0x6f3   : > { %v9674_v26 = vsel %vm1519_vm3, %v9636_v52, -inf  ;;  %v9637_v39 = vadd.f32 %v15706_v14, %v18874_v36  ;;  %v10810_v27 = vpack.c.bf16 %v18934_v54, %v18927_v57  ;;  %v18952_v13 = vld [vmem:[#allocation3 + $0x21] sm:$0xff] }
 0x6f4   : > { %v9676_v60 = vmax.f32 %v9674_v26, %v9675_v22  ;;  %v9678_v19 = vsel %vm1519_vm3, %v9639_v35, -inf  ;;  %v19658_v52 = vld [vmem:[#allocation27_spill] sm:$0xff] }
 0x6f5   : > { %v9677_v18 = vsel %vm1519_vm3, %v9637_v39, -inf  ;;  %v15373_v8 = vpop.f32.mrb[8].mxu1 }
 0x6f6   : > { %9710 = vst.msk [vmem:[#allocation5 + $0x30] sm:$0xff] %vm1519_vm3, %v9676_v60  ;;  %v9679_v41 = vmax.f32 %v9677_v18, %v9678_v19  ;;  %v15707_v43 = vadd.f32 %v15373_v8, %v19651_v0  ;;  %v9522_v24 = vpop.f32.mrb[9].mxu1 }
 0x6f7   : > { %v9724_v29 = vld [vmem:[#allocation5 + $0x20] ss:$2 sm:$0xff]  ;;  %v9740_v61 = vld [vmem:[#allocation5 + $0x21] ss:$2 sm:$0xff]  ;;  %v15708_v45 = vadd.f32 %v9522_v24, %v19652_v23  ;;  %v15374_v3 = vpop.f32.mrb[10].mxu1 }
 0x6f8   : > { %v9753_v42 = vmax.f32 %v9724_v29, %v9740_v61  ;;  %9711 = vst.msk [vmem:[#allocation5 + $0x38] sm:$0xff] %vm1519_vm3, %v9679_v41  ;;  %v9642_v44 = vadd.f32 %v15707_v43, %v18874_v36  ;;  %v15709_v30 = vadd.f32 %v15374_v3, %v19653_v28  ;;  %v9525_v33 = vpop.f32.mrb[11].mxu1  ;;  %v19659_v28 = vld [vmem:[#allocation28_spill] sm:$0xff] }
 0x6f9   : > { %v9640_v62 = vadd.f32 %v15708_v45, %v18874_v36  ;;  %v15710_v2 = vadd.f32 %v9525_v33, %v19654_v16  ;;  %v9811_v58 = vld [vmem:[#allocation3 + $0x31] sm:$0xff] }
 0x6fa   : > { %9786 = vst.msk [vmem:[#allocation3 + $0x42] sm:$0xff] %vm1519_vm3, %v9753_v42  ;;  %v9681_v11 = vsel %vm1519_vm3, %v9642_v44, -inf  ;;  %v9643_v51 = vadd.f32 %v15709_v30, %v18874_v36  ;;  %v18958_v37 = vpack.c.bf16 %v9811_v58, %v18952_v13  ;;  %v18983_v22 = vld [vmem:[#allocation3 + $0x32] sm:$0xff] }
 0x6fb   : > { %v9680_v6 = vsel %vm1519_vm3, %v9640_v62, -inf  ;;  %v9641_v38 = vadd.f32 %v15710_v2, %v18874_v36  ;;  %v18991_v60 = vld [vmem:[#allocation3 + $0x33] sm:$0xff] }
 0x6fc   : > { %v9682_v63 = vmax.f32 %v9680_v6, %v9681_v11  ;;  %v9684_v12 = vsel %vm1519_vm3, %v9643_v51, -inf  ;;  %15392 = vmatmul.mubr.msk.bf16.vlgmr.msra.gmra.mrb[160].mxu0 %vm1519_vm3, %v18958_v37  ;;  %v19001_v43 = vld [vmem:[#allocation3 + $0x34] sm:$0xff]  ;;  %v19661_v6 = vld [vmem:[#allocation31_spill] sm:$0xff] }
 0x6fd   : > { %v9683_v53 = vsel %vm1519_vm3, %v9641_v38, -inf  ;;  %v15377_v10 = vpop.f32.mrb[12].mxu1  ;;  %15400 = vmatpush3.bf16.msra.mxu0 %v18868_v34  ;;  %v19660_v2 = vld [vmem:[#allocation29_spill] sm:$0xff] }
 0x6fe   : > { %9712 = vst.msk [vmem:[#allocation5 + $0x40] sm:$0xff] %vm1519_vm3, %v9682_v63  ;;  %v9685_v1 = vmax.f32 %v9683_v53, %v9684_v12  ;;  %v15711_v7 = vadd.f32 %v15377_v10, %v19655_v40  ;;  %v9538_v46 = vpop.f32.mrb[13].mxu1  ;;  %15401 = vmatprep.subr.bf16.mxu0 %v16783_v4  ;;  %v19662_v53 = vld [vmem:[#allocation32_spill] sm:$0xff] }
 0x6ff   : > { %v9726_v5 = vld [vmem:[#allocation5 + $0x30] ss:$2 sm:$0xff]  ;;  %v9742_v48 = vld [vmem:[#allocation5 + $0x31] ss:$2 sm:$0xff]  ;;  %v15712_v17 = vadd.f32 %v9538_v46, %v19656_v56  ;;  %v15378_v15 = vpop.f32.mrb[14].mxu1 }
 0x700   : > { %v9754_v9 = vmax.f32 %v9726_v5, %v9742_v48  ;;  %9713 = vst.msk [vmem:[#allocation5 + $0x48] sm:$0xff] %vm1519_vm3, %v9685_v1  ;;  %v9646_v34 = vadd.f32 %v15711_v7, %v18874_v36  ;;  %v15713_v32 = vadd.f32 %v15378_v15, %v19657_v25  ;;  %v9541_v49 = vpop.f32.mrb[15].mxu1  ;;  %v19663_v25 = vld [vmem:[#allocation33_spill] sm:$0xff] }
 0x701   : > { %v9644_v31 = vadd.f32 %v15712_v17, %v18874_v36  ;;  %v15714_v21 = vadd.f32 %v9541_v49, %v19658_v52  ;;  %v9812_v14 = vld [vmem:[#allocation3 + $0x41] sm:$0xff]  ;;  %15402 = vmatpush3.bf16.msra.mxu0 %v16783_v4 }
 0x702   : > { %v18985_v35 = vld [vmem:[#allocation3 + $0x42] sm:$0xff]  ;;  %9787 = vst.msk [vmem:[#allocation3 + $0x52] sm:$0xff] %vm1519_vm3, %v9754_v9  ;;  %v9687_v26 = vsel %vm1519_vm3, %v9646_v34, -inf  ;;  %v9647_v39 = vadd.f32 %v15713_v32, %v18874_v36  ;;  %15411 = vmatprep.subr.bf16.mxu0 %v18975_v55  ;;  %v18997_v8 = vpack.c.bf16 %v9812_v14, %v9811_v58 }
 0x703   : > { %v18993_v19 = vld [vmem:[#allocation3 + $0x43] sm:$0xff]  ;;  %v9686_v41 = vsel %vm1519_vm3, %v9644_v31, -inf  ;;  %v9645_v0 = vadd.f32 %v15714_v21, %v18874_v36  ;;  %v19005_v24 = vpack.c.bf16 %v18985_v35, %v18983_v22  ;;  %v19664_v21 = vld [vmem:[#allocation34_spill] sm:$0xff] }
 0x704   : > { %v18995_v18 = vld [vmem:[#allocation3 + $0x44] sm:$0xff]  ;;  %v19009_v29 = vpack.c.bf16 %v18993_v19, %v18991_v60  ;;  %v9688_v61 = vmax.f32 %v9686_v41, %v9687_v26  ;;  %v9690_v23 = vsel %vm1519_vm3, %v9647_v39, -inf }
 0x705   : > { %v19014_v45 = vpack.c.bf16 %v18995_v18, %v19001_v43  ;;  %v9689_v3 = vsel %vm1519_vm3, %v9645_v0, -inf  ;;  %v15381_v42 = vpop.f32.mrb[16].mxu1  ;;  %v19665_v0 = vld [vmem:[#allocation35_spill] sm:$0xff] }
 0x706   : > { %9714 = vst.msk [vmem:[#allocation5 + $0x50] sm:$0xff] %vm1519_vm3, %v9688_v61  ;;  %v9691_v44 = vmax.f32 %v9689_v3, %v9690_v23  ;;  %v15715_v30 = vadd.f32 %v15381_v42, %v19659_v28  ;;  %v9554_v33 = vpop.f32.mrb[17].mxu1  ;;  %v19666_v42 = vld [vmem:[#allocation36_spill] sm:$0xff] }
 0x707   : > { %v9728_v62 = vld [vmem:[#allocation5 + $0x40] ss:$2 sm:$0xff]  ;;  %v9744_v16 = vld [vmem:[#allocation5 + $0x41] ss:$2 sm:$0xff]  ;;  %v15716_v58 = vadd.f32 %v9554_v33, %v19660_v2  ;;  %v15382_v11 = vpop.f32.mrb[18].mxu1 }
 0x708   : > { %v9755_v51 = vmax.f32 %v9728_v62, %v9744_v16  ;;  %9715 = vst.msk [vmem:[#allocation5 + $0x58] sm:$0xff] %vm1519_vm3, %v9691_v44  ;;  %v9650_v4 = vadd.f32 %v15715_v30, %v18874_v36  ;;  %v15717_v38 = vadd.f32 %v15382_v11, %v19661_v6  ;;  %v9557_v63 = vpop.f32.mrb[19].mxu1 }
 0x709   : > { %v9648_v12 = vadd.f32 %v15716_v58, %v18874_v36  ;;  %v15718_v10 = vadd.f32 %v9557_v63, %v19662_v53  ;;  %v9813_v1 = vld [vmem:[#allocation3 + $0x51] sm:$0xff] }
 0x70a   : > { %9788 = vst.msk [vmem:[#allocation3 + $0x62] sm:$0xff] %vm1519_vm3, %v9755_v51  ;;  %v9693_v40 = vsel %vm1519_vm3, %v9650_v4, -inf  ;;  %v9651_v7 = vadd.f32 %v15717_v38, %v18874_v36  ;;  %v19028_v46 = vpack.c.bf16 %v9813_v1, %v9812_v14  ;;  %v10008_v30 = vld [vmem:[#allocation3 + $0x52] sm:$0xff] }
 0x70b   : > { %v9692_v5 = vsel %vm1519_vm3, %v9648_v12, -inf  ;;  %v9649_v48 = vadd.f32 %v15718_v10, %v18874_v36  ;;  %v19049_v2 = vld [vmem:[#allocation3 + $0x53] sm:$0xff] }
 0x70c   : > { %v9694_v56 = vmax.f32 %v9692_v5, %v9693_v40  ;;  %v9696_v17 = vsel %vm1519_vm3, %v9651_v7, -inf  ;;  %15395 = vmatprep.mubr.msk.bf16.mxu0 %vm1519_vm3, %v19028_v46  ;;  %v19059_v38 = vld [vmem:[#allocation3 + $0x54] sm:$0xff]  ;;  %v9792_v7 = vld [vmem:[#allocation3] sm:$0xff] }
 0x70d   : > { %v9695_v15 = vsel %vm1519_vm3, %v9649_v48, -inf  ;;  %v15385_v9 = vpop.f32.mrb[20].mxu1 }
 0x70e   : > { %9716 = vst.msk [vmem:[#allocation5 + $0x60] sm:$0xff] %vm1519_vm3, %v9694_v56  ;;  %v9697_v34 = vmax.f32 %v9695_v15, %v9696_v17  ;;  %v15719_v32 = vadd.f32 %v15385_v9, %v19663_v25  ;;  %v9570_v49 = vpop.f32.mrb[21].mxu1  ;;  %v19076_v17 = vld [vmem:[#allocation3 + $0x10] sm:$0xff] }
 0x70f   : > { %v9730_v31 = vld [vmem:[#allocation5 + $0x50] ss:$2 sm:$0xff]  ;;  %v9746_v52 = vld [vmem:[#allocation5 + $0x51] ss:$2 sm:$0xff]  ;;  %v15720_v14 = vadd.f32 %v9570_v49, %v19664_v21  ;;  %v15386_v26 = vpop.f32.mrb[22].mxu1  ;;  %v9800_v9 = vpack.c.bf16 %v19076_v17, %v9792_v7  ;;  %v19092_v21 = vld [vmem:[#allocation3 + $0x20] sm:$0xff] }
 0x710   : > { %v9756_v39 = vmax.f32 %v9730_v31, %v9746_v52  ;;  %9717 = vst.msk [vmem:[#allocation5 + $0x68] sm:$0xff] %vm1519_vm3, %v9697_v34  ;;  %v9654_v41 = vadd.f32 %v15719_v32, %v18874_v36  ;;  %v15721_v61 = vadd.f32 %v15386_v26, %v19665_v0  ;;  %v9573_v23 = vpop.f32.mrb[23].mxu1  ;;  %v19088_v49 = vld [vmem:[#allocation3 + $0x30] sm:$0xff]  ;;  %v19099_v26 = vld [vmem:[#allocation3 + $0x40] sm:$0xff] }
 0x711   : > { %v9652_v3 = vadd.f32 %v15720_v14, %v18874_v36  ;;  %v15722_v44 = vadd.f32 %v9573_v23, %v19666_v42  ;;  %v9814_v28 = vld [vmem:[#allocation3 + $0x61] sm:$0xff]  ;;  %v19090_v52 = vld [vmem:[#allocation3 + $0x50] sm:$0xff]  ;;  %v19097_v14 = vpack.c.bf16 %v19088_v49, %v19092_v21 }
 0x712   : > { %v19044_v33 = vld [vmem:[#allocation3 + $0x62] sm:$0xff]  ;;  %9789 = vst.msk [vmem:[#allocation3 + $0x72] sm:$0xff] %vm1519_vm3, %v9756_v39  ;;  %v9699_v62 = vsel %vm1519_vm3, %v9654_v41, -inf  ;;  %v9655_v16 = vadd.f32 %v15721_v61, %v18874_v36  ;;  %v19055_v51 = vpack.c.bf16 %v9814_v28, %v9813_v1  ;;  %v19106_v41 = vpack.c.bf16 %v19090_v52, %v19099_v26  ;;  %v16786_v61 = vld [vmem:[%s19587_s5 + $0x30] sm:$0xff]  }
 0x713   : > { %v19051_v58 = vld [vmem:[#allocation3 + $0x63] sm:$0xff]  ;;  %v9698_v4 = vsel %vm1519_vm3, %v9652_v3, -inf  ;;  %v9653_v6 = vadd.f32 %v15722_v44, %v18874_v36  ;;  %v19062_v63 = vpack.c.bf16 %v19044_v33, %v10008_v30  ;;  %v19118_v3 = vld [vmem:[#allocation3 + $0x12] sm:$0xff] }
 0x714   : > { %v19053_v11 = vld [vmem:[#allocation3 + $0x64] sm:$0xff]  ;;  %v19066_v12 = vpack.c.bf16 %v19051_v58, %v19049_v2  ;;  %v9700_v53 = vmax.f32 %v9698_v4, %v9699_v62  ;;  %v9702_v10 = vsel %vm1519_vm3, %v9655_v16, -inf  ;;  %v16787_v16 = vld [vmem:[%s19587_s5 + $0x38] sm:$0xff]   ;;  %v19137_v4 = vpack.c.bf16 %v10008_v30, %v18985_v35 }
 0x715   : > { %v19071_v1 = vpack.c.bf16 %v19053_v11, %v19059_v38  ;;  %v9701_v40 = vsel %vm1519_vm3, %v9653_v6, -inf  ;;  %v16785_v39 = vld [vmem:[%s19587_s5 + $0x28] sm:$0xff]   ;;  %v9798_v42 = vld [vmem:[#allocation3 + $0x60] sm:$0xff]  ;;  %v19158_v30 = vpack.c.bf16 %v18991_v60, %v18932_v59  ;;  %v16790_v60 = vld [vmem:[%s19587_s5 + $0x50] sm:$0xff]  }
 0x716   : > { %9718 = vst.msk [vmem:[#allocation5 + $0x70] sm:$0xff] %vm1519_vm3, %v9700_v53  ;;  %v9703_v36 = vmax.f32 %v9701_v40, %v9702_v10  ;;  %v10003_v0 = vld [vmem:[#allocation3 + $0x2] sm:$0xff] }
 0x717   : > { %v9732_v5 = vld [vmem:[#allocation5 + $0x60] ss:$2 sm:$0xff]  ;;  %v9748_v48 = vld [vmem:[#allocation5 + $0x61] ss:$2 sm:$0xff]  ;;  %v10011_v44 = vpack.c.bf16 %v19118_v3, %v10003_v0 }
 0x718   : > { %v9757_v56 = vmax.f32 %v9732_v5, %v9748_v48  ;;  %9719 = vst.msk [vmem:[#allocation5 + $0x78] sm:$0xff] %vm1519_vm3, %v9703_v36  ;;  %v10117_v6 = vld [vmem:[#allocation3 + $0x3] sm:$0xff]  ;;  %v19165_v36 = vpack.c.bf16 %v19049_v2, %v18993_v19  ;;  %v19186_v2 = vpack.c.bf16 %v19001_v43, %v18934_v54  ;;  %v16791_v48 = vld [vmem:[%s19587_s5 + $0x58] sm:$0xff]  }
 0x719   : > { %v19078_v15 = vld [vmem:[#allocation3 + $0x71] sm:$0xff]  ;;  %v10125_v10 = vpack.c.bf16 %v18923_v20, %v10117_v6  ;;  %v16789_v40 = vld [vmem:[%s19587_s5 + $0x48] sm:$0xff]   ;;  %v16792_v43 = vld [vmem:[%s19587_s5 + $0x60] sm:$0xff]  }
 0x71a   : > { %9790 = vst.msk [vmem:[#allocation3 + $0x82] sm:$0xff] %vm1519_vm3, %v9757_v56  ;;  %v19083_v34 = vpack.c.bf16 %v19078_v15, %v9814_v28  ;;  %v19116_v23 = vld [vmem:[#allocation3 + $0x70] sm:$0xff]  ;;  %v19193_v56 = vpack.c.bf16 %v19059_v38, %v18995_v18  ;;  %v10354_v18 = vpack.c.bf16 %v19092_v21, %v19076_v17  ;;  %v19215_v38 = vpack.c.bf16 %v19099_v26, %v19088_v49  ;;  %v16801_v59 = vld [vmem:[%s19587_s5 + $0xa8] sm:$0xff]   ;;  %v16803_v54 = vld [vmem:[%s19587_s5 + $0xb8] sm:$0xff]  }
 0x71b   : > { %v19122_v28 = vpack.c.bf16 %v19116_v23, %v9798_v42  ;;  %v19146_v53 = vld [vmem:[#allocation3 + $0x72] sm:$0xff] }
 0x71c   : > { %15396 = vmatmul.mubr.msk.bf16.gmra.mrb[164].mxu0 %vm1519_vm3, %v19083_v34  ;;  %v19151_v35 = vpack.c.bf16 %v19146_v53, %v19044_v33  ;;  %v10231_v33 = vld [vmem:[#allocation3 + $0x4] sm:$0xff]  ;;  %v19174_v7 = vld [vmem:[#allocation3 + $0x73] sm:$0xff] }
 0x71d   : > { %15403 = vmatprep.mubr.msk.bf16.mxu0 %vm1519_vm3, %v9800_v9  ;;  %v10239_v5 = vpack.c.bf16 %v18927_v57, %v10231_v33  ;;  %v19179_v19 = vpack.c.bf16 %v19174_v7, %v19051_v58  ;;  %v19202_v58 = vld [vmem:[#allocation3 + $0x74] sm:$0xff] }
 0x71e   : > { %v19206_v9 = vpack.c.bf16 %v19202_v58, %v19053_v11  ;;  %v19221_v11 = vpack.c.bf16 %v9798_v42, %v19090_v52  ;;  %v16794_v17 = vld [vmem:[%s19587_s5 + $0x70] sm:$0xff]   ;;  %v16795_v52 = vld [vmem:[%s19587_s5 + $0x78] sm:$0xff]  }
 0x71f   : > { %v9734_v25 = vld [vmem:[#allocation5 + $0x70] ss:$2 sm:$0xff]  ;;  %v9750_v32 = vld [vmem:[#allocation5 + $0x71] ss:$2 sm:$0xff] }
 0x720   : > { %v9758_v31 = vmax.f32 %v9734_v25, %v9750_v32  ;;  %v16793_v25 = vld [vmem:[%s19587_s5 + $0x68] sm:$0xff]   ;;  %v16806_v6 = vld [vmem:[%s19587_s5 + $0xd0] sm:$0xff]  }
 0x721   : > { %v19230_v32 = vld [vmem:[#allocation3 + $0x80] sm:$0xff] }
 0x722   : > { %9791 = vst.msk [vmem:[#allocation3 + $0x92] sm:$0xff] %vm1519_vm3, %v9758_v31  ;;  %v19234_v49 = vpack.c.bf16 %v19230_v32, %v19116_v23  ;;  %v10468_v31 = vpack.c.bf16 %v18952_v13, %v18861_v47  ;;  %v16796_v47 = vld [vmem:[%s19587_s5 + $0x80] sm:$0xff]   ;;  %v16799_v23 = vld [vmem:[%s19587_s5 + $0x98] sm:$0xff]  }
 0x723   : > { %v19251_v13 = vld [vmem:[#allocation3 + $0x81] sm:$0xff] }
 0x724   : > { %15404 = vmatmul.mubr.msk.bf16.vlgmr.msra.gmra.mrb[160].mxu0 %vm1519_vm3, %v19097_v14  ;;  %v19255_v21 = vpack.c.bf16 %v19251_v13, %v19078_v15  ;;  %v16798_v15 = vld [vmem:[%s19587_s5 + $0x90] sm:$0xff]   ;;  %v10581_v0 = vld [vmem:[#allocation3 + $0x82] sm:$0xff] }
 0x725   : > { %15412 = vmatpush3.bf16.msra.mxu0 %v18975_v55  ;;  %15407 = vmatprep.mubr.msk.bf16.mxu0 %vm1519_vm3, %v19106_v41  ;;  %v19127_v55 = vld [vmem:[#allocation3 + $0x22] sm:$0xff] }
 0x726   : > { %15413 = vmatprep.subr.bf16.mxu0 %v16785_v39  ;;  %v19131_v62 = vpack.c.bf16 %v18983_v22, %v19127_v55  ;;  %v16788_v22 = vld [vmem:[%s19587_s5 + $0x40] sm:$0xff]   ;;  %v10582_v26 = vpack.c.bf16 %v19127_v55, %v19118_v3 }
 0x727   : > { %v16800_v3 = vld [vmem:[%s19587_s5 + $0xa0] sm:$0xff]  }
 0x728   : > { %v10695_v42 = vld [vmem:[#allocation3 + $0x83] sm:$0xff] }
 0x729   : > { %15414 = vmatpush3.bf16.msra.mxu0 %v16785_v39  ;;  %v16797_v39 = vld [vmem:[%s19587_s5 + $0x88] sm:$0xff]   ;;  %v19292_v20 = vpack.c.bf16 %v10695_v42, %v19174_v7  ;;  %v19327_v55 = vld [vmem:[#allocation3 + $0x90] sm:$0xff]  ;;  %v16812_v7 = vld [vmem:[%s19587_s5 + $0x100] sm:$0xff]  }
 0x72a   : > { %15423 = vmatprep.subr.bf16.mxu0 %v16786_v61  ;;  %v19386_v33 = vld [vmem:[#allocation3 + $0x93] sm:$0xff] }
 0x72c   : > { %15408 = vmatmul.mubr.msk.bf16.gmra.mrb[164].mxu0 %vm1519_vm3, %v19122_v28 }
 0x72d   : > { %15415 = vmatprep.mubr.msk.bf16.mxu0 %vm1519_vm3, %v10011_v44  ;;  %v10809_v44 = vld [vmem:[#allocation3 + $0x84] sm:$0xff] }
 0x72e   : > { %v19311_v57 = vpack.c.bf16 %v10809_v44, %v19202_v58  ;;  %v19424_v58 = vld [vmem:[#allocation3 + $0xa0] sm:$0xff] }
 0x734   : > { %15416 = vmatmul.mubr.msk.bf16.vlgmr.msra.gmra.mrb[160].mxu0 %vm1519_vm3, %v19131_v62 }
 0x735   : > { %15424 = vmatpush3.bf16.msra.mxu0 %v16786_v61  ;;  %15419 = vmatprep.mubr.msk.bf16.mxu0 %vm1519_vm3, %v19137_v4  ;;  %v19273_v61 = vpack.c.bf16 %v10581_v0, %v19146_v53  ;;  %v19367_v53 = vld [vmem:[#allocation3 + $0x92] sm:$0xff] }
 0x736   : > { %15425 = vmatprep.subr.bf16.mxu0 %v16787_v16 }
 0x739   : > { %15426 = vmatpush3.bf16.msra.mxu0 %v16787_v16  ;;  %v16805_v16 = vld [vmem:[%s19587_s5 + $0xc8] sm:$0xff]  }
 0x73a   : > { %15435 = vmatprep.subr.bf16.mxu0 %v16788_v22 }
 0x73c   : > { %15420 = vmatmul.mubr.msk.bf16.gmra.mrb[164].mxu0 %vm1519_vm3, %v19151_v35 }
 0x73d   : > { %15427 = vmatprep.mubr.msk.bf16.mxu0 %vm1519_vm3, %v10125_v10  ;;  %v16809_v10 = vld [vmem:[%s19587_s5 + $0xe8] sm:$0xff]  }
 0x744   : > { %15428 = vmatmul.mubr.msk.bf16.vlgmr.msra.gmra.mrb[160].mxu0 %vm1519_vm3, %v19158_v30 }
 0x745   : > { %15436 = vmatpush3.bf16.msra.mxu0 %v16788_v22  ;;  %15431 = vmatprep.mubr.msk.bf16.mxu0 %vm1519_vm3, %v19165_v36  ;;  %v19347_v22 = vld [vmem:[#allocation3 + $0x91] sm:$0xff] }
 0x746   : > { %15437 = vmatprep.subr.bf16.mxu0 %v16789_v40 }
 0x749   : > { %15438 = vmatpush3.bf16.msra.mxu0 %v16789_v40  ;;  %v16810_v40 = vld [vmem:[%s19587_s5 + $0xf0] sm:$0xff]  }
 0x74a   : > { %15447 = vmatprep.subr.bf16.mxu0 %v16790_v60 }
 0x74c   : > { %15432 = vmatmul.mubr.msk.bf16.gmra.mrb[164].mxu0 %vm1519_vm3, %v19179_v19 }
 0x74d   : > { %15439 = vmatprep.mubr.msk.bf16.mxu0 %vm1519_vm3, %v10239_v5  ;;  %v19405_v5 = vld [vmem:[#allocation3 + $0x94] sm:$0xff] }
 0x754   : > { %15440 = vmatmul.mubr.msk.bf16.vlgmr.msra.gmra.mrb[160].mxu0 %vm1519_vm3, %v19186_v2 }
 0x755   : > { %15448 = vmatpush3.bf16.msra.mxu0 %v16790_v60  ;;  %15443 = vmatprep.mubr.msk.bf16.mxu0 %vm1519_vm3, %v19193_v56  ;;  %v16811_v60 = vld [vmem:[%s19587_s5 + $0xf8] sm:$0xff]  }
 0x756   : > { %15449 = vmatprep.subr.bf16.mxu0 %v16791_v48 }
 0x759   : > { %15450 = vmatpush3.bf16.msra.mxu0 %v16791_v48  ;;  %v16813_v48 = vld [vmem:[%s19587_s5 + $0x108] sm:$0xff]  }
 0x75a   : > { %15459 = vmatprep.subr.bf16.mxu0 %v16792_v43 }
 0x75c   : > { %15444 = vmatmul.mubr.msk.bf16.gmra.mrb[164].mxu0 %vm1519_vm3, %v19206_v9 }
 0x75d   : > { %15451 = vmatprep.mubr.msk.bf16.mxu0 %vm1519_vm3, %v10354_v18  ;;  %v11498_v18 = vpack.c.bf16 %v19424_v58, %v19327_v55 }
 0x764   : > { %15452 = vmatmul.mubr.msk.bf16.vlgmr.msra.gmra.mrb[160].mxu0 %vm1519_vm3, %v19215_v38 }
 0x765   : > { %15460 = vmatpush3.bf16.msra.mxu0 %v16792_v43  ;;  %15455 = vmatprep.mubr.msk.bf16.mxu0 %vm1519_vm3, %v19221_v11  ;;  %v16814_v43 = vld [vmem:[%s19587_s5 + $0x110] sm:$0xff]  }
 0x766   : > { %15461 = vmatprep.subr.bf16.mxu0 %v16793_v25 }
 0x769   : > { %15462 = vmatpush3.bf16.msra.mxu0 %v16793_v25  ;;  %v16816_v25 = vld [vmem:[%s19587_s5 + $0x120] sm:$0xff]  }
 0x76a   : > { %15471 = vmatprep.subr.bf16.mxu0 %v16794_v17 }
 0x76c   : > { %15456 = vmatmul.mubr.msk.bf16.gmra.mrb[164].mxu0 %vm1519_vm3, %v19234_v49 }
 0x76d   : > { %15463 = vmatprep.mubr.msk.bf16.mxu0 %vm1519_vm3, %v10468_v31  ;;  %v19475_v31 = vld [vmem:[#allocation3 + $0xa3] sm:$0xff] }
 0x774   : > { %15464 = vmatmul.mubr.msk.bf16.vlgmr.msra.gmra.mrb[160].mxu0 %vm1519_vm3, %v18997_v8 }
 0x775   : > { %15472 = vmatpush3.bf16.msra.mxu0 %v16794_v17  ;;  %15467 = vmatprep.mubr.msk.bf16.mxu0 %vm1519_vm3, %v19055_v51  ;;  %v16818_v17 = vld [vmem:[%s19587_s5 + $0x130] sm:$0xff]  }
 0x776   : > { %15473 = vmatprep.subr.bf16.mxu0 %v16795_v52 }
 0x779   : > { %15474 = vmatpush3.bf16.msra.mxu0 %v16795_v52  ;;  %v16822_v52 = vld [vmem:[%s19587_s5 + $0x150] sm:$0xff]  }
 0x77a   : > { %15483 = vmatprep.subr.bf16.mxu0 %v16796_v47 }
 0x77c   : > { %15468 = vmatmul.mubr.msk.bf16.gmra.mrb[164].mxu0 %vm1519_vm3, %v19255_v21 }
 0x77d   : > { %15475 = vmatprep.mubr.msk.bf16.mxu0 %vm1519_vm3, %v10582_v26 }
 0x784   : > { %15476 = vmatmul.mubr.msk.bf16.vlgmr.msra.gmra.mrb[160].mxu0 %vm1519_vm3, %v19005_v24 }
 0x785   : > { %15484 = vmatpush3.bf16.msra.mxu0 %v16796_v47  ;;  %15479 = vmatprep.mubr.msk.bf16.mxu0 %vm1519_vm3, %v19062_v63  ;;  %v19492_v47 = vld [vmem:[#allocation3 + $0xa4] sm:$0xff] }
 0x786   : > { %15485 = vmatprep.subr.bf16.mxu0 %v16797_v39 }
 0x789   : > { %15486 = vmatpush3.bf16.msra.mxu0 %v16797_v39  ;;  %v12172_v39 = vld [vmem:[#allocation3 + $0x41] sm:$0xff] }
 0x78a   : > { %15495 = vmatprep.subr.bf16.mxu0 %v16798_v15 }
 0x78c   : > { %15480 = vmatmul.mubr.msk.bf16.gmra.mrb[164].mxu0 %vm1519_vm3, %v19273_v61 }
 0x78d   : > { %15487 = vmatprep.mubr.msk.bf16.mxu0 %vm1519_vm3, %v10696_v50  ;;  %v16802_v50 = vld [vmem:[%s19587_s5 + $0xb0] sm:$0xff]  }
 0x794   : > { %15488 = vmatmul.mubr.msk.bf16.vlgmr.msra.gmra.mrb[160].mxu0 %vm1519_vm3, %v19009_v29 }
 0x795   : > { %15496 = vmatpush3.bf16.msra.mxu0 %v16798_v15  ;;  %15491 = vmatprep.mubr.msk.bf16.mxu0 %vm1519_vm3, %v19066_v12 }
 0x796   : > { %15497 = vmatprep.subr.bf16.mxu0 %v16799_v23 }
 0x799   : > { %15498 = vmatpush3.bf16.msra.mxu0 %v16799_v23  ;;  %v16825_v23 = vld [vmem:[%s19587_s5 + $0x168] sm:$0xff]  }
 0x79a   : > { %15507 = vmatprep.subr.bf16.mxu0 %v16800_v3 }
 0x79c   : > { %15492 = vmatmul.mubr.msk.bf16.gmra.mrb[164].mxu0 %vm1519_vm3, %v19292_v20 }
 0x79d   : > { %15499 = vmatprep.mubr.msk.bf16.mxu0 %vm1519_vm3, %v10810_v27  ;;  %v16804_v27 = vld [vmem:[%s19587_s5 + $0xc0] sm:$0xff]  }
 0x7a4   : > { %15500 = vmatmul.mubr.msk.bf16.vlgmr.msra.gmra.mrb[160].mxu0 %vm1519_vm3, %v19014_v45 }
 0x7a5   : > { %15508 = vmatpush3.bf16.msra.mxu0 %v16800_v3  ;;  %15503 = vmatprep.mubr.msk.bf16.mxu0 %vm1519_vm3, %v19071_v1  ;;  %v12179_v3 = vld [vmem:[#allocation3 + $0xb1] sm:$0xff] }
 0x7a6   : > { %15509 = vmatprep.subr.bf16.mxu0 %v16801_v59 }
 0x7a9   : > { %15510 = vmatpush3.bf16.msra.mxu0 %v16801_v59  ;;  %v16827_v59 = vld [vmem:[%s19587_s5 + $0x178] sm:$0xff]  }
 0x7aa   : > { %15519 = vmatprep.subr.bf16.mxu0 %v16802_v50 }
 0x7ac   : > { %15504 = vmatmul.mubr.msk.bf16.gmra.mrb[164].mxu0 %vm1519_vm3, %v19311_v57 }
 0x7ad   : > { %15511 = vmatprep.mubr.msk.bf16.mxu0 %vm1519_vm3, %v19097_v14  ;;  %v19331_v14 = vpack.c.bf16 %v19327_v55, %v19230_v32  ;;  %v19458_v32 = vld [vmem:[#allocation3 + $0xa2] sm:$0xff] }
 0x7b4   : > { %15512 = vmatmul.mubr.msk.bf16.vlgmr.msra.gmra.mrb[160].mxu0 %vm1519_vm3, %v19106_v41 }
 0x7b5   : > { %15520 = vmatpush3.bf16.msra.mxu0 %v16802_v50  ;;  %15515 = vmatprep.mubr.msk.bf16.mxu0 %vm1519_vm3, %v19122_v28  ;;  %v12293_v50 = vld [vmem:[#allocation3 + $0xb2] sm:$0xff] }
 0x7b6   : > { %15521 = vmatprep.subr.bf16.mxu0 %v16803_v54 }
 0x7b9   : > { %15522 = vmatpush3.bf16.msra.mxu0 %v16803_v54 }
 0x7ba   : > { %15531 = vmatprep.subr.bf16.mxu0 %v16804_v27 }
 0x7bc   : > { %15516 = vmatmul.mubr.msk.bf16.gmra.mrb[164].mxu0 %vm1519_vm3, %v19331_v14 }
 0x7bd   : > { %15523 = vmatprep.mubr.msk.bf16.mxu0 %vm1519_vm3, %v18958_v37  ;;  %v19351_v37 = vpack.c.bf16 %v19347_v22, %v19251_v13  ;;  %v12065_v13 = vld [vmem:[#allocation3 + $0xb0] sm:$0xff] }
 0x7be   : > { %v12069_v26 = vpack.c.bf16 %v12065_v13, %v19424_v58 }
 0x7c4   : > { %15524 = vmatmul.mubr.msk.bf16.vlgmr.msra.gmra.mrb[160].mxu0 %vm1519_vm3, %v19028_v46  ;;  %v16807_v46 = vld [vmem:[%s19587_s5 + $0xd8] sm:$0xff]  }
 0x7c5   : > { %15532 = vmatpush3.bf16.msra.mxu0 %v16804_v27  ;;  %15527 = vmatprep.mubr.msk.bf16.mxu0 %vm1519_vm3, %v19083_v34  ;;  %v16808_v34 = vld [vmem:[%s19587_s5 + $0xe0] sm:$0xff]  }
 0x7c6   : > { %15533 = vmatprep.subr.bf16.mxu0 %v16805_v16  ;;  %v13675_v27 = vld [vmem:[%s19588_s6] ss:$0 sm:$0xff] }
 0x7c9   : > { %15534 = vmatpush3.bf16.msra.mxu0 %v16805_v16 }
 0x7ca   : > { %15543 = vmatprep.subr.bf16.mxu0 %v16806_v6 }
 0x7cc   : > { %15528 = vmatmul.mubr.msk.bf16.gmra.mrb[164].mxu0 %vm1519_vm3, %v19351_v37 }
 0x7cd   : > { %15535 = vmatprep.mubr.msk.bf16.mxu0 %vm1519_vm3, %v19131_v62  ;;  %v19370_v62 = vpack.c.bf16 %v19367_v53, %v10581_v0  ;;  %v12174_v0 = vld [vmem:[#allocation3 + $0x61] sm:$0xff] }
 0x7d4   : > { %15536 = vmatmul.mubr.msk.bf16.vlgmr.msra.gmra.mrb[160].mxu0 %vm1519_vm3, %v19137_v4 }
 0x7d5   : > { %15544 = vmatpush3.bf16.msra.mxu0 %v16806_v6  ;;  %15539 = vmatprep.mubr.msk.bf16.mxu0 %vm1519_vm3, %v19151_v35 }
 0x7d6   : > { %15545 = vmatprep.subr.bf16.mxu0 %v16807_v46 }
 0x7d9   : > { %15546 = vmatpush3.bf16.msra.mxu0 %v16807_v46 }
 0x7da   : > { %15555 = vmatprep.subr.bf16.mxu0 %v16808_v34 }
 0x7dc   : > { %15540 = vmatmul.mubr.msk.bf16.gmra.mrb[164].mxu0 %vm1519_vm3, %v19370_v62 }
 0x7dd   : > { %15547 = vmatprep.mubr.msk.bf16.mxu0 %vm1519_vm3, %v19158_v30  ;;  %v19389_v30 = vpack.c.bf16 %v19386_v33, %v10695_v42  ;;  %v16826_v42 = vld [vmem:[%s19587_s5 + $0x170] sm:$0xff]  }
 0x7e4   : > { %15548 = vmatmul.mubr.msk.bf16.vlgmr.msra.gmra.mrb[160].mxu0 %vm1519_vm3, %v19165_v36 }
 0x7e5   : > { %15556 = vmatpush3.bf16.msra.mxu0 %v16808_v34  ;;  %15551 = vmatprep.mubr.msk.bf16.mxu0 %vm1519_vm3, %v19179_v19 }
 0x7e6   : > { %15557 = vmatprep.subr.bf16.mxu0 %v16809_v10 }
 0x7e9   : > { %15558 = vmatpush3.bf16.msra.mxu0 %v16809_v10 }
 0x7ea   : > { %15567 = vmatprep.subr.bf16.mxu0 %v16810_v40 }
 0x7ec   : > { %15552 = vmatmul.mubr.msk.bf16.gmra.mrb[164].mxu0 %vm1519_vm3, %v19389_v30 }
 0x7ed   : > { %15559 = vmatprep.mubr.msk.bf16.mxu0 %vm1519_vm3, %v19186_v2  ;;  %v19408_v2 = vpack.c.bf16 %v19405_v5, %v10809_v44  ;;  %v16828_v44 = vld [vmem:[%s19587_s5 + $0x180] sm:$0xff]  }
 0x7f4   : > { %15560 = vmatmul.mubr.msk.bf16.vlgmr.msra.gmra.mrb[160].mxu0 %vm1519_vm3, %v19193_v56 }
 0x7f5   : > { %15568 = vmatpush3.bf16.msra.mxu0 %v16810_v40  ;;  %15563 = vmatprep.mubr.msk.bf16.mxu0 %vm1519_vm3, %v19206_v9 }
 0x7f6   : > { %15569 = vmatprep.subr.bf16.mxu0 %v16811_v60 }
 0x7f9   : > { %15570 = vmatpush3.bf16.msra.mxu0 %v16811_v60 }
 0x7fa   : > { %15579 = vmatprep.subr.bf16.mxu0 %v16812_v7 }
 0x7fc   : > { %15564 = vmatmul.mubr.msk.bf16.gmra.mrb[164].mxu0 %vm1519_vm3, %v19408_v2 }
 0x7fd   : > { %15571 = vmatprep.mubr.msk.bf16.mxu0 %vm1519_vm3, %v19215_v38  ;;  %v16815_v38 = vld [vmem:[%s19587_s5 + $0x118] sm:$0xff]  }
 0x804   : > { %15572 = vmatmul.mubr.msk.bf16.vlgmr.msra.gmra.mrb[160].mxu0 %vm1519_vm3, %v19221_v11  ;;  %v19441_v11 = vld [vmem:[#allocation3 + $0xa1] sm:$0xff] }
 0x805   : > { %15580 = vmatpush3.bf16.msra.mxu0 %v16812_v7  ;;  %15575 = vmatprep.mubr.msk.bf16.mxu0 %vm1519_vm3, %v19234_v49  ;;  %v16820_v49 = vld [vmem:[%s19587_s5 + $0x140] sm:$0xff]  }
 0x806   : > { %15581 = vmatprep.subr.bf16.mxu0 %v16813_v48 }
 0x809   : > { %15582 = vmatpush3.bf16.msra.mxu0 %v16813_v48 }
 0x80a   : > { %15591 = vmatprep.subr.bf16.mxu0 %v16814_v43 }
 0x80c   : > { %15576 = vmatmul.mubr.msk.bf16.gmra.mrb[164].mxu0 %vm1519_vm3, %v11498_v18 }
 0x80d   : > { %15583 = vmatprep.mubr.msk.bf16.mxu0 %vm1519_vm3, %v18997_v8  ;;  %v11612_v8 = vpack.c.bf16 %v19441_v11, %v19347_v22 }
 0x814   : > { %15584 = vmatmul.mubr.msk.bf16.vlgmr.msra.gmra.mrb[160].mxu0 %vm1519_vm3, %v19055_v51  ;;  %v16817_v51 = vld [vmem:[%s19587_s5 + $0x128] sm:$0xff]  }
 0x815   : > { %15592 = vmatpush3.bf16.msra.mxu0 %v16814_v43  ;;  %15587 = vmatprep.mubr.msk.bf16.mxu0 %vm1519_vm3, %v19255_v21  ;;  %v16824_v21 = vld [vmem:[%s19587_s5 + $0x160] sm:$0xff]  }
 0x816   : > { %15593 = vmatprep.subr.bf16.mxu0 %v16815_v38 }
 0x819   : > { %15594 = vmatpush3.bf16.msra.mxu0 %v16815_v38 }
 0x81a   : > { %15603 = vmatprep.subr.bf16.mxu0 %v16816_v25 }
 0x81c   : > { %15588 = vmatmul.mubr.msk.bf16.gmra.mrb[164].mxu0 %vm1519_vm3, %v11612_v8 }
 0x81d   : > { %15595 = vmatprep.mubr.msk.bf16.mxu0 %vm1519_vm3, %v19005_v24  ;;  %v11726_v24 = vpack.c.bf16 %v19458_v32, %v19367_v53 }
 0x824   : > { %15596 = vmatmul.mubr.msk.bf16.vlgmr.msra.gmra.mrb[160].mxu0 %vm1519_vm3, %v19062_v63  ;;  %v16819_v63 = vld [vmem:[%s19587_s5 + $0x138] sm:$0xff]  }
 0x825   : > { %15604 = vmatpush3.bf16.msra.mxu0 %v16816_v25  ;;  %15599 = vmatprep.mubr.msk.bf16.mxu0 %vm1519_vm3, %v19273_v61 }
 0x826   : > { %15605 = vmatprep.subr.bf16.mxu0 %v16817_v51 }
 0x829   : > { %15606 = vmatpush3.bf16.msra.mxu0 %v16817_v51 }
 0x82a   : > { %15615 = vmatprep.subr.bf16.mxu0 %v16818_v17 }
 0x82c   : > { %15600 = vmatmul.mubr.msk.bf16.gmra.mrb[164].mxu0 %vm1519_vm3, %v11726_v24 }
 0x82d   : > { %15607 = vmatprep.mubr.msk.bf16.mxu0 %vm1519_vm3, %v19009_v29  ;;  %v11840_v29 = vpack.c.bf16 %v19475_v31, %v19386_v33 }
 0x834   : > { %15608 = vmatmul.mubr.msk.bf16.vlgmr.msra.gmra.mrb[160].mxu0 %vm1519_vm3, %v19066_v12  ;;  %v16821_v12 = vld [vmem:[%s19587_s5 + $0x148] sm:$0xff]  }
 0x835   : > { %15616 = vmatpush3.bf16.msra.mxu0 %v16818_v17  ;;  %15611 = vmatprep.mubr.msk.bf16.mxu0 %vm1519_vm3, %v19292_v20  ;;  %v12183_v20 = vpack.c.bf16 %v12179_v3, %v19441_v11 }
 0x836   : > { %15617 = vmatprep.subr.bf16.mxu0 %v16819_v63 }
 0x839   : > { %15618 = vmatpush3.bf16.msra.mxu0 %v16819_v63 }
 0x83a   : > { %15627 = vmatprep.subr.bf16.mxu0 %v16820_v49 }
 0x83c   : > { %15612 = vmatmul.mubr.msk.bf16.gmra.mrb[164].mxu0 %vm1519_vm3, %v11840_v29 }
 0x83d   : > { %15619 = vmatprep.mubr.msk.bf16.mxu0 %vm1519_vm3, %v19014_v45  ;;  %v11954_v45 = vpack.c.bf16 %v19492_v47, %v19405_v5 }
 0x844   : > { %15620 = vmatmul.mubr.msk.bf16.vlgmr.msra.gmra.mrb[160].mxu0 %vm1519_vm3, %v19071_v1  ;;  %v16823_v1 = vld [vmem:[%s19587_s5 + $0x158] sm:$0xff]  }
 0x845   : > { %15628 = vmatpush3.bf16.msra.mxu0 %v16820_v49  ;;  %15623 = vmatprep.mubr.msk.bf16.mxu0 %vm1519_vm3, %v19311_v57  ;;  %v12297_v57 = vpack.c.bf16 %v12293_v50, %v19458_v32 }
 0x846   : > { %15629 = vmatprep.subr.bf16.mxu0 %v16821_v12 }
 0x849   : > { %15630 = vmatpush3.bf16.msra.mxu0 %v16821_v12 }
 0x84a   : > { %15639 = vmatprep.subr.bf16.mxu0 %v16822_v52 }
 0x84c   : > { %15624 = vmatmul.mubr.msk.bf16.gmra.mrb[164].mxu0 %vm1519_vm3, %v11954_v45 }
 0x84d   : > { %15631 = vmatprep.mubr.msk.bf16.mxu0 %vm1519_vm3, %v19106_v41  ;;  %v12173_v41 = vld [vmem:[#allocation3 + $0x51] sm:$0xff] }
 0x84e   : > { %v12180_v15 = vpack.c.bf16 %v12173_v41, %v12172_v39 }
 0x854   : > { %15632 = vmatmul.mubr.msk.bf16.vlgmr.msra.gmra.mrb[160].mxu0 %vm1519_vm3, %v19122_v28  ;;  %v12175_v28 = vld [vmem:[#allocation3 + $0x71] sm:$0xff] }
 0x855   : > { %15640 = vmatpush3.bf16.msra.mxu0 %v16822_v52  ;;  %15635 = vmatprep.mubr.msk.bf16.mxu0 %vm1519_vm3, %v19331_v14  ;;  %v12181_v61 = vpack.c.bf16 %v12175_v28, %v12174_v0 }
 0x856   : > { %15641 = vmatprep.subr.bf16.mxu0 %v16823_v1 }
 0x859   : > { %15642 = vmatpush3.bf16.msra.mxu0 %v16823_v1 }
 0x85a   : > { %15651 = vmatprep.subr.bf16.mxu0 %v16824_v21 }
 0x85c   : > { %15636 = vmatmul.mubr.msk.bf16.gmra.mrb[164].mxu0 %vm1519_vm3, %v12069_v26 }
 0x85d   : > { %15643 = vmatprep.mubr.msk.bf16.mxu0 %vm1519_vm3, %v12180_v15 }
 0x864   : > { %15644 = vmatmul.mubr.msk.bf16.vlgmr.msra.gmra.mrb[160].mxu0 %vm1519_vm3, %v12181_v61 }
 0x865   : > { %15652 = vmatpush3.bf16.msra.mxu0 %v16824_v21  ;;  %15647 = vmatprep.mubr.msk.bf16.mxu0 %vm1519_vm3, %v19351_v37 }
 0x866   : > { %15653 = vmatprep.subr.bf16.mxu0 %v16825_v23 }
 0x869   : > { %15654 = vmatpush3.bf16.msra.mxu0 %v16825_v23 }
 0x86a   : > { %15663 = vmatprep.subr.bf16.mxu0 %v16826_v42 }
 0x86c   : > { %15648 = vmatmul.mubr.msk.bf16.gmra.mrb[164].mxu0 %vm1519_vm3, %v12183_v20 }
 0x86d   : > { %15655 = vmatprep.mubr.msk.bf16.mxu0 %vm1519_vm3, %v19137_v4  ;;  %v16829_v4 = vld [vmem:[%s19587_s5 + $0x188] sm:$0xff]  }
 0x874   : > { %15656 = vmatmul.mubr.msk.bf16.vlgmr.msra.gmra.mrb[160].mxu0 %vm1519_vm3, %v19151_v35  ;;  %v12407_v35 = vld [vmem:[#allocation3 + $0xb3] sm:$0xff] }
 0x875   : > { %15664 = vmatpush3.bf16.msra.mxu0 %v16826_v42  ;;  %15659 = vmatprep.mubr.msk.bf16.mxu0 %vm1519_vm3, %v19370_v62  ;;  %v12411_v54 = vpack.c.bf16 %v12407_v35, %v19475_v31 }
 0x876   : > { %15665 = vmatprep.subr.bf16.mxu0 %v16827_v59 }
 0x879   : > { %15666 = vmatpush3.bf16.msra.mxu0 %v16827_v59 }
 0x87a   : > { %15675 = vmatprep.subr.bf16.mxu0 %v16828_v44 }
 0x87c   : > { %15660 = vmatmul.mubr.msk.bf16.gmra.mrb[164].mxu0 %vm1519_vm3, %v12297_v57 }
 0x87d   : > { %15667 = vmatprep.mubr.msk.bf16.mxu0 %vm1519_vm3, %v19165_v36  ;;  %v12521_v36 = vld [vmem:[#allocation3 + $0xb4] sm:$0xff] }
 0x884   : > { %15668 = vmatmul.mubr.msk.bf16.vlgmr.msra.gmra.mrb[160].mxu0 %vm1519_vm3, %v19179_v19  ;;  %v12525_v19 = vpack.c.bf16 %v12521_v36, %v19492_v47 }
 0x885   : > { %15676 = vmatpush3.bf16.msra.mxu0 %v16828_v44  ;;  %15671 = vmatprep.mubr.msk.bf16.mxu0 %vm1519_vm3, %v19389_v30 }
 0x886   : > { %15677 = vmatprep.subr.bf16.mxu0 %v16829_v4 }
 0x889   : > { %15678 = vmatpush3.bf16.msra.mxu0 %v16829_v4 }
 0x88c   : > { %15672 = vmatmul.mubr.msk.bf16.gmra.mrb[164].mxu0 %vm1519_vm3, %v12411_v54 }
 0x88d   : > { %15679 = vmatprep.mubr.msk.bf16.mxu0 %vm1519_vm3, %v19193_v56 }
 0x894   : > { %15680 = vmatmul.mubr.msk.bf16.vlgmr.msra.gmra.mrb[160].mxu0 %vm1519_vm3, %v19206_v9 }
 0x895   : > { %15683 = vmatprep.mubr.msk.bf16.mxu0 %vm1519_vm3, %v19408_v2 }
 0x89c   : > { %15684 = vmatmul.mubr.msk.bf16.gmra.mrb[164].mxu0 %vm1519_vm3, %v12525_v19 }
 0x967   : > { %v15681_v55 = vpop.f32.mrb[160].mxu0 }
 0x968   : > { %v12637_v14 = vadd.f32 %v15681_v55, %v13675_v27  ;;  %v12589_v16 = vpop.f32.mrb[161].mxu0 }
 0x969   : > { %v12635_v56 = vadd.f32 %v13675_v27, %v12589_v16  ;;  %v15682_v6 = vpop.f32.mrb[162].mxu0 }
 0x96a   : > { %v12638_v22 = vadd.f32 %v15682_v6, %v13675_v27  ;;  %v12592_v9 = vpop.f32.mrb[163].mxu0  ;;  %v12647_v46 = vsel %vm12643_vm5, %v12637_v14, -inf }
 0x96b   : > { %v12636_v37 = vadd.f32 %v13675_v27, %v12592_v9  ;;  %v12644_v53 = vsel %vm12643_vm5, %v12635_v56, -inf }
 0x96c   : > { %v12648_v34 = vsel %vm12643_vm5, %v12638_v22, -inf }
 0x96d   : > { %v12649_v62 = vmax.f32 %v12647_v46, %v12648_v34  ;;  %v12645_v10 = vsel %vm12643_vm5, %v12636_v37, -inf }
 0x96e   : > { %v12646_v40 = vmax.f32 %v12644_v53, %v12645_v10 }
 0x96f   : > { %12657 = vst.msk [vmem:[#allocation6 + $0x8] sm:$0xff] %vm12643_vm5, %v12649_v62  ;;  %v15685_v33 = vpop.f32.mrb[164].mxu0 }
 0x970   : > { %12656 = vst.msk [vmem:[#allocation6] sm:$0xff] %vm12643_vm5, %v12646_v40  ;;  %v12641_v30 = vadd.f32 %v15685_v33, %v13675_v27  ;;  %v12605_v60 = vpop.f32.mrb[165].mxu0 }
 0x971   : > { %v12639_v7 = vadd.f32 %v13675_v27, %v12605_v60  ;;  %v15686_v5 = vpop.f32.mrb[166].mxu0 }
 0x972   : > { %v12642_v2 = vadd.f32 %v15686_v5, %v13675_v27  ;;  %v12608_v48 = vpop.f32.mrb[167].mxu0  ;;  %v12653_v58 = vsel %vm12643_vm5, %v12641_v30, -inf }
 0x973   : > { %v12640_v43 = vadd.f32 %v13675_v27, %v12608_v48  ;;  %v12650_v38 = vsel %vm12643_vm5, %v12639_v7, -inf }
 0x974   : > { %v12654_v18 = vsel %vm12643_vm5, %v12642_v2, -inf }
 0x975   : > { %v12655_v25 = vmax.f32 %v12653_v58, %v12654_v18  ;;  %v12651_v11 = vsel %vm12643_vm5, %v12640_v43, -inf }
 0x976   : > { %v12662_v8 = vld [vmem:[#allocation6 + $0x8] ss:$2 sm:$0xf]  ;;  %v12670_v51 = vld [vmem:[#allocation6 + $0x9] ss:$2 sm:$0xf]  ;;  %v12652_v17 = vmax.f32 %v12650_v38, %v12651_v11 }
 0x977   : > { %v12676_v32 = vmax.f32 %v12662_v8, %v12670_v51  ;;  %v12660_v24 = vld [vmem:[#allocation6] ss:$2 sm:$0xf]  ;;  %v12668_v63 = vld [vmem:[#allocation6 + $0x1] ss:$2 sm:$0xf] }
 0x978   : > { %12659 = vst.msk [vmem:[#allocation6 + $0x18] sm:$0xff] %vm12643_vm5, %v12655_v25  ;;  %v12675_v49 = vmax.f32 %v12660_v24, %v12668_v63  ;;  %12658 = vst.msk [vmem:[#allocation6 + $0x10] sm:$0xff] %vm12643_vm5, %v12652_v17 }
 0x979   : > { %12681 = vst.msk [vmem:[%s278_s22 + $0x4] sm:$0xf] %vm12679_vm6, %v12676_v32 }
 0x97a   : > { %12680 = vst.msk [vmem:[%s278_s22] sm:$0xf] %vm12679_vm6, %v12675_v49 }
 0x97f   : > { %v12666_v31 = vld [vmem:[#allocation6 + $0x18] ss:$2 sm:$0xf]  ;;  %v12674_v29 = vld [vmem:[#allocation6 + $0x19] ss:$2 sm:$0xf] }
 0x980   : > { %v12678_v12 = vmax.f32 %v12666_v31, %v12674_v29  ;;  %v12664_v52 = vld [vmem:[#allocation6 + $0x10] ss:$2 sm:$0xf]  ;;  %v12672_v47 = vld [vmem:[#allocation6 + $0x11] ss:$2 sm:$0xf] }
 0x981   : > { %v12677_v45 = vmax.f32 %v12664_v52, %v12672_v47 }
 0x982   : > { %12683 = vst.msk [vmem:[%s278_s22 + $0xc] sm:$0xf] %vm12679_vm6, %v12678_v12 }
 0x983   : > { %12682 = vst.msk [vmem:[%s278_s22 + $0x8] sm:$0xf] %vm12679_vm6, %v12677_v45 }
 0x984 PF: > { %s17_s24 = sadd.s32 1, %s16839_s24  }
 0x985   : > { %p14_p4 = scmp.ge.s32.totalorder %s17_s24, 4  }
 0x987   :  { %16 = sbr.rel (!%p14_p4) target bundleno = 1 (0x1), region = 219 }

</bundles_post_ra>
